<compile_context>
chip_gen: v7x
topology: tpu7x:2x2x1
jax: 0.10.0
libtpu: 0.0.40
codegen_flags: <defaults>
</compile_context>

<pallas_src>
import functools

import jax
import jax.numpy as jnp
from jax.experimental import pallas as pl
from jax.experimental.pallas import tpu as pltpu


# ----------------------------------------------------------------------------
# Fused conv3x3 kernel:
#   out = out_affine( conv3x3( in_affine_relu(x) zero-padded ) ), + channel stats
# ----------------------------------------------------------------------------
def _conv3x3_fused_kernel(x_ref, w_ref, isc_ref, ish_ref, osc_ref, osh_ref,
                          o_ref, sum_ref, sq_ref, xs_ref, *, H, W,
                          in_relu, out_relu):
    """One image per grid step.

    x_ref   : (1, H, W, Cin)     unpadded NHWC input (previous conv's raw output)
    w_ref   : (3, 3*Cin, Cout)   weights, dy-major, dx*Cin+c packed contraction
    isc/ish : (1, Cin)           input-side per-channel scale / shift (prev BN / bias)
    osc/osh : (1, Cout)          output-side per-channel scale / shift (this conv's bias)
    o_ref   : (1, H, W, Cout)
    sum_ref : (1, 1, Cout)       per-image channel sum of the written output
    sq_ref  : (1, 1, Cout)       per-image channel sum of squares
    xs_ref  : VMEM (H+2, W, 3*Cin) scratch: zero-padded, dx-replicated activation
    """
    cin = x_ref.shape[-1]
    cout = o_ref.shape[-1]

    # ---- input-side affine (+ReLU) fused here: no separate elementwise pass ----
    a = x_ref[0] * isc_ref[...] + ish_ref[...]          # (H, W, Cin)
    if in_relu:
        a = jnp.maximum(a, 0.0)

    # ---- build zero-padded, dx-replicated layout in VMEM scratch -------------
    #   xs[r, w, dx*Cin + c] == zero_pad(a)[r, w + dx, c]
    # Halo stays exactly zero (== PyTorch zero padding of the post-BN-ReLU act).
    zcol = jnp.zeros((H, 1, cin), jnp.float32)
    a_l = jnp.concatenate([zcol, a[:, 0:W - 1, :]], axis=1)   # dx = 0 tap
    a_r = jnp.concatenate([a[:, 1:W, :], zcol], axis=1)       # dx = 2 tap
    a3 = jnp.concatenate([a_l, a, a_r], axis=2)               # (H, W, 3*Cin)

    zrow = jnp.zeros((1, W, 3 * cin), jnp.float32)
    xs_ref[0:1] = zrow
    xs_ref[H + 1:H + 2] = zrow
    xs_ref[1:H + 1] = a3

    # ---- 3 deep matmuls (K = 3*Cin) instead of 9 shallow K = Cin ones --------
    acc = jnp.zeros((H * W, cout), jnp.float32)
    for dy in range(3):
        patch = xs_ref[dy:dy + H].reshape(H * W, 3 * cin)
        acc = acc + jnp.dot(patch, w_ref[dy],
                            preferred_element_type=jnp.float32)

    # ---- output-side affine (conv bias) + optional ReLU epilogue -------------
    out = acc * osc_ref[...] + osh_ref[...]
    if out_relu:
        out = jnp.maximum(out, 0.0)

    o_ref[0] = out.reshape(H, W, cout)
    # Channel stats for the *next* layer's training-mode BatchNorm ride on the
    # epilogue instead of a full HBM re-read of the activation.
    sum_ref[0] = jnp.sum(out, axis=0, keepdims=True)
    sq_ref[0] = jnp.sum(out * out, axis=0, keepdims=True)


def conv3x3_fused(x_nhwc, w_packed, in_scale, in_shift, out_scale, out_shift,
                  *, in_relu, out_relu):
    """x: (N,H,W,Cin), w: (3, 3*Cin, Cout), affines: (1,Cin)/(1,Cout).

    Returns (y: (N,H,W,Cout), ch_sum: (N,1,Cout), ch_sumsq: (N,1,Cout)).
    """
    N, H, W, Cin = x_nhwc.shape
    K3, Cout = w_packed.shape[1], w_packed.shape[2]

    kernel = functools.partial(_conv3x3_fused_kernel, H=H, W=W,
                               in_relu=in_relu, out_relu=out_relu)
    return pl.pallas_call(
        kernel,
        out_shape=(
            jax.ShapeDtypeStruct((N, H, W, Cout), jnp.float32),
            jax.ShapeDtypeStruct((N, 1, Cout), jnp.float32),
            jax.ShapeDtypeStruct((N, 1, Cout), jnp.float32),
        ),
        grid=(N,),
        in_specs=[
            pl.BlockSpec((1, H, W, Cin), lambda n: (n, 0, 0, 0)),
            pl.BlockSpec((3, K3, Cout), lambda n: (0, 0, 0)),
            pl.BlockSpec((1, Cin), lambda n: (0, 0)),
            pl.BlockSpec((1, Cin), lambda n: (0, 0)),
            pl.BlockSpec((1, Cout), lambda n: (0, 0)),
            pl.BlockSpec((1, Cout), lambda n: (0, 0)),
        ],
        out_specs=(
            pl.BlockSpec((1, H, W, Cout), lambda n: (n, 0, 0, 0)),
            pl.BlockSpec((1, 1, Cout), lambda n: (n, 0, 0)),
            pl.BlockSpec((1, 1, Cout), lambda n: (n, 0, 0)),
        ),
        scratch_shapes=[pltpu.VMEM((H + 2, W, K3), jnp.float32)],
        compiler_params=pltpu.CompilerParams(
            dimension_semantics=("parallel",)),
    )(x_nhwc, w_packed, in_scale, in_shift, out_scale, out_shift)


# ----------------------------------------------------------------------------
# Parameter init (deterministic, mirrors DnCNN._initialize_weights)
# ----------------------------------------------------------------------------
def init_params(key, n_ch_in, n_ch_out, n_block):
    n_unit = 64
    sigma = (2.0 / (9.0 * 64)) ** 0.5
    clip_b = 0.025
    keys = iter(jax.random.split(key, 4 * n_block + 8))

    def conv_w(cin, cout):
        # PyTorch weight (Cout, Cin, 3, 3) ~ normal(0, sigma); stored here as
        # (3, 3*Cin, Cout): dy-major, contraction index dx*Cin + c (same dist).
        w = sigma * jax.random.normal(next(keys), (3, 3, cin, cout), jnp.float32)
        return w.reshape(3, 3 * cin, cout)

    def conv_b(cin, cout):
        bound = 1.0 / (9.0 * cin) ** 0.5  # PyTorch default Conv2d bias init
        return jax.random.uniform(next(keys), (1, cout), jnp.float32,
                                  minval=-bound, maxval=bound)

    params = {
        "w0": conv_w(n_ch_in, n_unit),
        "b0": conv_b(n_ch_in, n_unit),
        "mid": [],
        "wL": conv_w(n_unit, n_ch_out),
        "bL": conv_b(n_unit, n_ch_out),
    }
    for _ in range(n_block - 2):
        g = sigma * jax.random.normal(next(keys), (n_unit,), jnp.float32)
        g = jnp.where((g >= 0.0) & (g < clip_b), clip_b, g)
        g = jnp.where((g > -clip_b) & (g < 0.0), -clip_b, g)
        params["mid"].append({
            "w": conv_w(n_unit, n_unit),
            "gamma": g,
            "beta": jnp.zeros((n_unit,), jnp.float32),  # default BN bias = 0
        })
    return params


# ----------------------------------------------------------------------------
# Forward pass
# ----------------------------------------------------------------------------
def dncnn_forward(x_nchw, params):
    n_unit = 64
    eps = 1e-5

    x = jnp.transpose(x_nchw, (0, 2, 3, 1))  # -> NHWC
    N, H, W, Cin = x.shape
    n_pix = jnp.float32(N * H * W)

    ones_in = jnp.ones((1, Cin), jnp.float32)
    zeros_in = jnp.zeros((1, Cin), jnp.float32)
    ones_u = jnp.ones((1, n_unit), jnp.float32)
    zeros_u = jnp.zeros((1, n_unit), jnp.float32)

    # Conv0 + bias + ReLU (bias/ReLU fused in the epilogue; identity input affine).
    h, _, _ = conv3x3_fused(x, params["w0"], ones_in, zeros_in,
                            ones_u, params["b0"],
                            in_relu=False, out_relu=True)

    # Middle blocks: Conv(no bias) -> BatchNorm(train-mode batch stats) -> ReLU.
    # Each conv emits raw y + channel stats; the BN affine + ReLU is fused into
    # the *next* conv's input side, so y is only read/written once in HBM.
    cur = h
    in_scale, in_shift, in_relu = ones_u, zeros_u, False
    for blk in params["mid"]:
        y, s, sq = conv3x3_fused(cur, blk["w"], in_scale, in_shift,
                                 ones_u, zeros_u,
                                 in_relu=in_relu, out_relu=False)
        tot = jnp.sum(s, axis=(0, 1))          # (64,) over full (N,H,W)
        totsq = jnp.sum(sq, axis=(0, 1))
        mean = tot / n_pix
        var = jnp.maximum(totsq / n_pix - mean * mean, 0.0)   # biased variance
        scale = blk["gamma"] / jnp.sqrt(var + eps)
        shift = blk["beta"] - mean * scale
        cur = y
        in_scale, in_shift, in_relu = scale.reshape(1, -1), shift.reshape(1, -1), True

    # Final conv + bias (no ReLU); last BN affine + ReLU fused on its input side.
    n_ch_out = params["wL"].shape[-1]
    ones_o = jnp.ones((1, n_ch_out), jnp.float32)
    body, _, _ = conv3x3_fused(cur, params["wL"], in_scale, in_shift,
                               ones_o, params["bL"],
                               in_relu=in_relu, out_relu=False)

    # residual: x - body(x), back to NCHW
    return x_nchw - jnp.transpose(body, (0, 3, 1, 2))


# ----------------------------------------------------------------------------
if __name__ == "__main__":
    key = jax.random.PRNGKey(0)
    k_x, k_p = jax.random.split(key)

    n_ch_in, n_ch_out, n_block = 4, 4, 5
    x = jax.random.normal(k_x, (2, n_ch_in, 16, 16), jnp.float32)

    params = init_params(k_p, n_ch_in, n_ch_out, n_block)
    out = jax.jit(dncnn_forward)(x, params)
    out = jax.block_until_ready(out)

    assert out.shape == x.shape and out.dtype == jnp.float32
    assert bool(jnp.all(jnp.isfinite(out)))
    print("KERNEL_OK")
</pallas_src>

<mosaic_0001>
module attributes {stable_mosaic.version = 11 : i64} {
  func.func @_conv3x3_fused_kernel(%arg0: i32, %arg1: memref<1x16x16x4xf32, #tpu.memory_space<vmem>>, %arg2: memref<3x12x64xf32, #tpu.memory_space<vmem>>, %arg3: memref<1x4xf32, #tpu.memory_space<vmem>>, %arg4: memref<1x4xf32, #tpu.memory_space<vmem>>, %arg5: memref<1x64xf32, #tpu.memory_space<vmem>>, %arg6: memref<1x64xf32, #tpu.memory_space<vmem>>, %arg7: memref<1x16x16x64xf32, #tpu.memory_space<vmem>>, %arg8: memref<1x1x64xf32, #tpu.memory_space<vmem>>, %arg9: memref<1x1x64xf32, #tpu.memory_space<vmem>>, %arg10: memref<18x16x12xf32, #tpu.memory_space<vmem>>) attributes {dimension_semantics = [#tpu.dimension_semantics<parallel>], iteration_bounds = array<i64: 2>, scalar_prefetch = 0 : i64, scratch_operands = 1 : i64, tpu.core_type = #tpu.core_type<tc>, window_params = [{transform_indices = @transform_0, window_bounds = array<i64: 1, 16, 16, 4>}, {pipeline_mode = #tpu.pipeline_mode<synchronous>, transform_indices = @transform_1, window_bounds = array<i64: 3, 12, 64>}, {pipeline_mode = #tpu.pipeline_mode<synchronous>, transform_indices = @transform_2, window_bounds = array<i64: 1, 4>}, {pipeline_mode = #tpu.pipeline_mode<synchronous>, transform_indices = @transform_3, window_bounds = array<i64: 1, 4>}, {pipeline_mode = #tpu.pipeline_mode<synchronous>, transform_indices = @transform_4, window_bounds = array<i64: 1, 64>}, {pipeline_mode = #tpu.pipeline_mode<synchronous>, transform_indices = @transform_5, window_bounds = array<i64: 1, 64>}, {transform_indices = @transform_6, window_bounds = array<i64: 1, 16, 16, 64>}, {transform_indices = @transform_7, window_bounds = array<i64: 1, 1, 64>}, {transform_indices = @transform_8, window_bounds = array<i64: 1, 1, 64>}]} {
    %c0 = arith.constant 0 : index
    %c0_0 = arith.constant 0 : index
    %c0_1 = arith.constant 0 : index
    %c0_2 = arith.constant 0 : index
    %0 = vector.load %arg1[%c0, %c0_0, %c0_1, %c0_2] : memref<1x16x16x4xf32, #tpu.memory_space<vmem>>, vector<1x16x16x4xf32>
    %1 = vector.shape_cast %0 : vector<1x16x16x4xf32> to vector<16x16x4xf32>
    %c0_3 = arith.constant 0 : index
    %c0_4 = arith.constant 0 : index
    %2 = vector.load %arg3[%c0_3, %c0_4] : memref<1x4xf32, #tpu.memory_space<vmem>>, vector<1x4xf32>
    %3 = vector.shape_cast %2 : vector<1x4xf32> to vector<1x1x4xf32>
    %4 = vector.broadcast %3 : vector<1x1x4xf32> to vector<16x16x4xf32>
    %5 = arith.mulf %1, %4 : vector<16x16x4xf32>
    %c0_5 = arith.constant 0 : index
    %c0_6 = arith.constant 0 : index
    %6 = vector.load %arg4[%c0_5, %c0_6] : memref<1x4xf32, #tpu.memory_space<vmem>>, vector<1x4xf32>
    %7 = vector.shape_cast %6 : vector<1x4xf32> to vector<1x1x4xf32>
    %8 = vector.broadcast %7 : vector<1x1x4xf32> to vector<16x16x4xf32>
    %9 = arith.addf %5, %8 : vector<16x16x4xf32>
    %cst = arith.constant 0.000000e+00 : f32
    %10 = vector.broadcast %cst : f32 to vector<16x1x4xf32>
    %11 = vector.extract_strided_slice %9 {offsets = [0, 0, 0], sizes = [16, 15, 4], strides = [1, 1, 1]} : vector<16x16x4xf32> to vector<16x15x4xf32>
    %12 = tpu.concatenate %10, %11 in 1 : vector<16x1x4xf32>, vector<16x15x4xf32> -> vector<16x16x4xf32>
    %13 = vector.extract_strided_slice %9 {offsets = [0, 1, 0], sizes = [16, 15, 4], strides = [1, 1, 1]} : vector<16x16x4xf32> to vector<16x15x4xf32>
    %14 = tpu.concatenate %13, %10 in 1 : vector<16x15x4xf32>, vector<16x1x4xf32> -> vector<16x16x4xf32>
    %15 = tpu.concatenate %12, %9, %14 in 2 : vector<16x16x4xf32>, vector<16x16x4xf32>, vector<16x16x4xf32> -> vector<16x16x12xf32>
    %cst_7 = arith.constant 0.000000e+00 : f32
    %16 = vector.broadcast %cst_7 : f32 to vector<1x16x12xf32>
    %c0_8 = arith.constant 0 : index
    %c0_9 = arith.constant 0 : index
    %c0_10 = arith.constant 0 : index
    %17 = vector.load %arg10[%c0_8, %c0_9, %c0_10] : memref<18x16x12xf32, #tpu.memory_space<vmem>>, vector<1x16x12xf32>
    tpu.vector_store %arg10[%c0_8, %c0_9, %c0_10], %16 {strides = array<i32>} : memref<18x16x12xf32, #tpu.memory_space<vmem>>, vector<1x16x12xf32>,
    %c17 = arith.constant 17 : index
    %c0_11 = arith.constant 0 : index
    %c0_12 = arith.constant 0 : index
    %18 = vector.load %arg10[%c17, %c0_11, %c0_12] : memref<18x16x12xf32, #tpu.memory_space<vmem>>, vector<1x16x12xf32>
    tpu.vector_store %arg10[%c17, %c0_11, %c0_12], %16 {strides = array<i32>} : memref<18x16x12xf32, #tpu.memory_space<vmem>>, vector<1x16x12xf32>,
    %c1 = arith.constant 1 : index
    %c0_13 = arith.constant 0 : index
    %c0_14 = arith.constant 0 : index
    %19 = vector.load %arg10[%c1, %c0_13, %c0_14] : memref<18x16x12xf32, #tpu.memory_space<vmem>>, vector<16x16x12xf32>
    tpu.vector_store %arg10[%c1, %c0_13, %c0_14], %15 {strides = array<i32>} : memref<18x16x12xf32, #tpu.memory_space<vmem>>, vector<16x16x12xf32>,
    %cst_15 = arith.constant 0.000000e+00 : f32
    %20 = vector.broadcast %cst_15 : f32 to vector<256x64xf32>
    %c0_16 = arith.constant 0 : index
    %c0_17 = arith.constant 0 : index
    %c0_18 = arith.constant 0 : index
    %21 = vector.load %arg10[%c0_16, %c0_17, %c0_18] : memref<18x16x12xf32, #tpu.memory_space<vmem>>, vector<16x16x12xf32>
    %22 = vector.shape_cast %21 : vector<16x16x12xf32> to vector<256x12xf32>
    %c0_19 = arith.constant 0 : index
    %c0_20 = arith.constant 0 : index
    %c0_21 = arith.constant 0 : index
    %23 = vector.load %arg2[%c0_19, %c0_20, %c0_21] : memref<3x12x64xf32, #tpu.memory_space<vmem>>, vector<1x12x64xf32>
    %24 = vector.shape_cast %23 : vector<1x12x64xf32> to vector<12x64xf32>
    %cst_22 = arith.constant dense<0.000000e+00> : vector<256x64xf32>
    %25 = tpu.matmul %22, %24, %cst_22 {dimension_numbers = #tpu.dot_dimension_numbers<[1], [0], [0], [1], [0, 0, 1, 1], [], []>} : vector<256x12xf32>, vector<12x64xf32>, vector<256x64xf32> -> vector<256x64xf32>
    %26 = arith.addf %20, %25 : vector<256x64xf32>
    %c1_23 = arith.constant 1 : index
    %c0_24 = arith.constant 0 : index
    %c0_25 = arith.constant 0 : index
    %27 = vector.load %arg10[%c1_23, %c0_24, %c0_25] : memref<18x16x12xf32, #tpu.memory_space<vmem>>, vector<16x16x12xf32>
    %28 = vector.shape_cast %27 : vector<16x16x12xf32> to vector<256x12xf32>
    %c1_26 = arith.constant 1 : index
    %c0_27 = arith.constant 0 : index
    %c0_28 = arith.constant 0 : index
    %29 = vector.load %arg2[%c1_26, %c0_27, %c0_28] : memref<3x12x64xf32, #tpu.memory_space<vmem>>, vector<1x12x64xf32>
    %30 = vector.shape_cast %29 : vector<1x12x64xf32> to vector<12x64xf32>
    %cst_29 = arith.constant dense<0.000000e+00> : vector<256x64xf32>
    %31 = tpu.matmul %28, %30, %cst_29 {dimension_numbers = #tpu.dot_dimension_numbers<[1], [0], [0], [1], [0, 0, 1, 1], [], []>} : vector<256x12xf32>, vector<12x64xf32>, vector<256x64xf32> -> vector<256x64xf32>
    %32 = arith.addf %26, %31 : vector<256x64xf32>
    %c2 = arith.constant 2 : index
    %c0_30 = arith.constant 0 : index
    %c0_31 = arith.constant 0 : index
    %33 = vector.load %arg10[%c2, %c0_30, %c0_31] : memref<18x16x12xf32, #tpu.memory_space<vmem>>, vector<16x16x12xf32>
    %34 = vector.shape_cast %33 : vector<16x16x12xf32> to vector<256x12xf32>
    %c2_32 = arith.constant 2 : index
    %c0_33 = arith.constant 0 : index
    %c0_34 = arith.constant 0 : index
    %35 = vector.load %arg2[%c2_32, %c0_33, %c0_34] : memref<3x12x64xf32, #tpu.memory_space<vmem>>, vector<1x12x64xf32>
    %36 = vector.shape_cast %35 : vector<1x12x64xf32> to vector<12x64xf32>
    %cst_35 = arith.constant dense<0.000000e+00> : vector<256x64xf32>
    %37 = tpu.matmul %34, %36, %cst_35 {dimension_numbers = #tpu.dot_dimension_numbers<[1], [0], [0], [1], [0, 0, 1, 1], [], []>} : vector<256x12xf32>, vector<12x64xf32>, vector<256x64xf32> -> vector<256x64xf32>
    %38 = arith.addf %32, %37 : vector<256x64xf32>
    %c0_36 = arith.constant 0 : index
    %c0_37 = arith.constant 0 : index
    %39 = vector.load %arg5[%c0_36, %c0_37] : memref<1x64xf32, #tpu.memory_space<vmem>>, vector<1x64xf32>
    %40 = vector.broadcast %39 : vector<1x64xf32> to vector<256x64xf32>
    %41 = arith.mulf %38, %40 : vector<256x64xf32>
    %c0_38 = arith.constant 0 : index
    %c0_39 = arith.constant 0 : index
    %42 = vector.load %arg6[%c0_38, %c0_39] : memref<1x64xf32, #tpu.memory_space<vmem>>, vector<1x64xf32>
    %43 = vector.broadcast %42 : vector<1x64xf32> to vector<256x64xf32>
    %44 = arith.addf %41, %43 : vector<256x64xf32>
    %cst_40 = arith.constant 0.000000e+00 : f32
    %45 = vector.broadcast %cst_40 : f32 to vector<256x64xf32>
    %46 = arith.maximumf %44, %45 : vector<256x64xf32>
    %47 = vector.shape_cast %46 : vector<256x64xf32> to vector<16x16x64xf32>
    %c0_41 = arith.constant 0 : index
    %c0_42 = arith.constant 0 : index
    %c0_43 = arith.constant 0 : index
    %c0_44 = arith.constant 0 : index
    %48 = vector.load %arg7[%c0_41, %c0_42, %c0_43, %c0_44] : memref<1x16x16x64xf32, #tpu.memory_space<vmem>>, vector<1x16x16x64xf32>
    %49 = vector.shape_cast %48 : vector<1x16x16x64xf32> to vector<16x16x64xf32>
    %50 = vector.shape_cast %47 : vector<16x16x64xf32> to vector<1x16x16x64xf32>
    tpu.vector_store %arg7[%c0_41, %c0_42, %c0_43, %c0_44], %50 {strides = array<i32>} : memref<1x16x16x64xf32, #tpu.memory_space<vmem>>, vector<1x16x16x64xf32>,
    %cst_45 = arith.constant dense<0.000000e+00> : vector<64xf32>
    %51 = vector.multi_reduction <add>, %46, %cst_45 [0] : vector<256x64xf32> to vector<64xf32>
    %52 = vector.shape_cast %51 : vector<64xf32> to vector<1x64xf32>
    %c0_46 = arith.constant 0 : index
    %c0_47 = arith.constant 0 : index
    %c0_48 = arith.constant 0 : index
    %53 = vector.load %arg8[%c0_46, %c0_47, %c0_48] : memref<1x1x64xf32, #tpu.memory_space<vmem>>, vector<1x1x64xf32>
    %54 = vector.shape_cast %53 : vector<1x1x64xf32> to vector<1x64xf32>
    %55 = vector.shape_cast %52 : vector<1x64xf32> to vector<1x1x64xf32>
    tpu.vector_store %arg8[%c0_46, %c0_47, %c0_48], %55 {strides = array<i32>} : memref<1x1x64xf32, #tpu.memory_space<vmem>>, vector<1x1x64xf32>,
    %56 = arith.mulf %46, %46 : vector<256x64xf32>
    %cst_49 = arith.constant dense<0.000000e+00> : vector<64xf32>
    %57 = vector.multi_reduction <add>, %56, %cst_49 [0] : vector<256x64xf32> to vector<64xf32>
    %58 = vector.shape_cast %57 : vector<64xf32> to vector<1x64xf32>
    %c0_50 = arith.constant 0 : index
    %c0_51 = arith.constant 0 : index
    %c0_52 = arith.constant 0 : index
    %59 = vector.load %arg9[%c0_50, %c0_51, %c0_52] : memref<1x1x64xf32, #tpu.memory_space<vmem>>, vector<1x1x64xf32>
    %60 = vector.shape_cast %59 : vector<1x1x64xf32> to vector<1x64xf32>
    %61 = vector.shape_cast %58 : vector<1x64xf32> to vector<1x1x64xf32>
    tpu.vector_store %arg9[%c0_50, %c0_51, %c0_52], %61 {strides = array<i32>} : memref<1x1x64xf32, #tpu.memory_space<vmem>>, vector<1x1x64xf32>,
    return
  }
  func.func @transform_0(%arg0: i32) -> (i32, i32, i32, i32) {
    %c0_i32 = arith.constant 0 : i32
    %c0_i32_0 = arith.constant 0 : i32
    %c0_i32_1 = arith.constant 0 : i32
    %c0_i32_2 = arith.constant 0 : i32
    return %arg0, %c0_i32, %c0_i32_0, %c0_i32_1 : i32, i32, i32, i32
  }
  func.func @transform_1(%arg0: i32) -> (i32, i32, i32) {
    %c0_i32 = arith.constant 0 : i32
    %c0_i32_0 = arith.constant 0 : i32
    %c0_i32_1 = arith.constant 0 : i32
    %c0_i32_2 = arith.constant 0 : i32
    return %c0_i32, %c0_i32_0, %c0_i32_1 : i32, i32, i32
  }
  func.func @transform_2(%arg0: i32) -> (i32, i32) {
    %c0_i32 = arith.constant 0 : i32
    %c0_i32_0 = arith.constant 0 : i32
    %c0_i32_1 = arith.constant 0 : i32
    return %c0_i32, %c0_i32_0 : i32, i32
  }
  func.func @transform_3(%arg0: i32) -> (i32, i32) {
    %c0_i32 = arith.constant 0 : i32
    %c0_i32_0 = arith.constant 0 : i32
    %c0_i32_1 = arith.constant 0 : i32
    return %c0_i32, %c0_i32_0 : i32, i32
  }
  func.func @transform_4(%arg0: i32) -> (i32, i32) {
    %c0_i32 = arith.constant 0 : i32
    %c0_i32_0 = arith.constant 0 : i32
    %c0_i32_1 = arith.constant 0 : i32
    return %c0_i32, %c0_i32_0 : i32, i32
  }
  func.func @transform_5(%arg0: i32) -> (i32, i32) {
    %c0_i32 = arith.constant 0 : i32
    %c0_i32_0 = arith.constant 0 : i32
    %c0_i32_1 = arith.constant 0 : i32
    return %c0_i32, %c0_i32_0 : i32, i32
  }
  func.func @transform_6(%arg0: i32) -> (i32, i32, i32, i32) {
    %c0_i32 = arith.constant 0 : i32
    %c0_i32_0 = arith.constant 0 : i32
    %c0_i32_1 = arith.constant 0 : i32
    %c0_i32_2 = arith.constant 0 : i32
    return %arg0, %c0_i32, %c0_i32_0, %c0_i32_1 : i32, i32, i32, i32
  }
  func.func @transform_7(%arg0: i32) -> (i32, i32, i32) {
    %c0_i32 = arith.constant 0 : i32
    %c0_i32_0 = arith.constant 0 : i32
    %c0_i32_1 = arith.constant 0 : i32
    return %arg0, %c0_i32, %c0_i32_0 : i32, i32, i32
  }
  func.func @transform_8(%arg0: i32) -> (i32, i32, i32) {
    %c0_i32 = arith.constant 0 : i32
    %c0_i32_0 = arith.constant 0 : i32
    %c0_i32_1 = arith.constant 0 : i32
    return %arg0, %c0_i32, %c0_i32_0 : i32, i32, i32
  }
}

module attributes {stable_mosaic.version = 11 : i64} {
  func.func @_conv3x3_fused_kernel(%arg0: i32, %arg1: memref<1x16x16x64xf32, #tpu.memory_space<vmem>>, %arg2: memref<3x192x64xf32, #tpu.memory_space<vmem>>, %arg3: memref<1x64xf32, #tpu.memory_space<vmem>>, %arg4: memref<1x64xf32, #tpu.memory_space<vmem>>, %arg5: memref<1x64xf32, #tpu.memory_space<vmem>>, %arg6: memref<1x64xf32, #tpu.memory_space<vmem>>, %arg7: memref<1x16x16x64xf32, #tpu.memory_space<vmem>>, %arg8: memref<1x1x64xf32, #tpu.memory_space<vmem>>, %arg9: memref<1x1x64xf32, #tpu.memory_space<vmem>>, %arg10: memref<18x16x192xf32, #tpu.memory_space<vmem>>) attributes {dimension_semantics = [#tpu.dimension_semantics<parallel>], iteration_bounds = array<i64: 2>, scalar_prefetch = 0 : i64, scratch_operands = 1 : i64, tpu.core_type = #tpu.core_type<tc>, window_params = [{transform_indices = @transform_0, window_bounds = array<i64: 1, 16, 16, 64>}, {pipeline_mode = #tpu.pipeline_mode<synchronous>, transform_indices = @transform_1, window_bounds = array<i64: 3, 192, 64>}, {pipeline_mode = #tpu.pipeline_mode<synchronous>, transform_indices = @transform_2, window_bounds = array<i64: 1, 64>}, {pipeline_mode = #tpu.pipeline_mode<synchronous>, transform_indices = @transform_3, window_bounds = array<i64: 1, 64>}, {pipeline_mode = #tpu.pipeline_mode<synchronous>, transform_indices = @transform_4, window_bounds = array<i64: 1, 64>}, {pipeline_mode = #tpu.pipeline_mode<synchronous>, transform_indices = @transform_5, window_bounds = array<i64: 1, 64>}, {transform_indices = @transform_6, window_bounds = array<i64: 1, 16, 16, 64>}, {transform_indices = @transform_7, window_bounds = array<i64: 1, 1, 64>}, {transform_indices = @transform_8, window_bounds = array<i64: 1, 1, 64>}]} {
    %c0 = arith.constant 0 : index
    %c0_0 = arith.constant 0 : index
    %c0_1 = arith.constant 0 : index
    %c0_2 = arith.constant 0 : index
    %0 = vector.load %arg1[%c0, %c0_0, %c0_1, %c0_2] : memref<1x16x16x64xf32, #tpu.memory_space<vmem>>, vector<1x16x16x64xf32>
    %1 = vector.shape_cast %0 : vector<1x16x16x64xf32> to vector<16x16x64xf32>
    %c0_3 = arith.constant 0 : index
    %c0_4 = arith.constant 0 : index
    %2 = vector.load %arg3[%c0_3, %c0_4] : memref<1x64xf32, #tpu.memory_space<vmem>>, vector<1x64xf32>
    %3 = vector.shape_cast %2 : vector<1x64xf32> to vector<1x1x64xf32>
    %4 = vector.broadcast %3 : vector<1x1x64xf32> to vector<16x16x64xf32>
    %5 = arith.mulf %1, %4 : vector<16x16x64xf32>
    %c0_5 = arith.constant 0 : index
    %c0_6 = arith.constant 0 : index
    %6 = vector.load %arg4[%c0_5, %c0_6] : memref<1x64xf32, #tpu.memory_space<vmem>>, vector<1x64xf32>
    %7 = vector.shape_cast %6 : vector<1x64xf32> to vector<1x1x64xf32>
    %8 = vector.broadcast %7 : vector<1x1x64xf32> to vector<16x16x64xf32>
    %9 = arith.addf %5, %8 : vector<16x16x64xf32>
    %cst = arith.constant 0.000000e+00 : f32
    %10 = vector.broadcast %cst : f32 to vector<16x1x64xf32>
    %11 = vector.extract_strided_slice %9 {offsets = [0, 0, 0], sizes = [16, 15, 64], strides = [1, 1, 1]} : vector<16x16x64xf32> to vector<16x15x64xf32>
    %12 = tpu.concatenate %10, %11 in 1 : vector<16x1x64xf32>, vector<16x15x64xf32> -> vector<16x16x64xf32>
    %13 = vector.extract_strided_slice %9 {offsets = [0, 1, 0], sizes = [16, 15, 64], strides = [1, 1, 1]} : vector<16x16x64xf32> to vector<16x15x64xf32>
    %14 = tpu.concatenate %13, %10 in 1 : vector<16x15x64xf32>, vector<16x1x64xf32> -> vector<16x16x64xf32>
    %15 = tpu.concatenate %12, %9, %14 in 2 : vector<16x16x64xf32>, vector<16x16x64xf32>, vector<16x16x64xf32> -> vector<16x16x192xf32>
    %cst_7 = arith.constant 0.000000e+00 : f32
    %16 = vector.broadcast %cst_7 : f32 to vector<1x16x192xf32>
    %c0_8 = arith.constant 0 : index
    %c0_9 = arith.constant 0 : index
    %c0_10 = arith.constant 0 : index
    %17 = vector.load %arg10[%c0_8, %c0_9, %c0_10] : memref<18x16x192xf32, #tpu.memory_space<vmem>>, vector<1x16x192xf32>
    tpu.vector_store %arg10[%c0_8, %c0_9, %c0_10], %16 {strides = array<i32>} : memref<18x16x192xf32, #tpu.memory_space<vmem>>, vector<1x16x192xf32>,
    %c17 = arith.constant 17 : index
    %c0_11 = arith.constant 0 : index
    %c0_12 = arith.constant 0 : index
    %18 = vector.load %arg10[%c17, %c0_11, %c0_12] : memref<18x16x192xf32, #tpu.memory_space<vmem>>, vector<1x16x192xf32>
    tpu.vector_store %arg10[%c17, %c0_11, %c0_12], %16 {strides = array<i32>} : memref<18x16x192xf32, #tpu.memory_space<vmem>>, vector<1x16x192xf32>,
    %c1 = arith.constant 1 : index
    %c0_13 = arith.constant 0 : index
    %c0_14 = arith.constant 0 : index
    %19 = vector.load %arg10[%c1, %c0_13, %c0_14] : memref<18x16x192xf32, #tpu.memory_space<vmem>>, vector<16x16x192xf32>
    tpu.vector_store %arg10[%c1, %c0_13, %c0_14], %15 {strides = array<i32>} : memref<18x16x192xf32, #tpu.memory_space<vmem>>, vector<16x16x192xf32>,
    %cst_15 = arith.constant 0.000000e+00 : f32
    %20 = vector.broadcast %cst_15 : f32 to vector<256x64xf32>
    %c0_16 = arith.constant 0 : index
    %c0_17 = arith.constant 0 : index
    %c0_18 = arith.constant 0 : index
    %21 = vector.load %arg10[%c0_16, %c0_17, %c0_18] : memref<18x16x192xf32, #tpu.memory_space<vmem>>, vector<16x16x192xf32>
    %22 = vector.shape_cast %21 : vector<16x16x192xf32> to vector<256x192xf32>
    %c0_19 = arith.constant 0 : index
    %c0_20 = arith.constant 0 : index
    %c0_21 = arith.constant 0 : index
    %23 = vector.load %arg2[%c0_19, %c0_20, %c0_21] : memref<3x192x64xf32, #tpu.memory_space<vmem>>, vector<1x192x64xf32>
    %24 = vector.shape_cast %23 : vector<1x192x64xf32> to vector<192x64xf32>
    %cst_22 = arith.constant dense<0.000000e+00> : vector<256x64xf32>
    %25 = tpu.matmul %22, %24, %cst_22 {dimension_numbers = #tpu.dot_dimension_numbers<[1], [0], [0], [1], [0, 0, 1, 1], [], []>} : vector<256x192xf32>, vector<192x64xf32>, vector<256x64xf32> -> vector<256x64xf32>
    %26 = arith.addf %20, %25 : vector<256x64xf32>
    %c1_23 = arith.constant 1 : index
    %c0_24 = arith.constant 0 : index
    %c0_25 = arith.constant 0 : index
    %27 = vector.load %arg10[%c1_23, %c0_24, %c0_25] : memref<18x16x192xf32, #tpu.memory_space<vmem>>, vector<16x16x192xf32>
    %28 = vector.shape_cast %27 : vector<16x16x192xf32> to vector<256x192xf32>
    %c1_26 = arith.constant 1 : index
    %c0_27 = arith.constant 0 : index
    %c0_28 = arith.constant 0 : index
    %29 = vector.load %arg2[%c1_26, %c0_27, %c0_28] : memref<3x192x64xf32, #tpu.memory_space<vmem>>, vector<1x192x64xf32>
    %30 = vector.shape_cast %29 : vector<1x192x64xf32> to vector<192x64xf32>
    %cst_29 = arith.constant dense<0.000000e+00> : vector<256x64xf32>
    %31 = tpu.matmul %28, %30, %cst_29 {dimension_numbers = #tpu.dot_dimension_numbers<[1], [0], [0], [1], [0, 0, 1, 1], [], []>} : vector<256x192xf32>, vector<192x64xf32>, vector<256x64xf32> -> vector<256x64xf32>
    %32 = arith.addf %26, %31 : vector<256x64xf32>
    %c2 = arith.constant 2 : index
    %c0_30 = arith.constant 0 : index
    %c0_31 = arith.constant 0 : index
    %33 = vector.load %arg10[%c2, %c0_30, %c0_31] : memref<18x16x192xf32, #tpu.memory_space<vmem>>, vector<16x16x192xf32>
    %34 = vector.shape_cast %33 : vector<16x16x192xf32> to vector<256x192xf32>
    %c2_32 = arith.constant 2 : index
    %c0_33 = arith.constant 0 : index
    %c0_34 = arith.constant 0 : index
    %35 = vector.load %arg2[%c2_32, %c0_33, %c0_34] : memref<3x192x64xf32, #tpu.memory_space<vmem>>, vector<1x192x64xf32>
    %36 = vector.shape_cast %35 : vector<1x192x64xf32> to vector<192x64xf32>
    %cst_35 = arith.constant dense<0.000000e+00> : vector<256x64xf32>
    %37 = tpu.matmul %34, %36, %cst_35 {dimension_numbers = #tpu.dot_dimension_numbers<[1], [0], [0], [1], [0, 0, 1, 1], [], []>} : vector<256x192xf32>, vector<192x64xf32>, vector<256x64xf32> -> vector<256x64xf32>
    %38 = arith.addf %32, %37 : vector<256x64xf32>
    %c0_36 = arith.constant 0 : index
    %c0_37 = arith.constant 0 : index
    %39 = vector.load %arg5[%c0_36, %c0_37] : memref<1x64xf32, #tpu.memory_space<vmem>>, vector<1x64xf32>
    %40 = vector.broadcast %39 : vector<1x64xf32> to vector<256x64xf32>
    %41 = arith.mulf %38, %40 : vector<256x64xf32>
    %c0_38 = arith.constant 0 : index
    %c0_39 = arith.constant 0 : index
    %42 = vector.load %arg6[%c0_38, %c0_39] : memref<1x64xf32, #tpu.memory_space<vmem>>, vector<1x64xf32>
    %43 = vector.broadcast %42 : vector<1x64xf32> to vector<256x64xf32>
    %44 = arith.addf %41, %43 : vector<256x64xf32>
    %45 = vector.shape_cast %44 : vector<256x64xf32> to vector<16x16x64xf32>
    %c0_40 = arith.constant 0 : index
    %c0_41 = arith.constant 0 : index
    %c0_42 = arith.constant 0 : index
    %c0_43 = arith.constant 0 : index
    %46 = vector.load %arg7[%c0_40, %c0_41, %c0_42, %c0_43] : memref<1x16x16x64xf32, #tpu.memory_space<vmem>>, vector<1x16x16x64xf32>
    %47 = vector.shape_cast %46 : vector<1x16x16x64xf32> to vector<16x16x64xf32>
    %48 = vector.shape_cast %45 : vector<16x16x64xf32> to vector<1x16x16x64xf32>
    tpu.vector_store %arg7[%c0_40, %c0_41, %c0_42, %c0_43], %48 {strides = array<i32>} : memref<1x16x16x64xf32, #tpu.memory_space<vmem>>, vector<1x16x16x64xf32>,
    %cst_44 = arith.constant dense<0.000000e+00> : vector<64xf32>
    %49 = vector.multi_reduction <add>, %44, %cst_44 [0] : vector<256x64xf32> to vector<64xf32>
    %50 = vector.shape_cast %49 : vector<64xf32> to vector<1x64xf32>
    %c0_45 = arith.constant 0 : index
    %c0_46 = arith.constant 0 : index
    %c0_47 = arith.constant 0 : index
    %51 = vector.load %arg8[%c0_45, %c0_46, %c0_47] : memref<1x1x64xf32, #tpu.memory_space<vmem>>, vector<1x1x64xf32>
    %52 = vector.shape_cast %51 : vector<1x1x64xf32> to vector<1x64xf32>
    %53 = vector.shape_cast %50 : vector<1x64xf32> to vector<1x1x64xf32>
    tpu.vector_store %arg8[%c0_45, %c0_46, %c0_47], %53 {strides = array<i32>} : memref<1x1x64xf32, #tpu.memory_space<vmem>>, vector<1x1x64xf32>,
    %54 = arith.mulf %44, %44 : vector<256x64xf32>
    %cst_48 = arith.constant dense<0.000000e+00> : vector<64xf32>
    %55 = vector.multi_reduction <add>, %54, %cst_48 [0] : vector<256x64xf32> to vector<64xf32>
    %56 = vector.shape_cast %55 : vector<64xf32> to vector<1x64xf32>
    %c0_49 = arith.constant 0 : index
    %c0_50 = arith.constant 0 : index
    %c0_51 = arith.constant 0 : index
    %57 = vector.load %arg9[%c0_49, %c0_50, %c0_51] : memref<1x1x64xf32, #tpu.memory_space<vmem>>, vector<1x1x64xf32>
    %58 = vector.shape_cast %57 : vector<1x1x64xf32> to vector<1x64xf32>
    %59 = vector.shape_cast %56 : vector<1x64xf32> to vector<1x1x64xf32>
    tpu.vector_store %arg9[%c0_49, %c0_50, %c0_51], %59 {strides = array<i32>} : memref<1x1x64xf32, #tpu.memory_space<vmem>>, vector<1x1x64xf32>,
    return
  }
  func.func @transform_0(%arg0: i32) -> (i32, i32, i32, i32) {
    %c0_i32 = arith.constant 0 : i32
    %c0_i32_0 = arith.constant 0 : i32
    %c0_i32_1 = arith.constant 0 : i32
    %c0_i32_2 = arith.constant 0 : i32
    return %arg0, %c0_i32, %c0_i32_0, %c0_i32_1 : i32, i32, i32, i32
  }
  func.func @transform_1(%arg0: i32) -> (i32, i32, i32) {
    %c0_i32 = arith.constant 0 : i32
    %c0_i32_0 = arith.constant 0 : i32
    %c0_i32_1 = arith.constant 0 : i32
    %c0_i32_2 = arith.constant 0 : i32
    return %c0_i32, %c0_i32_0, %c0_i32_1 : i32, i32, i32
  }
  func.func @transform_2(%arg0: i32) -> (i32, i32) {
    %c0_i32 = arith.constant 0 : i32
    %c0_i32_0 = arith.constant 0 : i32
    %c0_i32_1 = arith.constant 0 : i32
    return %c0_i32, %c0_i32_0 : i32, i32
  }
  func.func @transform_3(%arg0: i32) -> (i32, i32) {
    %c0_i32 = arith.constant 0 : i32
    %c0_i32_0 = arith.constant 0 : i32
    %c0_i32_1 = arith.constant 0 : i32
    return %c0_i32, %c0_i32_0 : i32, i32
  }
  func.func @transform_4(%arg0: i32) -> (i32, i32) {
    %c0_i32 = arith.constant 0 : i32
    %c0_i32_0 = arith.constant 0 : i32
    %c0_i32_1 = arith.constant 0 : i32
    return %c0_i32, %c0_i32_0 : i32, i32
  }
  func.func @transform_5(%arg0: i32) -> (i32, i32) {
    %c0_i32 = arith.constant 0 : i32
    %c0_i32_0 = arith.constant 0 : i32
    %c0_i32_1 = arith.constant 0 : i32
    return %c0_i32, %c0_i32_0 : i32, i32
  }
  func.func @transform_6(%arg0: i32) -> (i32, i32, i32, i32) {
    %c0_i32 = arith.constant 0 : i32
    %c0_i32_0 = arith.constant 0 : i32
    %c0_i32_1 = arith.constant 0 : i32
    %c0_i32_2 = arith.constant 0 : i32
    return %arg0, %c0_i32, %c0_i32_0, %c0_i32_1 : i32, i32, i32, i32
  }
  func.func @transform_7(%arg0: i32) -> (i32, i32, i32) {
    %c0_i32 = arith.constant 0 : i32
    %c0_i32_0 = arith.constant 0 : i32
    %c0_i32_1 = arith.constant 0 : i32
    return %arg0, %c0_i32, %c0_i32_0 : i32, i32, i32
  }
  func.func @transform_8(%arg0: i32) -> (i32, i32, i32) {
    %c0_i32 = arith.constant 0 : i32
    %c0_i32_0 = arith.constant 0 : i32
    %c0_i32_1 = arith.constant 0 : i32
    return %arg0, %c0_i32, %c0_i32_0 : i32, i32, i32
  }
}

module attributes {stable_mosaic.version = 11 : i64} {
  func.func @_conv3x3_fused_kernel(%arg0: i32, %arg1: memref<1x16x16x64xf32, #tpu.memory_space<vmem>>, %arg2: memref<3x192x64xf32, #tpu.memory_space<vmem>>, %arg3: memref<1x64xf32, #tpu.memory_space<vmem>>, %arg4: memref<1x64xf32, #tpu.memory_space<vmem>>, %arg5: memref<1x64xf32, #tpu.memory_space<vmem>>, %arg6: memref<1x64xf32, #tpu.memory_space<vmem>>, %arg7: memref<1x16x16x64xf32, #tpu.memory_space<vmem>>, %arg8: memref<1x1x64xf32, #tpu.memory_space<vmem>>, %arg9: memref<1x1x64xf32, #tpu.memory_space<vmem>>, %arg10: memref<18x16x192xf32, #tpu.memory_space<vmem>>) attributes {dimension_semantics = [#tpu.dimension_semantics<parallel>], iteration_bounds = array<i64: 2>, scalar_prefetch = 0 : i64, scratch_operands = 1 : i64, tpu.core_type = #tpu.core_type<tc>, window_params = [{transform_indices = @transform_0, window_bounds = array<i64: 1, 16, 16, 64>}, {pipeline_mode = #tpu.pipeline_mode<synchronous>, transform_indices = @transform_1, window_bounds = array<i64: 3, 192, 64>}, {pipeline_mode = #tpu.pipeline_mode<synchronous>, transform_indices = @transform_2, window_bounds = array<i64: 1, 64>}, {pipeline_mode = #tpu.pipeline_mode<synchronous>, transform_indices = @transform_3, window_bounds = array<i64: 1, 64>}, {pipeline_mode = #tpu.pipeline_mode<synchronous>, transform_indices = @transform_4, window_bounds = array<i64: 1, 64>}, {pipeline_mode = #tpu.pipeline_mode<synchronous>, transform_indices = @transform_5, window_bounds = array<i64: 1, 64>}, {transform_indices = @transform_6, window_bounds = array<i64: 1, 16, 16, 64>}, {transform_indices = @transform_7, window_bounds = array<i64: 1, 1, 64>}, {transform_indices = @transform_8, window_bounds = array<i64: 1, 1, 64>}]} {
    %c0 = arith.constant 0 : index
    %c0_0 = arith.constant 0 : index
    %c0_1 = arith.constant 0 : index
    %c0_2 = arith.constant 0 : index
    %0 = vector.load %arg1[%c0, %c0_0, %c0_1, %c0_2] : memref<1x16x16x64xf32, #tpu.memory_space<vmem>>, vector<1x16x16x64xf32>
    %1 = vector.shape_cast %0 : vector<1x16x16x64xf32> to vector<16x16x64xf32>
    %c0_3 = arith.constant 0 : index
    %c0_4 = arith.constant 0 : index
    %2 = vector.load %arg3[%c0_3, %c0_4] : memref<1x64xf32, #tpu.memory_space<vmem>>, vector<1x64xf32>
    %3 = vector.shape_cast %2 : vector<1x64xf32> to vector<1x1x64xf32>
    %4 = vector.broadcast %3 : vector<1x1x64xf32> to vector<16x16x64xf32>
    %5 = arith.mulf %1, %4 : vector<16x16x64xf32>
    %c0_5 = arith.constant 0 : index
    %c0_6 = arith.constant 0 : index
    %6 = vector.load %arg4[%c0_5, %c0_6] : memref<1x64xf32, #tpu.memory_space<vmem>>, vector<1x64xf32>
    %7 = vector.shape_cast %6 : vector<1x64xf32> to vector<1x1x64xf32>
    %8 = vector.broadcast %7 : vector<1x1x64xf32> to vector<16x16x64xf32>
    %9 = arith.addf %5, %8 : vector<16x16x64xf32>
    %cst = arith.constant 0.000000e+00 : f32
    %10 = vector.broadcast %cst : f32 to vector<16x16x64xf32>
    %11 = arith.maximumf %9, %10 : vector<16x16x64xf32>
    %cst_7 = arith.constant 0.000000e+00 : f32
    %12 = vector.broadcast %cst_7 : f32 to vector<16x1x64xf32>
    %13 = vector.extract_strided_slice %11 {offsets = [0, 0, 0], sizes = [16, 15, 64], strides = [1, 1, 1]} : vector<16x16x64xf32> to vector<16x15x64xf32>
    %14 = tpu.concatenate %12, %13 in 1 : vector<16x1x64xf32>, vector<16x15x64xf32> -> vector<16x16x64xf32>
    %15 = vector.extract_strided_slice %11 {offsets = [0, 1, 0], sizes = [16, 15, 64], strides = [1, 1, 1]} : vector<16x16x64xf32> to vector<16x15x64xf32>
    %16 = tpu.concatenate %15, %12 in 1 : vector<16x15x64xf32>, vector<16x1x64xf32> -> vector<16x16x64xf32>
    %17 = tpu.concatenate %14, %11, %16 in 2 : vector<16x16x64xf32>, vector<16x16x64xf32>, vector<16x16x64xf32> -> vector<16x16x192xf32>
    %cst_8 = arith.constant 0.000000e+00 : f32
    %18 = vector.broadcast %cst_8 : f32 to vector<1x16x192xf32>
    %c0_9 = arith.constant 0 : index
    %c0_10 = arith.constant 0 : index
    %c0_11 = arith.constant 0 : index
    %19 = vector.load %arg10[%c0_9, %c0_10, %c0_11] : memref<18x16x192xf32, #tpu.memory_space<vmem>>, vector<1x16x192xf32>
    tpu.vector_store %arg10[%c0_9, %c0_10, %c0_11], %18 {strides = array<i32>} : memref<18x16x192xf32, #tpu.memory_space<vmem>>, vector<1x16x192xf32>,
    %c17 = arith.constant 17 : index
    %c0_12 = arith.constant 0 : index
    %c0_13 = arith.constant 0 : index
    %20 = vector.load %arg10[%c17, %c0_12, %c0_13] : memref<18x16x192xf32, #tpu.memory_space<vmem>>, vector<1x16x192xf32>
    tpu.vector_store %arg10[%c17, %c0_12, %c0_13], %18 {strides = array<i32>} : memref<18x16x192xf32, #tpu.memory_space<vmem>>, vector<1x16x192xf32>,
    %c1 = arith.constant 1 : index
    %c0_14 = arith.constant 0 : index
    %c0_15 = arith.constant 0 : index
    %21 = vector.load %arg10[%c1, %c0_14, %c0_15] : memref<18x16x192xf32, #tpu.memory_space<vmem>>, vector<16x16x192xf32>
    tpu.vector_store %arg10[%c1, %c0_14, %c0_15], %17 {strides = array<i32>} : memref<18x16x192xf32, #tpu.memory_space<vmem>>, vector<16x16x192xf32>,
    %cst_16 = arith.constant 0.000000e+00 : f32
    %22 = vector.broadcast %cst_16 : f32 to vector<256x64xf32>
    %c0_17 = arith.constant 0 : index
    %c0_18 = arith.constant 0 : index
    %c0_19 = arith.constant 0 : index
    %23 = vector.load %arg10[%c0_17, %c0_18, %c0_19] : memref<18x16x192xf32, #tpu.memory_space<vmem>>, vector<16x16x192xf32>
    %24 = vector.shape_cast %23 : vector<16x16x192xf32> to vector<256x192xf32>
    %c0_20 = arith.constant 0 : index
    %c0_21 = arith.constant 0 : index
    %c0_22 = arith.constant 0 : index
    %25 = vector.load %arg2[%c0_20, %c0_21, %c0_22] : memref<3x192x64xf32, #tpu.memory_space<vmem>>, vector<1x192x64xf32>
    %26 = vector.shape_cast %25 : vector<1x192x64xf32> to vector<192x64xf32>
    %cst_23 = arith.constant dense<0.000000e+00> : vector<256x64xf32>
    %27 = tpu.matmul %24, %26, %cst_23 {dimension_numbers = #tpu.dot_dimension_numbers<[1], [0], [0], [1], [0, 0, 1, 1], [], []>} : vector<256x192xf32>, vector<192x64xf32>, vector<256x64xf32> -> vector<256x64xf32>
    %28 = arith.addf %22, %27 : vector<256x64xf32>
    %c1_24 = arith.constant 1 : index
    %c0_25 = arith.constant 0 : index
    %c0_26 = arith.constant 0 : index
    %29 = vector.load %arg10[%c1_24, %c0_25, %c0_26] : memref<18x16x192xf32, #tpu.memory_space<vmem>>, vector<16x16x192xf32>
    %30 = vector.shape_cast %29 : vector<16x16x192xf32> to vector<256x192xf32>
    %c1_27 = arith.constant 1 : index
    %c0_28 = arith.constant 0 : index
    %c0_29 = arith.constant 0 : index
    %31 = vector.load %arg2[%c1_27, %c0_28, %c0_29] : memref<3x192x64xf32, #tpu.memory_space<vmem>>, vector<1x192x64xf32>
    %32 = vector.shape_cast %31 : vector<1x192x64xf32> to vector<192x64xf32>
    %cst_30 = arith.constant dense<0.000000e+00> : vector<256x64xf32>
    %33 = tpu.matmul %30, %32, %cst_30 {dimension_numbers = #tpu.dot_dimension_numbers<[1], [0], [0], [1], [0, 0, 1, 1], [], []>} : vector<256x192xf32>, vector<192x64xf32>, vector<256x64xf32> -> vector<256x64xf32>
    %34 = arith.addf %28, %33 : vector<256x64xf32>
    %c2 = arith.constant 2 : index
    %c0_31 = arith.constant 0 : index
    %c0_32 = arith.constant 0 : index
    %35 = vector.load %arg10[%c2, %c0_31, %c0_32] : memref<18x16x192xf32, #tpu.memory_space<vmem>>, vector<16x16x192xf32>
    %36 = vector.shape_cast %35 : vector<16x16x192xf32> to vector<256x192xf32>
    %c2_33 = arith.constant 2 : index
    %c0_34 = arith.constant 0 : index
    %c0_35 = arith.constant 0 : index
    %37 = vector.load %arg2[%c2_33, %c0_34, %c0_35] : memref<3x192x64xf32, #tpu.memory_space<vmem>>, vector<1x192x64xf32>
    %38 = vector.shape_cast %37 : vector<1x192x64xf32> to vector<192x64xf32>
    %cst_36 = arith.constant dense<0.000000e+00> : vector<256x64xf32>
    %39 = tpu.matmul %36, %38, %cst_36 {dimension_numbers = #tpu.dot_dimension_numbers<[1], [0], [0], [1], [0, 0, 1, 1], [], []>} : vector<256x192xf32>, vector<192x64xf32>, vector<256x64xf32> -> vector<256x64xf32>
    %40 = arith.addf %34, %39 : vector<256x64xf32>
    %c0_37 = arith.constant 0 : index
    %c0_38 = arith.constant 0 : index
    %41 = vector.load %arg5[%c0_37, %c0_38] : memref<1x64xf32, #tpu.memory_space<vmem>>, vector<1x64xf32>
    %42 = vector.broadcast %41 : vector<1x64xf32> to vector<256x64xf32>
    %43 = arith.mulf %40, %42 : vector<256x64xf32>
    %c0_39 = arith.constant 0 : index
    %c0_40 = arith.constant 0 : index
    %44 = vector.load %arg6[%c0_39, %c0_40] : memref<1x64xf32, #tpu.memory_space<vmem>>, vector<1x64xf32>
    %45 = vector.broadcast %44 : vector<1x64xf32> to vector<256x64xf32>
    %46 = arith.addf %43, %45 : vector<256x64xf32>
    %47 = vector.shape_cast %46 : vector<256x64xf32> to vector<16x16x64xf32>
    %c0_41 = arith.constant 0 : index
    %c0_42 = arith.constant 0 : index
    %c0_43 = arith.constant 0 : index
    %c0_44 = arith.constant 0 : index
    %48 = vector.load %arg7[%c0_41, %c0_42, %c0_43, %c0_44] : memref<1x16x16x64xf32, #tpu.memory_space<vmem>>, vector<1x16x16x64xf32>
    %49 = vector.shape_cast %48 : vector<1x16x16x64xf32> to vector<16x16x64xf32>
    %50 = vector.shape_cast %47 : vector<16x16x64xf32> to vector<1x16x16x64xf32>
    tpu.vector_store %arg7[%c0_41, %c0_42, %c0_43, %c0_44], %50 {strides = array<i32>} : memref<1x16x16x64xf32, #tpu.memory_space<vmem>>, vector<1x16x16x64xf32>,
    %cst_45 = arith.constant dense<0.000000e+00> : vector<64xf32>
    %51 = vector.multi_reduction <add>, %46, %cst_45 [0] : vector<256x64xf32> to vector<64xf32>
    %52 = vector.shape_cast %51 : vector<64xf32> to vector<1x64xf32>
    %c0_46 = arith.constant 0 : index
    %c0_47 = arith.constant 0 : index
    %c0_48 = arith.constant 0 : index
    %53 = vector.load %arg8[%c0_46, %c0_47, %c0_48] : memref<1x1x64xf32, #tpu.memory_space<vmem>>, vector<1x1x64xf32>
    %54 = vector.shape_cast %53 : vector<1x1x64xf32> to vector<1x64xf32>
    %55 = vector.shape_cast %52 : vector<1x64xf32> to vector<1x1x64xf32>
    tpu.vector_store %arg8[%c0_46, %c0_47, %c0_48], %55 {strides = array<i32>} : memref<1x1x64xf32, #tpu.memory_space<vmem>>, vector<1x1x64xf32>,
    %56 = arith.mulf %46, %46 : vector<256x64xf32>
    %cst_49 = arith.constant dense<0.000000e+00> : vector<64xf32>
    %57 = vector.multi_reduction <add>, %56, %cst_49 [0] : vector<256x64xf32> to vector<64xf32>
    %58 = vector.shape_cast %57 : vector<64xf32> to vector<1x64xf32>
    %c0_50 = arith.constant 0 : index
    %c0_51 = arith.constant 0 : index
    %c0_52 = arith.constant 0 : index
    %59 = vector.load %arg9[%c0_50, %c0_51, %c0_52] : memref<1x1x64xf32, #tpu.memory_space<vmem>>, vector<1x1x64xf32>
    %60 = vector.shape_cast %59 : vector<1x1x64xf32> to vector<1x64xf32>
    %61 = vector.shape_cast %58 : vector<1x64xf32> to vector<1x1x64xf32>
    tpu.vector_store %arg9[%c0_50, %c0_51, %c0_52], %61 {strides = array<i32>} : memref<1x1x64xf32, #tpu.memory_space<vmem>>, vector<1x1x64xf32>,
    return
  }
  func.func @transform_0(%arg0: i32) -> (i32, i32, i32, i32) {
    %c0_i32 = arith.constant 0 : i32
    %c0_i32_0 = arith.constant 0 : i32
    %c0_i32_1 = arith.constant 0 : i32
    %c0_i32_2 = arith.constant 0 : i32
    return %arg0, %c0_i32, %c0_i32_0, %c0_i32_1 : i32, i32, i32, i32
  }
  func.func @transform_1(%arg0: i32) -> (i32, i32, i32) {
    %c0_i32 = arith.constant 0 : i32
    %c0_i32_0 = arith.constant 0 : i32
    %c0_i32_1 = arith.constant 0 : i32
    %c0_i32_2 = arith.constant 0 : i32
    return %c0_i32, %c0_i32_0, %c0_i32_1 : i32, i32, i32
  }
  func.func @transform_2(%arg0: i32) -> (i32, i32) {
    %c0_i32 = arith.constant 0 : i32
    %c0_i32_0 = arith.constant 0 : i32
    %c0_i32_1 = arith.constant 0 : i32
    return %c0_i32, %c0_i32_0 : i32, i32
  }
  func.func @transform_3(%arg0: i32) -> (i32, i32) {
    %c0_i32 = arith.constant 0 : i32
    %c0_i32_0 = arith.constant 0 : i32
    %c0_i32_1 = arith.constant 0 : i32
    return %c0_i32, %c0_i32_0 : i32, i32
  }
  func.func @transform_4(%arg0: i32) -> (i32, i32) {
    %c0_i32 = arith.constant 0 : i32
    %c0_i32_0 = arith.constant 0 : i32
    %c0_i32_1 = arith.constant 0 : i32
    return %c0_i32, %c0_i32_0 : i32, i32
  }
  func.func @transform_5(%arg0: i32) -> (i32, i32) {
    %c0_i32 = arith.constant 0 : i32
    %c0_i32_0 = arith.constant 0 : i32
    %c0_i32_1 = arith.constant 0 : i32
    return %c0_i32, %c0_i32_0 : i32, i32
  }
  func.func @transform_6(%arg0: i32) -> (i32, i32, i32, i32) {
    %c0_i32 = arith.constant 0 : i32
    %c0_i32_0 = arith.constant 0 : i32
    %c0_i32_1 = arith.constant 0 : i32
    %c0_i32_2 = arith.constant 0 : i32
    return %arg0, %c0_i32, %c0_i32_0, %c0_i32_1 : i32, i32, i32, i32
  }
  func.func @transform_7(%arg0: i32) -> (i32, i32, i32) {
    %c0_i32 = arith.constant 0 : i32
    %c0_i32_0 = arith.constant 0 : i32
    %c0_i32_1 = arith.constant 0 : i32
    return %arg0, %c0_i32, %c0_i32_0 : i32, i32, i32
  }
  func.func @transform_8(%arg0: i32) -> (i32, i32, i32) {
    %c0_i32 = arith.constant 0 : i32
    %c0_i32_0 = arith.constant 0 : i32
    %c0_i32_1 = arith.constant 0 : i32
    return %arg0, %c0_i32, %c0_i32_0 : i32, i32, i32
  }
}

module attributes {stable_mosaic.version = 11 : i64} {
  func.func @_conv3x3_fused_kernel(%arg0: i32, %arg1: memref<1x16x16x64xf32, #tpu.memory_space<vmem>>, %arg2: memref<3x192x4xf32, #tpu.memory_space<vmem>>, %arg3: memref<1x64xf32, #tpu.memory_space<vmem>>, %arg4: memref<1x64xf32, #tpu.memory_space<vmem>>, %arg5: memref<1x4xf32, #tpu.memory_space<vmem>>, %arg6: memref<1x4xf32, #tpu.memory_space<vmem>>, %arg7: memref<1x16x16x4xf32, #tpu.memory_space<vmem>>, %arg8: memref<1x1x4xf32, #tpu.memory_space<vmem>>, %arg9: memref<1x1x4xf32, #tpu.memory_space<vmem>>, %arg10: memref<18x16x192xf32, #tpu.memory_space<vmem>>) attributes {dimension_semantics = [#tpu.dimension_semantics<parallel>], iteration_bounds = array<i64: 2>, scalar_prefetch = 0 : i64, scratch_operands = 1 : i64, tpu.core_type = #tpu.core_type<tc>, window_params = [{transform_indices = @transform_0, window_bounds = array<i64: 1, 16, 16, 64>}, {pipeline_mode = #tpu.pipeline_mode<synchronous>, transform_indices = @transform_1, window_bounds = array<i64: 3, 192, 4>}, {pipeline_mode = #tpu.pipeline_mode<synchronous>, transform_indices = @transform_2, window_bounds = array<i64: 1, 64>}, {pipeline_mode = #tpu.pipeline_mode<synchronous>, transform_indices = @transform_3, window_bounds = array<i64: 1, 64>}, {pipeline_mode = #tpu.pipeline_mode<synchronous>, transform_indices = @transform_4, window_bounds = array<i64: 1, 4>}, {pipeline_mode = #tpu.pipeline_mode<synchronous>, transform_indices = @transform_5, window_bounds = array<i64: 1, 4>}, {transform_indices = @transform_6, window_bounds = array<i64: 1, 16, 16, 4>}, {transform_indices = @transform_7, window_bounds = array<i64: 1, 1, 4>}, {transform_indices = @transform_8, window_bounds = array<i64: 1, 1, 4>}]} {
    %c0 = arith.constant 0 : index
    %c0_0 = arith.constant 0 : index
    %c0_1 = arith.constant 0 : index
    %c0_2 = arith.constant 0 : index
    %0 = vector.load %arg1[%c0, %c0_0, %c0_1, %c0_2] : memref<1x16x16x64xf32, #tpu.memory_space<vmem>>, vector<1x16x16x64xf32>
    %1 = vector.shape_cast %0 : vector<1x16x16x64xf32> to vector<16x16x64xf32>
    %c0_3 = arith.constant 0 : index
    %c0_4 = arith.constant 0 : index
    %2 = vector.load %arg3[%c0_3, %c0_4] : memref<1x64xf32, #tpu.memory_space<vmem>>, vector<1x64xf32>
    %3 = vector.shape_cast %2 : vector<1x64xf32> to vector<1x1x64xf32>
    %4 = vector.broadcast %3 : vector<1x1x64xf32> to vector<16x16x64xf32>
    %5 = arith.mulf %1, %4 : vector<16x16x64xf32>
    %c0_5 = arith.constant 0 : index
    %c0_6 = arith.constant 0 : index
    %6 = vector.load %arg4[%c0_5, %c0_6] : memref<1x64xf32, #tpu.memory_space<vmem>>, vector<1x64xf32>
    %7 = vector.shape_cast %6 : vector<1x64xf32> to vector<1x1x64xf32>
    %8 = vector.broadcast %7 : vector<1x1x64xf32> to vector<16x16x64xf32>
    %9 = arith.addf %5, %8 : vector<16x16x64xf32>
    %cst = arith.constant 0.000000e+00 : f32
    %10 = vector.broadcast %cst : f32 to vector<16x16x64xf32>
    %11 = arith.maximumf %9, %10 : vector<16x16x64xf32>
    %cst_7 = arith.constant 0.000000e+00 : f32
    %12 = vector.broadcast %cst_7 : f32 to vector<16x1x64xf32>
    %13 = vector.extract_strided_slice %11 {offsets = [0, 0, 0], sizes = [16, 15, 64], strides = [1, 1, 1]} : vector<16x16x64xf32> to vector<16x15x64xf32>
    %14 = tpu.concatenate %12, %13 in 1 : vector<16x1x64xf32>, vector<16x15x64xf32> -> vector<16x16x64xf32>
    %15 = vector.extract_strided_slice %11 {offsets = [0, 1, 0], sizes = [16, 15, 64], strides = [1, 1, 1]} : vector<16x16x64xf32> to vector<16x15x64xf32>
    %16 = tpu.concatenate %15, %12 in 1 : vector<16x15x64xf32>, vector<16x1x64xf32> -> vector<16x16x64xf32>
    %17 = tpu.concatenate %14, %11, %16 in 2 : vector<16x16x64xf32>, vector<16x16x64xf32>, vector<16x16x64xf32> -> vector<16x16x192xf32>
    %cst_8 = arith.constant 0.000000e+00 : f32
    %18 = vector.broadcast %cst_8 : f32 to vector<1x16x192xf32>
    %c0_9 = arith.constant 0 : index
    %c0_10 = arith.constant 0 : index
    %c0_11 = arith.constant 0 : index
    %19 = vector.load %arg10[%c0_9, %c0_10, %c0_11] : memref<18x16x192xf32, #tpu.memory_space<vmem>>, vector<1x16x192xf32>
    tpu.vector_store %arg10[%c0_9, %c0_10, %c0_11], %18 {strides = array<i32>} : memref<18x16x192xf32, #tpu.memory_space<vmem>>, vector<1x16x192xf32>,
    %c17 = arith.constant 17 : index
    %c0_12 = arith.constant 0 : index
    %c0_13 = arith.constant 0 : index
    %20 = vector.load %arg10[%c17, %c0_12, %c0_13] : memref<18x16x192xf32, #tpu.memory_space<vmem>>, vector<1x16x192xf32>
    tpu.vector_store %arg10[%c17, %c0_12, %c0_13], %18 {strides = array<i32>} : memref<18x16x192xf32, #tpu.memory_space<vmem>>, vector<1x16x192xf32>,
    %c1 = arith.constant 1 : index
    %c0_14 = arith.constant 0 : index
    %c0_15 = arith.constant 0 : index
    %21 = vector.load %arg10[%c1, %c0_14, %c0_15] : memref<18x16x192xf32, #tpu.memory_space<vmem>>, vector<16x16x192xf32>
    tpu.vector_store %arg10[%c1, %c0_14, %c0_15], %17 {strides = array<i32>} : memref<18x16x192xf32, #tpu.memory_space<vmem>>, vector<16x16x192xf32>,
    %cst_16 = arith.constant 0.000000e+00 : f32
    %22 = vector.broadcast %cst_16 : f32 to vector<256x4xf32>
    %c0_17 = arith.constant 0 : index
    %c0_18 = arith.constant 0 : index
    %c0_19 = arith.constant 0 : index
    %23 = vector.load %arg10[%c0_17, %c0_18, %c0_19] : memref<18x16x192xf32, #tpu.memory_space<vmem>>, vector<16x16x192xf32>
    %24 = vector.shape_cast %23 : vector<16x16x192xf32> to vector<256x192xf32>
    %c0_20 = arith.constant 0 : index
    %c0_21 = arith.constant 0 : index
    %c0_22 = arith.constant 0 : index
    %25 = vector.load %arg2[%c0_20, %c0_21, %c0_22] : memref<3x192x4xf32, #tpu.memory_space<vmem>>, vector<1x192x4xf32>
    %26 = vector.shape_cast %25 : vector<1x192x4xf32> to vector<192x4xf32>
    %cst_23 = arith.constant dense<0.000000e+00> : vector<256x4xf32>
    %27 = tpu.matmul %24, %26, %cst_23 {dimension_numbers = #tpu.dot_dimension_numbers<[1], [0], [0], [1], [0, 0, 1, 1], [], []>} : vector<256x192xf32>, vector<192x4xf32>, vector<256x4xf32> -> vector<256x4xf32>
    %28 = arith.addf %22, %27 : vector<256x4xf32>
    %c1_24 = arith.constant 1 : index
    %c0_25 = arith.constant 0 : index
    %c0_26 = arith.constant 0 : index
    %29 = vector.load %arg10[%c1_24, %c0_25, %c0_26] : memref<18x16x192xf32, #tpu.memory_space<vmem>>, vector<16x16x192xf32>
    %30 = vector.shape_cast %29 : vector<16x16x192xf32> to vector<256x192xf32>
    %c1_27 = arith.constant 1 : index
    %c0_28 = arith.constant 0 : index
    %c0_29 = arith.constant 0 : index
    %31 = vector.load %arg2[%c1_27, %c0_28, %c0_29] : memref<3x192x4xf32, #tpu.memory_space<vmem>>, vector<1x192x4xf32>
    %32 = vector.shape_cast %31 : vector<1x192x4xf32> to vector<192x4xf32>
    %cst_30 = arith.constant dense<0.000000e+00> : vector<256x4xf32>
    %33 = tpu.matmul %30, %32, %cst_30 {dimension_numbers = #tpu.dot_dimension_numbers<[1], [0], [0], [1], [0, 0, 1, 1], [], []>} : vector<256x192xf32>, vector<192x4xf32>, vector<256x4xf32> -> vector<256x4xf32>
    %34 = arith.addf %28, %33 : vector<256x4xf32>
    %c2 = arith.constant 2 : index
    %c0_31 = arith.constant 0 : index
    %c0_32 = arith.constant 0 : index
    %35 = vector.load %arg10[%c2, %c0_31, %c0_32] : memref<18x16x192xf32, #tpu.memory_space<vmem>>, vector<16x16x192xf32>
    %36 = vector.shape_cast %35 : vector<16x16x192xf32> to vector<256x192xf32>
    %c2_33 = arith.constant 2 : index
    %c0_34 = arith.constant 0 : index
    %c0_35 = arith.constant 0 : index
    %37 = vector.load %arg2[%c2_33, %c0_34, %c0_35] : memref<3x192x4xf32, #tpu.memory_space<vmem>>, vector<1x192x4xf32>
    %38 = vector.shape_cast %37 : vector<1x192x4xf32> to vector<192x4xf32>
    %cst_36 = arith.constant dense<0.000000e+00> : vector<256x4xf32>
    %39 = tpu.matmul %36, %38, %cst_36 {dimension_numbers = #tpu.dot_dimension_numbers<[1], [0], [0], [1], [0, 0, 1, 1], [], []>} : vector<256x192xf32>, vector<192x4xf32>, vector<256x4xf32> -> vector<256x4xf32>
    %40 = arith.addf %34, %39 : vector<256x4xf32>
    %c0_37 = arith.constant 0 : index
    %c0_38 = arith.constant 0 : index
    %41 = vector.load %arg5[%c0_37, %c0_38] : memref<1x4xf32, #tpu.memory_space<vmem>>, vector<1x4xf32>
    %42 = vector.broadcast %41 : vector<1x4xf32> to vector<256x4xf32>
    %43 = arith.mulf %40, %42 : vector<256x4xf32>
    %c0_39 = arith.constant 0 : index
    %c0_40 = arith.constant 0 : index
    %44 = vector.load %arg6[%c0_39, %c0_40] : memref<1x4xf32, #tpu.memory_space<vmem>>, vector<1x4xf32>
    %45 = vector.broadcast %44 : vector<1x4xf32> to vector<256x4xf32>
    %46 = arith.addf %43, %45 : vector<256x4xf32>
    %47 = vector.shape_cast %46 : vector<256x4xf32> to vector<16x16x4xf32>
    %c0_41 = arith.constant 0 : index
    %c0_42 = arith.constant 0 : index
    %c0_43 = arith.constant 0 : index
    %c0_44 = arith.constant 0 : index
    %48 = vector.load %arg7[%c0_41, %c0_42, %c0_43, %c0_44] : memref<1x16x16x4xf32, #tpu.memory_space<vmem>>, vector<1x16x16x4xf32>
    %49 = vector.shape_cast %48 : vector<1x16x16x4xf32> to vector<16x16x4xf32>
    %50 = vector.shape_cast %47 : vector<16x16x4xf32> to vector<1x16x16x4xf32>
    tpu.vector_store %arg7[%c0_41, %c0_42, %c0_43, %c0_44], %50 {strides = array<i32>} : memref<1x16x16x4xf32, #tpu.memory_space<vmem>>, vector<1x16x16x4xf32>,
    %cst_45 = arith.constant dense<0.000000e+00> : vector<4xf32>
    %51 = vector.multi_reduction <add>, %46, %cst_45 [0] : vector<256x4xf32> to vector<4xf32>
    %52 = vector.shape_cast %51 : vector<4xf32> to vector<1x4xf32>
    %c0_46 = arith.constant 0 : index
    %c0_47 = arith.constant 0 : index
    %c0_48 = arith.constant 0 : index
    %53 = vector.load %arg8[%c0_46, %c0_47, %c0_48] : memref<1x1x4xf32, #tpu.memory_space<vmem>>, vector<1x1x4xf32>
    %54 = vector.shape_cast %53 : vector<1x1x4xf32> to vector<1x4xf32>
    %55 = vector.shape_cast %52 : vector<1x4xf32> to vector<1x1x4xf32>
    tpu.vector_store %arg8[%c0_46, %c0_47, %c0_48], %55 {strides = array<i32>} : memref<1x1x4xf32, #tpu.memory_space<vmem>>, vector<1x1x4xf32>,
    %56 = arith.mulf %46, %46 : vector<256x4xf32>
    %cst_49 = arith.constant dense<0.000000e+00> : vector<4xf32>
    %57 = vector.multi_reduction <add>, %56, %cst_49 [0] : vector<256x4xf32> to vector<4xf32>
    %58 = vector.shape_cast %57 : vector<4xf32> to vector<1x4xf32>
    %c0_50 = arith.constant 0 : index
    %c0_51 = arith.constant 0 : index
    %c0_52 = arith.constant 0 : index
    %59 = vector.load %arg9[%c0_50, %c0_51, %c0_52] : memref<1x1x4xf32, #tpu.memory_space<vmem>>, vector<1x1x4xf32>
    %60 = vector.shape_cast %59 : vector<1x1x4xf32> to vector<1x4xf32>
    %61 = vector.shape_cast %58 : vector<1x4xf32> to vector<1x1x4xf32>
    tpu.vector_store %arg9[%c0_50, %c0_51, %c0_52], %61 {strides = array<i32>} : memref<1x1x4xf32, #tpu.memory_space<vmem>>, vector<1x1x4xf32>,
    return
  }
  func.func @transform_0(%arg0: i32) -> (i32, i32, i32, i32) {
    %c0_i32 = arith.constant 0 : i32
    %c0_i32_0 = arith.constant 0 : i32
    %c0_i32_1 = arith.constant 0 : i32
    %c0_i32_2 = arith.constant 0 : i32
    return %arg0, %c0_i32, %c0_i32_0, %c0_i32_1 : i32, i32, i32, i32
  }
  func.func @transform_1(%arg0: i32) -> (i32, i32, i32) {
    %c0_i32 = arith.constant 0 : i32
    %c0_i32_0 = arith.constant 0 : i32
    %c0_i32_1 = arith.constant 0 : i32
    %c0_i32_2 = arith.constant 0 : i32
    return %c0_i32, %c0_i32_0, %c0_i32_1 : i32, i32, i32
  }
  func.func @transform_2(%arg0: i32) -> (i32, i32) {
    %c0_i32 = arith.constant 0 : i32
    %c0_i32_0 = arith.constant 0 : i32
    %c0_i32_1 = arith.constant 0 : i32
    return %c0_i32, %c0_i32_0 : i32, i32
  }
  func.func @transform_3(%arg0: i32) -> (i32, i32) {
    %c0_i32 = arith.constant 0 : i32
    %c0_i32_0 = arith.constant 0 : i32
    %c0_i32_1 = arith.constant 0 : i32
    return %c0_i32, %c0_i32_0 : i32, i32
  }
  func.func @transform_4(%arg0: i32) -> (i32, i32) {
    %c0_i32 = arith.constant 0 : i32
    %c0_i32_0 = arith.constant 0 : i32
    %c0_i32_1 = arith.constant 0 : i32
    return %c0_i32, %c0_i32_0 : i32, i32
  }
  func.func @transform_5(%arg0: i32) -> (i32, i32) {
    %c0_i32 = arith.constant 0 : i32
    %c0_i32_0 = arith.constant 0 : i32
    %c0_i32_1 = arith.constant 0 : i32
    return %c0_i32, %c0_i32_0 : i32, i32
  }
  func.func @transform_6(%arg0: i32) -> (i32, i32, i32, i32) {
    %c0_i32 = arith.constant 0 : i32
    %c0_i32_0 = arith.constant 0 : i32
    %c0_i32_1 = arith.constant 0 : i32
    %c0_i32_2 = arith.constant 0 : i32
    return %arg0, %c0_i32, %c0_i32_0, %c0_i32_1 : i32, i32, i32, i32
  }
  func.func @transform_7(%arg0: i32) -> (i32, i32, i32) {
    %c0_i32 = arith.constant 0 : i32
    %c0_i32_0 = arith.constant 0 : i32
    %c0_i32_1 = arith.constant 0 : i32
    return %arg0, %c0_i32, %c0_i32_0 : i32, i32, i32
  }
  func.func @transform_8(%arg0: i32) -> (i32, i32, i32) {
    %c0_i32 = arith.constant 0 : i32
    %c0_i32_0 = arith.constant 0 : i32
    %c0_i32_1 = arith.constant 0 : i32
    return %arg0, %c0_i32, %c0_i32_0 : i32, i32, i32
  }
}

</mosaic_0001>

<bundles_post_ra>
// kernel: dncnn_forward.5
= control target key start
LH: loop header
LB: loop body
LE: loop exit
PB: predicated region body
PF: predicated region fallthrough
CT: control target
= control target key end

     0   :  { %14 = vsyncpa [#allocation4], 0  ;;  %s4424_s0 = inlined_call_operand.vmem [shape: f32[2,16,16,4], index: 0, kind: input, shape index: {}]   ;;  %s4425_s1 = inlined_call_operand.vmem [shape: f32[3,12,64], index: 1, kind: input, shape index: {}]   ;;  %s4426_s2 = inlined_call_operand.vmem [shape: f32[1,4], index: 2, kind: input, shape index: {}]   ;;  %s4427_s3 = inlined_call_operand.vmem [shape: f32[1,4], index: 3, kind: input, shape index: {}]   ;;  %s4428_s4 = inlined_call_operand.vmem [shape: f32[1,64], index: 4, kind: input, shape index: {}]   ;;  %s4429_s5 = inlined_call_operand.vmem [shape: f32[1,64], index: 5, kind: input, shape index: {}]   ;;  %s4430_s6 = inlined_call_operand.vmem [shape: f32[2,16,16,64], index: 6, kind: output, shape index: {0}]   ;;  %s4431_s7 = inlined_call_operand.hbm [shape: f32[2,1,64], index: 7, kind: output, shape index: {1}]   ;;  %s4432_s8 = inlined_call_operand.hbm [shape: f32[2,1,64], index: 8, kind: output, shape index: {2}]  }
   0x1   :  { %16 = vsyncpa [#allocation4 + $0x1], 0 }
   0x2   :  { %17 = vsyncpa [#allocation6], 0 }
   0x3   :  { %19 = vsyncpa [#allocation6 + $0x1], 0  ;;  %s3188_s27 = smov 0   ;;  %s3190_s28 = smov 0  }
   0x4   :  { %s3192_s29 = smov 0   ;;  %s3194_s30 = smov 0  }
   0x5 LB: > { %s3209_s9 = sadd.s32 4294967295, %s3135_s30   ;;  %s2530_s10 = sadd.s32 4294967294, %s3135_s30   ;;  %s3135_s30 = sphi %s3194_s30, %s4442_s30   ;;  %s3131_s29 = sphi %s3192_s29, %s4441_s29   ;;  %s3127_s28 = sphi %s3190_s28, %s4440_s28   ;;  %s3123_s27 = sphi %s3188_s27, %s4439_s27  }
   0x6   : > { %s3213_s11 = sadd.s32 1, %s3135_s30   ;;  %s189_s12 = sadd.s32 1, %s3131_s29 }
   0x7   : > { %s186_s13 = ssub.s32 %s3135_s30, %s3213_s11  ;;  %p199_p0 = scmp.ne.s32.totalorder %s3131_s29, %s3127_s28 }
   0x8   : > { %p187_p1 = scmp.eq.s32.totalorder %s186_s13, 0  ;;  %p200_p2 = scmp.eq.s32.totalorder %s3209_s9, 1 }
   0x9   : > { %p205_p3 = scmp.ne.s32.totalorder %s3127_s28, %s3123_s27  ;;  %p206_p4 = scmp.eq.s32.totalorder %s2530_s10, 1 }
   0xa   : > { %s3224_s14 = scalar_select %p187_p1, %s3131_s29, %s189_s12  }
   0xb   : > { %p3226_p5 = por %p200_p2, %p199_p0  ;;  %p3230_p6 = por %p206_p4, %p205_p3 }
   0xc   : > { %p2533_p7 = scmp.ge.s32.totalorder %s3135_s30, 1  ;;  %p273_p8 = scmp.lt.s32.totalorder %s3135_s30, 3 }
   0xe   : > { %p274_p9 = pnand %p2533_p7, %p273_p8 }
   0xf   : > { %p315_p10 = scmp.lt.s32.totalorder (!%p274_p9), %s3209_s9, 1  ;;  %vm919_vm0 = vcmask (!%p274_p9), 97280   ;;  %v990_v0 = vld [vmem:[%s4425_s1] sm:$0xff] (!%p274_p9)  ;;  %v991_v1 = vld [vmem:[%s4425_s1 + $0x8] sm:$0xf] (!%p274_p9)  ;;  %v3137_v2 = vmov (!%p274_p9), 0.0  }
  0x10   : > { %277 = sbr.rel (%p274_p9) target bundleno = 592 (0x250), region = 44  ;;  %920 = vst.msk [vmem:[#allocation2] sm:$0xff] (!%p274_p9), %vm919_vm0, %v3137_v2  ;;  %921 = vst.msk [vmem:[#allocation2 + $0x8] sm:$0xff] (!%p274_p9), %vm919_vm0, %v3137_v2  ;;  %v3254_v3 = vld [vmem:[%s4426_s2] ss:$0 sm:$0xff] (!%p274_p9)  ;;  %vm1123_vm1 = vcmask (!%p274_p9), 1043456   ;;  %v3256_v4 = vpack.c.bf16 (!%p274_p9), %v991_v1, %v990_v0 }
  0x11   : > { %923 = vst.msk [vmem:[#allocation2 + $0x110] sm:$0xff] (!%p274_p9), %vm919_vm0, %v3137_v2  ;;  %924 = vst.msk [vmem:[#allocation2 + $0x118] sm:$0xff] (!%p274_p9), %vm919_vm0, %v3137_v2  ;;  %v3268_v5 = vld [vmem:[%s4427_s3] ss:$0 sm:$0xff] (!%p274_p9)  ;;  %vm3138_vm2 = vmmov (!%p274_p9), 1   ;;  %vm564_vm4 = vcmask (!%p274_p9), 1046528  }
  0x12   : > { %vm3270_vm3 = vmpackc.low (!%p274_p9), %vm1123_vm1, %vm3138_vm2  ;;  %s3139_s18 = smov (!%p274_p9), 4   ;;  %s3140_s19 = smov (!%p274_p9), 8   ;;  %vm467_vm5 = vcmask (!%p274_p9), 1040384   ;;  %vm853_vm6 = vcmask (!%p274_p9), 31744   ;;  %vm886_vm7 = vcmask (!%p274_p9), 64512   ;;  %vm2178_vm8 = vcmask (!%p274_p9), 523264  }
  0x13   : > { %2917 = vmatprep.subr.msk.bf16.mxu0 (!%p274_p9), %vm3270_vm3, %v3256_v4  ;;  %vm2280_vm9 = vcmask (!%p274_p9), 516096   ;;  %s3141_s13 = smov (!%p274_p9), [#allocation3]  }
  0x14   : > { %2920 = vmatpush3.bf16.msk.msra.mxu0 (!%p274_p9), %vm3270_vm3, %v3256_v4 }
  0x17   : > { %s3238_s17 = scalar_select %p315_p10, %s3209_s9, 1  ;;  %v958_v23 = vld [vmem:[#allocation2] sm:$0xff]  ;;  %v959_v30 = vld [vmem:[#allocation2 + $0x8] sm:$0xff] }
  0x18   : > { %2809 = vmatprep.mubr.msk.f32.mxu0 %vm919_vm0, %v958_v23 }
  0x19   : > { %s2649_s22 = sshll.u32 %s3238_s17, 8  ;;  %2810 = vmatmul.mubr.msk.f32.vlgmr.msra.gmra.mrb[0].mxu0 %vm919_vm0, %v959_v30  ;;  %s4338_s17 = sand.u32 1, %s3127_s28  }
  0x1a   : > { %s3263_s10 = scalar_lea.vmem %s4424_s0, %s2649_s22  ;;  %s4108_s24 = scalar_lea.vmem %s4430_s6, %s2649_s22 }
  0x1b   : > { %v328_v7 = vld [vmem:[%s3263_s10 + $0x18] sm:$0xff]  ;;  %v325_v8 = vld [vmem:[%s3263_s10] sm:$0xff]  ;;  %v326_v9 = vld [vmem:[%s3263_s10 + $0x8] sm:$0xff]  ;;  %s2645_s22 = sshll.u32 %s3209_s9, 4  ;;  %s308_s25 = scalar_lea.vmem [#allocation3], %s4338_s17 }
  0x1c   : > { %v367_v10 = vmul.f32 %v3254_v3, %v328_v7  ;;  %v364_v11 = vmul.f32 %v3254_v3, %v325_v8  ;;  %v365_v12 = vmul.f32 %v3254_v3, %v326_v9  ;;  %v327_v13 = vld [vmem:[%s3263_s10 + $0x10] sm:$0xff]  ;;  %v329_v15 = vld [vmem:[%s3263_s10 + $0x20] sm:$0xff]  ;;  %v330_v19 = vld [vmem:[%s3263_s10 + $0x28] sm:$0xff]  ;;  %s2409_s26 = sshll.u32 %s308_s25, 4  ;;  %s4356_s21 = scalar_lea.hbm %s4432_s8, %s2645_s22  ;;  %s4350_s26 = int_to_ptr.vmem [resolvable:$true] %s2409_s26 }
  0x1d   : > { %v366_v14 = vmul.f32 %v3254_v3, %v327_v13  ;;  %v368_v22 = vmul.f32 %v3254_v3, %v329_v15  ;;  %v369_v25 = vmul.f32 %v3254_v3, %v330_v19  ;;  %v331_v26 = vld [vmem:[%s3263_s10 + $0x30] sm:$0xff]  ;;  %v332_v35 = vld [vmem:[%s3263_s10 + $0x38] sm:$0xff]  ;;  %v341_v36 = vld [vmem:[%s3263_s10 + $0x80] sm:$0xff]  ;;  %s2390_s23 = scalar_lea.sflag [#allocation4], %s4338_s17 }
  0x1e   : > { %v3290_v16 = vadd.f32 %v3268_v5, %v367_v10  ;;  %v3293_v17 = vadd.f32 %v3268_v5, %v364_v11  ;;  %v3296_v18 = vadd.f32 %v3268_v5, %v365_v12  ;;  %v370_v29 = vmul.f32 %v3254_v3, %v331_v26  ;;  %v342_v43 = vld [vmem:[%s3263_s10 + $0x88] sm:$0xff]  ;;  %v343_v45 = vld [vmem:[%s3263_s10 + $0x90] sm:$0xff]  ;;  %v344_v46 = vld [vmem:[%s3263_s10 + $0x98] sm:$0xff] }
  0x1f   : > { %v3307_v24 = vadd.f32 %v3268_v5, %v366_v14  ;;  %v3317_v28 = vadd.f32 %v3268_v5, %v368_v22  ;;  %v3324_v34 = vadd.f32 %v3268_v5, %v369_v25  ;;  %v371_v38 = vmul.f32 %v3254_v3, %v332_v35  ;;  %v345_v47 = vld [vmem:[%s3263_s10 + $0xa0] sm:$0xff]  ;;  %v346_v48 = vld [vmem:[%s3263_s10 + $0xa8] sm:$0xff]  ;;  %v347_v53 = vld [vmem:[%s3263_s10 + $0xb0] sm:$0xff] }
  0x20   : > { %651 = vrot.lane.b32.xlu1 %v3290_v16, %s3139_s18  ;;  %645 = vrot.lane.b32.xlu0 %v3293_v17, %s3139_s18  ;;  %v565_v20 = vrot.slane %v3293_v17, 1  ;;  %v566_v21 = vrot.slane %v3296_v18, 1  ;;  %v569_v33 = vrot.slane %v3290_v16, 1  ;;  %v3333_v37 = vadd.f32 %v3268_v5, %v370_v29  ;;  %v348_v54 = vld [vmem:[%s3263_s10 + $0xb8] sm:$0xff]  ;;  %v349_v59 = vld [vmem:[%s3263_s10 + $0xc0] sm:$0xff] }
  0x21   : > { %v568_v32 = vrot.slane %v3307_v24, 1  ;;  %v571_v41 = vrot.slane %v3317_v28, 1  ;;  %v572_v42 = vrot.slane %v3324_v34, 1  ;;  %v380_v44 = vmul.f32 %v3254_v3, %v341_v36  ;;  %v333_v8 = vld [vmem:[%s3263_s10 + $0x40] sm:$0xff]  ;;  %v334_v9 = vld [vmem:[%s3263_s10 + $0x48] sm:$0xff]  ;;  %v352_v29 = vld [vmem:[%s3263_s10 + $0xd8] sm:$0xff] }
  0x22   : > { %v567_v27 = vsel %vm564_vm4, %v565_v20, %v566_v21  ;;  %v629_v31 = vsel %vm564_vm4, %v566_v21, 0.0  ;;  %v630_v40 = vsel %vm564_vm4, %v569_v33, 0.0  ;;  %v3349_v49 = vadd.f32 %v3268_v5, %v371_v38  ;;  %v350_v21 = vld [vmem:[%s3263_s10 + $0xc8] sm:$0xff]  ;;  %v353_v36 = vld [vmem:[%s3263_s10 + $0xe0] sm:$0xff] }
  0x23   : > { %v570_v39 = vsel %vm564_vm4, %v568_v32, %v569_v33  ;;  %v574_v50 = vrot.slane %v3333_v37, 1  ;;  %v3353_v51 = vadd.f32 %v3268_v5, %v380_v44  ;;  %v381_v52 = vmul.f32 %v3254_v3, %v342_v43  ;;  %v335_v32 = vld [vmem:[%s3263_s10 + $0x50] sm:$0xff]  ;;  %v354_v38 = vld [vmem:[%s3263_s10 + $0xe8] sm:$0xff] }
  0x24   : > { %647 = vrot.lane.b32.xlu0 %v3296_v18, %s3139_s18  ;;  %757 = vrot.lane.b32.xlu1 %v567_v27, %s3140_s19  ;;  %v573_v55 = vsel %vm564_vm4, %v571_v41, %v572_v42  ;;  %v631_v56 = vsel %vm564_vm4, %v572_v42, 0.0  ;;  %v382_v57 = vmul.f32 %v3254_v3, %v343_v45  ;;  %v383_v58 = vmul.f32 %v3254_v3, %v344_v46  ;;  %v351_v27 = vld [vmem:[%s3263_s10 + $0xd0] sm:$0xff] }
  0x25   : > { %v3364_v60 = vadd.f32 %v3268_v5, %v381_v52  ;;  %v589_v61 = vrot.slane %v3353_v51, 1  ;;  %v384_v62 = vmul.f32 %v3254_v3, %v345_v47  ;;  %v385_v63 = vmul.f32 %v3254_v3, %v346_v48 }
  0x26   : > { %v3370_v0 = vadd.f32 %v3268_v5, %v382_v57  ;;  %v3373_v1 = vadd.f32 %v3268_v5, %v383_v58  ;;  %v386_v2 = vmul.f32 %v3254_v3, %v347_v53  ;;  %v387_v7 = vmul.f32 %v3254_v3, %v348_v54 }
  0x27   : > { %v590_v10 = vrot.slane %v3364_v60, 1  ;;  %v3385_v11 = vadd.f32 %v3268_v5, %v384_v62  ;;  %v3388_v12 = vadd.f32 %v3268_v5, %v385_v63  ;;  %v388_v13 = vmul.f32 %v3254_v3, %v349_v59 }
  0x28   : > { %649 = vrot.lane.b32.xlu0 %v3307_v24, %s3139_s18  ;;  %759 = vrot.lane.b32.xlu1 %v629_v31, %s3140_s19  ;;  %v592_v14 = vrot.slane %v3370_v0, 1  ;;  %v593_v15 = vrot.slane %v3373_v1, 1  ;;  %v3394_v19 = vadd.f32 %v3268_v5, %v386_v2  ;;  %v3397_v20 = vadd.f32 %v3268_v5, %v387_v7  ;;  %v355_v7 = vld [vmem:[%s3263_s10 + $0xf0] sm:$0xff] }
  0x29   : > { %v3401_v22 = vsel %vm564_vm4, %v589_v61, %v590_v10  ;;  %v3404_v23 = vsel %vm564_vm4, %v590_v10, 0.0  ;;  %v595_v25 = vrot.slane %v3385_v11, 1  ;;  %v596_v26 = vrot.slane %v3388_v12, 1  ;;  %v337_v61 = vld [vmem:[%s3263_s10 + $0x60] sm:$0xff] }
  0x2a   : > { %v372_v30 = vmul.f32 %v3254_v3, %v333_v8  ;;  %v373_v31 = vmul.f32 %v3254_v3, %v334_v9  ;;  %v3414_v33 = vsel %vm564_vm4, %v592_v14, %v593_v15  ;;  %v3417_v35 = vsel %vm564_vm4, %v593_v15, 0.0  ;;  %v338_v9 = vld [vmem:[%s3263_s10 + $0x68] sm:$0xff]  ;;  %v356_v14 = vld [vmem:[%s3263_s10 + $0xf8] sm:$0xff] }
  0x2b   : > { %v3430_v41 = vadd.f32 %v3268_v5, %v388_v13  ;;  %v389_v42 = vmul.f32 %v3254_v3, %v350_v21  ;;  %v575_v43 = vrot.slane %v3349_v49, 1  ;;  %v390_v44 = vmul.f32 %v3254_v3, %v351_v27 }
  0x2c   : > { %761 = vrot.lane.b32.xlu0 %v570_v39, %s3140_s19  ;;  %763 = vrot.lane.b32.xlu1 %v630_v40, %s3140_s19  ;;  %v3424_v39 = vsel %vm564_vm4, %v595_v25, %v596_v26  ;;  %v3427_v40 = vsel %vm564_vm4, %v596_v26, 0.0  ;;  %v391_v45 = vmul.f32 %v3254_v3, %v352_v29  ;;  %v471_v46 = vrot.slane %v3307_v24, 7 }
  0x2d   : > { %v374_v47 = vmul.f32 %v3254_v3, %v335_v32  ;;  %v3439_v48 = vadd.f32 %v3268_v5, %v389_v42  ;;  %v392_v52 = vmul.f32 %v3254_v3, %v353_v36  ;;  %v393_v53 = vmul.f32 %v3254_v3, %v354_v38 }
  0x2e   : > { %v3444_v54 = vadd.f32 %v3268_v5, %v372_v30  ;;  %v3451_v57 = vadd.f32 %v3268_v5, %v391_v45  ;;  %v472_v58 = vrot.slane %v3290_v16, 7  ;;  %v412_v59 = vadd.f32 %v3268_v5, %v373_v31 }
  0x2f   : > { %v3461_v62 = vadd.f32 %v3268_v5, %v392_v52  ;;  %v3464_v63 = vadd.f32 %v3268_v5, %v393_v53  ;;  %v469_v2 = vrot.slane %v3296_v18, 7  ;;  %v576_v16 = vsel %vm564_vm4, %v574_v50, %v575_v43  ;;  %v2540_v18 = vld [vmem:[%s4425_s1 + $0x10] sm:$0xff]  ;;  %v2541_v50 = vld [vmem:[%s4425_s1 + $0x18] sm:$0xf] }
  0x30   : > { %653 = vrot.lane.b32.xlu0 %v3317_v28, %s3139_s18  ;;  %655 = vrot.lane.b32.xlu1 %v3324_v34, %s3139_s18  ;;  %v632_v8 = vsel %vm564_vm4, %v575_v43, 0.0  ;;  %v3476_v10 = vsel %vm467_vm5, %v471_v46, %v472_v58  ;;  %v468_v13 = vrot.slane %v3293_v17, 7  ;;  %v3488_v21 = vadd.f32 %v3268_v5, %v374_v47  ;;  %v339_v58 = vld [vmem:[%s3263_s10 + $0x70] sm:$0xff] }
  0x31   : > { %v376_v25 = vmul.f32 %v3254_v3, %v337_v61  ;;  %v394_v27 = vmul.f32 %v3254_v3, %v355_v7  ;;  %v577_v29 = vrot.slane %v3444_v54, 1  ;;  %v578_v30 = vrot.slane %v412_v59, 1 }
  0x32   : > { %v3494_v26 = vsel %vm467_vm5, %v468_v13, %v469_v2  ;;  %v377_v31 = vmul.f32 %v3254_v3, %v338_v9  ;;  %v395_v32 = vmul.f32 %v3254_v3, %v356_v14  ;;  %v2909_v38 = vpack.c.bf16 %v2541_v50, %v2540_v18 }
  0x33   : > { %v3503_v36 = vadd.f32 %v3268_v5, %v394_v27  ;;  %v474_v42 = vrot.slane %v3317_v28, 7  ;;  %v475_v43 = vrot.slane %v3324_v34, 7  ;;  %v477_v45 = vrot.slane %v3333_v37, 7 }
  0x34   : > { %765 = vrot.lane.b32.xlu0 %v573_v55, %s3140_s19  ;;  %767 = vrot.lane.b32.xlu1 %v631_v56, %s3140_s19  ;;  %v336_v55 = vld [vmem:[%s3263_s10 + $0x58] sm:$0xff]  ;;  %v3448_v56 = vadd.f32 %v3268_v5, %v390_v44  ;;  %v3508_v44 = vadd.f32 %v3268_v5, %v395_v32  ;;  %v478_v47 = vrot.slane %v3349_v49, 7  ;;  %v480_v52 = vrot.slane %v3444_v54, 7 }
  0x35   : > { %v375_v15 = vmul.f32 %v3254_v3, %v336_v55  ;;  %v3515_v55 = vadd.f32 %v3268_v5, %v376_v25  ;;  %2911 = vmatprep.subr.msk.bf16.mxu1 %vm3270_vm3, %v2909_v38  ;;  %v3523_v34 = vsel %vm467_vm5, %v474_v42, %v475_v43  ;;  %v481_v61 = vrot.slane %v412_v59, 7 }
  0x36   : > { %v633_v2 = vsel %vm564_vm4, %v578_v30, 0.0  ;;  %v416_v7 = vadd.f32 %v3268_v5, %v377_v31  ;;  %2914 = vmatpush3.bf16.msk.msra.mxu1 %vm3270_vm3, %v2909_v38  ;;  %v378_v18 = vmul.f32 %v3254_v3, %v339_v58 }
  0x37   : > { %v414_v53 = vadd.f32 %v3268_v5, %v375_v15  ;;  %v3542_v9 = vsel %vm467_vm5, %v480_v52, %v481_v61  ;;  %v486_v15 = vrot.slane %v3515_v55, 7  ;;  %2927 = vmatprep.subr.msk.bf16.mxu1 %vm3270_vm3, %v3256_v4 }
  0x38   : > { %657 = vrot.lane.b32.xlu0 %v3333_v37, %s3139_s18  ;;  %659 = vrot.lane.b32.xlu1 %v3349_v49, %s3139_s18  ;;  %v579_v49 = vsel %vm564_vm4, %v577_v29, %v578_v30  ;;  %v487_v50 = vrot.slane %v416_v7, 7  ;;  %v580_v30 = vrot.slane %v3488_v21, 1  ;;  %v3565_v32 = vadd.f32 %v3268_v5, %v378_v18 }
  0x39   : > { %v484_v14 = vrot.slane %v414_v53, 7  ;;  %v581_v31 = vrot.slane %v414_v53, 1 }
  0x3a   : > { %v3561_v29 = vsel %vm467_vm5, %v486_v15, %v487_v50  ;;  %v489_v38 = vrot.slane %v3565_v32, 7 }
  0x3b   : > { %v582_v43 = vsel %vm564_vm4, %v580_v30, %v581_v31 }
  0x3c   : > { %769 = vrot.lane.b32.xlu0 %v576_v16, %s3140_s19  ;;  %771 = vrot.lane.b32.xlu1 %v632_v8, %s3140_s19  ;;  %v340_v16 = vld [vmem:[%s3263_s10 + $0x78] sm:$0xff]  ;;  %v3535_v8 = vsel %vm467_vm5, %v477_v45, %v478_v47  ;;  %v634_v47 = vsel %vm564_vm4, %v581_v31, 0.0  ;;  %s4433_s10 = scalar_lea.vmem [#allocation5], %s4338_s17 }
  0x3d   : > { %v379_v25 = vmul.f32 %v3254_v3, %v340_v16  ;;  %s2422_s12 = sshll.u32 %s4433_s10, 4  ;;  %s4358_s12 = int_to_ptr.vmem [resolvable:$true] %s2422_s12 }
  0x3f   : > { %v418_v3 = vadd.f32 %v3268_v5, %v379_v25  ;;  %v583_v5 = vrot.slane %v3515_v55, 1  ;;  %v493_v25 = vrot.slane %v3364_v60, 7 }
  0x40   : > { %661 = vrot.lane.b32.xlu0 %v3444_v54, %s3139_s18  ;;  %663 = vrot.lane.b32.xlu1 %v412_v59, %s3139_s18  ;;  %v483_v59 = vrot.slane %v3488_v21, 7 }
  0x41   : > { %v490_v58 = vrot.slane %v418_v3, 7  ;;  %v587_v31 = vrot.slane %v418_v3, 1 }
  0x42   : > { %v3554_v27 = vsel %vm467_vm5, %v483_v59, %v484_v14  ;;  %v492_v14 = vrot.slane %v3353_v51, 7 }
  0x43   : > { %v3577_v61 = vsel %vm467_vm5, %v489_v38, %v490_v58  ;;  %v636_v58 = vsel %vm564_vm4, %v587_v31, 0.0 }
  0x44   : > { %773 = vrot.lane.b32.xlu0 %v579_v49, %s3140_s19  ;;  %775 = vrot.lane.b32.xlu1 %v633_v2, %s3140_s19  ;;  %v584_v49 = vrot.slane %v416_v7, 1  ;;  %v2609_v2 = vld [vmem:[%s4425_s1 + $0x28] sm:$0xf]  ;;  %v3602_v30 = vsel %vm467_vm5, %v492_v14, %v493_v25  ;;  %v607_v25 = vrot.slane %v3461_v62, 1 }
  0x46   : > { %v585_v18 = vsel %vm564_vm4, %v583_v5, %v584_v49  ;;  %v635_v50 = vsel %vm564_vm4, %v584_v49, 0.0  ;;  %v496_v5 = vrot.slane %v3373_v1, 7 }
  0x48   : > { %665 = vrot.lane.b32.xlu0 %v3488_v21, %s3139_s18  ;;  %667 = vrot.lane.b32.xlu1 %v414_v53, %s3139_s18  ;;  %v2608_v53 = vld [vmem:[%s4425_s1 + $0x20] sm:$0xff] }
  0x49   : > { %v2921_v16 = vpack.c.bf16 %v2609_v2, %v2608_v53  ;;  %v499_v53 = vrot.slane %v3388_v12, 7 }
  0x4b   : > { %2923 = vmatprep.subr.msk.bf16.mxu0 %vm3270_vm3, %v2921_v16 }
  0x4c   : > { %777 = vrot.lane.b32.xlu0 %v582_v43, %s3140_s19  ;;  %779 = vrot.lane.b32.xlu1 %v634_v47, %s3140_s19  ;;  %v495_v43 = vrot.slane %v3370_v0, 7 }
  0x4d   : > { %2926 = vmatpush3.bf16.msk.msra.mxu0 %vm3270_vm3, %v2921_v16  ;;  %v605_v16 = vrot.slane %v3451_v57, 1 }
  0x4e   : > { %v3617_v49 = vsel %vm467_vm5, %v495_v43, %v496_v5 }
  0x50   : > { %669 = vrot.lane.b32.xlu0 %v3515_v55, %s3139_s18  ;;  %671 = vrot.lane.b32.xlu1 %v416_v7, %s3139_s18  ;;  %v586_v7 = vrot.slane %v3565_v32, 1 }
  0x52   : > { %v588_v47 = vsel %vm564_vm4, %v586_v7, %v587_v31  ;;  %v608_v7 = vrot.slane %v3464_v63, 1 }
  0x54   : > { %781 = vrot.lane.b32.xlu0 %v585_v18, %s3140_s19  ;;  %783 = vrot.lane.b32.xlu1 %v635_v50, %s3140_s19  ;;  %v642_v50 = vsel %vm564_vm4, %v605_v16, 0.0  ;;  %v609_v31 = vsel %vm564_vm4, %v607_v25, %v608_v7 }
  0x58   : > { %673 = vrot.lane.b32.xlu0 %v3565_v32, %s3139_s18  ;;  %675 = vrot.lane.b32.xlu1 %v418_v3, %s3139_s18  ;;  %v498_v3 = vrot.slane %v3385_v11, 7 }
  0x5a   : > { %v3630_v2 = vsel %vm467_vm5, %v498_v3, %v499_v53  ;;  %v548_v53 = vsel %vm467_vm5, 0.0, %v468_v13 }
  0x5c   : > { %785 = vrot.lane.b32.xlu0 %v588_v47, %s3140_s19  ;;  %787 = vrot.lane.b32.xlu1 %v636_v58, %s3140_s19  ;;  %v643_v47 = vsel %vm564_vm4, %v608_v7, 0.0 }
  0x60   : > { %677 = vrot.lane.b32.xlu0 %v3353_v51, %s3139_s18  ;;  %679 = vrot.lane.b32.xlu1 %v3364_v60, %s3139_s18  ;;  %v598_v60 = vrot.slane %v3394_v19, 1 }
  0x64   : > { %789 = vrot.lane.b32.xlu0 %v3401_v22, %s3140_s19  ;;  %791 = vrot.lane.b32.xlu1 %v3404_v23, %s3140_s19  ;;  %v601_v23 = vrot.slane %v3430_v41, 1 }
  0x68   : > { %681 = vrot.lane.b32.xlu0 %v3370_v0, %s3139_s18  ;;  %683 = vrot.lane.b32.xlu1 %v3373_v1, %s3139_s18  ;;  %v599_v1 = vrot.slane %v3397_v20, 1 }
  0x6a   : > { %v600_v22 = vsel %vm564_vm4, %v598_v60, %v599_v1  ;;  %v610_v60 = vrot.slane %v3503_v36, 1 }
  0x6c   : > { %793 = vrot.lane.b32.xlu0 %v3414_v33, %s3140_s19  ;;  %795 = vrot.lane.b32.xlu1 %v3417_v35, %s3140_s19  ;;  %v602_v33 = vrot.slane %v3439_v48, 1 }
  0x6e   : > { %v603_v35 = vsel %vm564_vm4, %v601_v23, %v602_v33 }
  0x70   : > { %685 = vrot.lane.b32.xlu0 %v3385_v11, %s3139_s18  ;;  %687 = vrot.lane.b32.xlu1 %v3388_v12, %s3139_s18  ;;  %v640_v12 = vsel %vm564_vm4, %v599_v1, 0.0  ;;  %v611_v1 = vrot.slane %v3508_v44, 1 }
  0x72   : > { %v612_v17 = vsel %vm564_vm4, %v610_v60, %v611_v1  ;;  %v644_v13 = vsel %vm564_vm4, %v611_v1, 0.0 }
  0x74   : > { %797 = vrot.lane.b32.xlu0 %v3424_v39, %s3140_s19  ;;  %799 = vrot.lane.b32.xlu1 %v3427_v40, %s3140_s19  ;;  %v641_v39 = vsel %vm564_vm4, %v602_v33, 0.0  ;;  %v604_v40 = vrot.slane %v3448_v56, 1 }
  0x76   : > { %v606_v18 = vsel %vm564_vm4, %v604_v40, %v605_v16  ;;  %v549_v16 = vsel %vm467_vm5, 0.0, %v471_v46 }
  0x78   : > { %689 = vrot.lane.b32.xlu0 %v3394_v19, %s3139_s18  ;;  %691 = vrot.lane.b32.xlu1 %v3397_v20, %s3139_s18 }
  0x7c   : > { %801 = vrot.lane.b32.xlu0 %v600_v22, %s3140_s19  ;;  %803 = vrot.lane.b32.xlu1 %v640_v12, %s3140_s19 }
  0x80   : > { %693 = vrot.lane.b32.xlu0 %v3430_v41, %s3139_s18  ;;  %695 = vrot.lane.b32.xlu1 %v3439_v48, %s3139_s18 }
  0x84   : > { %805 = vrot.lane.b32.xlu0 %v603_v35, %s3140_s19  ;;  %807 = vrot.lane.b32.xlu1 %v641_v39, %s3140_s19 }
  0x88   : > { %697 = vrot.lane.b32.xlu0 %v3448_v56, %s3139_s18  ;;  %699 = vrot.lane.b32.xlu1 %v3451_v57, %s3139_s18 }
  0x8c   : > { %809 = vrot.lane.b32.xlu0 %v606_v18, %s3140_s19  ;;  %811 = vrot.lane.b32.xlu1 %v642_v50, %s3140_s19 }
  0x90   : > { %701 = vrot.lane.b32.xlu0 %v3461_v62, %s3139_s18  ;;  %703 = vrot.lane.b32.xlu1 %v3464_v63, %s3139_s18 }
  0x92   : > { %v652_v58 = vpop.permute.xlu1 %651  ;;  %v646_v5 = vpop.permute.xlu0 %645 }
  0x93   : > { %v854_v22 = vsel %vm853_vm6, %v548_v53, %v646_v5  ;;  %v857_v50 = vsel %vm853_vm6, %v3476_v10, %v652_v58  ;;  %v550_v10 = vsel %vm467_vm5, 0.0, %v474_v42 }
  0x94   : > { %813 = vrot.lane.b32.xlu0 %v609_v31, %s3140_s19  ;;  %815 = vrot.lane.b32.xlu1 %v643_v47, %s3140_s19 }
  0x96   : > { %v648_v12 = vpop.permute.xlu0 %647  ;;  %v758_v23 = vpop.permute.xlu1 %757 }
  0x97   : > { %v887_v33 = vsel %vm886_vm7, %v854_v22, %v758_v23  ;;  %v855_v35 = vsel %vm853_vm6, %v3494_v26, %v648_v12 }
  0x98   : > { %926 = vst.msk [vmem:[#allocation2 + $0x10] sm:$0xff] %vm919_vm0, %v887_v33  ;;  %705 = vrot.lane.b32.xlu0 %v3503_v36, %s3139_s18  ;;  %707 = vrot.lane.b32.xlu1 %v3508_v44, %s3139_s18  ;;  %s3045_s18 = sshll.u32 %s3141_s13, 4  ;;  %s3046_s18 = int_to_ptr.vmem [resolvable:$false] %s3045_s18 }
  0x99   : > { %s3047_s10 = scalar_lea.vmem %s3046_s18, 32  ;;  %p3048_p0 = scmp.lt.s32.totalorder %s4350_s26, %s3046_s18 }
  0x9a   : > { %v650_v39 = vpop.permute.xlu0 %649  ;;  %v760_v40 = vpop.permute.xlu1 %759 }
  0x9b   : > { %v888_v18 = vsel %vm886_vm7, %v855_v35, %v760_v40  ;;  %v856_v25 = vsel %vm853_vm6, %v549_v16, %v650_v39 }
  0x9c   : > { %927 = vst.msk [vmem:[#allocation2 + $0x18] sm:$0xff] %vm919_vm0, %v888_v18  ;;  %817 = vrot.lane.b32.xlu0 %v612_v17, %s3140_s19  ;;  %819 = vrot.lane.b32.xlu1 %v644_v13, %s3140_s19  ;;  %s4348_s19 = scalar_lea.hbm %s4431_s7, %s2645_s22 }
  0x9e   : > { %v762_v26 = vpop.permute.xlu0 %761  ;;  %v764_v7 = vpop.permute.xlu1 %763 }
  0x9f   : > { %v889_v31 = vsel %vm886_vm7, %v856_v25, %v762_v26  ;;  %v890_v24 = vsel %vm886_vm7, %v857_v50, %v764_v7  ;;  %v992_v46 = vld [vmem:[#allocation2 + $0x10] sm:$0xff] }
  0xa0   : > { %928 = vst.msk [vmem:[#allocation2 + $0x20] sm:$0xff] %vm919_vm0, %v889_v31  ;;  %929 = vst.msk [vmem:[#allocation2 + $0x28] sm:$0xff] %vm919_vm0, %v890_v24  ;;  %2757 = vmatprep.mubr.msk.f32.mxu1 %vm919_vm0, %v992_v46  ;;  %2812 = vmatprep.mubr.msk.f32.mxu0 %vm919_vm0, %v992_v46 }
  0xa2   : > { %v654_v47 = vpop.permute.xlu0 %653  ;;  %v656_v5 = vpop.permute.xlu1 %655 }
  0xa3   : > { %v993_v58 = vld [vmem:[#allocation2 + $0x18] sm:$0xff]  ;;  %v858_v53 = vsel %vm853_vm6, %v550_v10, %v654_v47  ;;  %v859_v60 = vsel %vm853_vm6, %v3523_v34, %v656_v5  ;;  %v551_v34 = vsel %vm467_vm5, 0.0, %v477_v45 }
  0xa4   : > { %2758 = vmatmul.mubr.msk.f32.vlgmr.msra.gmra.mrb[0].mxu1 %vm919_vm0, %v993_v58  ;;  %2813 = vmatmul.mubr.msk.f32.gmra.mrb[2].mxu0 %vm919_vm0, %v993_v58 }
  0xa5   : > { %2928 = vmatpush3.bf16.msk.msra.mxu1 %vm3270_vm3, %v3256_v4 }
  0xa6   : > { %v766_v1 = vpop.permute.xlu0 %765  ;;  %v768_v22 = vpop.permute.xlu1 %767 }
  0xa7   : > { %v891_v28 = vsel %vm886_vm7, %v858_v53, %v766_v1  ;;  %v892_v42 = vsel %vm886_vm7, %v859_v60, %v768_v22  ;;  %v3737_v12 = vld [vmem:[#allocation2 + $0x20] sm:$0xff]  ;;  %v3739_v23 = vld [vmem:[#allocation2 + $0x28] sm:$0xff] }
  0xa8   : > { %930 = vst.msk [vmem:[#allocation2 + $0x30] sm:$0xff] %vm919_vm0, %v891_v28  ;;  %931 = vst.msk [vmem:[#allocation2 + $0x38] sm:$0xff] %vm919_vm0, %v892_v42  ;;  %2760 = vmatprep.mubr.msk.f32.mxu1 %vm919_vm0, %v3737_v12  ;;  %2815 = vmatprep.mubr.msk.f32.mxu0 %vm919_vm0, %v3737_v12 }
  0xa9   : > { %2761 = vmatmul.mubr.msk.f32.gmra.mrb[2].mxu1 %vm919_vm0, %v3739_v23  ;;  %2816 = vmatmul.mubr.msk.f32.gmra.mrb[4].mxu0 %vm919_vm0, %v3739_v23 }
  0xaa   : > { %v658_v4 = vpop.permute.xlu0 %657  ;;  %v660_v6 = vpop.permute.xlu1 %659 }
  0xab   : > { %v860_v33 = vsel %vm853_vm6, %v551_v34, %v658_v4  ;;  %v861_v17 = vsel %vm853_vm6, %v3535_v8, %v660_v6  ;;  %v552_v8 = vsel %vm467_vm5, 0.0, %v480_v52 }
  0xae   : > { %v770_v13 = vpop.permute.xlu0 %769  ;;  %v772_v35 = vpop.permute.xlu1 %771 }
  0xaf   : > { %v893_v39 = vsel %vm886_vm7, %v860_v33, %v770_v13  ;;  %v894_v40 = vsel %vm886_vm7, %v861_v17, %v772_v35  ;;  %v3759_v16 = vld [vmem:[#allocation2 + $0x30] sm:$0xff]  ;;  %v3761_v18 = vld [vmem:[#allocation2 + $0x38] sm:$0xff] }
  0xb0   : > { %932 = vst.msk [vmem:[#allocation2 + $0x40] sm:$0xff] %vm919_vm0, %v893_v39  ;;  %933 = vst.msk [vmem:[#allocation2 + $0x48] sm:$0xff] %vm919_vm0, %v894_v40  ;;  %2763 = vmatprep.mubr.msk.f32.mxu1 %vm919_vm0, %v3759_v16  ;;  %2818 = vmatprep.mubr.msk.f32.mxu0 %vm919_vm0, %v3759_v16 }
  0xb1   : > { %2764 = vmatmul.mubr.msk.f32.gmra.mrb[4].mxu1 %vm919_vm0, %v3761_v18  ;;  %2819 = vmatmul.mubr.msk.f32.gmra.mrb[6].mxu0 %vm919_vm0, %v3761_v18 }
  0xb2   : > { %v662_v37 = vpop.permute.xlu0 %661  ;;  %v664_v45 = vpop.permute.xlu1 %663 }
  0xb3   : > { %v862_v50 = vsel %vm853_vm6, %v552_v8, %v662_v37  ;;  %v863_v25 = vsel %vm853_vm6, %v3542_v9, %v664_v45  ;;  %v553_v9 = vsel %vm467_vm5, 0.0, %v483_v59 }
  0xb6   : > { %v774_v26 = vpop.permute.xlu0 %773  ;;  %v776_v7 = vpop.permute.xlu1 %775 }
  0xb7   : > { %v895_v31 = vsel %vm886_vm7, %v862_v50, %v774_v26  ;;  %v896_v24 = vsel %vm886_vm7, %v863_v25, %v776_v7  ;;  %v3781_v46 = vld [vmem:[#allocation2 + $0x40] sm:$0xff]  ;;  %v3783_v47 = vld [vmem:[#allocation2 + $0x48] sm:$0xff] }
  0xb8   : > { %934 = vst.msk [vmem:[#allocation2 + $0x50] sm:$0xff] %vm919_vm0, %v895_v31  ;;  %935 = vst.msk [vmem:[#allocation2 + $0x58] sm:$0xff] %vm919_vm0, %v896_v24  ;;  %2766 = vmatprep.mubr.msk.f32.mxu1 %vm919_vm0, %v3781_v46  ;;  %2821 = vmatprep.mubr.msk.f32.mxu0 %vm919_vm0, %v3781_v46 }
  0xb9   : > { %2767 = vmatmul.mubr.msk.f32.gmra.mrb[6].mxu1 %vm919_vm0, %v3783_v47  ;;  %2822 = vmatmul.mubr.msk.f32.gmra.mrb[8].mxu0 %vm919_vm0, %v3783_v47 }
  0xba   : > { %v666_v54 = vpop.permute.xlu0 %665  ;;  %v668_v52 = vpop.permute.xlu1 %667 }
  0xbb   : > { %v864_v5 = vsel %vm853_vm6, %v553_v9, %v666_v54  ;;  %v865_v10 = vsel %vm853_vm6, %v3554_v27, %v668_v52  ;;  %v554_v27 = vsel %vm467_vm5, 0.0, %v486_v15 }
  0xbe   : > { %v778_v58 = vpop.permute.xlu0 %777  ;;  %v780_v53 = vpop.permute.xlu1 %779 }
  0xbf   : > { %v897_v60 = vsel %vm886_vm7, %v864_v5, %v778_v58  ;;  %v898_v1 = vsel %vm886_vm7, %v865_v10, %v780_v53  ;;  %v3803_v22 = vld [vmem:[#allocation2 + $0x50] sm:$0xff]  ;;  %v3805_v28 = vld [vmem:[#allocation2 + $0x58] sm:$0xff]  ;;  %v558_v53 = vsel %vm467_vm5, 0.0, %v498_v3  ;;  %v501_v3 = vrot.slane %v3394_v19, 7 }
  0xc0   : > { %936 = vst.msk [vmem:[#allocation2 + $0x60] sm:$0xff] %vm919_vm0, %v897_v60  ;;  %937 = vst.msk [vmem:[#allocation2 + $0x68] sm:$0xff] %vm919_vm0, %v898_v1  ;;  %2769 = vmatprep.mubr.msk.f32.mxu1 %vm919_vm0, %v3803_v22  ;;  %2824 = vmatprep.mubr.msk.f32.mxu0 %vm919_vm0, %v3803_v22 }
  0xc1   : > { %2770 = vmatmul.mubr.msk.f32.gmra.mrb[8].mxu1 %vm919_vm0, %v3805_v28  ;;  %2825 = vmatmul.mubr.msk.f32.gmra.mrb[10].mxu0 %vm919_vm0, %v3805_v28  ;;  %v559_v19 = vsel %vm467_vm5, 0.0, %v501_v3 }
  0xc2   : > { %v670_v21 = vpop.permute.xlu0 %669  ;;  %v672_v59 = vpop.permute.xlu1 %671 }
  0xc3   : > { %v866_v42 = vsel %vm853_vm6, %v554_v27, %v670_v21  ;;  %v867_v4 = vsel %vm853_vm6, %v3561_v29, %v672_v59  ;;  %v555_v29 = vsel %vm467_vm5, 0.0, %v489_v38 }
  0xc6   : > { %v782_v6 = vpop.permute.xlu0 %781  ;;  %v784_v34 = vpop.permute.xlu1 %783 }
  0xc7   : > { %v899_v33 = vsel %vm886_vm7, %v866_v42, %v782_v6  ;;  %v900_v17 = vsel %vm886_vm7, %v867_v4, %v784_v34  ;;  %v3825_v13 = vld [vmem:[#allocation2 + $0x60] sm:$0xff]  ;;  %v3827_v35 = vld [vmem:[#allocation2 + $0x68] sm:$0xff]  ;;  %v502_v42 = vrot.slane %v3397_v20, 7 }
  0xc8   : > { %938 = vst.msk [vmem:[#allocation2 + $0x70] sm:$0xff] %vm919_vm0, %v899_v33  ;;  %939 = vst.msk [vmem:[#allocation2 + $0x78] sm:$0xff] %vm919_vm0, %v900_v17  ;;  %2772 = vmatprep.mubr.msk.f32.mxu1 %vm919_vm0, %v3825_v13  ;;  %2827 = vmatprep.mubr.msk.f32.mxu0 %vm919_vm0, %v3825_v13 }
  0xc9   : > { %2773 = vmatmul.mubr.msk.f32.gmra.mrb[10].mxu1 %vm919_vm0, %v3827_v35  ;;  %2828 = vmatmul.mubr.msk.f32.gmra.mrb[12].mxu0 %vm919_vm0, %v3827_v35  ;;  %v503_v20 = vsel %vm467_vm5, %v501_v3, %v502_v42  ;;  %v513_v3 = vrot.slane %v3503_v36, 7  ;;  %v514_v42 = vrot.slane %v3508_v44, 7 }
  0xca   : > { %v674_v55 = vpop.permute.xlu0 %673  ;;  %v676_v15 = vpop.permute.xlu1 %675 }
  0xcb   : > { %v868_v39 = vsel %vm853_vm6, %v555_v29, %v674_v55  ;;  %v869_v40 = vsel %vm853_vm6, %v3577_v61, %v676_v15  ;;  %v556_v61 = vsel %vm467_vm5, 0.0, %v492_v14  ;;  %v504_v29 = vrot.slane %v3430_v41, 7 }
  0xcc   : > { %v515_v36 = vsel %vm467_vm5, %v513_v3, %v514_v42 }
  0xcd   : > { %v560_v41 = vsel %vm467_vm5, 0.0, %v504_v29 }
  0xce   : > { %v786_v37 = vpop.permute.xlu0 %785  ;;  %v788_v45 = vpop.permute.xlu1 %787 }
  0xcf   : > { %v901_v8 = vsel %vm886_vm7, %v868_v39, %v786_v37  ;;  %v902_v50 = vsel %vm886_vm7, %v869_v40, %v788_v45  ;;  %v1004_v25 = vld [vmem:[#allocation2 + $0x70] sm:$0xff]  ;;  %v3847_v26 = vld [vmem:[#allocation2 + $0x78] sm:$0xff]  ;;  %v505_v39 = vrot.slane %v3439_v48, 7 }
  0xd0   : > { %940 = vst.msk [vmem:[#allocation2 + $0x80] sm:$0xff] %vm919_vm0, %v901_v8  ;;  %941 = vst.msk [vmem:[#allocation2 + $0x88] sm:$0xff] %vm919_vm0, %v902_v50  ;;  %2775 = vmatprep.mubr.msk.f32.mxu1 %vm919_vm0, %v1004_v25  ;;  %2830 = vmatprep.mubr.msk.f32.mxu0 %vm919_vm0, %v1004_v25 }
  0xd1   : > { %2776 = vmatmul.mubr.msk.f32.gmra.mrb[12].mxu1 %vm919_vm0, %v3847_v26  ;;  %2831 = vmatmul.mubr.msk.f32.gmra.mrb[14].mxu0 %vm919_vm0, %v3847_v26  ;;  %v506_v48 = vsel %vm467_vm5, %v504_v29, %v505_v39 }
  0xd2   : > { %v678_v32 = vpop.permute.xlu0 %677  ;;  %v680_v38 = vpop.permute.xlu1 %679  ;;  %2861 = vmatprep.mubr.msk.f32.mxu0 %vm919_vm0, %v3737_v12 }
  0xd3   : > { %v870_v7 = vsel %vm853_vm6, %v556_v61, %v678_v32  ;;  %v871_v31 = vsel %vm853_vm6, %v3602_v30, %v680_v38 }
  0xd5   : > { %2862 = vmatmul.mubr.msk.f32.vlgmr.msra.gmra.mrb[0].mxu0 %vm919_vm0, %v3739_v23 }
  0xd6   : > { %v790_v24 = vpop.permute.xlu0 %789  ;;  %v792_v54 = vpop.permute.xlu1 %791  ;;  %2864 = vmatprep.mubr.msk.f32.mxu0 %vm919_vm0, %v3759_v16  ;;  %v557_v16 = vsel %vm467_vm5, 0.0, %v495_v43 }
  0xd7   : > { %v903_v52 = vsel %vm886_vm7, %v870_v7, %v790_v24  ;;  %v904_v12 = vsel %vm886_vm7, %v871_v31, %v792_v54  ;;  %v3871_v51 = vld [vmem:[#allocation2 + $0x80] sm:$0xff]  ;;  %v3873_v14 = vld [vmem:[#allocation2 + $0x88] sm:$0xff]  ;;  %v507_v7 = vrot.slane %v3448_v56, 7  ;;  %v508_v31 = vrot.slane %v3451_v57, 7 }
  0xd8   : > { %942 = vst.msk [vmem:[#allocation2 + $0x90] sm:$0xff] %vm919_vm0, %v903_v52  ;;  %943 = vst.msk [vmem:[#allocation2 + $0x98] sm:$0xff] %vm919_vm0, %v904_v12  ;;  %2778 = vmatprep.mubr.msk.f32.mxu1 %vm919_vm0, %v3871_v51 }
  0xd9   : > { %2779 = vmatmul.mubr.msk.f32.gmra.mrb[14].mxu1 %vm919_vm0, %v3873_v14  ;;  %2865 = vmatmul.mubr.msk.f32.gmra.mrb[2].mxu0 %vm919_vm0, %v3761_v18  ;;  %v561_v56 = vsel %vm467_vm5, 0.0, %v507_v7  ;;  %v509_v57 = vsel %vm467_vm5, %v507_v7, %v508_v31  ;;  %v4094_v7 = vld [vmem:[%s4429_s5] ss:$0 sm:$0xff] }
  0xda   : > { %v682_v30 = vpop.permute.xlu0 %681  ;;  %v684_v23 = vpop.permute.xlu1 %683  ;;  %2867 = vmatprep.mubr.msk.f32.mxu0 %vm919_vm0, %v3781_v46 }
  0xdb   : > { %v872_v9 = vsel %vm853_vm6, %v557_v16, %v682_v30  ;;  %v873_v5 = vsel %vm853_vm6, %v3617_v49, %v684_v23 }
  0xdd   : > { %2868 = vmatmul.mubr.msk.f32.gmra.mrb[4].mxu0 %vm919_vm0, %v3783_v47 }
  0xde   : > { %v794_v10 = vpop.permute.xlu0 %793  ;;  %v796_v58 = vpop.permute.xlu1 %795  ;;  %2870 = vmatprep.mubr.msk.f32.mxu0 %vm919_vm0, %v3803_v22 }
  0xdf   : > { %v905_v18 = vsel %vm886_vm7, %v872_v9, %v794_v10  ;;  %v906_v46 = vsel %vm886_vm7, %v873_v5, %v796_v58  ;;  %v3897_v0 = vld [vmem:[#allocation2 + $0x90] sm:$0xff]  ;;  %v3899_v43 = vld [vmem:[#allocation2 + $0x98] sm:$0xff]  ;;  %v510_v58 = vrot.slane %v3461_v62, 7 }
  0xe0   : > { %944 = vst.msk [vmem:[#allocation2 + $0xa0] sm:$0xff] %vm919_vm0, %v905_v18  ;;  %945 = vst.msk [vmem:[#allocation2 + $0xa8] sm:$0xff] %vm919_vm0, %v906_v46  ;;  %2781 = vmatprep.mubr.msk.f32.mxu1 %vm919_vm0, %v3897_v0  ;;  %v511_v18 = vrot.slane %v3464_v63, 7 }
  0xe1   : > { %2782 = vmatmul.mubr.msk.f32.gmra.mrb[16].mxu1 %vm919_vm0, %v3899_v43  ;;  %2871 = vmatmul.mubr.msk.f32.gmra.mrb[6].mxu0 %vm919_vm0, %v3805_v28  ;;  %v562_v63 = vsel %vm467_vm5, 0.0, %v510_v58 }
  0xe2   : > { %v686_v49 = vpop.permute.xlu0 %685  ;;  %v688_v47 = vpop.permute.xlu1 %687  ;;  %2873 = vmatprep.mubr.msk.f32.mxu0 %vm919_vm0, %v3825_v13 }
  0xe3   : > { %v874_v60 = vsel %vm853_vm6, %v558_v53, %v686_v49  ;;  %v875_v1 = vsel %vm853_vm6, %v3630_v2, %v688_v47  ;;  %v512_v49 = vsel %vm467_vm5, %v510_v58, %v511_v18 }
  0xe5   : > { %2874 = vmatmul.mubr.msk.f32.gmra.mrb[8].mxu0 %vm919_vm0, %v3827_v35 }
  0xe6   : > { %v798_v22 = vpop.permute.xlu0 %797  ;;  %v800_v21 = vpop.permute.xlu1 %799  ;;  %2876 = vmatprep.mubr.msk.f32.mxu0 %vm919_vm0, %v1004_v25 }
  0xe7   : > { %v907_v28 = vsel %vm886_vm7, %v874_v60, %v798_v22  ;;  %v908_v59 = vsel %vm886_vm7, %v875_v1, %v800_v21  ;;  %v3922_v27 = vld [vmem:[#allocation2 + $0xa0] sm:$0xff]  ;;  %v3924_v11 = vld [vmem:[#allocation2 + $0xa8] sm:$0xff] }
  0xe8   : > { %946 = vst.msk [vmem:[#allocation2 + $0xb0] sm:$0xff] %vm919_vm0, %v907_v28  ;;  %947 = vst.msk [vmem:[#allocation2 + $0xb8] sm:$0xff] %vm919_vm0, %v908_v59  ;;  %2784 = vmatprep.mubr.msk.f32.mxu1 %vm919_vm0, %v3922_v27 }
  0xe9   : > { %2785 = vmatmul.mubr.msk.f32.gmra.mrb[18].mxu1 %vm919_vm0, %v3924_v11  ;;  %2877 = vmatmul.mubr.msk.f32.gmra.mrb[10].mxu0 %vm919_vm0, %v3847_v26 }
  0xea   : > { %v690_v2 = vpop.permute.xlu0 %689  ;;  %v692_v4 = vpop.permute.xlu1 %691  ;;  %2879 = vmatprep.mubr.msk.f32.mxu0 %vm919_vm0, %v3871_v51 }
  0xeb   : > { %v876_v6 = vsel %vm853_vm6, %v559_v19, %v690_v2  ;;  %v877_v34 = vsel %vm853_vm6, %v503_v20, %v692_v4  ;;  %v563_v19 = vsel %vm467_vm5, 0.0, %v513_v3 }
  0xed   : > { %2880 = vmatmul.mubr.msk.f32.gmra.mrb[12].mxu0 %vm919_vm0, %v3873_v14 }
  0xee   : > { %v802_v33 = vpop.permute.xlu0 %801  ;;  %v804_v17 = vpop.permute.xlu1 %803  ;;  %2882 = vmatprep.mubr.msk.f32.mxu0 %vm919_vm0, %v3897_v0 }
  0xef   : > { %v909_v13 = vsel %vm886_vm7, %v876_v6, %v802_v33  ;;  %v910_v35 = vsel %vm886_vm7, %v877_v34, %v804_v17  ;;  %v3948_v55 = vld [vmem:[#allocation2 + $0xb0] sm:$0xff]  ;;  %v3950_v15 = vld [vmem:[#allocation2 + $0xb8] sm:$0xff] }
  0xf0   : > { %948 = vst.msk [vmem:[#allocation2 + $0xc0] sm:$0xff] %vm919_vm0, %v909_v13  ;;  %949 = vst.msk [vmem:[#allocation2 + $0xc8] sm:$0xff] %vm919_vm0, %v910_v35  ;;  %2787 = vmatprep.mubr.msk.f32.mxu1 %vm919_vm0, %v3948_v55 }
  0xf1   : > { %2788 = vmatmul.mubr.msk.f32.gmra.mrb[20].mxu1 %vm919_vm0, %v3950_v15  ;;  %2883 = vmatmul.mubr.msk.f32.gmra.mrb[14].mxu0 %vm919_vm0, %v3899_v43 }
  0xf2   : > { %v694_v40 = vpop.permute.xlu0 %693  ;;  %v696_v37 = vpop.permute.xlu1 %695  ;;  %2885 = vmatprep.mubr.msk.f32.mxu0 %vm919_vm0, %v3922_v27 }
  0xf3   : > { %v878_v45 = vsel %vm853_vm6, %v560_v41, %v694_v40  ;;  %v879_v8 = vsel %vm853_vm6, %v506_v48, %v696_v37  ;;  %v1707_v40 = vld [vmem:[#allocation2 + $0x110] sm:$0xff]  ;;  %v1708_v37 = vld [vmem:[#allocation2 + $0x118] sm:$0xff] }
  0xf5   : > { %2886 = vmatmul.mubr.msk.f32.gmra.mrb[16].mxu0 %vm919_vm0, %v3924_v11 }
  0xf6   : > { %v806_v50 = vpop.permute.xlu0 %805  ;;  %v808_v25 = vpop.permute.xlu1 %807  ;;  %2888 = vmatprep.mubr.msk.f32.mxu0 %vm919_vm0, %v3948_v55 }
  0xf7   : > { %v911_v26 = vsel %vm886_vm7, %v878_v45, %v806_v50  ;;  %v912_v32 = vsel %vm886_vm7, %v879_v8, %v808_v25  ;;  %v3974_v38 = vld [vmem:[#allocation2 + $0xc0] sm:$0xff]  ;;  %v3976_v61 = vld [vmem:[#allocation2 + $0xc8] sm:$0xff] }
  0xf8   : > { %950 = vst.msk [vmem:[#allocation2 + $0xd0] sm:$0xff] %vm919_vm0, %v911_v26  ;;  %951 = vst.msk [vmem:[#allocation2 + $0xd8] sm:$0xff] %vm919_vm0, %v912_v32  ;;  %2790 = vmatprep.mubr.msk.f32.mxu1 %vm919_vm0, %v3974_v38  ;;  %v4089_v32 = vld [vmem:[%s4428_s4] ss:$0 sm:$0xff] }
  0xf9   : > { %2791 = vmatmul.mubr.msk.f32.gmra.mrb[22].mxu1 %vm919_vm0, %v3976_v61  ;;  %2889 = vmatmul.mubr.msk.f32.gmra.mrb[18].mxu0 %vm919_vm0, %v3950_v15 }
  0xfa   : > { %v698_v24 = vpop.permute.xlu0 %697  ;;  %v700_v54 = vpop.permute.xlu1 %699  ;;  %2891 = vmatprep.mubr.msk.f32.mxu0 %vm919_vm0, %v3974_v38 }
  0xfb   : > { %v880_v52 = vsel %vm853_vm6, %v561_v56, %v698_v24  ;;  %v881_v12 = vsel %vm853_vm6, %v509_v57, %v700_v54 }
  0xfd   : > { %2892 = vmatmul.mubr.msk.f32.gmra.mrb[20].mxu0 %vm919_vm0, %v3976_v61 }
  0xfe   : > { %v810_v30 = vpop.permute.xlu0 %809  ;;  %v812_v23 = vpop.permute.xlu1 %811 }
  0xff   : > { %v913_v16 = vsel %vm886_vm7, %v880_v52, %v810_v30  ;;  %v914_v9 = vsel %vm886_vm7, %v881_v12, %v812_v23  ;;  %v3998_v5 = vld [vmem:[#allocation2 + $0xd0] sm:$0xff]  ;;  %v4000_v10 = vld [vmem:[#allocation2 + $0xd8] sm:$0xff] }
 0x100   : > { %952 = vst.msk [vmem:[#allocation2 + $0xe0] sm:$0xff] %vm919_vm0, %v913_v16  ;;  %953 = vst.msk [vmem:[#allocation2 + $0xe8] sm:$0xff] %vm919_vm0, %v914_v9  ;;  %2793 = vmatprep.mubr.msk.f32.mxu1 %vm919_vm0, %v3998_v5  ;;  %2894 = vmatprep.mubr.msk.f32.mxu0 %vm919_vm0, %v3998_v5 }
 0x101   : > { %2794 = vmatmul.mubr.msk.f32.gmra.mrb[24].mxu1 %vm919_vm0, %v4000_v10  ;;  %2895 = vmatmul.mubr.msk.f32.gmra.mrb[22].mxu0 %vm919_vm0, %v4000_v10 }
 0x102   : > { %v702_v46 = vpop.permute.xlu0 %701  ;;  %v704_v62 = vpop.permute.xlu1 %703 }
 0x103   : > { %v882_v47 = vsel %vm853_vm6, %v562_v63, %v702_v46  ;;  %v883_v53 = vsel %vm853_vm6, %v512_v49, %v704_v62 }
 0x106   : > { %v814_v60 = vpop.permute.xlu0 %813  ;;  %v816_v1 = vpop.permute.xlu1 %815 }
 0x107   : > { %v915_v22 = vsel %vm886_vm7, %v882_v47, %v814_v60  ;;  %v916_v21 = vsel %vm886_vm7, %v883_v53, %v816_v1  ;;  %v1018_v28 = vld [vmem:[#allocation2 + $0xe0] sm:$0xff]  ;;  %v1019_v59 = vld [vmem:[#allocation2 + $0xe8] sm:$0xff] }
 0x108   : > { %954 = vst.msk [vmem:[#allocation2 + $0xf0] sm:$0xff] %vm919_vm0, %v915_v22  ;;  %955 = vst.msk [vmem:[#allocation2 + $0xf8] sm:$0xff] %vm919_vm0, %v916_v21  ;;  %2796 = vmatprep.mubr.msk.f32.mxu1 %vm919_vm0, %v1018_v28  ;;  %2897 = vmatprep.mubr.msk.f32.mxu0 %vm919_vm0, %v1018_v28 }
 0x109   : > { %2797 = vmatmul.mubr.msk.f32.gmra.mrb[26].mxu1 %vm919_vm0, %v1019_v59  ;;  %2898 = vmatmul.mubr.msk.f32.gmra.mrb[24].mxu0 %vm919_vm0, %v1019_v59 }
 0x10a   : > { %v706_v2 = vpop.permute.xlu0 %705  ;;  %v708_v4 = vpop.permute.xlu1 %707 }
 0x10b   : > { %v884_v44 = vsel %vm853_vm6, %v563_v19, %v706_v2  ;;  %v885_v20 = vsel %vm853_vm6, %v515_v36, %v708_v4 }
 0x10e   : > { %v818_v6 = vpop.permute.xlu0 %817  ;;  %v820_v34 = vpop.permute.xlu1 %819 }
 0x10f   : > { %v917_v33 = vsel %vm886_vm7, %v884_v44, %v818_v6  ;;  %v918_v17 = vsel %vm886_vm7, %v885_v20, %v820_v34  ;;  %v1020_v13 = vld [vmem:[#allocation2 + $0xf0] sm:$0xff]  ;;  %v1021_v35 = vld [vmem:[#allocation2 + $0xf8] sm:$0xff] }
 0x110   : > { %956 = vst.msk [vmem:[#allocation2 + $0x100] sm:$0xff] %vm919_vm0, %v917_v33  ;;  %957 = vst.msk [vmem:[#allocation2 + $0x108] sm:$0xff] %vm919_vm0, %v918_v17  ;;  %2799 = vmatprep.mubr.msk.f32.mxu1 %vm919_vm0, %v1020_v13  ;;  %2900 = vmatprep.mubr.msk.f32.mxu0 %vm919_vm0, %v1020_v13 }
 0x111   : > { %2800 = vmatmul.mubr.msk.f32.gmra.mrb[28].mxu1 %vm919_vm0, %v1021_v35  ;;  %2901 = vmatmul.mubr.msk.f32.gmra.mrb[26].mxu0 %vm919_vm0, %v1021_v35 }
 0x117   : > { %v1022_v29 = vld [vmem:[#allocation2 + $0x100] sm:$0xff]  ;;  %v1023_v39 = vld [vmem:[#allocation2 + $0x108] sm:$0xff] }
 0x118   : > { %2802 = vmatprep.mubr.msk.f32.mxu1 %vm919_vm0, %v1022_v29  ;;  %2903 = vmatprep.mubr.msk.f32.mxu0 %vm919_vm0, %v1022_v29 }
 0x119   : > { %2803 = vmatmul.mubr.msk.f32.gmra.mrb[30].mxu1 %vm919_vm0, %v1023_v39  ;;  %2904 = vmatmul.mubr.msk.f32.gmra.mrb[28].mxu0 %vm919_vm0, %v1023_v39 }
 0x11a   : > { %2833 = vmatprep.mubr.msk.f32.mxu1 %vm919_vm0, %v3871_v51  ;;  %2906 = vmatprep.mubr.msk.f32.mxu0 %vm919_vm0, %v1707_v40 }
 0x11d   : > { %2834 = vmatmul.mubr.msk.f32.vlgmr.msra.gmra.mrb[16].mxu1 %vm919_vm0, %v3873_v14  ;;  %2907 = vmatmul.mubr.msk.f32.gmra.mrb[30].mxu0 %vm919_vm0, %v1708_v37 }
 0x11e   : > { %2836 = vmatprep.mubr.msk.f32.mxu1 %vm919_vm0, %v3897_v0 }
 0x121   : > { %2837 = vmatmul.mubr.msk.f32.gmra.mrb[18].mxu1 %vm919_vm0, %v3899_v43 }
 0x122   : > { %2839 = vmatprep.mubr.msk.f32.mxu1 %vm919_vm0, %v3922_v27 }
 0x125   : > { %2840 = vmatmul.mubr.msk.f32.gmra.mrb[20].mxu1 %vm919_vm0, %v3924_v11 }
 0x126   : > { %2842 = vmatprep.mubr.msk.f32.mxu1 %vm919_vm0, %v3948_v55 }
 0x129   : > { %2843 = vmatmul.mubr.msk.f32.gmra.mrb[22].mxu1 %vm919_vm0, %v3950_v15 }
 0x12a   : > { %2845 = vmatprep.mubr.msk.f32.mxu1 %vm919_vm0, %v3974_v38 }
 0x12d   : > { %2846 = vmatmul.mubr.msk.f32.gmra.mrb[24].mxu1 %vm919_vm0, %v3976_v61 }
 0x12e   : > { %2848 = vmatprep.mubr.msk.f32.mxu1 %vm919_vm0, %v3998_v5 }
 0x131   : > { %2849 = vmatmul.mubr.msk.f32.gmra.mrb[26].mxu1 %vm919_vm0, %v4000_v10 }
 0x132   : > { %2851 = vmatprep.mubr.msk.f32.mxu1 %vm919_vm0, %v1018_v28 }
 0x135   : > { %2852 = vmatmul.mubr.msk.f32.gmra.mrb[28].mxu1 %vm919_vm0, %v1019_v59 }
 0x136   : > { %2854 = vmatprep.mubr.msk.f32.mxu1 %vm919_vm0, %v1020_v13 }
 0x139   : > { %2855 = vmatmul.mubr.msk.f32.gmra.mrb[30].mxu1 %vm919_vm0, %v1021_v35 }
 0x177   : > { %v2759_v51 = vpop.f32.mrb[0].mxu1 }
 0x178   : > { %v1193_v14 = vpop.f32.mrb[1].mxu1 }
 0x17c   : > { %v2762_v0 = vpop.f32.mrb[2].mxu1 }
 0x17d   : > { %v1203_v43 = vpop.f32.mrb[3].mxu1 }
 0x184   : > { %v2765_v27 = vpop.f32.mrb[4].mxu1 }
 0x185   : > { %v1213_v11 = vpop.f32.mrb[5].mxu1 }
 0x18c   : > { %v2768_v55 = vpop.f32.mrb[6].mxu1 }
 0x18d   : > { %v1223_v15 = vpop.f32.mrb[7].mxu1 }
 0x194   : > { %v4074_v41 = vpop.f32.mrb[8].mxu1 }
 0x195   : > { %v4076_v48 = vpop.f32.mrb[9].mxu1 }
 0x19c   : > { %v4078_v45 = vpop.f32.mrb[10].mxu1 }
 0x19d   : > { %v4080_v8 = vpop.f32.mrb[11].mxu1 }
 0x1a4   : > { %v4082_v50 = vpop.f32.mrb[12].mxu1 }
 0x1a5   : > { %v4084_v25 = vpop.f32.mrb[13].mxu1 }
 0x1a8   : > { %v2863_v26 = vpop.f32.mrb[0].mxu0 }
 0x1a9   : > { %v2929_v38 = vadd.f32 %v2863_v26, %v2759_v51  ;;  %v1877_v61 = vpop.f32.mrb[1].mxu0 }
 0x1aa   : > { %v2930_v31 = vadd.f32 %v1877_v61, %v1193_v14 }
 0x1ab   : > { %v2076_v24 = vmul.f32 %v2929_v38, %v4089_v32 }
 0x1ac   : > { %v2075_v54 = vmul.f32 %v2930_v31, %v4089_v32  ;;  %v4098_v56 = vpop.f32.mrb[14].mxu1  ;;  %v2866_v57 = vpop.f32.mrb[2].mxu0 }
 0x1ad   : > { %v2115_v52 = vadd.f32 %v4094_v7, %v2076_v24  ;;  %v2931_v12 = vadd.f32 %v2866_v57, %v2762_v0  ;;  %v4101_v30 = vpop.f32.mrb[15].mxu1  ;;  %v1887_v23 = vpop.f32.mrb[3].mxu0 }
 0x1ae   : > { %v2114_v16 = vadd.f32 %v4094_v7, %v2075_v54  ;;  %v2932_v9 = vadd.f32 %v1887_v23, %v1203_v43 }
 0x1af   : > { %v2147_v5 = vmax.f32 %v2115_v52, 0.0  ;;  %v2078_v10 = vmul.f32 %v2931_v12, %v4089_v32 }
 0x1b0   : > { %v2146_v58 = vmax.f32 %v2114_v16, 0.0  ;;  %v2077_v18 = vmul.f32 %v2932_v9, %v4089_v32  ;;  %v2869_v46 = vpop.f32.mrb[4].mxu0 }
 0x1b1   : > { %2180 = vst.msk [vmem:[%s4108_s24 + $0x8] sm:$0xff] %vm2178_vm8, %v2147_v5  ;;  %v2212_v62 = vsel %vm2178_vm8, %v2147_v5, 0.0  ;;  %v2283_v63 = vmul.f32 %v2147_v5, %v2147_v5  ;;  %v2117_v49 = vadd.f32 %v4094_v7, %v2078_v10  ;;  %v2933_v47 = vadd.f32 %v2869_v46, %v2765_v27  ;;  %v1897_v53 = vpop.f32.mrb[5].mxu0 }
 0x1b2   : > { %2179 = vst.msk [vmem:[%s4108_s24] sm:$0xff] %vm2178_vm8, %v2146_v58  ;;  %v2211_v60 = vsel %vm2178_vm8, %v2146_v58, 0.0  ;;  %v2282_v1 = vmul.f32 %v2146_v58, %v2146_v58  ;;  %v2116_v22 = vadd.f32 %v4094_v7, %v2077_v18  ;;  %v2934_v21 = vadd.f32 %v1897_v53, %v1213_v11 }
 0x1b3   : > { %v2315_v28 = vsel %vm2178_vm8, %v2283_v63, 0.0  ;;  %v2213_v59 = vadd.f32 %v2212_v62, %v2211_v60  ;;  %v2149_v3 = vmax.f32 %v2117_v49, 0.0  ;;  %v2080_v42 = vmul.f32 %v2933_v47, %v4089_v32 }
 0x1b4   : > { %v2314_v2 = vsel %vm2178_vm8, %v2282_v1, 0.0  ;;  %v2148_v4 = vmax.f32 %v2116_v22, 0.0  ;;  %v2079_v19 = vmul.f32 %v2934_v21, %v4089_v32  ;;  %v2872_v36 = vpop.f32.mrb[6].mxu0 }
 0x1b5   : > { %v2316_v44 = vadd.f32 %v2315_v28, %v2314_v2  ;;  %2182 = vst.msk [vmem:[%s4108_s24 + $0x18] sm:$0xff] %vm2178_vm8, %v2149_v3  ;;  %v2285_v20 = vmul.f32 %v2149_v3, %v2149_v3  ;;  %v2119_v6 = vadd.f32 %v4094_v7, %v2080_v42  ;;  %v1907_v34 = vpop.f32.mrb[7].mxu0  ;;  %v2935_v35 = vadd.f32 %v2872_v36, %v2768_v55 }
 0x1b6   : > { %2181 = vst.msk [vmem:[%s4108_s24 + $0x10] sm:$0xff] %vm2178_vm8, %v2148_v4  ;;  %v2214_v33 = vsel %vm2178_vm8, %v2148_v4, 0.0  ;;  %v2284_v17 = vmul.f32 %v2148_v4, %v2148_v4  ;;  %v2118_v13 = vadd.f32 %v4094_v7, %v2079_v19  ;;  %v2936_v40 = vadd.f32 %v1907_v34, %v1223_v15 }
 0x1b7   : > { %v2215_v29 = vadd.f32 %v2214_v33, %v2213_v59  ;;  %v2151_v39 = vmax.f32 %v2119_v6, 0.0  ;;  %v2216_v37 = vsel %vm2178_vm8, %v2149_v3, 0.0  ;;  %v2082_v0 = vmul.f32 %v2935_v35, %v4089_v32 }
 0x1b8   : > { %v2317_v51 = vsel %vm2178_vm8, %v2284_v17, 0.0  ;;  %v2150_v14 = vmax.f32 %v2118_v13, 0.0  ;;  %v2875_v43 = vpop.f32.mrb[8].mxu0  ;;  %v2319_v27 = vsel %vm2178_vm8, %v2285_v20, 0.0  ;;  %v2081_v24 = vmul.f32 %v2936_v40, %v4089_v32 }
 0x1b9   : > { %v2318_v11 = vadd.f32 %v2317_v51, %v2316_v44  ;;  %2184 = vst.msk [vmem:[%s4108_s24 + $0x28] sm:$0xff] %vm2178_vm8, %v2151_v39  ;;  %v2287_v26 = vmul.f32 %v2151_v39, %v2151_v39  ;;  %v2217_v38 = vadd.f32 %v2216_v37, %v2215_v29  ;;  %v1917_v61 = vpop.f32.mrb[9].mxu0  ;;  %v2121_v31 = vadd.f32 %v4094_v7, %v2082_v0 }
 0x1ba   : > { %2183 = vst.msk [vmem:[%s4108_s24 + $0x20] sm:$0xff] %vm2178_vm8, %v2150_v14  ;;  %v2218_v55 = vsel %vm2178_vm8, %v2150_v14, 0.0  ;;  %v2286_v15 = vmul.f32 %v2150_v14, %v2150_v14  ;;  %v2220_v54 = vsel %vm2178_vm8, %v2151_v39, 0.0  ;;  %v2937_v12 = vadd.f32 %v2875_v43, %v4074_v41 }
 0x1bb   : > { %v2219_v57 = vadd.f32 %v2218_v55, %v2217_v38  ;;  %v2320_v52 = vadd.f32 %v2319_v27, %v2318_v11  ;;  %v2153_v16 = vmax.f32 %v2121_v31, 0.0  ;;  %v2120_v9 = vadd.f32 %v4094_v7, %v2081_v24 }
 0x1bc   : > { %v2321_v23 = vsel %vm2178_vm8, %v2286_v15, 0.0  ;;  %v2938_v5 = vadd.f32 %v1917_v61, %v4076_v48  ;;  %v2878_v10 = vpop.f32.mrb[10].mxu0  ;;  %v2084_v46 = vmul.f32 %v2937_v12, %v4089_v32  ;;  %v2323_v49 = vsel %vm2178_vm8, %v2287_v26, 0.0 }
 0x1bd   : > { %v2322_v58 = vadd.f32 %v2321_v23, %v2320_v52  ;;  %v2221_v18 = vadd.f32 %v2220_v54, %v2219_v57  ;;  %v2939_v62 = vadd.f32 %v2878_v10, %v4078_v45  ;;  %v1927_v63 = vpop.f32.mrb[11].mxu0  ;;  %2186 = vst.msk [vmem:[%s4108_s24 + $0x38] sm:$0xff] %vm2178_vm8, %v2153_v16  ;;  %v2289_v41 = vmul.f32 %v2153_v16, %v2153_v16 }
 0x1be   : > { %v2152_v47 = vmax.f32 %v2120_v9, 0.0  ;;  %v2083_v53 = vmul.f32 %v2938_v5, %v4089_v32  ;;  %v2123_v48 = vadd.f32 %v4094_v7, %v2084_v46  ;;  %v2940_v22 = vadd.f32 %v1927_v63, %v4080_v8 }
 0x1bf   : > { %v2324_v60 = vadd.f32 %v2323_v49, %v2322_v58  ;;  %v2086_v1 = vmul.f32 %v2939_v62, %v4089_v32  ;;  %v2224_v21 = vsel %vm2178_vm8, %v2153_v16, 0.0  ;;  %v2327_v34 = vsel %vm2178_vm8, %v2289_v41, 0.0 }
 0x1c0   : > { %2185 = vst.msk [vmem:[%s4108_s24 + $0x30] sm:$0xff] %vm2178_vm8, %v2152_v47  ;;  %v2222_v45 = vsel %vm2178_vm8, %v2152_v47, 0.0  ;;  %v2288_v28 = vmul.f32 %v2152_v47, %v2152_v47  ;;  %v2122_v59 = vadd.f32 %v4094_v7, %v2083_v53  ;;  %v2881_v3 = vpop.f32.mrb[12].mxu0  ;;  %v2155_v2 = vmax.f32 %v2123_v48, 0.0 }
 0x1c1   : > { %v2223_v42 = vadd.f32 %v2222_v45, %v2221_v18  ;;  %v2125_v4 = vadd.f32 %v4094_v7, %v2086_v1  ;;  %v2085_v19 = vmul.f32 %v2940_v22, %v4089_v32  ;;  %v1937_v36 = vpop.f32.mrb[13].mxu0  ;;  %v2941_v20 = vadd.f32 %v2881_v3, %v4082_v50 }
 0x1c2   : > { %v2325_v8 = vsel %vm2178_vm8, %v2288_v28, 0.0  ;;  %v2154_v44 = vmax.f32 %v2122_v59, 0.0  ;;  %v2942_v6 = vadd.f32 %v1937_v36, %v4084_v25  ;;  %2188 = vst.msk [vmem:[%s4108_s24 + $0x48] sm:$0xff] %vm2178_vm8, %v2155_v2  ;;  %v2291_v17 = vmul.f32 %v2155_v2, %v2155_v2 }
 0x1c3   : > { %v2326_v33 = vadd.f32 %v2325_v8, %v2324_v60  ;;  %v2225_v13 = vadd.f32 %v2224_v21, %v2223_v42  ;;  %v2157_v39 = vmax.f32 %v2125_v4, 0.0  ;;  %v2124_v40 = vadd.f32 %v4094_v7, %v2085_v19 }
 0x1c4   : > { %2187 = vst.msk [vmem:[%s4108_s24 + $0x40] sm:$0xff] %vm2178_vm8, %v2154_v44  ;;  %v2226_v35 = vsel %vm2178_vm8, %v2154_v44, 0.0  ;;  %v2290_v29 = vmul.f32 %v2154_v44, %v2154_v44  ;;  %v2884_v50 = vpop.f32.mrb[14].mxu0  ;;  %v2088_v51 = vmul.f32 %v2941_v20, %v4089_v32  ;;  %v2228_v0 = vsel %vm2178_vm8, %v2155_v2, 0.0 }
 0x1c5   : > { %v2227_v37 = vadd.f32 %v2226_v35, %v2225_v13  ;;  %v2328_v25 = vadd.f32 %v2327_v34, %v2326_v33  ;;  %v1947_v14 = vpop.f32.mrb[15].mxu0  ;;  %v2331_v43 = vsel %vm2178_vm8, %v2291_v17, 0.0  ;;  %2190 = vst.msk [vmem:[%s4108_s24 + $0x58] sm:$0xff] %vm2178_vm8, %v2157_v39  ;;  %v2156_v11 = vmax.f32 %v2124_v40, 0.0 }
 0x1c6   : > { %v2329_v27 = vsel %vm2178_vm8, %v2290_v29, 0.0  ;;  %v2127_v61 = vadd.f32 %v4094_v7, %v2088_v51  ;;  %v2087_v55 = vmul.f32 %v2942_v6, %v4089_v32  ;;  %v2293_v15 = vmul.f32 %v2157_v39, %v2157_v39 }
 0x1c7   : > { %v2330_v26 = vadd.f32 %v2329_v27, %v2328_v25  ;;  %v2229_v38 = vadd.f32 %v2228_v0, %v2227_v37  ;;  %2189 = vst.msk [vmem:[%s4108_s24 + $0x50] sm:$0xff] %vm2178_vm8, %v2156_v11  ;;  %v2230_v31 = vsel %vm2178_vm8, %v2156_v11, 0.0  ;;  %v2292_v24 = vmul.f32 %v2156_v11, %v2156_v11 }
 0x1c8   : > { %v2943_v54 = vadd.f32 %v2884_v50, %v4098_v56  ;;  %v2887_v57 = vpop.f32.mrb[16].mxu0  ;;  %v2159_v23 = vmax.f32 %v2127_v61, 0.0  ;;  %v2126_v16 = vadd.f32 %v4094_v7, %v2087_v55  ;;  %v2944_v58 = vadd.f32 %v1947_v14, %v4101_v30 }
 0x1c9   : > { %v2231_v52 = vadd.f32 %v2230_v31, %v2229_v38  ;;  %v2332_v12 = vadd.f32 %v2331_v43, %v2330_v26  ;;  %v1957_v9 = vpop.f32.mrb[17].mxu0  ;;  %v2333_v5 = vsel %vm2178_vm8, %v2292_v24, 0.0  ;;  %v2232_v18 = vsel %vm2178_vm8, %v2157_v39, 0.0 }
 0x1ca   : > { %v2090_v10 = vmul.f32 %v2943_v54, %v4089_v32  ;;  %2192 = vst.msk [vmem:[%s4108_s24 + $0x68] sm:$0xff] %vm2178_vm8, %v2159_v23  ;;  %v2158_v56 = vmax.f32 %v2126_v16, 0.0  ;;  %v2335_v62 = vsel %vm2178_vm8, %v2293_v15, 0.0  ;;  %v2089_v41 = vmul.f32 %v2944_v58, %v4089_v32 }
 0x1cb   : > { %v2334_v46 = vadd.f32 %v2333_v5, %v2332_v12  ;;  %v2233_v63 = vadd.f32 %v2232_v18, %v2231_v52  ;;  %v2295_v53 = vmul.f32 %v2159_v23, %v2159_v23  ;;  %v2236_v59 = vsel %vm2178_vm8, %v2159_v23, 0.0 }
 0x1cc   : > { %v2129_v49 = vadd.f32 %v4094_v7, %v2090_v10  ;;  %v2890_v47 = vpop.f32.mrb[18].mxu0  ;;  %2191 = vst.msk [vmem:[%s4108_s24 + $0x60] sm:$0xff] %vm2178_vm8, %v2158_v56  ;;  %v2234_v30 = vsel %vm2178_vm8, %v2158_v56, 0.0  ;;  %v2294_v60 = vmul.f32 %v2158_v56, %v2158_v56  ;;  %v2128_v45 = vadd.f32 %v4094_v7, %v2089_v41 }
 0x1cd   : > { %v2336_v48 = vadd.f32 %v2335_v62, %v2334_v46  ;;  %v1967_v1 = vpop.f32.mrb[19].mxu0  ;;  %v2235_v22 = vadd.f32 %v2234_v30, %v2233_v63  ;;  %v2339_v4 = vsel %vm2178_vm8, %v2295_v53, 0.0 }
 0x1ce   : > { %v2161_v21 = vmax.f32 %v2129_v49, 0.0  ;;  %v2337_v28 = vsel %vm2178_vm8, %v2294_v60, 0.0  ;;  %v2160_v42 = vmax.f32 %v2128_v45, 0.0 }
 0x1cf   : > { %v2338_v3 = vadd.f32 %v2337_v28, %v2336_v48  ;;  %v2237_v19 = vadd.f32 %v2236_v59, %v2235_v22 }
 0x1d0   : > { %2194 = vst.msk [vmem:[%s4108_s24 + $0x78] sm:$0xff] %vm2178_vm8, %v2161_v21  ;;  %v2893_v2 = vpop.f32.mrb[20].mxu0  ;;  %v2297_v8 = vmul.f32 %v2161_v21, %v2161_v21  ;;  %2193 = vst.msk [vmem:[%s4108_s24 + $0x70] sm:$0xff] %vm2178_vm8, %v2160_v42  ;;  %v2238_v44 = vsel %vm2178_vm8, %v2160_v42, 0.0  ;;  %v2296_v20 = vmul.f32 %v2160_v42, %v2160_v42  ;;  %v2240_v33 = vsel %vm2178_vm8, %v2161_v21, 0.0 }
 0x1d1   : > { %v1977_v36 = vpop.f32.mrb[21].mxu0  ;;  %v2340_v6 = vadd.f32 %v2339_v4, %v2338_v3  ;;  %v2239_v34 = vadd.f32 %v2238_v44, %v2237_v19 }
 0x1d2   : > { %v2341_v17 = vsel %vm2178_vm8, %v2296_v20, 0.0  ;;  %v2343_v40 = vsel %vm2178_vm8, %v2297_v8, 0.0 }
 0x1d3   : > { %v2342_v35 = vadd.f32 %v2341_v17, %v2340_v6  ;;  %v2241_v39 = vadd.f32 %v2240_v33, %v2239_v34 }
 0x1d4   : > { %v4210_v13 = vpop.f32.mrb[22].mxu0 }
 0x1d5   : > { %v4212_v29 = vpop.f32.mrb[23].mxu0  ;;  %v2344_v50 = vadd.f32 %v2343_v40, %v2342_v35 }
 0x1dc   : > { %v4215_v37 = vpop.f32.mrb[24].mxu0 }
 0x1dd   : > { %v4217_v25 = vpop.f32.mrb[25].mxu0 }
 0x1e4   : > { %v4219_v51 = vpop.f32.mrb[26].mxu0 }
 0x1e5   : > { %v4221_v14 = vpop.f32.mrb[27].mxu0 }
 0x1ec   : > { %v4223_v0 = vpop.f32.mrb[28].mxu0 }
 0x1ed   : > { %v4225_v43 = vpop.f32.mrb[29].mxu0 }
 0x1f0   : > { %v2835_v27 = vpop.f32.mrb[16].mxu1  ;;  %v4227_v11 = vpop.f32.mrb[30].mxu0 }
 0x1f1   : > { %v2945_v26 = vadd.f32 %v2887_v57, %v2835_v27  ;;  %v1597_v38 = vpop.f32.mrb[17].mxu1  ;;  %v4229_v61 = vpop.f32.mrb[31].mxu0 }
 0x1f2   : > { %v2946_v55 = vadd.f32 %v1957_v9, %v1597_v38 }
 0x1f3   : > { %v2092_v15 = vmul.f32 %v2945_v26, %v4089_v32 }
 0x1f4   : > { %v2091_v31 = vmul.f32 %v2946_v55, %v4089_v32  ;;  %v2838_v24 = vpop.f32.mrb[18].mxu1 }
 0x1f5   : > { %v2131_v54 = vadd.f32 %v4094_v7, %v2092_v15  ;;  %v2947_v52 = vadd.f32 %v2890_v47, %v2838_v24  ;;  %v1607_v12 = vpop.f32.mrb[19].mxu1 }
 0x1f6   : > { %v2130_v23 = vadd.f32 %v4094_v7, %v2091_v31  ;;  %v2948_v16 = vadd.f32 %v1967_v1, %v1607_v12 }
 0x1f7   : > { %v2163_v5 = vmax.f32 %v2131_v54, 0.0  ;;  %v2094_v57 = vmul.f32 %v2947_v52, %v4089_v32 }
 0x1f8   : > { %v2162_v10 = vmax.f32 %v2130_v23, 0.0  ;;  %v2093_v58 = vmul.f32 %v2948_v16, %v4089_v32  ;;  %v2841_v9 = vpop.f32.mrb[20].mxu1 }
 0x1f9   : > { %2196 = vst.msk [vmem:[%s4108_s24 + $0x88] sm:$0xff] %vm2178_vm8, %v2163_v5  ;;  %v2299_v18 = vmul.f32 %v2163_v5, %v2163_v5  ;;  %v2133_v46 = vadd.f32 %v4094_v7, %v2094_v57  ;;  %v2949_v56 = vadd.f32 %v2893_v2, %v2841_v9  ;;  %v1617_v62 = vpop.f32.mrb[21].mxu1  ;;  %v2244_v53 = vsel %vm2178_vm8, %v2163_v5, 0.0 }
 0x1fa   : > { %2195 = vst.msk [vmem:[%s4108_s24 + $0x80] sm:$0xff] %vm2178_vm8, %v2162_v10  ;;  %v2242_v63 = vsel %vm2178_vm8, %v2162_v10, 0.0  ;;  %v2298_v49 = vmul.f32 %v2162_v10, %v2162_v10  ;;  %v2132_v41 = vadd.f32 %v4094_v7, %v2093_v58  ;;  %v2950_v47 = vadd.f32 %v1977_v36, %v1617_v62 }
 0x1fb   : > { %v2243_v30 = vadd.f32 %v2242_v63, %v2241_v39  ;;  %v2165_v60 = vmax.f32 %v2133_v46, 0.0  ;;  %v2096_v48 = vmul.f32 %v2949_v56, %v4089_v32  ;;  %v2347_v1 = vsel %vm2178_vm8, %v2299_v18, 0.0 }
 0x1fc   : > { %v2345_v22 = vsel %vm2178_vm8, %v2298_v49, 0.0  ;;  %v2164_v21 = vmax.f32 %v2132_v41, 0.0  ;;  %v2095_v45 = vmul.f32 %v2950_v47, %v4089_v32  ;;  %v2844_v28 = vpop.f32.mrb[22].mxu1 }
 0x1fd   : > { %v2346_v59 = vadd.f32 %v2345_v22, %v2344_v50  ;;  %2198 = vst.msk [vmem:[%s4108_s24 + $0x98] sm:$0xff] %vm2178_vm8, %v2165_v60  ;;  %v2248_v3 = vsel %vm2178_vm8, %v2165_v60, 0.0  ;;  %v2301_v42 = vmul.f32 %v2165_v60, %v2165_v60  ;;  %v2245_v2 = vadd.f32 %v2244_v53, %v2243_v30  ;;  %v1627_v4 = vpop.f32.mrb[23].mxu1 }
 0x1fe   : > { %2197 = vst.msk [vmem:[%s4108_s24 + $0x90] sm:$0xff] %vm2178_vm8, %v2164_v21  ;;  %v2246_v19 = vsel %vm2178_vm8, %v2164_v21, 0.0  ;;  %v2300_v36 = vmul.f32 %v2164_v21, %v2164_v21  ;;  %v2135_v8 = vadd.f32 %v4094_v7, %v2096_v48  ;;  %v2134_v44 = vadd.f32 %v4094_v7, %v2095_v45 }
 0x1ff   : > { %v2351_v20 = vsel %vm2178_vm8, %v2301_v42, 0.0  ;;  %v2247_v6 = vadd.f32 %v2246_v19, %v2245_v2  ;;  %v2348_v34 = vadd.f32 %v2347_v1, %v2346_v59  ;;  %v2951_v33 = vadd.f32 %v4210_v13, %v2844_v28 }
 0x200   : > { %v2349_v17 = vsel %vm2178_vm8, %v2300_v36, 0.0  ;;  %v2167_v35 = vmax.f32 %v2135_v8, 0.0  ;;  %v2166_v39 = vmax.f32 %v2134_v44, 0.0  ;;  %v2952_v40 = vadd.f32 %v4212_v29, %v1627_v4  ;;  %v2847_v50 = vpop.f32.mrb[24].mxu1 }
 0x201   : > { %v2350_v27 = vadd.f32 %v2349_v17, %v2348_v34  ;;  %v2249_v26 = vadd.f32 %v2248_v3, %v2247_v6  ;;  %v2098_v38 = vmul.f32 %v2951_v33, %v4089_v32  ;;  %v2953_v55 = vadd.f32 %v4215_v37, %v2847_v50  ;;  %v1637_v15 = vpop.f32.mrb[25].mxu1 }
 0x202   : > { %2200 = vst.msk [vmem:[%s4108_s24 + $0xa8] sm:$0xff] %vm2178_vm8, %v2167_v35  ;;  %v2252_v31 = vsel %vm2178_vm8, %v2167_v35, 0.0  ;;  %v2303_v24 = vmul.f32 %v2167_v35, %v2167_v35  ;;  %2199 = vst.msk [vmem:[%s4108_s24 + $0xa0] sm:$0xff] %vm2178_vm8, %v2166_v39  ;;  %v2250_v13 = vsel %vm2178_vm8, %v2166_v39, 0.0  ;;  %v2302_v54 = vmul.f32 %v2166_v39, %v2166_v39 }
 0x203   : > { %v2251_v52 = vadd.f32 %v2250_v13, %v2249_v26  ;;  %v2352_v29 = vadd.f32 %v2351_v20, %v2350_v27  ;;  %v2137_v12 = vadd.f32 %v4094_v7, %v2098_v38  ;;  %v2097_v23 = vmul.f32 %v2952_v40, %v4089_v32 }
 0x204   : > { %v2355_v37 = vsel %vm2178_vm8, %v2303_v24, 0.0  ;;  %v2353_v16 = vsel %vm2178_vm8, %v2302_v54, 0.0  ;;  %v2100_v5 = vmul.f32 %v2953_v55, %v4089_v32  ;;  %v2954_v57 = vadd.f32 %v4217_v25, %v1637_v15  ;;  %v2850_v10 = vpop.f32.mrb[26].mxu1 }
 0x205   : > { %v2354_v58 = vadd.f32 %v2353_v16, %v2352_v29  ;;  %v2169_v9 = vmax.f32 %v2137_v12, 0.0  ;;  %v2136_v18 = vadd.f32 %v4094_v7, %v2097_v23  ;;  %v2253_v46 = vadd.f32 %v2252_v31, %v2251_v52  ;;  %v1647_v56 = vpop.f32.mrb[27].mxu1 }
 0x206   : > { %v2139_v62 = vadd.f32 %v4094_v7, %v2100_v5  ;;  %v2099_v63 = vmul.f32 %v2954_v57, %v4089_v32  ;;  %v2955_v49 = vadd.f32 %v4219_v51, %v2850_v10  ;;  %v2956_v41 = vadd.f32 %v4221_v14, %v1647_v56 }
 0x207   : > { %2202 = vst.msk [vmem:[%s4108_s24 + $0xb8] sm:$0xff] %vm2178_vm8, %v2169_v9  ;;  %v2305_v25 = vmul.f32 %v2169_v9, %v2169_v9  ;;  %v2168_v47 = vmax.f32 %v2136_v18, 0.0  ;;  %v2356_v53 = vadd.f32 %v2355_v37, %v2354_v58  ;;  %v2256_v28 = vsel %vm2178_vm8, %v2169_v9, 0.0 }
 0x208   : > { %v2171_v30 = vmax.f32 %v2139_v62, 0.0  ;;  %v2138_v60 = vadd.f32 %v4094_v7, %v2099_v63  ;;  %v2102_v48 = vmul.f32 %v2955_v49, %v4089_v32  ;;  %v2101_v1 = vmul.f32 %v2956_v41, %v4089_v32  ;;  %v2853_v22 = vpop.f32.mrb[28].mxu1 }
 0x209   : > { %2201 = vst.msk [vmem:[%s4108_s24 + $0xb0] sm:$0xff] %vm2178_vm8, %v2168_v47  ;;  %v2254_v51 = vsel %vm2178_vm8, %v2168_v47, 0.0  ;;  %v2304_v14 = vmul.f32 %v2168_v47, %v2168_v47  ;;  %v2957_v21 = vadd.f32 %v4223_v0, %v2853_v22  ;;  %v1657_v45 = vpop.f32.mrb[29].mxu1  ;;  %v2359_v8 = vsel %vm2178_vm8, %v2305_v25, 0.0 }
 0x20a   : > { %v2255_v59 = vadd.f32 %v2254_v51, %v2253_v46  ;;  %2204 = vst.msk [vmem:[%s4108_s24 + $0xc8] sm:$0xff] %vm2178_vm8, %v2171_v30  ;;  %v2307_v3 = vmul.f32 %v2171_v30, %v2171_v30  ;;  %v2170_v42 = vmax.f32 %v2138_v60, 0.0  ;;  %v2141_v4 = vadd.f32 %v4094_v7, %v2102_v48 }
 0x20b   : > { %v2357_v2 = vsel %vm2178_vm8, %v2304_v14, 0.0  ;;  %v2140_v19 = vadd.f32 %v4094_v7, %v2101_v1  ;;  %v2104_v36 = vmul.f32 %v2957_v21, %v4089_v32  ;;  %v2958_v27 = vadd.f32 %v4225_v43, %v1657_v45 }
 0x20c   : > { %v2358_v44 = vadd.f32 %v2357_v2, %v2356_v53  ;;  %2203 = vst.msk [vmem:[%s4108_s24 + $0xc0] sm:$0xff] %vm2178_vm8, %v2170_v42  ;;  %v2257_v0 = vadd.f32 %v2256_v28, %v2255_v59  ;;  %v2258_v20 = vsel %vm2178_vm8, %v2170_v42, 0.0  ;;  %v2856_v6 = vpop.f32.mrb[30].mxu1  ;;  %v2306_v34 = vmul.f32 %v2170_v42, %v2170_v42 }
 0x20d   : > { %v2173_v33 = vmax.f32 %v2141_v4, 0.0  ;;  %v2172_v17 = vmax.f32 %v2140_v19, 0.0  ;;  %v2143_v35 = vadd.f32 %v4094_v7, %v2104_v36  ;;  %v1667_v39 = vpop.f32.mrb[31].mxu1  ;;  %v2959_v26 = vadd.f32 %v4227_v11, %v2856_v6 }
 0x20e   : > { %v2259_v40 = vadd.f32 %v2258_v20, %v2257_v0  ;;  %v2360_v50 = vadd.f32 %v2359_v8, %v2358_v44  ;;  %v2260_v38 = vsel %vm2178_vm8, %v2171_v30, 0.0  ;;  %v2363_v55 = vsel %vm2178_vm8, %v2307_v3, 0.0 }
 0x20f   : > { %v2361_v15 = vsel %vm2178_vm8, %v2306_v34, 0.0  ;;  %2206 = vst.msk [vmem:[%s4108_s24 + $0xd8] sm:$0xff] %vm2178_vm8, %v2173_v33  ;;  %2205 = vst.msk [vmem:[%s4108_s24 + $0xd0] sm:$0xff] %vm2178_vm8, %v2172_v17  ;;  %v2262_v31 = vsel %vm2178_vm8, %v2172_v17, 0.0  ;;  %v2308_v54 = vmul.f32 %v2172_v17, %v2172_v17  ;;  %v2175_v52 = vmax.f32 %v2143_v35, 0.0 }
 0x210   : > { %v2362_v24 = vadd.f32 %v2361_v15, %v2360_v50  ;;  %v2261_v13 = vadd.f32 %v2260_v38, %v2259_v40  ;;  %v2309_v43 = vmul.f32 %v2173_v33, %v2173_v33  ;;  %v2103_v11 = vmul.f32 %v2958_v27, %v4089_v32 }
 0x211   : > { %v2106_v29 = vmul.f32 %v2959_v26, %v4089_v32  ;;  %v2960_v12 = vadd.f32 %v4229_v61, %v1667_v39  ;;  %v2365_v16 = vsel %vm2178_vm8, %v2308_v54, 0.0  ;;  %2208 = vst.msk [vmem:[%s4108_s24 + $0xe8] sm:$0xff] %vm2178_vm8, %v2175_v52  ;;  %v2264_v5 = vsel %vm2178_vm8, %v2173_v33, 0.0 }
 0x212   : > { %v2263_v23 = vadd.f32 %v2262_v31, %v2261_v13  ;;  %v2364_v37 = vadd.f32 %v2363_v55, %v2362_v24  ;;  %v2142_v57 = vadd.f32 %v4094_v7, %v2103_v11  ;;  %v2367_v61 = vsel %vm2178_vm8, %v2309_v43, 0.0 }
 0x213   : > { %v2145_v10 = vadd.f32 %v4094_v7, %v2106_v29  ;;  %v2105_v58 = vmul.f32 %v2960_v12, %v4089_v32  ;;  %v2311_v49 = vmul.f32 %v2175_v52, %v2175_v52  ;;  %v2268_v53 = vsel %vm2178_vm8, %v2175_v52, 0.0 }
 0x214   : > { %v2366_v9 = vadd.f32 %v2365_v16, %v2364_v37  ;;  %v2265_v18 = vadd.f32 %v2264_v5, %v2263_v23  ;;  %v2174_v46 = vmax.f32 %v2142_v57, 0.0 }
 0x215   : > { %v2177_v56 = vmax.f32 %v2145_v10, 0.0  ;;  %v2144_v62 = vadd.f32 %v4094_v7, %v2105_v58  ;;  %v2371_v22 = vsel %vm2178_vm8, %v2311_v49, 0.0 }
 0x216   : > { %v2368_v63 = vadd.f32 %v2367_v61, %v2366_v9  ;;  %2207 = vst.msk [vmem:[%s4108_s24 + $0xe0] sm:$0xff] %vm2178_vm8, %v2174_v46  ;;  %v2266_v41 = vsel %vm2178_vm8, %v2174_v46, 0.0  ;;  %v2310_v25 = vmul.f32 %v2174_v46, %v2174_v46 }
 0x217   : > { %2210 = vst.msk [vmem:[%s4108_s24 + $0xf8] sm:$0xff] %vm2178_vm8, %v2177_v56  ;;  %v2267_v47 = vadd.f32 %v2266_v41, %v2265_v18  ;;  %v2176_v32 = vmax.f32 %v2144_v62, 0.0  ;;  %v2313_v51 = vmul.f32 %v2177_v56, %v2177_v56  ;;  %v2272_v28 = vsel %vm2178_vm8, %v2177_v56, 0.0 }
 0x218   : > { %v2369_v30 = vsel %vm2178_vm8, %v2310_v25, 0.0 }
 0x219   : > { %v2370_v60 = vadd.f32 %v2369_v30, %v2368_v63  ;;  %2209 = vst.msk [vmem:[%s4108_s24 + $0xf0] sm:$0xff] %vm2178_vm8, %v2176_v32  ;;  %v2269_v7 = vadd.f32 %v2268_v53, %v2267_v47  ;;  %v2270_v48 = vsel %vm2178_vm8, %v2176_v32, 0.0  ;;  %v2312_v1 = vmul.f32 %v2176_v32, %v2176_v32  ;;  %s3041_s24 = scalar_lea.vmem %s4350_s26, 16 }
 0x21a   : > { %v2375_v42 = vsel %vm2178_vm8, %v2313_v51, 0.0  ;;  %p3042_p11 = scmp.ne.s32.totalorder %s4350_s26, %s3041_s24  ;;  %p3049_p1 = scmp.lt.s32.totalorder %s3047_s10, %s3041_s24 }
 0x21b   : > { %v2271_v14 = vadd.f32 %v2270_v48, %v2269_v7  ;;  %v2372_v21 = vadd.f32 %v2371_v22, %v2370_v60  ;;  %v2373_v45 = vsel %vm2178_vm8, %v2312_v1, 0.0 }
 0x21c   : > { %p3043_p12 = pnand %p3042_p11, %p3226_p5  ;;  %p3050_p2 = por %p3049_p1, %p3048_p0 }
 0x21d   : > { %v2273_v59 = vadd.f32 %v2272_v28, %v2271_v14  ;;  %v2374_v3 = vadd.f32 %v2373_v45, %v2372_v21 }
 0x21e   : > { %p3044_p13 = pneg %p3043_p12 }
 0x21f   : > { %v2274_v2 = vrot.slane %v2273_v59, 4  ;;  %v2376_v4 = vadd.f32 %v2375_v42, %v2374_v3 }
 0x220   : > { %p3051_p3 = pnand %p3050_p2, %p3044_p13 }
 0x221   : > { %v2275_v19 = vadd.f32 %v2274_v2, %v2273_v59  ;;  %v2377_v36 = vrot.slane %v2376_v4, 4 }
 0x223   : > { %v2276_v8 = vrot.slane %v2275_v19, 2  ;;  %v2378_v44 = vadd.f32 %v2377_v36, %v2376_v4 }
 0x225   : > { %v2277_v0 = vadd.f32 %v2276_v8, %v2275_v19  ;;  %v2379_v20 = vrot.slane %v2378_v44, 2 }
 0x227   : > { %v2278_v6 = vrot.slane %v2277_v0, 1  ;;  %v2380_v34 = vadd.f32 %v2379_v20, %v2378_v44 }
 0x229   : > { %v2279_v33 = vadd.f32 %v2278_v6, %v2277_v0  ;;  %v2381_v17 = vrot.slane %v2380_v34, 1 }
 0x22b   : > { %2281 = vst.msk [vmem:[%s308_s25] sm:$0x1] %vm2280_vm9, %v2279_v33  ;;  %v2382_v35 = vadd.f32 %v2381_v17, %v2380_v34 }
 0x22c   : > { %3054 = shalt.err (!%p3051_p3)
}
 0x22d   : > { %s3055_s22 = scalar_lea.hbm %s4348_s19, 16  ;;  %s3059_s20 = scalar_lea.hbm %s4431_s7, 32 }
 0x22e   : > { %p3056_p4 = scmp.ne.s32.totalorder %s4348_s19, %s3055_s22  ;;  %p3060_p9 = scmp.lt.u32.totalorder %s4348_s19, %s4431_s7 }
 0x22f   : > { %p3061_p10 = scmp.lt.u32.totalorder %s3059_s20, %s3055_s22  ;;  %p3063_p12 = scmp.lt.u32.totalorder %s3055_s22, %s4348_s19 }
 0x230   : > { %p3057_p7 = pnand %p3056_p4, %p3226_p5 }
 0x231   : > { %p3062_p11 = por %p3061_p10, %p3060_p9 }
 0x232   : > { %p3058_p8 = pneg %p3057_p7 }
 0x233   : > { %p3064_p13 = por %p3063_p12, %p3062_p11 }
 0x235   : > { %p3065_p0 = pnand %p3064_p13, %p3058_p8 }
 0x237   : > { %3068 = shalt.err (!%p3065_p0)
}
 0x238   : > { %2993 = dma.vmem_to_hbm [thread:$0]  (%p3226_p5), %s4350_s26, 16, %s4348_s19, %s2390_s23  }
 0x239   : > { %s4438_s10 = scalar_lea.vmem [#allocation5], %s4338_s17  ;;  %s2394_s24 = scalar_lea.sflag [#allocation6], %s4338_s17 }
 0x23a   : > { %2383 = vst.msk [vmem:[%s4438_s10] sm:$0x1] %vm2280_vm9, %v2382_v35  ;;  %s3069_s25 = scalar_lea.vmem %s4358_s12, 16  ;;  %s3142_s22 = smov [#allocation5]  }
 0x23b   : > { %p3070_p1 = scmp.ne.s32.totalorder %s4358_s12, %s3069_s25  ;;  %s3073_s9 = sshll.u32 %s3142_s22, 4  ;;  %s3074_s9 = int_to_ptr.vmem [resolvable:$false] %s3073_s9 }
 0x23c   : > { %s3075_s20 = scalar_lea.vmem %s3074_s9, 32  ;;  %p3076_p4 = scmp.lt.s32.totalorder %s4358_s12, %s3074_s9 }
 0x23d   : > { %p3071_p2 = pnand %p3070_p1, %p3226_p5  ;;  %p3077_p7 = scmp.lt.s32.totalorder %s3075_s20, %s3069_s25 }
 0x23f   : > { %p3072_p3 = pneg %p3071_p2  ;;  %p3078_p8 = por %p3077_p7, %p3076_p4 }
 0x241   : > { %p3079_p9 = pnand %p3078_p8, %p3072_p3 }
 0x243   : > { %3082 = shalt.err (!%p3079_p9)
}
 0x244   : > { %s3083_s17 = scalar_lea.hbm %s4356_s21, 16  ;;  %s3087_s23 = scalar_lea.hbm %s4432_s8, 32 }
 0x245   : > { %p3084_p10 = scmp.ne.s32.totalorder %s4356_s21, %s3083_s17  ;;  %p3088_p13 = scmp.lt.u32.totalorder %s4356_s21, %s4432_s8 }
 0x246   : > { %p3089_p0 = scmp.lt.u32.totalorder %s3087_s23, %s3083_s17  ;;  %p3091_p2 = scmp.lt.u32.totalorder %s3083_s17, %s4356_s21 }
 0x247   : > { %p3085_p11 = pnand %p3084_p10, %p3226_p5 }
 0x248   : > { %p3090_p1 = por %p3089_p0, %p3088_p13 }
 0x249   : > { %p3086_p12 = pneg %p3085_p11 }
 0x24a   : > { %p3092_p3 = por %p3091_p2, %p3090_p1 }
 0x24c   : > { %p3093_p4 = pnand %p3092_p3, %p3086_p12 }
 0x24e   : > { %3096 = shalt.err (!%p3093_p4)
}
 0x24f   : > { %2994 = dma.vmem_to_hbm [thread:$0]  (%p3226_p5), %s4358_s12, 16, %s4356_s21, %s2394_s24  }
 0x250 PF: > { %p3004_p7 = scmp.ge.s32.totalorder %s3135_s30, 2  ;;  %s2442_s10 = sand.u32 1, %s3123_s27  }
 0x251   : > { %s2443_s25 = scalar_lea.sflag [#allocation4], %s2442_s10 }
 0x252   : > { %p2998_p8 = pnand %p3004_p7, %p3230_p6 }
 0x254   : > { %3114 = dma.done.wait (!%p2998_p8), %s2443_s25, 16  }
 0x255   : > { %3116 = vsyncadd (!%p2998_p8), %s2443_s25, 4294967280  ;;  %s2451_s22 = scalar_lea.sflag [#allocation6], %s2442_s10 }
 0x256   : > { %3118 = dma.done.wait (!%p2998_p8), %s2451_s22, 16  }
 0x257   : > { %3120 = vsyncadd (!%p2998_p8), %s2451_s22, 4294967280  ;;  %p22_p5 = scmp.ge.s32.totalorder %s3213_s11, 4   ;;  %s4439_s27 = smov %s3127_s28 }
 0x258   : > { %s4440_s28 = smov %s3131_s29  ;;  %s4441_s29 = smov %s3224_s14 }
 0x259   : > { %s4442_s30 = smov %s3213_s11  ;;  %24 = sbr.rel (!%p22_p5) target bundleno = 5 (0x5), region = 113 }
 0x260   :  { %2455 = vsyncpa [#allocation4], 1 }
 0x261   :  { %2457 = vsyncpa [#allocation4 + $0x1], 1 }
 0x262   :  { %2458 = vsyncpa [#allocation6], 1 }
 0x263   :  { %2460 = vsyncpa [#allocation6 + $0x1], 1 }

// kernel: dncnn_forward.6
= control target key start
LH: loop header
LB: loop body
LE: loop exit
PB: predicated region body
PF: predicated region fallthrough
CT: control target
= control target key end

     0   :  { %s2969_s27 = smov 0   ;;  %s4498_s0 = inlined_call_operand.vmem [shape: f32[2,16,16,64], index: 0, kind: input, shape index: {}]   ;;  %s4499_s1 = inlined_call_operand.vmem [shape: f32[3,192,64], index: 1, kind: input, shape index: {}]   ;;  %s4500_s2 = inlined_call_operand.vmem [shape: f32[1,64], index: 2, kind: input, shape index: {}, may-alias: {2,4}]   ;;  %s4501_s3 = inlined_call_operand.vmem [shape: f32[1,64], index: 3, kind: input, shape index: {}, may-alias: {3,5}]   ;;  %s4502_s4 = inlined_call_operand.vmem [shape: f32[1,64], index: 4, kind: input, shape index: {}, may-alias: {2,4}]   ;;  %s4503_s5 = inlined_call_operand.vmem [shape: f32[1,64], index: 5, kind: input, shape index: {}, may-alias: {3,5}]   ;;  %s4504_s6 = inlined_call_operand.vmem [shape: f32[2,16,16,64], index: 6, kind: output, shape index: {0}]   ;;  %s4505_s7 = inlined_call_operand.vmem [shape: f32[2,1,64], index: 7, kind: output, shape index: {1}]   ;;  %s4506_s8 = inlined_call_operand.vmem [shape: f32[2,1,64], index: 8, kind: output, shape index: {2}]  }
   0x1 LB: > { %s2512_s28 = sadd.s32 4294967295, %s2919_s27   ;;  %p2516_p0 = scmp.ge.s32.totalorder %s2919_s27, 1  ;;  %s2919_s27 = sphi %s2969_s27, %s19_s27  }
   0x2   : > { %p267_p1 = scmp.lt.s32.totalorder %s2919_s27, 3 }
   0x4   : > { %p268_p2 = pnand %p2516_p0, %p267_p1 }
   0x5   : > { %p307_p3 = scmp.lt.s32.totalorder (!%p268_p2), %s2512_s28, 1  ;;  %vm755_vm0 = vcmask (!%p268_p2), 523264   ;;  %v926_v0 = vld [vmem:[%s4499_s1] sm:$0xff] (!%p268_p2)  ;;  %v927_v1 = vld [vmem:[%s4499_s1 + $0x8] sm:$0xff] (!%p268_p2)  ;;  %v928_v2 = vld [vmem:[%s4499_s1 + $0x10] sm:$0xff] (!%p268_p2)  ;;  %v2921_v4 = vmov (!%p268_p2), 0.0|0.0  }
   0x6   : > { %271 = sbr.rel (%p268_p2) target bundleno = 561 (0x231), region = 44  ;;  %v2991_v3 = vld [vmem:[%s4500_s2] ss:$0 sm:$0xff] (!%p268_p2)  ;;  %2709 = vmatprep.subr.bf16.mxu0 (!%p268_p2), %v2921_v4  ;;  %v2994_v5 = vpack.c.bf16 (!%p268_p2), %v927_v1, %v926_v0  ;;  %v929_v6 = vld [vmem:[%s4499_s1 + $0x18] sm:$0xff] (!%p268_p2)  ;;  %2673 = vmatprep.subr.bf16.mxu1 (!%p268_p2), %v2921_v4  ;;  %v2524_v8 = vld [vmem:[%s4499_s1 + $0xc8] sm:$0xff] (!%p268_p2)  ;;  %v2922_v13 = vmov (!%p268_p2), 0.0  }
   0x7   : > { %v2523_v7 = vld [vmem:[%s4499_s1 + $0xc0] sm:$0xff] (!%p268_p2)  ;;  %v931_v11 = vld [vmem:[%s4499_s1 + $0x28] sm:$0xff] (!%p268_p2)  ;;  %v2525_v12 = vld [vmem:[%s4499_s1 + $0xd0] sm:$0xff] (!%p268_p2)  ;;  %789 = vst.msk [vmem:[#allocation2 + $0x8] sm:$0xff] (!%p268_p2), %vm755_vm0, %v2922_v13  ;;  %v3026_v14 = vpack.c.bf16 (!%p268_p2), %v929_v6, %v928_v2  ;;  %vm562_vm1 = vcmask (!%p268_p2), 1046528   ;;  %s2923_s23 = smov (!%p268_p2), 64  }
   0x8   : > { %v2674_v9 = vpack.c.bf16 (!%p268_p2), %v2524_v8, %v2523_v7  ;;  %v930_v10 = vld [vmem:[%s4499_s1 + $0x20] sm:$0xff] (!%p268_p2)  ;;  %788 = vst [vmem:[#allocation2] sm:$0xff] (!%p268_p2), %v2922_v13  ;;  %791 = vst.msk [vmem:[#allocation2 + $0x18] sm:$0xff] (!%p268_p2), %vm755_vm0, %v2922_v13  ;;  %2711 = vmatpush1.bf16.msra.mxu0 (!%p268_p2), %v2994_v5  ;;  %v2526_v15 = vld [vmem:[%s4499_s1 + $0xd8] sm:$0xff] (!%p268_p2)  ;;  %vm465_vm2 = vcmask (!%p268_p2), 1040384   ;;  %vm2303_vm3 = vcmask (!%p268_p2), 516096  }
   0x9   : > { %794 = vst.msk [vmem:[#allocation2 + $0x228] sm:$0xff] (!%p268_p2), %vm755_vm0, %v2922_v13  ;;  %796 = vst.msk [vmem:[#allocation2 + $0x238] sm:$0xff] (!%p268_p2), %vm755_vm0, %v2922_v13  ;;  %v932_v16 = vld [vmem:[%s4499_s1 + $0x30] sm:$0xff] (!%p268_p2)  ;;  %v933_v17 = vld [vmem:[%s4499_s1 + $0x38] sm:$0xff] (!%p268_p2)  ;;  %2712 = vmatprep.subr.bf16.mxu0 (!%p268_p2), %v2921_v4  ;;  %v3063_v24 = vpack.c.bf16 (!%p268_p2), %v931_v11, %v930_v10  ;;  %v2677_v25 = vpack.c.bf16 (!%p268_p2), %v2526_v15, %v2525_v12 }
   0xa   : > { %v3047_v18 = vld [vmem:[%s4501_s3] ss:$0 sm:$0xff] (!%p268_p2)  ;;  %2675 = vmatpush1.bf16.msra.mxu1 (!%p268_p2), %v2674_v9  ;;  %v3058_v20 = vld [vmem:[%s4499_s1 + $0xe8] sm:$0xff] (!%p268_p2)  ;;  %v3072_v32 = vpack.c.bf16 (!%p268_p2), %v933_v17, %v932_v16 }
   0xb   : > { %v3053_v19 = vld [vmem:[%s4499_s1 + $0xe0] sm:$0xff] (!%p268_p2)  ;;  %2676 = vmatprep.subr.bf16.mxu1 (!%p268_p2), %v2921_v4 }
   0xc   : > { %2714 = vmatpush1.bf16.msra.mxu0 (!%p268_p2), %v3026_v14  ;;  %v2680_v38 = vpack.c.bf16 (!%p268_p2), %v3058_v20, %v3053_v19 }
   0xd   : > { %s4520_s28 = smov (!%p307_p3, %s2512_s28), 1  ;;  %2715 = vmatprep.subr.bf16.mxu0 %v2921_v4 }
   0xe   : > { %s2671_s29 = sshll.u32 %s4520_s28, 8  ;;  %2678 = vmatpush1.bf16.msra.mxu1 %v2677_v25  ;;  %v863_v52 = vld [vmem:[#allocation2 + $0x8] sm:$0xff]  ;;  %s319_s21 = scalar_lea.vmem %s4505_s7, %s4520_s28 }
   0xf   : > { %s3042_s16 = scalar_lea.vmem %s4498_s0, %s2671_s29  ;;  %2679 = vmatprep.subr.bf16.mxu1 %v2921_v4  ;;  %2579 = vmatprep.mubr.msk.f32.mxu0 %vm755_vm0, %v863_v52  ;;  %s322_s25 = scalar_lea.vmem %s4506_s8, %s4520_s28 }
  0x10   : > { %v323_v21 = vld [vmem:[%s3042_s16] sm:$0xff]  ;;  %v324_v22 = vld [vmem:[%s3042_s16 + $0x8] sm:$0xff]  ;;  %v325_v23 = vld [vmem:[%s3042_s16 + $0x10] sm:$0xff]  ;;  %2717 = vmatpush1.bf16.msra.mxu0 %v3063_v24 }
  0x11   : > { %v362_v26 = vmul.f32 %v2991_v3, %v323_v21  ;;  %v363_v27 = vmul.f32 %v2991_v3, %v324_v22  ;;  %v364_v28 = vmul.f32 %v2991_v3, %v325_v23  ;;  %v326_v29 = vld [vmem:[%s3042_s16 + $0x18] sm:$0xff]  ;;  %v327_v30 = vld [vmem:[%s3042_s16 + $0x20] sm:$0xff]  ;;  %v328_v31 = vld [vmem:[%s3042_s16 + $0x28] sm:$0xff]  ;;  %2718 = vmatprep.subr.bf16.mxu0 %v2921_v4 }
  0x12   : > { %v365_v33 = vmul.f32 %v2991_v3, %v326_v29  ;;  %v366_v34 = vmul.f32 %v2991_v3, %v327_v30  ;;  %v367_v35 = vmul.f32 %v2991_v3, %v328_v31  ;;  %v329_v36 = vld [vmem:[%s3042_s16 + $0x30] sm:$0xff]  ;;  %v330_v37 = vld [vmem:[%s3042_s16 + $0x38] sm:$0xff]  ;;  %v331_v47 = vld [vmem:[%s3042_s16 + $0x40] sm:$0xff]  ;;  %2681 = vmatpush1.bf16.msra.mxu1 %v2680_v38 }
  0x13   : > { %v3083_v39 = vadd.f32 %v3047_v18, %v362_v26  ;;  %v3086_v40 = vadd.f32 %v3047_v18, %v363_v27  ;;  %v3089_v41 = vadd.f32 %v3047_v18, %v364_v28  ;;  %v368_v42 = vmul.f32 %v2991_v3, %v329_v36  ;;  %v332_v57 = vld [vmem:[%s3042_s16 + $0x48] sm:$0xff]  ;;  %v333_v58 = vld [vmem:[%s3042_s16 + $0x50] sm:$0xff]  ;;  %v334_v59 = vld [vmem:[%s3042_s16 + $0x58] sm:$0xff]  ;;  %2682 = vmatprep.subr.bf16.mxu1 %v2921_v4 }
  0x14   : > { %v3094_v43 = vadd.f32 %v3047_v18, %v365_v33  ;;  %v3097_v44 = vadd.f32 %v3047_v18, %v366_v34  ;;  %v3100_v45 = vadd.f32 %v3047_v18, %v367_v35  ;;  %v369_v46 = vmul.f32 %v2991_v3, %v330_v37  ;;  %v335_v0 = vld [vmem:[%s3042_s16 + $0x60] sm:$0xff]  ;;  %v336_v1 = vld [vmem:[%s3042_s16 + $0x68] sm:$0xff]  ;;  %v337_v2 = vld [vmem:[%s3042_s16 + $0x70] sm:$0xff]  ;;  %2720 = vmatpush1.bf16.msra.mxu0 %v3072_v32 }
  0x15   : > { %659 = vrot.lane.b32.xlu0 %v3083_v39, %s2923_s23  ;;  %v563_v48 = vrot.slane %v3083_v39, 1  ;;  %v564_v49 = vrot.slane %v3086_v40, 1  ;;  %663 = vrot.lane.b32.xlu1 %v3089_v41, %s2923_s23  ;;  %v566_v50 = vrot.slane %v3089_v41, 1  ;;  %v3112_v51 = vadd.f32 %v3047_v18, %v368_v42  ;;  %v338_v21 = vld [vmem:[%s3042_s16 + $0x78] sm:$0xff]  ;;  %v339_v22 = vld [vmem:[%s3042_s16 + $0x80] sm:$0xff] }
  0x16   : > { %v567_v53 = vrot.slane %v3094_v43, 1  ;;  %v569_v54 = vrot.slane %v3097_v44, 1  ;;  %v570_v55 = vrot.slane %v3100_v45, 1  ;;  %v3118_v56 = vadd.f32 %v3047_v18, %v369_v46  ;;  %2721 = vmatprep.subr.bf16.mxu0 %v2921_v4  ;;  %v340_v37 = vld [vmem:[%s3042_s16 + $0x88] sm:$0xff]  ;;  %v934_v38 = vld [vmem:[%s4499_s1 + $0x40] sm:$0xff] }
  0x17   : > { %v643_v60 = vsel %vm562_vm1, %v564_v49, 0.0  ;;  %v565_v61 = vsel %vm562_vm1, %v563_v48, %v564_v49  ;;  %v572_v62 = vrot.slane %v3112_v51, 1  ;;  %v370_v63 = vmul.f32 %v2991_v3, %v331_v47  ;;  %v341_v49 = vld [vmem:[%s3042_s16 + $0x90] sm:$0xff] }
  0x18   : > { %801 = vst.msk [vmem:[#allocation2 + $0x38] sm:$0xff] %vm755_vm0, %v643_v60  ;;  %799 = vst.msk [vmem:[#allocation2 + $0x28] sm:$0xff] %vm755_vm0, %v565_v61  ;;  %v644_v6 = vsel %vm562_vm1, %v567_v53, 0.0  ;;  %v568_v7 = vsel %vm562_vm1, %v566_v50, %v567_v53  ;;  %v571_v8 = vsel %vm562_vm1, %v569_v54, %v570_v55  ;;  %v645_v9 = vsel %vm562_vm1, %v570_v55, 0.0  ;;  %v342_v50 = vld [vmem:[%s3042_s16 + $0x98] sm:$0xff] }
  0x19   : > { %661 = vrot.lane.b32.xlu0 %v3086_v40, %s2923_s23  ;;  %805 = vst.msk [vmem:[#allocation2 + $0x58] sm:$0xff] %vm755_vm0, %v644_v6  ;;  %665 = vrot.lane.b32.xlu1 %v3094_v43, %s2923_s23  ;;  %803 = vst.msk [vmem:[#allocation2 + $0x48] sm:$0xff] %vm755_vm0, %v568_v7  ;;  %v573_v10 = vrot.slane %v3118_v56, 1  ;;  %v3150_v11 = vadd.f32 %v3047_v18, %v370_v63  ;;  %v371_v12 = vmul.f32 %v2991_v3, %v332_v57  ;;  %v343_v57 = vld [vmem:[%s3042_s16 + $0xa0] sm:$0xff]  ;;  %v2529_v7 = vld [vmem:[%s4499_s1 + $0xf0] sm:$0xff] }
  0x1a   : > { %807 = vst.msk [vmem:[#allocation2 + $0x68] sm:$0xff] %vm755_vm0, %v571_v8  ;;  %809 = vst.msk [vmem:[#allocation2 + $0x78] sm:$0xff] %vm755_vm0, %v645_v9  ;;  %v372_v15 = vmul.f32 %v2991_v3, %v333_v58  ;;  %v373_v16 = vmul.f32 %v2991_v3, %v334_v59  ;;  %v374_v17 = vmul.f32 %v2991_v3, %v335_v0  ;;  %v344_v58 = vld [vmem:[%s3042_s16 + $0xa8] sm:$0xff]  ;;  %v2530_v8 = vld [vmem:[%s4499_s1 + $0xf8] sm:$0xff] }
  0x1b   : > { %v375_v19 = vmul.f32 %v2991_v3, %v336_v1  ;;  %v376_v20 = vmul.f32 %v2991_v3, %v337_v2  ;;  %v574_v23 = vsel %vm562_vm1, %v572_v62, %v573_v10  ;;  %v646_v25 = vsel %vm562_vm1, %v573_v10, 0.0  ;;  %v935_v59 = vld [vmem:[%s4499_s1 + $0x48] sm:$0xff] }
  0x1c   : > { %v575_v26 = vrot.slane %v3150_v11, 1  ;;  %v3165_v27 = vadd.f32 %v3047_v18, %v371_v12  ;;  %811 = vst.msk [vmem:[#allocation2 + $0x88] sm:$0xff] %vm755_vm0, %v574_v23  ;;  %813 = vst.msk [vmem:[#allocation2 + $0x98] sm:$0xff] %vm755_vm0, %v646_v25  ;;  %v3172_v28 = vadd.f32 %v3047_v18, %v372_v15  ;;  %v3175_v29 = vadd.f32 %v3047_v18, %v373_v16 }
  0x1d   : > { %v3178_v30 = vadd.f32 %v3047_v18, %v374_v17  ;;  %v3181_v31 = vadd.f32 %v3047_v18, %v375_v19  ;;  %667 = vrot.lane.b32.xlu0 %v3097_v44, %s2923_s23  ;;  %669 = vrot.lane.b32.xlu1 %v3100_v45, %s2923_s23  ;;  %v3189_v34 = vadd.f32 %v3047_v18, %v376_v20  ;;  %v345_v17 = vld [vmem:[%s3042_s16 + $0xb0] sm:$0xff]  ;;  %v937_v20 = vld [vmem:[%s4499_s1 + $0x58] sm:$0xff] }
  0x1e   : > { %v576_v33 = vrot.slane %v3165_v27, 1  ;;  %v377_v35 = vmul.f32 %v2991_v3, %v338_v21  ;;  %v378_v36 = vmul.f32 %v2991_v3, %v339_v22  ;;  %v578_v42 = vrot.slane %v3172_v28, 1  ;;  %v936_v19 = vld [vmem:[%s4499_s1 + $0x50] sm:$0xff] }
  0x1f   : > { %v579_v46 = vrot.slane %v3175_v29, 1  ;;  %v581_v47 = vrot.slane %v3178_v30, 1  ;;  %v582_v48 = vrot.slane %v3181_v31, 1  ;;  %v584_v54 = vrot.slane %v3189_v34, 1  ;;  %v3240_v9 = vld [vmem:[#allocation2 + $0x28] sm:$0xff] }
  0x20   : > { %v577_v52 = vsel %vm562_vm1, %v575_v26, %v576_v33  ;;  %v647_v53 = vsel %vm562_vm1, %v576_v33, 0.0  ;;  %v3207_v55 = vadd.f32 %v3047_v18, %v377_v35  ;;  %v3230_v1 = vadd.f32 %v3047_v18, %v378_v36  ;;  %2547 = vmatprep.mubr.msk.f32.mxu1 %vm755_vm0, %v3240_v9 }
  0x21   : > { %815 = vst.msk [vmem:[#allocation2 + $0xa8] sm:$0xff] %vm755_vm0, %v577_v52  ;;  %817 = vst.msk [vmem:[#allocation2 + $0xb8] sm:$0xff] %vm755_vm0, %v647_v53  ;;  %v580_v60 = vsel %vm562_vm1, %v578_v42, %v579_v46  ;;  %v648_v61 = vsel %vm562_vm1, %v579_v46, 0.0  ;;  %v583_v62 = vsel %vm562_vm1, %v581_v47, %v582_v48  ;;  %v649_v63 = vsel %vm562_vm1, %v582_v48, 0.0  ;;  %671 = vrot.lane.b32.xlu0 %v3112_v51, %s2923_s23 }
  0x22   : > { %673 = vrot.lane.b32.xlu1 %v3118_v56, %s2923_s23  ;;  %819 = vst.msk [vmem:[#allocation2 + $0xc8] sm:$0xff] %vm755_vm0, %v580_v60  ;;  %821 = vst.msk [vmem:[#allocation2 + $0xd8] sm:$0xff] %vm755_vm0, %v648_v61  ;;  %v585_v0 = vrot.slane %v3207_v55, 1  ;;  %v379_v2 = vmul.f32 %v2991_v3, %v340_v37  ;;  %v380_v6 = vmul.f32 %v2991_v3, %v341_v49  ;;  %v587_v23 = vrot.slane %v3230_v1, 1  ;;  %v2531_v37 = vld [vmem:[%s4499_s1 + $0x100] sm:$0xff]  ;;  %v346_v49 = vld [vmem:[%s3042_s16 + $0xb8] sm:$0xff] }
  0x23   : > { %823 = vst.msk [vmem:[#allocation2 + $0xe8] sm:$0xff] %vm755_vm0, %v583_v62  ;;  %825 = vst.msk [vmem:[#allocation2 + $0xf8] sm:$0xff] %vm755_vm0, %v649_v63  ;;  %v381_v10 = vmul.f32 %v2991_v3, %v342_v50  ;;  %v382_v12 = vmul.f32 %v2991_v3, %v343_v57  ;;  %v383_v15 = vmul.f32 %v2991_v3, %v344_v58  ;;  %v938_v57 = vld [vmem:[%s4499_s1 + $0x60] sm:$0xff]  ;;  %v939_v58 = vld [vmem:[%s4499_s1 + $0x68] sm:$0xff] }
  0x24   : > { %v3245_v16 = vpack.c.bf16 %v935_v59, %v934_v38  ;;  %v586_v21 = vsel %vm562_vm1, %v584_v54, %v585_v0  ;;  %v650_v22 = vsel %vm562_vm1, %v585_v0, 0.0  ;;  %v3260_v25 = vadd.f32 %v3047_v18, %v379_v2  ;;  %v2532_v38 = vld [vmem:[%s4499_s1 + $0x108] sm:$0xff]  ;;  %v347_v62 = vld [vmem:[%s3042_s16 + $0xc0] sm:$0xff] }
  0x25   : > { %827 = vst.msk [vmem:[#allocation2 + $0x108] sm:$0xff] %vm755_vm0, %v586_v21  ;;  %829 = vst.msk [vmem:[#allocation2 + $0x118] sm:$0xff] %vm755_vm0, %v650_v22  ;;  %v3265_v26 = vadd.f32 %v3047_v18, %v380_v6  ;;  %v3268_v33 = vadd.f32 %v3047_v18, %v381_v10  ;;  %v3271_v35 = vadd.f32 %v3047_v18, %v382_v12  ;;  %675 = vrot.lane.b32.xlu0 %v3150_v11, %s2923_s23  ;;  %v348_v63 = vld [vmem:[%s3042_s16 + $0xc8] sm:$0xff]  ;;  %v2534_v10 = vld [vmem:[%s4499_s1 + $0x118] sm:$0xff] }
  0x26   : > { %v3274_v36 = vadd.f32 %v3047_v18, %v383_v15  ;;  %2723 = vmatpush1.bf16.msra.mxu0 %v3245_v16  ;;  %677 = vrot.lane.b32.xlu1 %v3165_v27, %s2923_s23  ;;  %v588_v42 = vrot.slane %v3260_v25, 1  ;;  %v2683_v46 = vpack.c.bf16 %v2530_v8, %v2529_v7  ;;  %v384_v47 = vmul.f32 %v2991_v3, %v345_v17  ;;  %v2533_v8 = vld [vmem:[%s4499_s1 + $0x110] sm:$0xff]  ;;  %v941_v21 = vld [vmem:[%s4499_s1 + $0x78] sm:$0xff] }
  0x27   : > { %v3289_v48 = vpack.c.bf16 %v937_v20, %v936_v19  ;;  %v590_v50 = vrot.slane %v3265_v26, 1  ;;  %v591_v52 = vrot.slane %v3268_v33, 1  ;;  %v593_v53 = vrot.slane %v3271_v35, 1  ;;  %2724 = vmatprep.subr.bf16.mxu0 %v2921_v4  ;;  %v349_v12 = vld [vmem:[%s3042_s16 + $0xd0] sm:$0xff] }
  0x28   : > { %v594_v54 = vrot.slane %v3274_v36, 1  ;;  %v589_v59 = vsel %vm562_vm1, %v587_v23, %v588_v42  ;;  %v651_v60 = vsel %vm562_vm1, %v588_v42, 0.0  ;;  %2684 = vmatpush1.bf16.msra.mxu1 %v2683_v46  ;;  %v2686_v61 = vpack.c.bf16 %v2532_v38, %v2531_v37  ;;  %v940_v20 = vld [vmem:[%s4499_s1 + $0x70] sm:$0xff]  ;;  %v350_v37 = vld [vmem:[%s3042_s16 + $0xd8] sm:$0xff] }
  0x29   : > { %831 = vst.msk [vmem:[#allocation2 + $0x128] sm:$0xff] %vm755_vm0, %v589_v59  ;;  %833 = vst.msk [vmem:[#allocation2 + $0x138] sm:$0xff] %vm755_vm0, %v651_v60  ;;  %v592_v0 = vsel %vm562_vm1, %v590_v50, %v591_v52  ;;  %v652_v2 = vsel %vm562_vm1, %v591_v52, 0.0  ;;  %2685 = vmatprep.subr.bf16.mxu1 %v2921_v4  ;;  %679 = vrot.lane.b32.xlu0 %v3172_v28, %s2923_s23  ;;  %v3331_v15 = vadd.f32 %v3047_v18, %v384_v47  ;;  %v2535_v47 = vld [vmem:[%s4499_s1 + $0x120] sm:$0xff]  ;;  %v943_v59 = vld [vmem:[%s4499_s1 + $0x88] sm:$0xff] }
  0x2a   : > { %v595_v6 = vsel %vm562_vm1, %v593_v53, %v594_v54  ;;  %v653_v7 = vsel %vm562_vm1, %v594_v54, 0.0  ;;  %2726 = vmatpush1.bf16.msra.mxu0 %v3289_v48  ;;  %681 = vrot.lane.b32.xlu1 %v3175_v29, %s2923_s23  ;;  %835 = vst.msk [vmem:[#allocation2 + $0x148] sm:$0xff] %vm755_vm0, %v592_v0  ;;  %837 = vst.msk [vmem:[#allocation2 + $0x158] sm:$0xff] %vm755_vm0, %v652_v2  ;;  %v385_v17 = vmul.f32 %v2991_v3, %v346_v49  ;;  %v2536_v49 = vld [vmem:[%s4499_s1 + $0x128] sm:$0xff] }
  0x2b   : > { %839 = vst.msk [vmem:[#allocation2 + $0x168] sm:$0xff] %vm755_vm0, %v595_v6  ;;  %841 = vst.msk [vmem:[#allocation2 + $0x178] sm:$0xff] %vm755_vm0, %v653_v7  ;;  %v3334_v19 = vpack.c.bf16 %v939_v58, %v938_v57  ;;  %2727 = vmatprep.subr.bf16.mxu0 %v2921_v4  ;;  %v386_v22 = vmul.f32 %v2991_v3, %v347_v62  ;;  %v387_v23 = vmul.f32 %v2991_v3, %v348_v63  ;;  %v942_v57 = vld [vmem:[%s4499_s1 + $0x80] sm:$0xff]  ;;  %v352_v6 = vld [vmem:[%s3042_s16 + $0xe8] sm:$0xff] }
  0x2c   : > { %v596_v38 = vrot.slane %v3331_v15, 1  ;;  %2687 = vmatpush1.bf16.msra.mxu1 %v2686_v61  ;;  %v3348_v42 = vadd.f32 %v3047_v18, %v385_v17  ;;  %v2689_v46 = vpack.c.bf16 %v2534_v10, %v2533_v8  ;;  %v388_v50 = vmul.f32 %v2991_v3, %v349_v12  ;;  %v351_v62 = vld [vmem:[%s3042_s16 + $0xe0] sm:$0xff]  ;;  %v353_v17 = vld [vmem:[%s3042_s16 + $0xf0] sm:$0xff] }
  0x2d   : > { %2688 = vmatprep.subr.bf16.mxu1 %v2921_v4  ;;  %v3360_v52 = vadd.f32 %v3047_v18, %v386_v22  ;;  %v3362_v53 = vpack.c.bf16 %v941_v21, %v940_v20  ;;  %v3365_v54 = vadd.f32 %v3047_v18, %v387_v23  ;;  %683 = vrot.lane.b32.xlu0 %v3178_v30, %s2923_s23  ;;  %v2537_v23 = vld [vmem:[%s4499_s1 + $0x130] sm:$0xff] }
  0x2e   : > { %2729 = vmatpush1.bf16.msra.mxu0 %v3334_v19  ;;  %685 = vrot.lane.b32.xlu1 %v3181_v31, %s2923_s23  ;;  %v597_v58 = vrot.slane %v3348_v42, 1  ;;  %v3379_v60 = vadd.f32 %v3047_v18, %v388_v50  ;;  %v389_v61 = vmul.f32 %v2991_v3, %v350_v37  ;;  %v2692_v0 = vpack.c.bf16 %v2536_v49, %v2535_v47  ;;  %v2538_v37 = vld [vmem:[%s4499_s1 + $0x138] sm:$0xff] }
  0x2f   : > { %2730 = vmatprep.subr.bf16.mxu0 %v2921_v4  ;;  %v599_v63 = vrot.slane %v3360_v52, 1  ;;  %v600_v2 = vrot.slane %v3365_v54, 1  ;;  %v3400_v22 = vpack.c.bf16 %v943_v59, %v942_v57  ;;  %v945_v47 = vld [vmem:[%s4499_s1 + $0x98] sm:$0xff]  ;;  %v391_v50 = vmul.f32 %v2991_v3, %v352_v6  ;;  %v2540_v6 = vld [vmem:[%s4499_s1 + $0x148] sm:$0xff] }
  0x30   : > { %v598_v7 = vsel %vm562_vm1, %v596_v38, %v597_v58  ;;  %v654_v8 = vsel %vm562_vm1, %v597_v58, 0.0  ;;  %2690 = vmatpush1.bf16.msra.mxu1 %v2689_v46  ;;  %v602_v10 = vrot.slane %v3379_v60, 1  ;;  %v3391_v12 = vadd.f32 %v3047_v18, %v389_v61  ;;  %v944_v46 = vld [vmem:[%s4499_s1 + $0x90] sm:$0xff] }
  0x31   : > { %843 = vst.msk [vmem:[#allocation2 + $0x188] sm:$0xff] %vm755_vm0, %v598_v7  ;;  %845 = vst.msk [vmem:[#allocation2 + $0x198] sm:$0xff] %vm755_vm0, %v654_v8  ;;  %2691 = vmatprep.subr.bf16.mxu1 %v2921_v4  ;;  %v601_v20 = vsel %vm562_vm1, %v599_v63, %v600_v2  ;;  %v655_v21 = vsel %vm562_vm1, %v600_v2, 0.0  ;;  %v390_v38 = vmul.f32 %v2991_v3, %v351_v62  ;;  %687 = vrot.lane.b32.xlu0 %v3189_v34, %s2923_s23  ;;  %v354_v62 = vld [vmem:[%s3042_s16 + $0xf8] sm:$0xff]  ;;  %v2539_v2 = vld [vmem:[%s4499_s1 + $0x140] sm:$0xff]  ;;  %s4280_s16 = scalar_lea.vmem %s4504_s6, %s2671_s29 }
  0x32   : > { %2732 = vmatpush1.bf16.msra.mxu0 %v3362_v53  ;;  %689 = vrot.lane.b32.xlu1 %v3207_v55, %s2923_s23  ;;  %847 = vst.msk [vmem:[#allocation2 + $0x1a8] sm:$0xff] %vm755_vm0, %v601_v20  ;;  %849 = vst.msk [vmem:[#allocation2 + $0x1b8] sm:$0xff] %vm755_vm0, %v655_v21  ;;  %v603_v49 = vrot.slane %v3391_v12, 1  ;;  %v4507_v58 = vrot.slane %v3083_v39, 7  ;;  %v467_v59 = vrot.slane %v3086_v40, 7  ;;  %v392_v61 = vmul.f32 %v2991_v3, %v353_v17  ;;  %v946_v21 = vld [vmem:[%s4499_s1 + $0xa0] sm:$0xff] }
  0x33   : > { %2733 = vmatprep.subr.bf16.mxu0 %v2921_v4  ;;  %v3425_v57 = vadd.f32 %v3047_v18, %v390_v38  ;;  %v2695_v63 = vpack.c.bf16 %v2538_v37, %v2537_v23  ;;  %v3440_v20 = vadd.f32 %v3047_v18, %v391_v50  ;;  %v3444_v40 = vpack.c.bf16 %v945_v47, %v944_v46  ;;  %v947_v23 = vld [vmem:[%s4499_s1 + $0xa8] sm:$0xff] }
  0x34   : > { %2693 = vmatpush1.bf16.msra.mxu1 %v2692_v0  ;;  %v604_v7 = vsel %vm562_vm1, %v602_v10, %v603_v49  ;;  %v656_v8 = vsel %vm562_vm1, %v603_v49, 0.0  ;;  %v3452_v10 = vsel %vm465_vm2, %v4507_v58, %v467_v59  ;;  %v3455_v17 = vadd.f32 %v3047_v18, %v392_v61 }
  0x35   : > { %2694 = vmatprep.subr.bf16.mxu1 %v2921_v4  ;;  %851 = vst.msk [vmem:[#allocation2 + $0x1c8] sm:$0xff] %vm755_vm0, %v604_v7  ;;  %853 = vst.msk [vmem:[#allocation2 + $0x1d8] sm:$0xff] %vm755_vm0, %v656_v8  ;;  %v605_v0 = vrot.slane %v3425_v57, 1  ;;  %691 = vrot.lane.b32.xlu0 %v3230_v1, %s2923_s23  ;;  %v606_v37 = vrot.slane %v3440_v20, 1  ;;  %v469_v38 = vrot.slane %v3089_v41, 7  ;;  %v393_v46 = vmul.f32 %v2991_v3, %v354_v62  ;;  %v3756_v41 = vld [vmem:[#allocation2 + $0x48] sm:$0xff] }
  0x36   : > { %2735 = vmatpush1.bf16.msra.mxu0 %v3400_v22  ;;  %693 = vrot.lane.b32.xlu1 %v3260_v25, %s2923_s23  ;;  %v470_v47 = vrot.slane %v3094_v43, 7  ;;  %v2698_v49 = vpack.c.bf16 %v2540_v6, %v2539_v2  ;;  %v608_v50 = vrot.slane %v3455_v17, 1  ;;  %v472_v59 = vrot.slane %v3097_v44, 7  ;;  %v949_v2 = vld [vmem:[%s4499_s1 + $0xb8] sm:$0xff] }
  0x37   : > { %2736 = vmatprep.subr.bf16.mxu0 %v2921_v4  ;;  %v473_v61 = vrot.slane %v3100_v45, 7  ;;  %v607_v7 = vsel %vm562_vm1, %v605_v0, %v606_v37  ;;  %v657_v8 = vsel %vm562_vm1, %v606_v37, 0.0  ;;  %v3478_v58 = vadd.f32 %v3047_v18, %v393_v46  ;;  %v2541_v45 = vld [vmem:[%s4499_s1 + $0x150] sm:$0xff]  ;;  %v2542_v18 = vld [vmem:[%s4499_s1 + $0x158] sm:$0xff] }
  0x38   : > { %2696 = vmatpush1.bf16.msra.mxu1 %v2695_v63  ;;  %v3483_v3 = vsel %vm465_vm2, %v469_v38, %v470_v47  ;;  %v3487_v43 = vpack.c.bf16 %v947_v23, %v946_v21  ;;  %855 = vst.msk [vmem:[#allocation2 + $0x1e8] sm:$0xff] %vm755_vm0, %v607_v7  ;;  %857 = vst.msk [vmem:[#allocation2 + $0x1f8] sm:$0xff] %vm755_vm0, %v657_v8  ;;  %v948_v63 = vld [vmem:[%s4499_s1 + $0xb0] sm:$0xff]  ;;  %v475_v0 = vrot.slane %v3112_v51, 7  ;;  %v476_v21 = vrot.slane %v3118_v56, 7 }
  0x39   : > { %2697 = vmatprep.subr.bf16.mxu1 %v2921_v4  ;;  %v3500_v62 = vsel %vm465_vm2, %v472_v59, %v473_v61  ;;  %695 = vrot.lane.b32.xlu0 %v3265_v26, %s2923_s23  ;;  %v609_v6 = vrot.slane %v3478_v58, 1  ;;  %v478_v23 = vrot.slane %v3150_v11, 7  ;;  %v479_v37 = vrot.slane %v3165_v27, 7  ;;  %v2543_v27 = vld [vmem:[%s4499_s1 + $0x160] sm:$0xff] }
  0x3a   : > { %2738 = vmatpush1.bf16.msra.mxu0 %v3444_v40  ;;  %697 = vrot.lane.b32.xlu1 %v3268_v33, %s2923_s23  ;;  %v2701_v46 = vpack.c.bf16 %v2542_v18, %v2541_v45  ;;  %v3523_v7 = vsel %vm465_vm2, %v475_v0, %v476_v21  ;;  %v3527_v56 = vpack.c.bf16 %v949_v2, %v948_v63  ;;  %v4509_v8 = vrot.slane %v3172_v28, 7  ;;  %v2612_v21 = vld [vmem:[%s4499_s1 + $0x188] sm:$0xff] }
  0x3b   : > { %2739 = vmatprep.subr.bf16.mxu0 %v2921_v4  ;;  %v610_v47 = vsel %vm562_vm1, %v608_v50, %v609_v6  ;;  %v658_v61 = vsel %vm562_vm1, %v609_v6, 0.0  ;;  %v3540_v50 = vsel %vm465_vm2, %v478_v23, %v479_v37  ;;  %v482_v45 = vrot.slane %v3175_v29, 7  ;;  %v2611_v29 = vld [vmem:[%s4499_s1 + $0x180] sm:$0xff] }
  0x3c   : > { %2699 = vmatpush1.bf16.msra.mxu1 %v2698_v49  ;;  %v2544_v49 = vld [vmem:[%s4499_s1 + $0x168] sm:$0xff]  ;;  %859 = vst.msk [vmem:[#allocation2 + $0x208] sm:$0xff] %vm755_vm0, %v610_v47  ;;  %861 = vst.msk [vmem:[#allocation2 + $0x218] sm:$0xff] %vm755_vm0, %v658_v61  ;;  %v4508_v63 = vrot.slane %v3178_v30, 7  ;;  %v485_v2 = vrot.slane %v3181_v31, 7  ;;  %v487_v37 = vrot.slane %v3189_v34, 7 }
  0x3d   : > { %2700 = vmatprep.subr.bf16.mxu1 %v2921_v4  ;;  %699 = vrot.lane.b32.xlu0 %v3271_v35, %s2923_s23  ;;  %v3552_v18 = vsel %vm465_vm2, %v4509_v8, %v482_v45  ;;  %v2704_v6 = vpack.c.bf16 %v2544_v49, %v2543_v27  ;;  %v488_v47 = vrot.slane %v3207_v55, 7  ;;  %v2545_v31 = vld [vmem:[%s4499_s1 + $0x170] sm:$0xff]  ;;  %v865_v55 = vld [vmem:[#allocation2 + $0x18] sm:$0xff]  ;;  %v490_v49 = vrot.slane %v3230_v1, 7 }
  0x3e   : > { %2741 = vmatpush1.bf16.msra.mxu0 %v3487_v43  ;;  %701 = vrot.lane.b32.xlu1 %v3274_v36, %s2923_s23  ;;  %v3575_v61 = vsel %vm465_vm2, %v4508_v63, %v485_v2  ;;  %v491_v45 = vrot.slane %v3260_v25, 7  ;;  %v2746_v2 = vpack.c.bf16 %v2612_v21, %v2611_v29  ;;  %v2613_v25 = vld [vmem:[%s4499_s1 + $0x190] sm:$0xff]  ;;  %v2615_v21 = vld [vmem:[%s4499_s1 + $0x1a0] sm:$0xff] }
  0x3f   : > { %2742 = vmatprep.subr.bf16.mxu0 %v2921_v4  ;;  %v3584_v27 = vsel %vm465_vm2, %v487_v37, %v488_v47  ;;  %v2616_v47 = vld [vmem:[%s4499_s1 + $0x1a8] sm:$0xff] }
  0x40   : > { %2702 = vmatpush1.bf16.msra.mxu1 %v2701_v46  ;;  %v2546_v46 = vld [vmem:[%s4499_s1 + $0x178] sm:$0xff]  ;;  %v3593_v8 = vsel %vm465_vm2, %v490_v49, %v491_v45  ;;  %v2619_v45 = vld [vmem:[%s4499_s1 + $0x1c0] sm:$0xff] }
  0x41   : > { %2703 = vmatprep.subr.bf16.mxu1 %v2921_v4  ;;  %703 = vrot.lane.b32.xlu0 %v3331_v15, %s2923_s23  ;;  %v2707_v63 = vpack.c.bf16 %v2546_v46, %v2545_v31  ;;  %v2617_v46 = vld [vmem:[%s4499_s1 + $0x1b0] sm:$0xff] }
  0x42   : > { %2744 = vmatpush1.bf16.msra.mxu0 %v3527_v56  ;;  %705 = vrot.lane.b32.xlu1 %v3348_v42, %s2923_s23 }
  0x43   : > { %2745 = vmatprep.subr.bf16.mxu0 %v2921_v4 }
  0x44   : > { %2705 = vmatpush1.bf16.msra.mxu1 %v2704_v6  ;;  %v2614_v6 = vld [vmem:[%s4499_s1 + $0x198] sm:$0xff] }
  0x45   : > { %1521 = vmatmul.mubr.f32.vlgmr.msra.gmra.mrb[0].mxu0 %v2922_v13  ;;  %2706 = vmatprep.subr.bf16.mxu1 %v2921_v4  ;;  %v2749_v29 = vpack.c.bf16 %v2614_v6, %v2613_v25  ;;  %v496_v25 = vrot.slane %v3271_v35, 7  ;;  %v497_v6 = vrot.slane %v3274_v36, 7  ;;  %v2623_v36 = vld [vmem:[%s4499_s1 + $0x1e0] sm:$0xff] }
  0x46   : > { %2580 = vmatprep.mubr.msk.f32.mxu0 %vm755_vm0, %v865_v55  ;;  %707 = vrot.lane.b32.xlu0 %v3360_v52, %s2923_s23  ;;  %v2618_v55 = vld [vmem:[%s4499_s1 + $0x1b8] sm:$0xff] }
  0x47   : > { %709 = vrot.lane.b32.xlu1 %v3365_v54, %s2923_s23  ;;  %2747 = vmatpush1.bf16.msra.mxu0 %v2746_v2  ;;  %v2620_v2 = vld [vmem:[%s4499_s1 + $0x1c8] sm:$0xff] }
  0x48   : > { %2708 = vmatpush1.bf16.msra.mxu1 %v2707_v63  ;;  %v494_v63 = vrot.slane %v3268_v33, 7  ;;  %2748 = vmatprep.subr.bf16.mxu0 %v2921_v4  ;;  %v2755_v33 = vpack.c.bf16 %v2618_v55, %v2617_v46  ;;  %v2624_v46 = vld [vmem:[%s4499_s1 + $0x1e8] sm:$0xff]  ;;  %v499_v55 = vrot.slane %v3331_v15, 7 }
  0x49   : > { %1526 = vmatmul.mubr.f32.gmra.mrb[2].mxu0 %v2922_v13  ;;  %2781 = vmatprep.subr.bf16.mxu1 %v2921_v4  ;;  %v493_v13 = vrot.slane %v3265_v26, 7 }
  0x4a   : > { %2581 = vmatprep.mubr.msk.f32.mxu0 %vm755_vm0, %v3240_v9  ;;  %711 = vrot.lane.b32.xlu0 %v3379_v60, %s2923_s23  ;;  %v2752_v9 = vpack.c.bf16 %v2616_v47, %v2615_v21  ;;  %v3656_v21 = vsel %vm465_vm2, %v496_v25, %v497_v6  ;;  %v2621_v47 = vld [vmem:[%s4499_s1 + $0x1d0] sm:$0xff] }
  0x4b   : > { %713 = vrot.lane.b32.xlu1 %v3391_v12, %s2923_s23  ;;  %2750 = vmatpush1.bf16.msra.mxu0 %v2749_v29  ;;  %v3627_v31 = vsel %vm465_vm2, %v493_v13, %v494_v63  ;;  %v2758_v29 = vpack.c.bf16 %v2620_v2, %v2619_v45  ;;  %v2622_v63 = vld [vmem:[%s4499_s1 + $0x1d8] sm:$0xff]  ;;  %v2764_v45 = vpack.c.bf16 %v2624_v46, %v2623_v36  ;;  %v2625_v6 = vld [vmem:[%s4499_s1 + $0x1f0] sm:$0xff]  ;;  %v503_v36 = vrot.slane %v3365_v54, 7  ;;  %v2631_v54 = vld [vmem:[%s4499_s1 + $0x220] sm:$0xff] }
  0x4c   : > { %2751 = vmatprep.subr.bf16.mxu0 %v2921_v4 }
  0x4e   : > { %715 = vrot.lane.b32.xlu0 %v3425_v57, %s2923_s23 }
  0x4f   : > { %717 = vrot.lane.b32.xlu1 %v3440_v20, %s2923_s23  ;;  %2753 = vmatpush1.bf16.msra.mxu0 %v2752_v9  ;;  %v2761_v9 = vpack.c.bf16 %v2622_v63, %v2621_v47  ;;  %v2628_v63 = vld [vmem:[%s4499_s1 + $0x208] sm:$0xff] }
  0x50   : > { %2754 = vmatprep.subr.bf16.mxu0 %v2921_v4 }
  0x52   : > { %719 = vrot.lane.b32.xlu0 %v3455_v17, %s2923_s23 }
  0x53   : > { %721 = vrot.lane.b32.xlu1 %v3478_v58, %s2923_s23  ;;  %2756 = vmatpush1.bf16.msra.mxu0 %v2755_v33  ;;  %v500_v33 = vrot.slane %v3348_v42, 7  ;;  %v2627_v42 = vld [vmem:[%s4499_s1 + $0x200] sm:$0xff] }
  0x54   : > { %2757 = vmatprep.subr.bf16.mxu0 %v2921_v4  ;;  %v2770_v46 = vpack.c.bf16 %v2628_v63, %v2627_v42  ;;  %v4512_v42 = vrot.slane %v3379_v60, 7  ;;  %v506_v63 = vrot.slane %v3391_v12, 7  ;;  %v4511_v12 = vrot.slane %v3425_v57, 7 }
  0x55   : > { %v3677_v2 = vsel %vm465_vm2, %v499_v55, %v500_v33 }
  0x57   : > { %2759 = vmatpush1.bf16.msra.mxu0 %v2758_v29  ;;  %v2626_v29 = vld [vmem:[%s4499_s1 + $0x1f8] sm:$0xff] }
  0x58   : > { %2760 = vmatprep.subr.bf16.mxu0 %v2921_v4  ;;  %v2767_v47 = vpack.c.bf16 %v2626_v29, %v2625_v6  ;;  %v2630_v6 = vld [vmem:[%s4499_s1 + $0x218] sm:$0xff] }
  0x5b   : > { %2762 = vmatpush1.bf16.msra.mxu0 %v2761_v9  ;;  %v4510_v9 = vrot.slane %v3360_v52, 7 }
  0x5c   : > { %2763 = vmatprep.subr.bf16.mxu0 %v2921_v4 }
  0x5d   : > { %v3698_v33 = vsel %vm465_vm2, %v4510_v9, %v503_v36 }
  0x5f   : > { %2765 = vmatpush1.bf16.msra.mxu0 %v2764_v45  ;;  %v2629_v45 = vld [vmem:[%s4499_s1 + $0x210] sm:$0xff] }
  0x60   : > { %2766 = vmatprep.subr.bf16.mxu0 %v2921_v4  ;;  %v2773_v29 = vpack.c.bf16 %v2630_v6, %v2629_v45  ;;  %v2633_v45 = vld [vmem:[%s4499_s1 + $0x230] sm:$0xff]  ;;  %v2634_v6 = vld [vmem:[%s4499_s1 + $0x238] sm:$0xff] }
  0x61   : > { %v2779_v9 = vpack.c.bf16 %v2634_v6, %v2633_v45  ;;  %v4513_v45 = vrot.slane %v3083_v39, 7 }
  0x63   : > { %2768 = vmatpush1.bf16.msra.mxu0 %v2767_v47  ;;  %v2632_v47 = vld [vmem:[%s4499_s1 + $0x228] sm:$0xff]  ;;  %v546_v6 = vsel %vm465_vm2, 0.0, %v4513_v45 }
  0x64   : > { %2769 = vmatprep.subr.bf16.mxu0 %v2921_v4  ;;  %v2776_v36 = vpack.c.bf16 %v2632_v47, %v2631_v54  ;;  %v511_v47 = vrot.slane %v3455_v17, 7  ;;  %v4042_v17 = vld [vmem:[#allocation2 + $0x138] sm:$0xff] }
  0x67   : > { %2771 = vmatpush1.bf16.msra.mxu0 %v2770_v46  ;;  %v3719_v46 = vsel %vm465_vm2, %v4512_v42, %v506_v63  ;;  %v512_v63 = vrot.slane %v3478_v58, 7 }
  0x68   : > { %2772 = vmatprep.subr.bf16.mxu0 %v2921_v4 }
  0x6b   : > { %2774 = vmatpush1.bf16.msra.mxu0 %v2773_v29  ;;  %v509_v29 = vrot.slane %v3440_v20, 7  ;;  %v547_v20 = vsel %vm465_vm2, 0.0, %v469_v38 }
  0x6c   : > { %2775 = vmatprep.subr.bf16.mxu0 %v2921_v4 }
  0x6d   : > { %v3734_v54 = vsel %vm465_vm2, %v4511_v12, %v509_v29  ;;  %v953_v12 = vld [vmem:[#allocation2 + $0x38] sm:$0xff] }
  0x6f   : > { %2777 = vmatpush1.bf16.msra.mxu0 %v2776_v36  ;;  %v3741_v36 = vsel %vm465_vm2, %v511_v47, %v512_v63 }
  0x70   : > { %2778 = vmatprep.subr.bf16.mxu0 %v2921_v4 }
  0x73   : > { %2780 = vmatpush1.bf16.msra.mxu0 %v2779_v9 }
  0x87   : > { %v660_v9 = vpop.permute.xlu0 %659  ;;  %v664_v29 = vpop.permute.xlu1 %663 }
  0x88   : > { %v756_v42 = vsel %vm755_vm0, %v546_v6, %v660_v9  ;;  %v3751_v58 = vsel %vm755_vm0, %v547_v20, %v664_v29  ;;  %v3772_v6 = vld [vmem:[#allocation2 + $0x58] sm:$0xff] }
  0x89   : > { %1200 = vmatmul.mubr.f32.vlgmr.msra.gmra.mrb[0].mxu1 %v756_v42  ;;  %1531 = vmatmul.mubr.f32.gmra.mrb[4].mxu0 %v756_v42 }
  0x8a   : > { %2793 = vmatpush1.bf16.msra.mxu1 %v2994_v5  ;;  %2548 = vmatprep.mubr.msk.f32.mxu1 %vm755_vm0, %v953_v12  ;;  %v548_v5 = vsel %vm465_vm2, 0.0, %v472_v59  ;;  %v549_v59 = vsel %vm465_vm2, 0.0, %v475_v0  ;;  %v550_v0 = vsel %vm465_vm2, 0.0, %v478_v23  ;;  %v4514_v23 = vrot.slane %v3172_v28, 7 }
  0x8b   : > { %v662_v39 = vpop.permute.xlu0 %661  ;;  %v666_v63 = vpop.permute.xlu1 %665  ;;  %2582 = vmatprep.mubr.msk.f32.mxu0 %vm755_vm0, %v953_v12  ;;  %2782 = vmatprep.subr.bf16.mxu1 %v2921_v4 }
  0x8c   : > { %v757_v38 = vsel %vm755_vm0, %v3452_v10, %v662_v39  ;;  %v3763_v45 = vsel %vm755_vm0, %v3483_v3, %v666_v63  ;;  %v3792_v3 = vld [vmem:[#allocation2 + $0x68] sm:$0xff]  ;;  %v551_v39 = vsel %vm465_vm2, 0.0, %v4514_v23 }
  0x8d   : > { %1205 = vmatmul.mubr.f32.gmra.mrb[2].mxu1 %v757_v38  ;;  %1536 = vmatmul.mubr.f32.gmra.mrb[6].mxu0 %v757_v38 }
  0x8e   : > { %2549 = vmatprep.mubr.msk.f32.mxu1 %vm755_vm0, %v3756_v41  ;;  %2583 = vmatprep.mubr.msk.f32.mxu0 %vm755_vm0, %v3756_v41 }
  0x8f   : > { %v668_v42 = vpop.permute.xlu0 %667  ;;  %v670_v12 = vpop.permute.xlu1 %669  ;;  %2794 = vmatpush1.bf16.msra.mxu1 %v3026_v14 }
  0x90   : > { %v3776_v10 = vsel %vm755_vm0, %v548_v5, %v668_v42  ;;  %v3780_v44 = vsel %vm755_vm0, %v3500_v62, %v670_v12  ;;  %2783 = vmatprep.subr.bf16.mxu1 %v2921_v4  ;;  %v4515_v5 = vrot.slane %v3178_v30, 7 }
  0x91   : > { %1210 = vmatmul.mubr.f32.gmra.mrb[4].mxu1 %v3751_v58  ;;  %1541 = vmatmul.mubr.f32.gmra.mrb[8].mxu0 %v3751_v58 }
  0x92   : > { %2550 = vmatprep.mubr.msk.f32.mxu1 %vm755_vm0, %v3772_v6  ;;  %2584 = vmatprep.mubr.msk.f32.mxu0 %vm755_vm0, %v3772_v6  ;;  %v552_v42 = vsel %vm465_vm2, 0.0, %v4515_v5 }
  0x93   : > { %v672_v14 = vpop.permute.xlu0 %671  ;;  %2795 = vmatpush1.bf16.msra.mxu1 %v3063_v24  ;;  %v3812_v24 = vld [vmem:[#allocation2 + $0x78] sm:$0xff] }
  0x94   : > { %v674_v62 = vpop.permute.xlu1 %673  ;;  %v3796_v20 = vsel %vm755_vm0, %v549_v59, %v672_v14  ;;  %2784 = vmatprep.subr.bf16.mxu1 %v2921_v4  ;;  %v553_v14 = vsel %vm465_vm2, 0.0, %v487_v37  ;;  %v554_v37 = vsel %vm465_vm2, 0.0, %v490_v49  ;;  %v555_v49 = vsel %vm465_vm2, 0.0, %v493_v13 }
  0x95   : > { %v3800_v51 = vsel %vm755_vm0, %v3523_v7, %v674_v62  ;;  %1215 = vmatmul.mubr.f32.gmra.mrb[6].mxu1 %v3763_v45  ;;  %1546 = vmatmul.mubr.f32.gmra.mrb[10].mxu0 %v3763_v45  ;;  %v556_v13 = vsel %vm465_vm2, 0.0, %v496_v25  ;;  %v557_v25 = vsel %vm465_vm2, 0.0, %v499_v55  ;;  %v4516_v55 = vrot.slane %v3360_v52, 7 }
  0x96   : > { %2551 = vmatprep.mubr.msk.f32.mxu1 %vm755_vm0, %v3792_v3  ;;  %2585 = vmatprep.mubr.msk.f32.mxu0 %vm755_vm0, %v3792_v3 }
  0x97   : > { %v676_v7 = vpop.permute.xlu0 %675  ;;  %2796 = vmatpush1.bf16.msra.mxu1 %v3072_v32  ;;  %v3832_v32 = vld [vmem:[#allocation2 + $0x88] sm:$0xff] }
  0x98   : > { %v678_v9 = vpop.permute.xlu1 %677  ;;  %v3816_v29 = vsel %vm755_vm0, %v550_v0, %v676_v7  ;;  %2785 = vmatprep.subr.bf16.mxu1 %v2921_v4 }
  0x99   : > { %v3820_v11 = vsel %vm755_vm0, %v3540_v50, %v678_v9  ;;  %1220 = vmatmul.mubr.f32.gmra.mrb[8].mxu1 %v3776_v10  ;;  %1551 = vmatmul.mubr.f32.gmra.mrb[12].mxu0 %v3776_v10 }
  0x9a   : > { %2552 = vmatprep.mubr.msk.f32.mxu1 %vm755_vm0, %v3812_v24  ;;  %2586 = vmatprep.mubr.msk.f32.mxu0 %vm755_vm0, %v3812_v24 }
  0x9b   : > { %v680_v50 = vpop.permute.xlu0 %679  ;;  %2797 = vmatpush1.bf16.msra.mxu1 %v3245_v16  ;;  %v3852_v16 = vld [vmem:[#allocation2 + $0x98] sm:$0xff] }
  0x9c   : > { %v682_v63 = vpop.permute.xlu1 %681  ;;  %v3836_v38 = vsel %vm755_vm0, %v551_v39, %v680_v50  ;;  %2786 = vmatprep.subr.bf16.mxu1 %v2921_v4 }
  0x9d   : > { %v3840_v28 = vsel %vm755_vm0, %v3552_v18, %v682_v63  ;;  %1225 = vmatmul.mubr.f32.gmra.mrb[10].mxu1 %v3780_v44  ;;  %1556 = vmatmul.mubr.f32.gmra.mrb[14].mxu0 %v3780_v44 }
  0x9e   : > { %2553 = vmatprep.mubr.msk.f32.mxu1 %vm755_vm0, %v3832_v32  ;;  %2587 = vmatprep.mubr.msk.f32.mxu0 %vm755_vm0, %v3832_v32 }
  0x9f   : > { %v684_v18 = vpop.permute.xlu0 %683  ;;  %2798 = vmatpush1.bf16.msra.mxu1 %v3289_v48  ;;  %v3872_v48 = vld [vmem:[#allocation2 + $0xa8] sm:$0xff] }
  0xa0   : > { %v686_v12 = vpop.permute.xlu1 %685  ;;  %v3856_v59 = vsel %vm755_vm0, %v552_v42, %v684_v18  ;;  %2787 = vmatprep.subr.bf16.mxu1 %v2921_v4  ;;  %v558_v18 = vsel %vm465_vm2, 0.0, %v4516_v55 }
  0xa1   : > { %v3860_v30 = vsel %vm755_vm0, %v3575_v61, %v686_v12  ;;  %1230 = vmatmul.mubr.f32.gmra.mrb[12].mxu1 %v3796_v20  ;;  %1561 = vmatmul.mubr.f32.gmra.mrb[16].mxu0 %v3796_v20 }
  0xa2   : > { %2554 = vmatprep.mubr.msk.f32.mxu1 %vm755_vm0, %v3852_v16  ;;  %2588 = vmatprep.mubr.msk.f32.mxu0 %vm755_vm0, %v3852_v16 }
  0xa3   : > { %v688_v61 = vpop.permute.xlu0 %687  ;;  %2799 = vmatpush1.bf16.msra.mxu1 %v3334_v19  ;;  %v3892_v19 = vld [vmem:[#allocation2 + $0xb8] sm:$0xff] }
  0xa4   : > { %v690_v62 = vpop.permute.xlu1 %689  ;;  %v3876_v0 = vsel %vm755_vm0, %v553_v14, %v688_v61  ;;  %2788 = vmatprep.subr.bf16.mxu1 %v2921_v4  ;;  %v4517_v14 = vrot.slane %v3379_v60, 7  ;;  %v4518_v60 = vrot.slane %v3425_v57, 7  ;;  %v561_v57 = vsel %vm465_vm2, 0.0, %v511_v47  ;;  %v4050_v47 = vld [vmem:[#allocation2 + $0x148] sm:$0xff] }
  0xa5   : > { %v3880_v34 = vsel %vm755_vm0, %v3584_v27, %v690_v62  ;;  %1235 = vmatmul.mubr.f32.gmra.mrb[14].mxu1 %v3800_v51  ;;  %1566 = vmatmul.mubr.f32.gmra.mrb[18].mxu0 %v3800_v51 }
  0xa6   : > { %2555 = vmatprep.mubr.msk.f32.mxu1 %vm755_vm0, %v3872_v48  ;;  %2589 = vmatprep.mubr.msk.f32.mxu0 %vm755_vm0, %v3872_v48  ;;  %v559_v61 = vsel %vm465_vm2, 0.0, %v4517_v14 }
  0xa7   : > { %v692_v27 = vpop.permute.xlu0 %691  ;;  %2800 = vmatpush1.bf16.msra.mxu1 %v3362_v53  ;;  %v3912_v53 = vld [vmem:[#allocation2 + $0xc8] sm:$0xff] }
  0xa8   : > { %v694_v7 = vpop.permute.xlu1 %693  ;;  %v3896_v9 = vsel %vm755_vm0, %v554_v37, %v692_v27  ;;  %2789 = vmatprep.subr.bf16.mxu1 %v2921_v4 }
  0xa9   : > { %v3900_v1 = vsel %vm755_vm0, %v3593_v8, %v694_v7  ;;  %1240 = vmatmul.mubr.f32.gmra.mrb[16].mxu1 %v3816_v29  ;;  %1571 = vmatmul.mubr.f32.gmra.mrb[20].mxu0 %v3816_v29  ;;  %v560_v7 = vsel %vm465_vm2, 0.0, %v4518_v60 }
  0xaa   : > { %2556 = vmatprep.mubr.msk.f32.mxu1 %vm755_vm0, %v3892_v19  ;;  %2590 = vmatprep.mubr.msk.f32.mxu0 %vm755_vm0, %v3892_v19 }
  0xab   : > { %v696_v8 = vpop.permute.xlu0 %695  ;;  %2801 = vmatpush1.bf16.msra.mxu1 %v3400_v22  ;;  %v3932_v22 = vld [vmem:[#allocation2 + $0xd8] sm:$0xff] }
  0xac   : > { %v698_v23 = vpop.permute.xlu1 %697  ;;  %v3916_v39 = vsel %vm755_vm0, %v555_v49, %v696_v8  ;;  %2790 = vmatprep.subr.bf16.mxu1 %v2921_v4  ;;  %v4009_v49 = vld [vmem:[#allocation2 + $0x118] sm:$0xff] }
  0xad   : > { %v3920_v26 = vsel %vm755_vm0, %v3627_v31, %v698_v23  ;;  %1245 = vmatmul.mubr.f32.gmra.mrb[18].mxu1 %v3820_v11  ;;  %1576 = vmatmul.mubr.f32.gmra.mrb[22].mxu0 %v3820_v11 }
  0xae   : > { %2557 = vmatprep.mubr.msk.f32.mxu1 %vm755_vm0, %v3912_v53  ;;  %2591 = vmatprep.mubr.msk.f32.mxu0 %vm755_vm0, %v3912_v53 }
  0xaf   : > { %v700_v31 = vpop.permute.xlu0 %699  ;;  %2802 = vmatpush1.bf16.msra.mxu1 %v3444_v40  ;;  %v3952_v40 = vld [vmem:[#allocation2 + $0xe8] sm:$0xff] }
  0xb0   : > { %v702_v50 = vpop.permute.xlu1 %701  ;;  %v3936_v63 = vsel %vm755_vm0, %v556_v13, %v700_v31  ;;  %2791 = vmatprep.subr.bf16.mxu1 %v2921_v4 }
  0xb1   : > { %v3940_v35 = vsel %vm755_vm0, %v3656_v21, %v702_v50  ;;  %1250 = vmatmul.mubr.f32.gmra.mrb[20].mxu1 %v3836_v38  ;;  %1581 = vmatmul.mubr.f32.gmra.mrb[24].mxu0 %v3836_v38 }
  0xb2   : > { %2558 = vmatprep.mubr.msk.f32.mxu1 %vm755_vm0, %v3932_v22  ;;  %2592 = vmatprep.mubr.msk.f32.mxu0 %vm755_vm0, %v3932_v22 }
  0xb3   : > { %v704_v21 = vpop.permute.xlu0 %703  ;;  %2803 = vmatpush1.bf16.msra.mxu1 %v3487_v43  ;;  %v3972_v43 = vld [vmem:[#allocation2 + $0xf8] sm:$0xff] }
  0xb4   : > { %v706_v5 = vpop.permute.xlu1 %705  ;;  %v3956_v42 = vsel %vm755_vm0, %v557_v25, %v704_v21  ;;  %2792 = vmatprep.subr.bf16.mxu1 %v2921_v4 }
  0xb5   : > { %v3960_v15 = vsel %vm755_vm0, %v3677_v2, %v706_v5  ;;  %1255 = vmatmul.mubr.f32.gmra.mrb[22].mxu1 %v3840_v28  ;;  %1586 = vmatmul.mubr.f32.gmra.mrb[26].mxu0 %v3840_v28 }
  0xb6   : > { %2559 = vmatprep.mubr.msk.f32.mxu1 %vm755_vm0, %v3952_v40  ;;  %2593 = vmatprep.mubr.msk.f32.mxu0 %vm755_vm0, %v3952_v40 }
  0xb7   : > { %2804 = vmatpush1.bf16.msra.mxu1 %v3527_v56  ;;  %v3991_v56 = vld [vmem:[#allocation2 + $0x108] sm:$0xff] }
  0xb8   : > { %v708_v2 = vpop.permute.xlu0 %707 }
  0xb9   : > { %v710_v12 = vpop.permute.xlu1 %709  ;;  %v3976_v4 = vsel %vm755_vm0, %v558_v18, %v708_v2  ;;  %1260 = vmatmul.mubr.f32.gmra.mrb[24].mxu1 %v3856_v59  ;;  %1591 = vmatmul.mubr.f32.gmra.mrb[28].mxu0 %v3856_v59 }
  0xba   : > { %v3980_v52 = vsel %vm755_vm0, %v3698_v33, %v710_v12  ;;  %2560 = vmatprep.mubr.msk.f32.mxu1 %vm755_vm0, %v3972_v43  ;;  %2594 = vmatprep.mubr.msk.f32.mxu0 %vm755_vm0, %v3972_v43 }
  0xbc   : > { %v712_v62 = vpop.permute.xlu0 %711 }
  0xbd   : > { %v714_v37 = vpop.permute.xlu1 %713  ;;  %v3994_v33 = vsel %vm755_vm0, %v559_v61, %v712_v62  ;;  %1265 = vmatmul.mubr.f32.gmra.mrb[26].mxu1 %v3860_v30  ;;  %1596 = vmatmul.mubr.f32.gmra.mrb[30].mxu0 %v3860_v30 }
  0xbe   : > { %v3998_v27 = vsel %vm755_vm0, %v3719_v46, %v714_v37  ;;  %2561 = vmatprep.mubr.msk.f32.mxu1 %vm755_vm0, %v3991_v56  ;;  %2635 = vmatprep.mubr.msk.f32.mxu0 %vm755_vm0, %v3756_v41  ;;  %v4027_v41 = vld [vmem:[#allocation2 + $0x128] sm:$0xff]  ;;  %v4267_v37 = vld [vmem:[%s4502_s4] ss:$0 sm:$0xff] }
  0xc0   : > { %v716_v8 = vpop.permute.xlu0 %715 }
  0xc1   : > { %v718_v23 = vpop.permute.xlu1 %717  ;;  %v4012_v46 = vsel %vm755_vm0, %v560_v7, %v716_v8  ;;  %1270 = vmatmul.mubr.f32.gmra.mrb[28].mxu1 %v3876_v0  ;;  %1932 = vmatmul.mubr.f32.vlgmr.msra.gmra.mrb[0].mxu0 %v3751_v58  ;;  %v4272_v7 = vld [vmem:[%s4503_s5] ss:$0 sm:$0xff] }
  0xc2   : > { %v4016_v13 = vsel %vm755_vm0, %v3734_v54, %v718_v23  ;;  %2562 = vmatprep.mubr.msk.f32.mxu1 %vm755_vm0, %v4009_v49  ;;  %2636 = vmatprep.mubr.msk.f32.mxu0 %vm755_vm0, %v3772_v6  ;;  %v4074_v6 = vld [vmem:[#allocation2 + $0x178] sm:$0xff] }
  0xc4   : > { %v720_v31 = vpop.permute.xlu0 %719 }
  0xc5   : > { %v722_v50 = vpop.permute.xlu1 %721  ;;  %v4030_v54 = vsel %vm755_vm0, %v561_v57, %v720_v31  ;;  %1275 = vmatmul.mubr.f32.gmra.mrb[30].mxu1 %v3880_v34  ;;  %1937 = vmatmul.mubr.f32.gmra.mrb[2].mxu0 %v3763_v45  ;;  %v4066_v45 = vld [vmem:[#allocation2 + $0x168] sm:$0xff] }
  0xc6   : > { %v4034_v58 = vsel %vm755_vm0, %v3741_v36, %v722_v50  ;;  %2563 = vmatprep.mubr.msk.f32.mxu1 %vm755_vm0, %v4027_v41  ;;  %2637 = vmatprep.mubr.msk.f32.mxu0 %vm755_vm0, %v3792_v3  ;;  %v4058_v36 = vld [vmem:[#allocation2 + $0x158] sm:$0xff]  ;;  %v4098_v3 = vld [vmem:[#allocation2 + $0x1a8] sm:$0xff] }
  0xc9   : > { %1280 = vmatmul.mubr.f32.gmra.mrb[32].mxu1 %v3896_v9  ;;  %1942 = vmatmul.mubr.f32.gmra.mrb[4].mxu0 %v3776_v10  ;;  %v4082_v10 = vld [vmem:[#allocation2 + $0x188] sm:$0xff] }
  0xca   : > { %2564 = vmatprep.mubr.msk.f32.mxu1 %vm755_vm0, %v4042_v17  ;;  %2638 = vmatprep.mubr.msk.f32.mxu0 %vm755_vm0, %v3812_v24  ;;  %v4122_v24 = vld [vmem:[#allocation2 + $0x1d8] sm:$0xff] }
  0xcd   : > { %1285 = vmatmul.mubr.f32.gmra.mrb[34].mxu1 %v3900_v1  ;;  %1947 = vmatmul.mubr.f32.gmra.mrb[6].mxu0 %v3780_v44  ;;  %v4090_v44 = vld [vmem:[#allocation2 + $0x198] sm:$0xff] }
  0xce   : > { %2565 = vmatprep.mubr.msk.f32.mxu1 %vm755_vm0, %v4050_v47  ;;  %2639 = vmatprep.mubr.msk.f32.mxu0 %vm755_vm0, %v3832_v32  ;;  %v1011_v32 = vld [vmem:[#allocation2 + $0x208] sm:$0xff] }
  0xd1   : > { %1290 = vmatmul.mubr.f32.gmra.mrb[36].mxu1 %v3916_v39  ;;  %1952 = vmatmul.mubr.f32.gmra.mrb[8].mxu0 %v3796_v20  ;;  %v4106_v20 = vld [vmem:[#allocation2 + $0x1b8] sm:$0xff] }
  0xd2   : > { %2566 = vmatprep.mubr.msk.f32.mxu1 %vm755_vm0, %v4058_v36  ;;  %2640 = vmatprep.mubr.msk.f32.mxu0 %vm755_vm0, %v3852_v16  ;;  %v1745_v16 = vld [vmem:[#allocation2 + $0x238] sm:$0xff] }
  0xd5   : > { %1295 = vmatmul.mubr.f32.gmra.mrb[38].mxu1 %v3920_v26  ;;  %1957 = vmatmul.mubr.f32.gmra.mrb[10].mxu0 %v3800_v51  ;;  %v4114_v51 = vld [vmem:[#allocation2 + $0x1c8] sm:$0xff] }
  0xd6   : > { %2567 = vmatprep.mubr.msk.f32.mxu1 %vm755_vm0, %v4066_v45  ;;  %2641 = vmatprep.mubr.msk.f32.mxu0 %vm755_vm0, %v3872_v48 }
  0xd9   : > { %1300 = vmatmul.mubr.f32.gmra.mrb[40].mxu1 %v3936_v63  ;;  %1962 = vmatmul.mubr.f32.gmra.mrb[12].mxu0 %v3816_v29  ;;  %v4130_v29 = vld [vmem:[#allocation2 + $0x1e8] sm:$0xff] }
  0xda   : > { %2568 = vmatprep.mubr.msk.f32.mxu1 %vm755_vm0, %v4074_v6  ;;  %2642 = vmatprep.mubr.msk.f32.mxu0 %vm755_vm0, %v3892_v19 }
  0xdd   : > { %1305 = vmatmul.mubr.f32.gmra.mrb[42].mxu1 %v3940_v35  ;;  %1967 = vmatmul.mubr.f32.gmra.mrb[14].mxu0 %v3820_v11  ;;  %v4138_v11 = vld [vmem:[#allocation2 + $0x1f8] sm:$0xff] }
  0xde   : > { %2569 = vmatprep.mubr.msk.f32.mxu1 %vm755_vm0, %v4082_v10  ;;  %2643 = vmatprep.mubr.msk.f32.mxu0 %vm755_vm0, %v3912_v53 }
  0xe1   : > { %1310 = vmatmul.mubr.f32.gmra.mrb[44].mxu1 %v3956_v42  ;;  %1972 = vmatmul.mubr.f32.gmra.mrb[16].mxu0 %v3836_v38  ;;  %v1013_v38 = vld [vmem:[#allocation2 + $0x218] sm:$0xff] }
  0xe2   : > { %2570 = vmatprep.mubr.msk.f32.mxu1 %vm755_vm0, %v4090_v44  ;;  %2644 = vmatprep.mubr.msk.f32.mxu0 %vm755_vm0, %v3932_v22 }
  0xe5   : > { %1315 = vmatmul.mubr.f32.gmra.mrb[46].mxu1 %v3960_v15  ;;  %1977 = vmatmul.mubr.f32.gmra.mrb[18].mxu0 %v3840_v28  ;;  %v1743_v28 = vld [vmem:[#allocation2 + $0x228] sm:$0xff] }
  0xe6   : > { %2571 = vmatprep.mubr.msk.f32.mxu1 %vm755_vm0, %v4098_v3  ;;  %2645 = vmatprep.mubr.msk.f32.mxu0 %vm755_vm0, %v3952_v40 }
  0xe9   : > { %1320 = vmatmul.mubr.f32.gmra.mrb[48].mxu1 %v3976_v4  ;;  %1982 = vmatmul.mubr.f32.gmra.mrb[20].mxu0 %v3856_v59  ;;  %v2912_v59 = vld [vmem:[#allocation2] sm:$0xff] }
  0xea   : > { %2572 = vmatprep.mubr.msk.f32.mxu1 %vm755_vm0, %v4106_v20  ;;  %2646 = vmatprep.mubr.msk.f32.mxu0 %vm755_vm0, %v3972_v43 }
  0xed   : > { %1325 = vmatmul.mubr.f32.gmra.mrb[50].mxu1 %v3980_v52  ;;  %1987 = vmatmul.mubr.f32.gmra.mrb[22].mxu0 %v3860_v30 }
  0xee   : > { %2573 = vmatprep.mubr.msk.f32.mxu1 %vm755_vm0, %v4114_v51  ;;  %2647 = vmatprep.mubr.msk.f32.mxu0 %vm755_vm0, %v3991_v56 }
  0xf1   : > { %1330 = vmatmul.mubr.f32.gmra.mrb[52].mxu1 %v3994_v33  ;;  %1992 = vmatmul.mubr.f32.gmra.mrb[24].mxu0 %v3876_v0 }
  0xf2   : > { %2574 = vmatprep.mubr.msk.f32.mxu1 %vm755_vm0, %v4122_v24  ;;  %2648 = vmatprep.mubr.msk.f32.mxu0 %vm755_vm0, %v4009_v49 }
  0xf5   : > { %1335 = vmatmul.mubr.f32.gmra.mrb[54].mxu1 %v3998_v27  ;;  %1997 = vmatmul.mubr.f32.gmra.mrb[26].mxu0 %v3880_v34 }
  0xf6   : > { %2575 = vmatprep.mubr.msk.f32.mxu1 %vm755_vm0, %v4130_v29  ;;  %2649 = vmatprep.mubr.msk.f32.mxu0 %vm755_vm0, %v4027_v41 }
  0xf9   : > { %1340 = vmatmul.mubr.f32.gmra.mrb[56].mxu1 %v4012_v46  ;;  %2002 = vmatmul.mubr.f32.gmra.mrb[28].mxu0 %v3896_v9 }
  0xfa   : > { %2576 = vmatprep.mubr.msk.f32.mxu1 %vm755_vm0, %v4138_v11  ;;  %2650 = vmatprep.mubr.msk.f32.mxu0 %vm755_vm0, %v4042_v17 }
  0xfd   : > { %1345 = vmatmul.mubr.f32.gmra.mrb[58].mxu1 %v4016_v13  ;;  %2007 = vmatmul.mubr.f32.gmra.mrb[30].mxu0 %v3900_v1 }
  0xfe   : > { %2577 = vmatprep.mubr.msk.f32.mxu1 %vm755_vm0, %v1011_v32  ;;  %2651 = vmatprep.mubr.msk.f32.mxu0 %vm755_vm0, %v4050_v47 }
 0x101   : > { %1350 = vmatmul.mubr.f32.gmra.mrb[60].mxu1 %v4030_v54  ;;  %2012 = vmatmul.mubr.f32.gmra.mrb[32].mxu0 %v3916_v39 }
 0x102   : > { %2578 = vmatprep.mubr.msk.f32.mxu1 %vm755_vm0, %v1013_v38  ;;  %2652 = vmatprep.mubr.msk.f32.mxu0 %vm755_vm0, %v4058_v36 }
 0x105   : > { %1355 = vmatmul.mubr.f32.gmra.mrb[62].mxu1 %v4034_v58  ;;  %2017 = vmatmul.mubr.f32.gmra.mrb[34].mxu0 %v3920_v26 }
 0x106   : > { %2595 = vmatprep.mubr.msk.f32.mxu1 %vm755_vm0, %v3991_v56  ;;  %2653 = vmatprep.mubr.msk.f32.mxu0 %vm755_vm0, %v4066_v45 }
 0x109   : > { %1601 = vmatmul.mubr.f32.vlgmr.msra.gmra.mrb[32].mxu1 %v3876_v0  ;;  %2022 = vmatmul.mubr.f32.gmra.mrb[36].mxu0 %v3936_v63 }
 0x10a   : > { %2596 = vmatprep.mubr.msk.f32.mxu1 %vm755_vm0, %v4009_v49  ;;  %2654 = vmatprep.mubr.msk.f32.mxu0 %vm755_vm0, %v4074_v6 }
 0x10d   : > { %1606 = vmatmul.mubr.f32.gmra.mrb[34].mxu1 %v3880_v34  ;;  %2027 = vmatmul.mubr.f32.gmra.mrb[38].mxu0 %v3940_v35 }
 0x10e   : > { %2597 = vmatprep.mubr.msk.f32.mxu1 %vm755_vm0, %v4027_v41  ;;  %2655 = vmatprep.mubr.msk.f32.mxu0 %vm755_vm0, %v4082_v10 }
 0x111   : > { %1611 = vmatmul.mubr.f32.gmra.mrb[36].mxu1 %v3896_v9  ;;  %2032 = vmatmul.mubr.f32.gmra.mrb[40].mxu0 %v3956_v42 }
 0x112   : > { %2598 = vmatprep.mubr.msk.f32.mxu1 %vm755_vm0, %v4042_v17  ;;  %2656 = vmatprep.mubr.msk.f32.mxu0 %vm755_vm0, %v4090_v44 }
 0x115   : > { %1616 = vmatmul.mubr.f32.gmra.mrb[38].mxu1 %v3900_v1  ;;  %2037 = vmatmul.mubr.f32.gmra.mrb[42].mxu0 %v3960_v15 }
 0x116   : > { %2599 = vmatprep.mubr.msk.f32.mxu1 %vm755_vm0, %v4050_v47  ;;  %2657 = vmatprep.mubr.msk.f32.mxu0 %vm755_vm0, %v4098_v3 }
 0x119   : > { %1621 = vmatmul.mubr.f32.gmra.mrb[40].mxu1 %v3916_v39  ;;  %2042 = vmatmul.mubr.f32.gmra.mrb[44].mxu0 %v3976_v4 }
 0x11a   : > { %2600 = vmatprep.mubr.msk.f32.mxu1 %vm755_vm0, %v4058_v36  ;;  %2658 = vmatprep.mubr.msk.f32.mxu0 %vm755_vm0, %v4106_v20 }
 0x11d   : > { %1626 = vmatmul.mubr.f32.gmra.mrb[42].mxu1 %v3920_v26  ;;  %2047 = vmatmul.mubr.f32.gmra.mrb[46].mxu0 %v3980_v52 }
 0x11e   : > { %2601 = vmatprep.mubr.msk.f32.mxu1 %vm755_vm0, %v4066_v45  ;;  %2659 = vmatprep.mubr.msk.f32.mxu0 %vm755_vm0, %v4114_v51 }
 0x121   : > { %1631 = vmatmul.mubr.f32.gmra.mrb[44].mxu1 %v3936_v63  ;;  %2052 = vmatmul.mubr.f32.gmra.mrb[48].mxu0 %v3994_v33 }
 0x122   : > { %2602 = vmatprep.mubr.msk.f32.mxu1 %vm755_vm0, %v4074_v6  ;;  %2660 = vmatprep.mubr.msk.f32.mxu0 %vm755_vm0, %v4122_v24 }
 0x125   : > { %1636 = vmatmul.mubr.f32.gmra.mrb[46].mxu1 %v3940_v35  ;;  %2057 = vmatmul.mubr.f32.gmra.mrb[50].mxu0 %v3998_v27 }
 0x126   : > { %2603 = vmatprep.mubr.msk.f32.mxu1 %vm755_vm0, %v4082_v10  ;;  %2661 = vmatprep.mubr.msk.f32.mxu0 %vm755_vm0, %v4130_v29 }
 0x129   : > { %1641 = vmatmul.mubr.f32.gmra.mrb[48].mxu1 %v3956_v42  ;;  %2062 = vmatmul.mubr.f32.gmra.mrb[52].mxu0 %v4012_v46 }
 0x12a   : > { %2604 = vmatprep.mubr.msk.f32.mxu1 %vm755_vm0, %v4090_v44  ;;  %2662 = vmatprep.mubr.msk.f32.mxu0 %vm755_vm0, %v4138_v11 }
 0x12d   : > { %1646 = vmatmul.mubr.f32.gmra.mrb[50].mxu1 %v3960_v15  ;;  %2067 = vmatmul.mubr.f32.gmra.mrb[54].mxu0 %v4016_v13 }
 0x12e   : > { %2605 = vmatprep.mubr.msk.f32.mxu1 %vm755_vm0, %v4098_v3  ;;  %2663 = vmatprep.mubr.msk.f32.mxu0 %vm755_vm0, %v1011_v32 }
 0x131   : > { %1651 = vmatmul.mubr.f32.gmra.mrb[52].mxu1 %v3976_v4  ;;  %2072 = vmatmul.mubr.f32.gmra.mrb[56].mxu0 %v4030_v54 }
 0x132   : > { %2606 = vmatprep.mubr.msk.f32.mxu1 %vm755_vm0, %v4106_v20  ;;  %2664 = vmatprep.mubr.msk.f32.mxu0 %vm755_vm0, %v1013_v38 }
 0x135   : > { %1656 = vmatmul.mubr.f32.gmra.mrb[54].mxu1 %v3980_v52  ;;  %2077 = vmatmul.mubr.f32.gmra.mrb[58].mxu0 %v4034_v58 }
 0x136   : > { %2607 = vmatprep.mubr.msk.f32.mxu1 %vm755_vm0, %v4114_v51  ;;  %2665 = vmatprep.mubr.msk.f32.mxu0 %vm755_vm0, %v1743_v28 }
 0x139   : > { %1661 = vmatmul.mubr.f32.gmra.mrb[56].mxu1 %v3994_v33  ;;  %2082 = vmatmul.mubr.f32.gmra.mrb[60].mxu0 %v2912_v59 }
 0x13a   : > { %2608 = vmatprep.mubr.msk.f32.mxu1 %vm755_vm0, %v4122_v24  ;;  %2666 = vmatprep.mubr.msk.f32.mxu0 %vm755_vm0, %v1745_v16 }
 0x13d   : > { %1666 = vmatmul.mubr.f32.gmra.mrb[58].mxu1 %v3998_v27  ;;  %2087 = vmatmul.mubr.f32.gmra.mrb[62].mxu0 %v2912_v59 }
 0x13e   : > { %2609 = vmatprep.mubr.msk.f32.mxu1 %vm755_vm0, %v4130_v29 }
 0x141   : > { %1671 = vmatmul.mubr.f32.gmra.mrb[60].mxu1 %v4012_v46 }
 0x142   : > { %2610 = vmatprep.mubr.msk.f32.mxu1 %vm755_vm0, %v4138_v11 }
 0x145   : > { %1676 = vmatmul.mubr.f32.gmra.mrb[62].mxu1 %v4016_v13 }
 0x15c   : > { %v1201_v30 = vpop.f32.mrb[0].mxu1 }
 0x15d   : > { %v1203_v48 = vpop.f32.mrb[1].mxu1 }
 0x160   : > { %v1206_v0 = vpop.f32.mrb[2].mxu1 }
 0x161   : > { %v1208_v34 = vpop.f32.mrb[3].mxu1 }
 0x164   : > { %v1211_v19 = vpop.f32.mrb[4].mxu1 }
 0x165   : > { %v1213_v9 = vpop.f32.mrb[5].mxu1 }
 0x168   : > { %v1216_v1 = vpop.f32.mrb[6].mxu1 }
 0x169   : > { %v1218_v53 = vpop.f32.mrb[7].mxu1 }
 0x16c   : > { %v4242_v39 = vpop.f32.mrb[8].mxu1 }
 0x16d   : > { %v1223_v26 = vpop.f32.mrb[9].mxu1 }
 0x170   : > { %v4244_v22 = vpop.f32.mrb[10].mxu1 }
 0x171   : > { %v1228_v63 = vpop.f32.mrb[11].mxu1 }
 0x174   : > { %v4246_v35 = vpop.f32.mrb[12].mxu1 }
 0x175   : > { %v1233_v25 = vpop.f32.mrb[13].mxu1 }
 0x178   : > { %v4248_v40 = vpop.f32.mrb[14].mxu1 }
 0x179   : > { %v1238_v21 = vpop.f32.mrb[15].mxu1 }
 0x17c   : > { %v4250_v5 = vpop.f32.mrb[16].mxu1 }
 0x17d   : > { %v1243_v42 = vpop.f32.mrb[17].mxu1 }
 0x180   : > { %v4252_v15 = vpop.f32.mrb[18].mxu1 }
 0x181   : > { %v1248_v55 = vpop.f32.mrb[19].mxu1 }
 0x184   : > { %v4254_v18 = vpop.f32.mrb[20].mxu1 }
 0x185   : > { %v1253_v43 = vpop.f32.mrb[21].mxu1 }
 0x188   : > { %v4256_v2 = vpop.f32.mrb[22].mxu1 }
 0x189   : > { %v1258_v12 = vpop.f32.mrb[23].mxu1 }
 0x18c   : > { %v4258_v4 = vpop.f32.mrb[24].mxu1 }
 0x18d   : > { %v1263_v52 = vpop.f32.mrb[25].mxu1 }
 0x190   : > { %v4260_v14 = vpop.f32.mrb[26].mxu1 }
 0x191   : > { %v1268_v61 = vpop.f32.mrb[27].mxu1 }
 0x194   : > { %v4262_v56 = vpop.f32.mrb[28].mxu1  ;;  %v1933_v62 = vpop.f32.mrb[0].mxu0 }
 0x195   : > { %v2805_v33 = vadd.f32 %v1933_v62, %v1201_v30  ;;  %v1273_v27 = vpop.f32.mrb[29].mxu1  ;;  %v1935_v60 = vpop.f32.mrb[1].mxu0 }
 0x197   : > { %v2131_v49 = vmul.f32 %v2805_v33, %v4267_v37 }
 0x198   : > { %v4282_v8 = vpop.f32.mrb[30].mxu1  ;;  %v1938_v23 = vpop.f32.mrb[2].mxu0 }
 0x199   : > { %v2170_v46 = vadd.f32 %v4272_v7, %v2131_v49  ;;  %v2806_v13 = vadd.f32 %v1938_v23, %v1206_v0  ;;  %v1278_v57 = vpop.f32.mrb[31].mxu1  ;;  %v1940_v41 = vpop.f32.mrb[3].mxu0 }
 0x19b   : > { %2202 = vst.msk [vmem:[%s4280_s16] sm:$0xff] %vm755_vm0, %v2170_v46  ;;  %v2132_v31 = vmul.f32 %v2806_v13, %v4267_v37  ;;  %v2305_v54 = vmul.f32 %v2170_v46, %v2170_v46  ;;  %v2234_v36 = vsel %vm755_vm0, %v2170_v46, 0.0 }
 0x19c   : > { %v1943_v50 = vpop.f32.mrb[4].mxu0 }
 0x19d   : > { %v2171_v58 = vadd.f32 %v4272_v7, %v2132_v31  ;;  %v2807_v17 = vadd.f32 %v1943_v50, %v1211_v19  ;;  %v1945_v47 = vpop.f32.mrb[5].mxu0  ;;  %v2337_v20 = vsel %vm755_vm0, %v2305_v54, 0.0 }
 0x19f   : > { %2203 = vst.msk [vmem:[%s4280_s16 + $0x8] sm:$0xff] %vm755_vm0, %v2171_v58  ;;  %v2235_v45 = vsel %vm755_vm0, %v2171_v58, 0.0  ;;  %v2306_v6 = vmul.f32 %v2171_v58, %v2171_v58  ;;  %v2133_v10 = vmul.f32 %v2807_v17, %v4267_v37 }
 0x1a0   : > { %v2236_v44 = vadd.f32 %v2235_v45, %v2234_v36  ;;  %v1948_v3 = vpop.f32.mrb[6].mxu0 }
 0x1a1   : > { %v2338_v51 = vsel %vm755_vm0, %v2306_v6, 0.0  ;;  %v2172_v24 = vadd.f32 %v4272_v7, %v2133_v10  ;;  %v2808_v29 = vadd.f32 %v1948_v3, %v1216_v1  ;;  %v1950_v11 = vpop.f32.mrb[7].mxu0 }
 0x1a2   : > { %v2339_v32 = vadd.f32 %v2338_v51, %v2337_v20 }
 0x1a3   : > { %2204 = vst.msk [vmem:[%s4280_s16 + $0x10] sm:$0xff] %vm755_vm0, %v2172_v24  ;;  %v2237_v38 = vsel %vm755_vm0, %v2172_v24, 0.0  ;;  %v2307_v28 = vmul.f32 %v2172_v24, %v2172_v24  ;;  %v2134_v16 = vmul.f32 %v2808_v29, %v4267_v37 }
 0x1a4   : > { %v2238_v59 = vadd.f32 %v2237_v38, %v2236_v44  ;;  %v1953_v30 = vpop.f32.mrb[8].mxu0 }
 0x1a5   : > { %v2340_v48 = vsel %vm755_vm0, %v2307_v28, 0.0  ;;  %v2173_v0 = vadd.f32 %v4272_v7, %v2134_v16  ;;  %v2809_v34 = vadd.f32 %v1953_v30, %v4242_v39  ;;  %v1955_v19 = vpop.f32.mrb[9].mxu0 }
 0x1a6   : > { %v2341_v9 = vadd.f32 %v2340_v48, %v2339_v32 }
 0x1a7   : > { %2205 = vst.msk [vmem:[%s4280_s16 + $0x18] sm:$0xff] %vm755_vm0, %v2173_v0  ;;  %v2239_v1 = vsel %vm755_vm0, %v2173_v0, 0.0  ;;  %v2308_v53 = vmul.f32 %v2173_v0, %v2173_v0  ;;  %v2135_v26 = vmul.f32 %v2809_v34, %v4267_v37 }
 0x1a8   : > { %v2240_v63 = vadd.f32 %v2239_v1, %v2238_v59  ;;  %v1958_v25 = vpop.f32.mrb[10].mxu0 }
 0x1a9   : > { %v2342_v21 = vsel %vm755_vm0, %v2308_v53, 0.0  ;;  %v2174_v42 = vadd.f32 %v4272_v7, %v2135_v26  ;;  %v2810_v55 = vadd.f32 %v1958_v25, %v4244_v22  ;;  %v1960_v43 = vpop.f32.mrb[11].mxu0 }
 0x1aa   : > { %v2343_v39 = vadd.f32 %v2342_v21, %v2341_v9 }
 0x1ab   : > { %2206 = vst.msk [vmem:[%s4280_s16 + $0x20] sm:$0xff] %vm755_vm0, %v2174_v42  ;;  %v2241_v12 = vsel %vm755_vm0, %v2174_v42, 0.0  ;;  %v2309_v52 = vmul.f32 %v2174_v42, %v2174_v42  ;;  %v2136_v61 = vmul.f32 %v2810_v55, %v4267_v37 }
 0x1ac   : > { %v2242_v62 = vadd.f32 %v2241_v12, %v2240_v63  ;;  %v1963_v33 = vpop.f32.mrb[12].mxu0 }
 0x1ad   : > { %v2344_v27 = vsel %vm755_vm0, %v2309_v52, 0.0  ;;  %v2175_v60 = vadd.f32 %v4272_v7, %v2136_v61  ;;  %v2811_v49 = vadd.f32 %v1963_v33, %v4246_v35  ;;  %v1965_v23 = vpop.f32.mrb[13].mxu0 }
 0x1ae   : > { %v2345_v22 = vadd.f32 %v2344_v27, %v2343_v39 }
 0x1af   : > { %2207 = vst.msk [vmem:[%s4280_s16 + $0x28] sm:$0xff] %vm755_vm0, %v2175_v60  ;;  %v2243_v46 = vsel %vm755_vm0, %v2175_v60, 0.0  ;;  %v2310_v13 = vmul.f32 %v2175_v60, %v2175_v60  ;;  %v2137_v57 = vmul.f32 %v2811_v49, %v4267_v37 }
 0x1b0   : > { %v2244_v41 = vadd.f32 %v2243_v46, %v2242_v62  ;;  %v1968_v31 = vpop.f32.mrb[14].mxu0 }
 0x1b1   : > { %v2346_v50 = vsel %vm755_vm0, %v2310_v13, 0.0  ;;  %v2176_v54 = vadd.f32 %v4272_v7, %v2137_v57  ;;  %v2812_v58 = vadd.f32 %v1968_v31, %v4248_v40  ;;  %v1970_v17 = vpop.f32.mrb[15].mxu0 }
 0x1b2   : > { %v2347_v35 = vadd.f32 %v2346_v50, %v2345_v22 }
 0x1b3   : > { %2208 = vst.msk [vmem:[%s4280_s16 + $0x30] sm:$0xff] %vm755_vm0, %v2176_v54  ;;  %v2245_v47 = vsel %vm755_vm0, %v2176_v54, 0.0  ;;  %v2311_v36 = vmul.f32 %v2176_v54, %v2176_v54  ;;  %v2138_v45 = vmul.f32 %v2812_v58, %v4267_v37 }
 0x1b4   : > { %v2246_v6 = vadd.f32 %v2245_v47, %v2244_v41  ;;  %v1973_v10 = vpop.f32.mrb[16].mxu0 }
 0x1b5   : > { %v2348_v44 = vsel %vm755_vm0, %v2311_v36, 0.0  ;;  %v2177_v3 = vadd.f32 %v4272_v7, %v2138_v45  ;;  %v2813_v20 = vadd.f32 %v1973_v10, %v4250_v5  ;;  %v1975_v51 = vpop.f32.mrb[17].mxu0 }
 0x1b6   : > { %v2349_v40 = vadd.f32 %v2348_v44, %v2347_v35 }
 0x1b7   : > { %2209 = vst.msk [vmem:[%s4280_s16 + $0x38] sm:$0xff] %vm755_vm0, %v2177_v3  ;;  %v2247_v24 = vsel %vm755_vm0, %v2177_v3, 0.0  ;;  %v2312_v29 = vmul.f32 %v2177_v3, %v2177_v3  ;;  %v2139_v11 = vmul.f32 %v2813_v20, %v4267_v37 }
 0x1b8   : > { %v2248_v32 = vadd.f32 %v2247_v24, %v2246_v6  ;;  %v1978_v38 = vpop.f32.mrb[18].mxu0 }
 0x1b9   : > { %v2350_v28 = vsel %vm755_vm0, %v2312_v29, 0.0  ;;  %v2178_v16 = vadd.f32 %v4272_v7, %v2139_v11  ;;  %v2814_v59 = vadd.f32 %v1978_v38, %v4252_v15  ;;  %v1980_v30 = vpop.f32.mrb[19].mxu0 }
 0x1ba   : > { %v2351_v5 = vadd.f32 %v2350_v28, %v2349_v40 }
 0x1bb   : > { %2210 = vst.msk [vmem:[%s4280_s16 + $0x40] sm:$0xff] %vm755_vm0, %v2178_v16  ;;  %v2249_v48 = vsel %vm755_vm0, %v2178_v16, 0.0  ;;  %v2313_v0 = vmul.f32 %v2178_v16, %v2178_v16  ;;  %v2140_v34 = vmul.f32 %v2814_v59, %v4267_v37 }
 0x1bc   : > { %v2250_v19 = vadd.f32 %v2249_v48, %v2248_v32  ;;  %v1983_v9 = vpop.f32.mrb[20].mxu0 }
 0x1bd   : > { %v2352_v1 = vsel %vm755_vm0, %v2313_v0, 0.0  ;;  %v2179_v53 = vadd.f32 %v4272_v7, %v2140_v34  ;;  %v2815_v26 = vadd.f32 %v1983_v9, %v4254_v18  ;;  %v1985_v63 = vpop.f32.mrb[21].mxu0 }
 0x1be   : > { %v2353_v15 = vadd.f32 %v2352_v1, %v2351_v5 }
 0x1bf   : > { %2211 = vst.msk [vmem:[%s4280_s16 + $0x48] sm:$0xff] %vm755_vm0, %v2179_v53  ;;  %v2251_v25 = vsel %vm755_vm0, %v2179_v53, 0.0  ;;  %v2314_v21 = vmul.f32 %v2179_v53, %v2179_v53  ;;  %v2141_v42 = vmul.f32 %v2815_v26, %v4267_v37 }
 0x1c0   : > { %v2252_v55 = vadd.f32 %v2251_v25, %v2250_v19  ;;  %v1988_v43 = vpop.f32.mrb[22].mxu0 }
 0x1c1   : > { %v2354_v39 = vsel %vm755_vm0, %v2314_v21, 0.0  ;;  %v2180_v12 = vadd.f32 %v4272_v7, %v2141_v42  ;;  %v2816_v52 = vadd.f32 %v1988_v43, %v4256_v2  ;;  %v1990_v61 = vpop.f32.mrb[23].mxu0 }
 0x1c2   : > { %v2355_v18 = vadd.f32 %v2354_v39, %v2353_v15 }
 0x1c3   : > { %2212 = vst.msk [vmem:[%s4280_s16 + $0x50] sm:$0xff] %vm755_vm0, %v2180_v12  ;;  %v2253_v62 = vsel %vm755_vm0, %v2180_v12, 0.0  ;;  %v2315_v33 = vmul.f32 %v2180_v12, %v2180_v12  ;;  %v2142_v27 = vmul.f32 %v2816_v52, %v4267_v37 }
 0x1c4   : > { %v2254_v60 = vadd.f32 %v2253_v62, %v2252_v55  ;;  %v1993_v49 = vpop.f32.mrb[24].mxu0 }
 0x1c5   : > { %v2356_v23 = vsel %vm755_vm0, %v2315_v33, 0.0  ;;  %v2181_v22 = vadd.f32 %v4272_v7, %v2142_v27  ;;  %v2817_v46 = vadd.f32 %v1993_v49, %v4258_v4  ;;  %v1995_v13 = vpop.f32.mrb[25].mxu0 }
 0x1c6   : > { %v2357_v2 = vadd.f32 %v2356_v23, %v2355_v18 }
 0x1c7   : > { %2213 = vst.msk [vmem:[%s4280_s16 + $0x58] sm:$0xff] %vm755_vm0, %v2181_v22  ;;  %v2255_v57 = vsel %vm755_vm0, %v2181_v22, 0.0  ;;  %v2316_v41 = vmul.f32 %v2181_v22, %v2181_v22  ;;  %v2143_v31 = vmul.f32 %v2817_v46, %v4267_v37 }
 0x1c8   : > { %v2256_v50 = vadd.f32 %v2255_v57, %v2254_v60  ;;  %v1998_v54 = vpop.f32.mrb[26].mxu0 }
 0x1c9   : > { %v2358_v58 = vsel %vm755_vm0, %v2316_v41, 0.0  ;;  %v2182_v17 = vadd.f32 %v4272_v7, %v2143_v31  ;;  %v2818_v35 = vadd.f32 %v1998_v54, %v4260_v14  ;;  %v2000_v47 = vpop.f32.mrb[27].mxu0 }
 0x1ca   : > { %v2359_v4 = vadd.f32 %v2358_v58, %v2357_v2 }
 0x1cb   : > { %2214 = vst.msk [vmem:[%s4280_s16 + $0x60] sm:$0xff] %vm755_vm0, %v2182_v17  ;;  %v2257_v36 = vsel %vm755_vm0, %v2182_v17, 0.0  ;;  %v2317_v45 = vmul.f32 %v2182_v17, %v2182_v17  ;;  %v2144_v6 = vmul.f32 %v2818_v35, %v4267_v37 }
 0x1cc   : > { %v2258_v10 = vadd.f32 %v2257_v36, %v2256_v50  ;;  %v2003_v44 = vpop.f32.mrb[28].mxu0 }
 0x1cd   : > { %v2360_v3 = vsel %vm755_vm0, %v2317_v45, 0.0  ;;  %v2183_v20 = vadd.f32 %v4272_v7, %v2144_v6  ;;  %v2819_v51 = vadd.f32 %v2003_v44, %v4262_v56  ;;  %v2005_v40 = vpop.f32.mrb[29].mxu0 }
 0x1ce   : > { %v2361_v14 = vadd.f32 %v2360_v3, %v2359_v4 }
 0x1cf   : > { %2215 = vst.msk [vmem:[%s4280_s16 + $0x68] sm:$0xff] %vm755_vm0, %v2183_v20  ;;  %v2259_v24 = vsel %vm755_vm0, %v2183_v20, 0.0  ;;  %v2318_v29 = vmul.f32 %v2183_v20, %v2183_v20  ;;  %v2145_v11 = vmul.f32 %v2819_v51, %v4267_v37 }
 0x1d0   : > { %v2260_v32 = vadd.f32 %v2259_v24, %v2258_v10  ;;  %v2008_v38 = vpop.f32.mrb[30].mxu0 }
 0x1d1   : > { %v2362_v28 = vsel %vm755_vm0, %v2318_v29, 0.0  ;;  %v2184_v16 = vadd.f32 %v4272_v7, %v2145_v11  ;;  %v2820_v59 = vadd.f32 %v2008_v38, %v4282_v8  ;;  %v2010_v30 = vpop.f32.mrb[31].mxu0 }
 0x1d2   : > { %v2363_v56 = vadd.f32 %v2362_v28, %v2361_v14 }
 0x1d3   : > { %2216 = vst.msk [vmem:[%s4280_s16 + $0x70] sm:$0xff] %vm755_vm0, %v2184_v16  ;;  %v2261_v5 = vsel %vm755_vm0, %v2184_v16, 0.0  ;;  %v2319_v48 = vmul.f32 %v2184_v16, %v2184_v16  ;;  %v2146_v0 = vmul.f32 %v2820_v59, %v4267_v37 }
 0x1d4   : > { %v2262_v34 = vadd.f32 %v2261_v5, %v2260_v32  ;;  %v2013_v19 = vpop.f32.mrb[32].mxu0 }
 0x1d5   : > { %v2364_v9 = vsel %vm755_vm0, %v2319_v48, 0.0  ;;  %v2185_v1 = vadd.f32 %v4272_v7, %v2146_v0  ;;  %v2015_v53 = vpop.f32.mrb[33].mxu0 }
 0x1d6   : > { %v2365_v26 = vadd.f32 %v2364_v9, %v2363_v56 }
 0x1d7   : > { %2217 = vst.msk [vmem:[%s4280_s16 + $0x78] sm:$0xff] %vm755_vm0, %v2185_v1  ;;  %v2263_v8 = vsel %vm755_vm0, %v2185_v1, 0.0  ;;  %v2320_v63 = vmul.f32 %v2185_v1, %v2185_v1 }
 0x1d8   : > { %v2264_v15 = vadd.f32 %v2263_v8, %v2262_v34  ;;  %v2018_v25 = vpop.f32.mrb[34].mxu0 }
 0x1d9   : > { %v2366_v21 = vsel %vm755_vm0, %v2320_v63, 0.0  ;;  %v2020_v42 = vpop.f32.mrb[35].mxu0 }
 0x1da   : > { %v2367_v55 = vadd.f32 %v2366_v21, %v2365_v26 }
 0x1dc   : > { %v1602_v43 = vpop.f32.mrb[32].mxu1  ;;  %v2023_v39 = vpop.f32.mrb[36].mxu0 }
 0x1dd   : > { %v2821_v12 = vadd.f32 %v2013_v19, %v1602_v43  ;;  %v1604_v52 = vpop.f32.mrb[33].mxu1  ;;  %v2025_v61 = vpop.f32.mrb[37].mxu0 }
 0x1df   : > { %v2147_v18 = vmul.f32 %v2821_v12, %v4267_v37 }
 0x1e0   : > { %v1607_v62 = vpop.f32.mrb[34].mxu1  ;;  %v2028_v33 = vpop.f32.mrb[38].mxu0 }
 0x1e1   : > { %v2186_v27 = vadd.f32 %v4272_v7, %v2147_v18  ;;  %v2822_v60 = vadd.f32 %v2018_v25, %v1607_v62  ;;  %v1609_v49 = vpop.f32.mrb[35].mxu1  ;;  %v2030_v23 = vpop.f32.mrb[39].mxu0 }
 0x1e3   : > { %2218 = vst.msk [vmem:[%s4280_s16 + $0x80] sm:$0xff] %vm755_vm0, %v2186_v27  ;;  %v2265_v22 = vsel %vm755_vm0, %v2186_v27, 0.0  ;;  %v2321_v46 = vmul.f32 %v2186_v27, %v2186_v27  ;;  %v2148_v13 = vmul.f32 %v2822_v60, %v4267_v37 }
 0x1e4   : > { %v2266_v2 = vadd.f32 %v2265_v22, %v2264_v15  ;;  %v1612_v57 = vpop.f32.mrb[36].mxu1  ;;  %v2033_v41 = vpop.f32.mrb[40].mxu0 }
 0x1e5   : > { %v2368_v31 = vsel %vm755_vm0, %v2321_v46, 0.0  ;;  %v2187_v50 = vadd.f32 %v4272_v7, %v2148_v13  ;;  %v2823_v54 = vadd.f32 %v2023_v39, %v1612_v57  ;;  %v1614_v58 = vpop.f32.mrb[37].mxu1  ;;  %v2035_v17 = vpop.f32.mrb[41].mxu0 }
 0x1e6   : > { %v2369_v35 = vadd.f32 %v2368_v31, %v2367_v55 }
 0x1e7   : > { %2219 = vst.msk [vmem:[%s4280_s16 + $0x88] sm:$0xff] %vm755_vm0, %v2187_v50  ;;  %v2267_v47 = vsel %vm755_vm0, %v2187_v50, 0.0  ;;  %v2322_v4 = vmul.f32 %v2187_v50, %v2187_v50  ;;  %v2149_v36 = vmul.f32 %v2823_v54, %v4267_v37 }
 0x1e8   : > { %v2268_v45 = vadd.f32 %v2267_v47, %v2266_v2  ;;  %v1617_v6 = vpop.f32.mrb[38].mxu1  ;;  %v2038_v10 = vpop.f32.mrb[42].mxu0 }
 0x1e9   : > { %v2370_v44 = vsel %vm755_vm0, %v2322_v4, 0.0  ;;  %v2188_v3 = vadd.f32 %v4272_v7, %v2149_v36  ;;  %v2824_v20 = vadd.f32 %v2028_v33, %v1617_v6  ;;  %v1619_v51 = vpop.f32.mrb[39].mxu1  ;;  %v2040_v40 = vpop.f32.mrb[43].mxu0 }
 0x1ea   : > { %v2371_v14 = vadd.f32 %v2370_v44, %v2369_v35 }
 0x1eb   : > { %2220 = vst.msk [vmem:[%s4280_s16 + $0x90] sm:$0xff] %vm755_vm0, %v2188_v3  ;;  %v2269_v24 = vsel %vm755_vm0, %v2188_v3, 0.0  ;;  %v2323_v29 = vmul.f32 %v2188_v3, %v2188_v3  ;;  %v2150_v11 = vmul.f32 %v2824_v20, %v4267_v37 }
 0x1ec   : > { %v2270_v32 = vadd.f32 %v2269_v24, %v2268_v45  ;;  %v1622_v38 = vpop.f32.mrb[40].mxu1  ;;  %v2043_v28 = vpop.f32.mrb[44].mxu0 }
 0x1ed   : > { %v2372_v16 = vsel %vm755_vm0, %v2323_v29, 0.0  ;;  %v2189_v59 = vadd.f32 %v4272_v7, %v2150_v11  ;;  %v2825_v30 = vadd.f32 %v2033_v41, %v1622_v38  ;;  %v1624_v56 = vpop.f32.mrb[41].mxu1  ;;  %v2045_v5 = vpop.f32.mrb[45].mxu0 }
 0x1ee   : > { %v2373_v48 = vadd.f32 %v2372_v16, %v2371_v14 }
 0x1ef   : > { %2221 = vst.msk [vmem:[%s4280_s16 + $0x98] sm:$0xff] %vm755_vm0, %v2189_v59  ;;  %v2271_v0 = vsel %vm755_vm0, %v2189_v59, 0.0  ;;  %v2324_v34 = vmul.f32 %v2189_v59, %v2189_v59  ;;  %v2151_v19 = vmul.f32 %v2825_v30, %v4267_v37 }
 0x1f0   : > { %v2272_v9 = vadd.f32 %v2271_v0, %v2270_v32  ;;  %v1627_v1 = vpop.f32.mrb[42].mxu1  ;;  %v2048_v53 = vpop.f32.mrb[46].mxu0 }
 0x1f1   : > { %v2374_v26 = vsel %vm755_vm0, %v2324_v34, 0.0  ;;  %v2190_v8 = vadd.f32 %v4272_v7, %v2151_v19  ;;  %v2826_v63 = vadd.f32 %v2038_v10, %v1627_v1  ;;  %v1629_v15 = vpop.f32.mrb[43].mxu1  ;;  %v2050_v25 = vpop.f32.mrb[47].mxu0 }
 0x1f2   : > { %v2375_v21 = vadd.f32 %v2374_v26, %v2373_v48 }
 0x1f3   : > { %2222 = vst.msk [vmem:[%s4280_s16 + $0xa0] sm:$0xff] %vm755_vm0, %v2190_v8  ;;  %v2273_v42 = vsel %vm755_vm0, %v2190_v8, 0.0  ;;  %v2325_v55 = vmul.f32 %v2190_v8, %v2190_v8  ;;  %v2152_v43 = vmul.f32 %v2826_v63, %v4267_v37 }
 0x1f4   : > { %v2274_v39 = vadd.f32 %v2273_v42, %v2272_v9  ;;  %v1632_v12 = vpop.f32.mrb[44].mxu1  ;;  %v2053_v52 = vpop.f32.mrb[48].mxu0 }
 0x1f5   : > { %v2376_v61 = vsel %vm755_vm0, %v2325_v55, 0.0  ;;  %v2191_v18 = vadd.f32 %v4272_v7, %v2152_v43  ;;  %v2827_v62 = vadd.f32 %v2043_v28, %v1632_v12  ;;  %v1634_v33 = vpop.f32.mrb[45].mxu1  ;;  %v2055_v27 = vpop.f32.mrb[49].mxu0 }
 0x1f6   : > { %v2377_v60 = vadd.f32 %v2376_v61, %v2375_v21 }
 0x1f7   : > { %2223 = vst.msk [vmem:[%s4280_s16 + $0xa8] sm:$0xff] %vm755_vm0, %v2191_v18  ;;  %v2275_v49 = vsel %vm755_vm0, %v2191_v18, 0.0  ;;  %v2326_v23 = vmul.f32 %v2191_v18, %v2191_v18  ;;  %v2153_v22 = vmul.f32 %v2827_v62, %v4267_v37 }
 0x1f8   : > { %v2276_v46 = vadd.f32 %v2275_v49, %v2274_v39  ;;  %v1637_v13 = vpop.f32.mrb[46].mxu1  ;;  %v2058_v2 = vpop.f32.mrb[50].mxu0 }
 0x1f9   : > { %v2378_v57 = vsel %vm755_vm0, %v2326_v23, 0.0  ;;  %v2192_v41 = vadd.f32 %v4272_v7, %v2153_v22  ;;  %v2828_v31 = vadd.f32 %v2048_v53, %v1637_v13  ;;  %v1639_v50 = vpop.f32.mrb[47].mxu1  ;;  %v2060_v54 = vpop.f32.mrb[51].mxu0 }
 0x1fa   : > { %v2379_v58 = vadd.f32 %v2378_v57, %v2377_v60 }
 0x1fb   : > { %2224 = vst.msk [vmem:[%s4280_s16 + $0xb0] sm:$0xff] %vm755_vm0, %v2192_v41  ;;  %v2277_v17 = vsel %vm755_vm0, %v2192_v41, 0.0  ;;  %v2327_v35 = vmul.f32 %v2192_v41, %v2192_v41  ;;  %v2154_v47 = vmul.f32 %v2828_v31, %v4267_v37 }
 0x1fc   : > { %v2278_v4 = vadd.f32 %v2277_v17, %v2276_v46  ;;  %v1642_v36 = vpop.f32.mrb[48].mxu1  ;;  %v2063_v45 = vpop.f32.mrb[52].mxu0 }
 0x1fd   : > { %v2380_v6 = vsel %vm755_vm0, %v2327_v35, 0.0  ;;  %v2193_v10 = vadd.f32 %v4272_v7, %v2154_v47  ;;  %v2829_v44 = vadd.f32 %v2053_v52, %v1642_v36  ;;  %v1644_v3 = vpop.f32.mrb[49].mxu1  ;;  %v2065_v20 = vpop.f32.mrb[53].mxu0 }
 0x1fe   : > { %v2381_v51 = vadd.f32 %v2380_v6, %v2379_v58 }
 0x1ff   : > { %2225 = vst.msk [vmem:[%s4280_s16 + $0xb8] sm:$0xff] %vm755_vm0, %v2193_v10  ;;  %v2279_v40 = vsel %vm755_vm0, %v2193_v10, 0.0  ;;  %v2328_v14 = vmul.f32 %v2193_v10, %v2193_v10  ;;  %v2155_v24 = vmul.f32 %v2829_v44, %v4267_v37 }
 0x200   : > { %v2280_v29 = vadd.f32 %v2279_v40, %v2278_v4  ;;  %v1647_v11 = vpop.f32.mrb[50].mxu1  ;;  %v2068_v32 = vpop.f32.mrb[54].mxu0 }
 0x201   : > { %v2382_v38 = vsel %vm755_vm0, %v2328_v14, 0.0  ;;  %v2194_v28 = vadd.f32 %v4272_v7, %v2155_v24  ;;  %v2830_v16 = vadd.f32 %v2058_v2, %v1647_v11  ;;  %v1649_v59 = vpop.f32.mrb[51].mxu1  ;;  %v2070_v30 = vpop.f32.mrb[55].mxu0 }
 0x202   : > { %v2383_v56 = vadd.f32 %v2382_v38, %v2381_v51 }
 0x203   : > { %2226 = vst.msk [vmem:[%s4280_s16 + $0xc0] sm:$0xff] %vm755_vm0, %v2194_v28  ;;  %v2281_v5 = vsel %vm755_vm0, %v2194_v28, 0.0  ;;  %v2329_v48 = vmul.f32 %v2194_v28, %v2194_v28  ;;  %v2156_v0 = vmul.f32 %v2830_v16, %v4267_v37 }
 0x204   : > { %v2282_v34 = vadd.f32 %v2281_v5, %v2280_v29  ;;  %v1652_v19 = vpop.f32.mrb[52].mxu1  ;;  %v2073_v9 = vpop.f32.mrb[56].mxu0 }
 0x205   : > { %v2384_v1 = vsel %vm755_vm0, %v2329_v48, 0.0  ;;  %v2195_v53 = vadd.f32 %v4272_v7, %v2156_v0  ;;  %v2831_v26 = vadd.f32 %v2063_v45, %v1652_v19  ;;  %v1654_v8 = vpop.f32.mrb[53].mxu1  ;;  %v2075_v63 = vpop.f32.mrb[57].mxu0 }
 0x206   : > { %v2385_v15 = vadd.f32 %v2384_v1, %v2383_v56 }
 0x207   : > { %2227 = vst.msk [vmem:[%s4280_s16 + $0xc8] sm:$0xff] %vm755_vm0, %v2195_v53  ;;  %v2283_v25 = vsel %vm755_vm0, %v2195_v53, 0.0  ;;  %v2330_v21 = vmul.f32 %v2195_v53, %v2195_v53  ;;  %v2157_v42 = vmul.f32 %v2831_v26, %v4267_v37 }
 0x208   : > { %v2284_v55 = vadd.f32 %v2283_v25, %v2282_v34  ;;  %v1657_v43 = vpop.f32.mrb[54].mxu1  ;;  %v2078_v39 = vpop.f32.mrb[58].mxu0 }
 0x209   : > { %v2386_v12 = vsel %vm755_vm0, %v2330_v21, 0.0  ;;  %v2196_v52 = vadd.f32 %v4272_v7, %v2157_v42  ;;  %v2832_v61 = vadd.f32 %v2068_v32, %v1657_v43  ;;  %v1659_v18 = vpop.f32.mrb[55].mxu1  ;;  %v2080_v62 = vpop.f32.mrb[59].mxu0 }
 0x20a   : > { %v2387_v33 = vadd.f32 %v2386_v12, %v2385_v15 }
 0x20b   : > { %2228 = vst.msk [vmem:[%s4280_s16 + $0xd0] sm:$0xff] %vm755_vm0, %v2196_v52  ;;  %v2285_v27 = vsel %vm755_vm0, %v2196_v52, 0.0  ;;  %v2331_v60 = vmul.f32 %v2196_v52, %v2196_v52  ;;  %v2158_v49 = vmul.f32 %v2832_v61, %v4267_v37 }
 0x20c   : > { %v2286_v23 = vadd.f32 %v2285_v27, %v2284_v55  ;;  %v1662_v22 = vpop.f32.mrb[56].mxu1  ;;  %v2083_v46 = vpop.f32.mrb[60].mxu0 }
 0x20d   : > { %v2388_v13 = vsel %vm755_vm0, %v2331_v60, 0.0  ;;  %v2197_v2 = vadd.f32 %v4272_v7, %v2158_v49  ;;  %v2833_v57 = vadd.f32 %v2073_v9, %v1662_v22  ;;  %v1664_v41 = vpop.f32.mrb[57].mxu1  ;;  %v2085_v31 = vpop.f32.mrb[61].mxu0 }
 0x20e   : > { %v2389_v50 = vadd.f32 %v2388_v13, %v2387_v33 }
 0x20f   : > { %2229 = vst.msk [vmem:[%s4280_s16 + $0xd8] sm:$0xff] %vm755_vm0, %v2197_v2  ;;  %v2287_v54 = vsel %vm755_vm0, %v2197_v2, 0.0  ;;  %v2332_v58 = vmul.f32 %v2197_v2, %v2197_v2  ;;  %v2159_v17 = vmul.f32 %v2833_v57, %v4267_v37 }
 0x210   : > { %v2288_v35 = vadd.f32 %v2287_v54, %v2286_v23  ;;  %v1667_v47 = vpop.f32.mrb[58].mxu1  ;;  %v2088_v4 = vpop.f32.mrb[62].mxu0 }
 0x211   : > { %v2390_v36 = vsel %vm755_vm0, %v2332_v58, 0.0  ;;  %v2198_v45 = vadd.f32 %v4272_v7, %v2159_v17  ;;  %v2834_v6 = vadd.f32 %v2078_v39, %v1667_v47  ;;  %v1669_v10 = vpop.f32.mrb[59].mxu1  ;;  %v2090_v44 = vpop.f32.mrb[63].mxu0 }
 0x212   : > { %v2391_v3 = vadd.f32 %v2390_v36, %v2389_v50 }
 0x213   : > { %2230 = vst.msk [vmem:[%s4280_s16 + $0xe0] sm:$0xff] %vm755_vm0, %v2198_v45  ;;  %v2289_v20 = vsel %vm755_vm0, %v2198_v45, 0.0  ;;  %v2333_v51 = vmul.f32 %v2198_v45, %v2198_v45  ;;  %v2160_v40 = vmul.f32 %v2834_v6, %v4267_v37 }
 0x214   : > { %v2290_v14 = vadd.f32 %v2289_v20, %v2288_v35  ;;  %v1672_v24 = vpop.f32.mrb[60].mxu1 }
 0x215   : > { %v2392_v29 = vsel %vm755_vm0, %v2333_v51, 0.0  ;;  %v2199_v11 = vadd.f32 %v4272_v7, %v2160_v40  ;;  %v2835_v32 = vadd.f32 %v2083_v46, %v1672_v24  ;;  %v1674_v38 = vpop.f32.mrb[61].mxu1 }
 0x216   : > { %v2393_v28 = vadd.f32 %v2392_v29, %v2391_v3 }
 0x217   : > { %2231 = vst.msk [vmem:[%s4280_s16 + $0xe8] sm:$0xff] %vm755_vm0, %v2199_v11  ;;  %v2291_v16 = vsel %vm755_vm0, %v2199_v11, 0.0  ;;  %v2334_v59 = vmul.f32 %v2199_v11, %v2199_v11  ;;  %v2161_v30 = vmul.f32 %v2835_v32, %v4267_v37 }
 0x218   : > { %v2292_v56 = vadd.f32 %v2291_v16, %v2290_v14  ;;  %v1677_v5 = vpop.f32.mrb[62].mxu1 }
 0x219   : > { %v2394_v48 = vsel %vm755_vm0, %v2334_v59, 0.0  ;;  %v2200_v0 = vadd.f32 %v4272_v7, %v2161_v30  ;;  %v2836_v34 = vadd.f32 %v2088_v4, %v1677_v5  ;;  %v1679_v19 = vpop.f32.mrb[63].mxu1 }
 0x21a   : > { %v2395_v9 = vadd.f32 %v2394_v48, %v2393_v28 }
 0x21b   : > { %2232 = vst.msk [vmem:[%s4280_s16 + $0xf0] sm:$0xff] %vm755_vm0, %v2200_v0  ;;  %v2293_v1 = vsel %vm755_vm0, %v2200_v0, 0.0  ;;  %v2335_v53 = vmul.f32 %v2200_v0, %v2200_v0  ;;  %v2162_v26 = vmul.f32 %v2836_v34, %v4267_v37 }
 0x21c   : > { %v2294_v8 = vadd.f32 %v2293_v1, %v2292_v56 }
 0x21d   : > { %v2396_v63 = vsel %vm755_vm0, %v2335_v53, 0.0  ;;  %v2201_v15 = vadd.f32 %v4272_v7, %v2162_v26 }
 0x21e   : > { %v2397_v25 = vadd.f32 %v2396_v63, %v2395_v9 }
 0x21f   : > { %2233 = vst.msk [vmem:[%s4280_s16 + $0xf8] sm:$0xff] %vm755_vm0, %v2201_v15  ;;  %v2295_v21 = vsel %vm755_vm0, %v2201_v15, 0.0  ;;  %v2336_v42 = vmul.f32 %v2201_v15, %v2201_v15 }
 0x220   : > { %v2296_v55 = vadd.f32 %v2295_v21, %v2294_v8 }
 0x221   : > { %v2398_v43 = vsel %vm755_vm0, %v2336_v42, 0.0 }
 0x222   : > { %v2297_v39 = vrot.slane %v2296_v55, 4  ;;  %v2399_v12 = vadd.f32 %v2398_v43, %v2397_v25 }
 0x224   : > { %v2298_v52 = vadd.f32 %v2297_v39, %v2296_v55  ;;  %v2400_v37 = vrot.slane %v2399_v12, 4 }
 0x226   : > { %v2299_v61 = vrot.slane %v2298_v52, 2  ;;  %v2401_v18 = vadd.f32 %v2400_v37, %v2399_v12 }
 0x228   : > { %v2300_v62 = vadd.f32 %v2299_v61, %v2298_v52  ;;  %v2402_v33 = vrot.slane %v2401_v18, 2 }
 0x22a   : > { %v2301_v7 = vrot.slane %v2300_v62, 1  ;;  %v2403_v27 = vadd.f32 %v2402_v33, %v2401_v18 }
 0x22c   : > { %v2302_v60 = vadd.f32 %v2301_v7, %v2300_v62  ;;  %v2404_v49 = vrot.slane %v2403_v27, 1 }
 0x22e   : > { %2304 = vst.msk [vmem:[%s319_s21] sm:$0x1] %vm2303_vm3, %v2302_v60  ;;  %v2405_v23 = vadd.f32 %v2404_v49, %v2403_v27 }
 0x230   : > { %2406 = vst.msk [vmem:[%s322_s25] sm:$0x1] %vm2303_vm3, %v2405_v23 }
 0x231 PF: > { %s19_s27 = sadd.s32 1, %s2919_s27  }
 0x232   : > { %p16_p4 = scmp.ge.s32.totalorder %s19_s27, 4  }
 0x234   :  { %18 = sbr.rel (!%p16_p4) target bundleno = 1 (0x1), region = 103 }

// kernel: dncnn_forward.7
= control target key start
LH: loop header
LB: loop body
LE: loop exit
PB: predicated region body
PF: predicated region fallthrough
CT: control target
= control target key end

     0   :  { %s3001_s27 = smov 0   ;;  %s4527_s0 = inlined_call_operand.vmem [shape: f32[2,16,16,64], index: 0, kind: input, shape index: {}]   ;;  %s4528_s1 = inlined_call_operand.vmem [shape: f32[3,192,64], index: 1, kind: input, shape index: {}]   ;;  %s4529_s2 = inlined_call_operand.vmem [shape: f32[1,64], index: 2, kind: input, shape index: {}]   ;;  %s4530_s3 = inlined_call_operand.vmem [shape: f32[1,64], index: 3, kind: input, shape index: {}]   ;;  %s4531_s4 = inlined_call_operand.vmem [shape: f32[1,64], index: 4, kind: input, shape index: {}]   ;;  %s4532_s5 = inlined_call_operand.vmem [shape: f32[1,64], index: 5, kind: input, shape index: {}]   ;;  %s4533_s6 = inlined_call_operand.vmem [shape: f32[2,16,16,64], index: 6, kind: output, shape index: {0}]   ;;  %s4534_s7 = inlined_call_operand.vmem [shape: f32[2,1,64], index: 7, kind: output, shape index: {1}]   ;;  %s4535_s8 = inlined_call_operand.vmem [shape: f32[2,1,64], index: 8, kind: output, shape index: {2}]  }
   0x1 LB: > { %s2544_s28 = sadd.s32 4294967295, %s2951_s27   ;;  %p2548_p0 = scmp.ge.s32.totalorder %s2951_s27, 1  ;;  %s2951_s27 = sphi %s3001_s27, %s19_s27  }
   0x2   : > { %p267_p1 = scmp.lt.s32.totalorder %s2951_s27, 3 }
   0x4   : > { %p268_p2 = pnand %p2548_p0, %p267_p1 }
   0x5   : > { %p307_p3 = scmp.lt.s32.totalorder (!%p268_p2), %s2544_s28, 1  ;;  %vm787_vm0 = vcmask (!%p268_p2), 523264   ;;  %v958_v0 = vld [vmem:[%s4528_s1] sm:$0xff] (!%p268_p2)  ;;  %v959_v1 = vld [vmem:[%s4528_s1 + $0x8] sm:$0xff] (!%p268_p2)  ;;  %v960_v2 = vld [vmem:[%s4528_s1 + $0x10] sm:$0xff] (!%p268_p2)  ;;  %v2953_v4 = vmov (!%p268_p2), 0.0|0.0  }
   0x6   : > { %271 = sbr.rel (%p268_p2) target bundleno = 563 (0x233), region = 44  ;;  %v3023_v3 = vld [vmem:[%s4529_s2] ss:$0 sm:$0xff] (!%p268_p2)  ;;  %2741 = vmatprep.subr.bf16.mxu0 (!%p268_p2), %v2953_v4  ;;  %v3026_v5 = vpack.c.bf16 (!%p268_p2), %v959_v1, %v958_v0  ;;  %v961_v6 = vld [vmem:[%s4528_s1 + $0x18] sm:$0xff] (!%p268_p2)  ;;  %2705 = vmatprep.subr.bf16.mxu1 (!%p268_p2), %v2953_v4  ;;  %v2556_v8 = vld [vmem:[%s4528_s1 + $0xc8] sm:$0xff] (!%p268_p2)  ;;  %v2954_v13 = vmov (!%p268_p2), 0.0  }
   0x7   : > { %v2555_v7 = vld [vmem:[%s4528_s1 + $0xc0] sm:$0xff] (!%p268_p2)  ;;  %v963_v11 = vld [vmem:[%s4528_s1 + $0x28] sm:$0xff] (!%p268_p2)  ;;  %v2557_v12 = vld [vmem:[%s4528_s1 + $0xd0] sm:$0xff] (!%p268_p2)  ;;  %821 = vst.msk [vmem:[#allocation2 + $0x8] sm:$0xff] (!%p268_p2), %vm787_vm0, %v2954_v13  ;;  %v3058_v14 = vpack.c.bf16 (!%p268_p2), %v961_v6, %v960_v2  ;;  %vm594_vm1 = vcmask (!%p268_p2), 1046528   ;;  %s2955_s23 = smov (!%p268_p2), 64  }
   0x8   : > { %v2706_v9 = vpack.c.bf16 (!%p268_p2), %v2556_v8, %v2555_v7  ;;  %v962_v10 = vld [vmem:[%s4528_s1 + $0x20] sm:$0xff] (!%p268_p2)  ;;  %820 = vst [vmem:[#allocation2] sm:$0xff] (!%p268_p2), %v2954_v13  ;;  %823 = vst.msk [vmem:[#allocation2 + $0x18] sm:$0xff] (!%p268_p2), %vm787_vm0, %v2954_v13  ;;  %2743 = vmatpush1.bf16.msra.mxu0 (!%p268_p2), %v3026_v5  ;;  %v2558_v15 = vld [vmem:[%s4528_s1 + $0xd8] sm:$0xff] (!%p268_p2)  ;;  %vm497_vm2 = vcmask (!%p268_p2), 1040384   ;;  %vm2335_vm3 = vcmask (!%p268_p2), 516096  }
   0x9   : > { %826 = vst.msk [vmem:[#allocation2 + $0x228] sm:$0xff] (!%p268_p2), %vm787_vm0, %v2954_v13  ;;  %828 = vst.msk [vmem:[#allocation2 + $0x238] sm:$0xff] (!%p268_p2), %vm787_vm0, %v2954_v13  ;;  %v964_v16 = vld [vmem:[%s4528_s1 + $0x30] sm:$0xff] (!%p268_p2)  ;;  %v965_v17 = vld [vmem:[%s4528_s1 + $0x38] sm:$0xff] (!%p268_p2)  ;;  %2744 = vmatprep.subr.bf16.mxu0 (!%p268_p2), %v2953_v4  ;;  %v3091_v24 = vpack.c.bf16 (!%p268_p2), %v963_v11, %v962_v10  ;;  %v2709_v25 = vpack.c.bf16 (!%p268_p2), %v2558_v15, %v2557_v12 }
   0xa   : > { %v3079_v18 = vld [vmem:[%s4530_s3] ss:$0 sm:$0xff] (!%p268_p2)  ;;  %2707 = vmatpush1.bf16.msra.mxu1 (!%p268_p2), %v2706_v9  ;;  %v2560_v20 = vld [vmem:[%s4528_s1 + $0xe8] sm:$0xff] (!%p268_p2)  ;;  %v3100_v32 = vpack.c.bf16 (!%p268_p2), %v965_v17, %v964_v16 }
   0xb   : > { %v2559_v19 = vld [vmem:[%s4528_s1 + $0xe0] sm:$0xff] (!%p268_p2)  ;;  %2708 = vmatprep.subr.bf16.mxu1 (!%p268_p2), %v2953_v4 }
   0xc   : > { %2746 = vmatpush1.bf16.msra.mxu0 (!%p268_p2), %v3058_v14  ;;  %v2712_v38 = vpack.c.bf16 (!%p268_p2), %v2560_v20, %v2559_v19 }
   0xd   : > { %s4549_s28 = smov (!%p307_p3, %s2544_s28), 1  ;;  %2747 = vmatprep.subr.bf16.mxu0 %v2953_v4 }
   0xe   : > { %s2703_s29 = sshll.u32 %s4549_s28, 8  ;;  %2710 = vmatpush1.bf16.msra.mxu1 %v2709_v25  ;;  %v895_v25 = vld [vmem:[#allocation2 + $0x8] sm:$0xff]  ;;  %s319_s22 = scalar_lea.vmem %s4534_s7, %s4549_s28 }
   0xf   : > { %s3074_s16 = scalar_lea.vmem %s4527_s0, %s2703_s29  ;;  %2711 = vmatprep.subr.bf16.mxu1 %v2953_v4  ;;  %2611 = vmatprep.mubr.msk.f32.mxu0 %vm787_vm0, %v895_v25  ;;  %s4309_s20 = scalar_lea.vmem %s4533_s6, %s2703_s29 }
  0x10   : > { %v323_v21 = vld [vmem:[%s3074_s16] sm:$0xff]  ;;  %v324_v22 = vld [vmem:[%s3074_s16 + $0x8] sm:$0xff]  ;;  %v325_v23 = vld [vmem:[%s3074_s16 + $0x10] sm:$0xff]  ;;  %2749 = vmatpush1.bf16.msra.mxu0 %v3091_v24 }
  0x11   : > { %v362_v26 = vmul.f32 %v3023_v3, %v323_v21  ;;  %v363_v27 = vmul.f32 %v3023_v3, %v324_v22  ;;  %v364_v28 = vmul.f32 %v3023_v3, %v325_v23  ;;  %v326_v29 = vld [vmem:[%s3074_s16 + $0x18] sm:$0xff]  ;;  %v327_v30 = vld [vmem:[%s3074_s16 + $0x20] sm:$0xff]  ;;  %v328_v31 = vld [vmem:[%s3074_s16 + $0x28] sm:$0xff]  ;;  %2750 = vmatprep.subr.bf16.mxu0 %v2953_v4 }
  0x12   : > { %v365_v33 = vmul.f32 %v3023_v3, %v326_v29  ;;  %v366_v34 = vmul.f32 %v3023_v3, %v327_v30  ;;  %v367_v35 = vmul.f32 %v3023_v3, %v328_v31  ;;  %v329_v36 = vld [vmem:[%s3074_s16 + $0x30] sm:$0xff]  ;;  %v330_v37 = vld [vmem:[%s3074_s16 + $0x38] sm:$0xff]  ;;  %v331_v55 = vld [vmem:[%s3074_s16 + $0x40] sm:$0xff]  ;;  %2713 = vmatpush1.bf16.msra.mxu1 %v2712_v38 }
  0x13   : > { %v401_v39 = vadd.f32 %v3079_v18, %v362_v26  ;;  %v402_v40 = vadd.f32 %v3079_v18, %v363_v27  ;;  %v403_v41 = vadd.f32 %v3079_v18, %v364_v28  ;;  %v368_v42 = vmul.f32 %v3023_v3, %v329_v36  ;;  %v332_v60 = vld [vmem:[%s3074_s16 + $0x48] sm:$0xff]  ;;  %v333_v1 = vld [vmem:[%s3074_s16 + $0x50] sm:$0xff]  ;;  %v334_v2 = vld [vmem:[%s3074_s16 + $0x58] sm:$0xff]  ;;  %2714 = vmatprep.subr.bf16.mxu1 %v2953_v4 }
  0x14   : > { %v404_v43 = vadd.f32 %v3079_v18, %v365_v33  ;;  %v405_v44 = vadd.f32 %v3079_v18, %v366_v34  ;;  %v406_v45 = vadd.f32 %v3079_v18, %v367_v35  ;;  %v369_v46 = vmul.f32 %v3023_v3, %v330_v37  ;;  %v335_v10 = vld [vmem:[%s3074_s16 + $0x60] sm:$0xff]  ;;  %v336_v11 = vld [vmem:[%s3074_s16 + $0x68] sm:$0xff]  ;;  %v337_v12 = vld [vmem:[%s3074_s16 + $0x70] sm:$0xff]  ;;  %2752 = vmatpush1.bf16.msra.mxu0 %v3100_v32 }
  0x15   : > { %v3117_v47 = vmax.f32 %v401_v39, 0.0  ;;  %v3119_v48 = vmax.f32 %v402_v40, 0.0  ;;  %v3121_v49 = vmax.f32 %v403_v41, 0.0  ;;  %v407_v50 = vadd.f32 %v3079_v18, %v368_v42  ;;  %v338_v30 = vld [vmem:[%s3074_s16 + $0x78] sm:$0xff]  ;;  %2753 = vmatprep.subr.bf16.mxu0 %v2953_v4  ;;  %v339_v40 = vld [vmem:[%s3074_s16 + $0x80] sm:$0xff] }
  0x16   : > { %v3125_v51 = vmax.f32 %v404_v43, 0.0  ;;  %v3127_v52 = vmax.f32 %v405_v44, 0.0  ;;  %v3129_v53 = vmax.f32 %v406_v45, 0.0  ;;  %v408_v54 = vadd.f32 %v3079_v18, %v369_v46 }
  0x17   : > { %691 = vrot.lane.b32.xlu0 %v3117_v47, %s2955_s23  ;;  %v595_v56 = vrot.slane %v3117_v47, 1  ;;  %v596_v57 = vrot.slane %v3119_v48, 1  ;;  %695 = vrot.lane.b32.xlu1 %v3121_v49, %s2955_s23  ;;  %v598_v58 = vrot.slane %v3121_v49, 1  ;;  %v3141_v59 = vmax.f32 %v407_v50, 0.0 }
  0x18   : > { %v599_v61 = vrot.slane %v3125_v51, 1  ;;  %v601_v62 = vrot.slane %v3127_v52, 1  ;;  %v602_v63 = vrot.slane %v3129_v53, 1  ;;  %v3147_v0 = vmax.f32 %v408_v54, 0.0 }
  0x19   : > { %v675_v6 = vsel %vm594_vm1, %v596_v57, 0.0  ;;  %v597_v7 = vsel %vm594_vm1, %v595_v56, %v596_v57  ;;  %v604_v8 = vrot.slane %v3141_v59, 1  ;;  %v370_v9 = vmul.f32 %v3023_v3, %v331_v55 }
  0x1a   : > { %833 = vst.msk [vmem:[#allocation2 + $0x38] sm:$0xff] %vm787_vm0, %v675_v6  ;;  %831 = vst.msk [vmem:[#allocation2 + $0x28] sm:$0xff] %vm787_vm0, %v597_v7  ;;  %v676_v15 = vsel %vm594_vm1, %v599_v61, 0.0  ;;  %v600_v16 = vsel %vm594_vm1, %v598_v58, %v599_v61  ;;  %v603_v17 = vsel %vm594_vm1, %v601_v62, %v602_v63  ;;  %v677_v19 = vsel %vm594_vm1, %v602_v63, 0.0  ;;  %v341_v61 = vld [vmem:[%s3074_s16 + $0x90] sm:$0xff]  ;;  %v966_v62 = vld [vmem:[%s4528_s1 + $0x40] sm:$0xff] }
  0x1b   : > { %693 = vrot.lane.b32.xlu0 %v3119_v48, %s2955_s23  ;;  %837 = vst.msk [vmem:[#allocation2 + $0x58] sm:$0xff] %vm787_vm0, %v676_v15  ;;  %697 = vrot.lane.b32.xlu1 %v3125_v51, %s2955_s23  ;;  %835 = vst.msk [vmem:[#allocation2 + $0x48] sm:$0xff] %vm787_vm0, %v600_v16  ;;  %v605_v20 = vrot.slane %v3147_v0, 1  ;;  %v409_v21 = vadd.f32 %v3079_v18, %v370_v9  ;;  %v371_v22 = vmul.f32 %v3023_v3, %v332_v60  ;;  %v340_v60 = vld [vmem:[%s3074_s16 + $0x88] sm:$0xff]  ;;  %v342_v7 = vld [vmem:[%s3074_s16 + $0x98] sm:$0xff] }
  0x1c   : > { %839 = vst.msk [vmem:[#allocation2 + $0x68] sm:$0xff] %vm787_vm0, %v603_v17  ;;  %841 = vst.msk [vmem:[#allocation2 + $0x78] sm:$0xff] %vm787_vm0, %v677_v19  ;;  %v372_v23 = vmul.f32 %v3023_v3, %v333_v1  ;;  %v373_v26 = vmul.f32 %v3023_v3, %v334_v2  ;;  %v374_v27 = vmul.f32 %v3023_v3, %v335_v10  ;;  %v344_v15 = vld [vmem:[%s3074_s16 + $0xa8] sm:$0xff] }
  0x1d   : > { %v375_v28 = vmul.f32 %v3023_v3, %v336_v11  ;;  %v376_v29 = vmul.f32 %v3023_v3, %v337_v12  ;;  %v606_v31 = vsel %vm594_vm1, %v604_v8, %v605_v20  ;;  %v678_v33 = vsel %vm594_vm1, %v605_v20, 0.0  ;;  %v343_v8 = vld [vmem:[%s3074_s16 + $0xa0] sm:$0xff]  ;;  %v967_v16 = vld [vmem:[%s4528_s1 + $0x48] sm:$0xff] }
  0x1e   : > { %v3187_v34 = vmax.f32 %v409_v21, 0.0  ;;  %v410_v35 = vadd.f32 %v3079_v18, %v371_v22  ;;  %843 = vst.msk [vmem:[#allocation2 + $0x88] sm:$0xff] %vm787_vm0, %v606_v31  ;;  %845 = vst.msk [vmem:[#allocation2 + $0x98] sm:$0xff] %vm787_vm0, %v678_v33  ;;  %v411_v36 = vadd.f32 %v3079_v18, %v372_v23  ;;  %v412_v37 = vadd.f32 %v3079_v18, %v373_v26  ;;  %v2561_v33 = vld [vmem:[%s4528_s1 + $0xf0] sm:$0xff] }
  0x1f   : > { %v413_v38 = vadd.f32 %v3079_v18, %v374_v27  ;;  %v414_v39 = vadd.f32 %v3079_v18, %v375_v28  ;;  %699 = vrot.lane.b32.xlu0 %v3127_v52, %s2955_s23  ;;  %701 = vrot.lane.b32.xlu1 %v3129_v53, %s2955_s23  ;;  %v415_v43 = vadd.f32 %v3079_v18, %v376_v29 }
  0x20   : > { %v607_v41 = vrot.slane %v3187_v34, 1  ;;  %v3203_v42 = vmax.f32 %v410_v35, 0.0  ;;  %v377_v44 = vmul.f32 %v3023_v3, %v338_v30  ;;  %v3207_v45 = vmax.f32 %v411_v36, 0.0  ;;  %v2562_v35 = vld [vmem:[%s4528_s1 + $0xf8] sm:$0xff]  ;;  %v345_v36 = vld [vmem:[%s3074_s16 + $0xb0] sm:$0xff] }
  0x21   : > { %v3209_v46 = vmax.f32 %v412_v37, 0.0  ;;  %v3211_v50 = vmax.f32 %v413_v38, 0.0  ;;  %v3213_v54 = vmax.f32 %v414_v39, 0.0  ;;  %v3216_v56 = vmax.f32 %v415_v43, 0.0  ;;  %v3244_v17 = vld [vmem:[#allocation2 + $0x28] sm:$0xff] }
  0x22   : > { %v608_v55 = vrot.slane %v3203_v42, 1  ;;  %v416_v57 = vadd.f32 %v3079_v18, %v377_v44  ;;  %v378_v58 = vmul.f32 %v3023_v3, %v339_v40  ;;  %v610_v63 = vrot.slane %v3207_v45, 1  ;;  %2579 = vmatprep.mubr.msk.f32.mxu1 %vm787_vm0, %v3244_v17 }
  0x23   : > { %v611_v1 = vrot.slane %v3209_v46, 1  ;;  %v613_v2 = vrot.slane %v3211_v50, 1  ;;  %v614_v6 = vrot.slane %v3213_v54, 1  ;;  %703 = vrot.lane.b32.xlu0 %v3141_v59, %s2955_s23  ;;  %705 = vrot.lane.b32.xlu1 %v3147_v0, %s2955_s23  ;;  %v616_v11 = vrot.slane %v3216_v56, 1 }
  0x24   : > { %v609_v9 = vsel %vm594_vm1, %v607_v41, %v608_v55  ;;  %v679_v10 = vsel %vm594_vm1, %v608_v55, 0.0  ;;  %v3238_v12 = vmax.f32 %v416_v57, 0.0  ;;  %v417_v25 = vadd.f32 %v3079_v18, %v378_v58  ;;  %v968_v41 = vld [vmem:[%s4528_s1 + $0x50] sm:$0xff]  ;;  %v969_v58 = vld [vmem:[%s4528_s1 + $0x58] sm:$0xff] }
  0x25   : > { %847 = vst.msk [vmem:[#allocation2 + $0xa8] sm:$0xff] %vm787_vm0, %v609_v9  ;;  %849 = vst.msk [vmem:[#allocation2 + $0xb8] sm:$0xff] %vm787_vm0, %v679_v10  ;;  %v612_v19 = vsel %vm594_vm1, %v610_v63, %v611_v1  ;;  %v680_v20 = vsel %vm594_vm1, %v611_v1, 0.0  ;;  %v615_v21 = vsel %vm594_vm1, %v613_v2, %v614_v6  ;;  %v681_v22 = vsel %vm594_vm1, %v614_v6, 0.0  ;;  %v346_v10 = vld [vmem:[%s3074_s16 + $0xb8] sm:$0xff] }
  0x26   : > { %851 = vst.msk [vmem:[#allocation2 + $0xc8] sm:$0xff] %vm787_vm0, %v612_v19  ;;  %853 = vst.msk [vmem:[#allocation2 + $0xd8] sm:$0xff] %vm787_vm0, %v680_v20  ;;  %v617_v23 = vrot.slane %v3238_v12, 1  ;;  %v379_v26 = vmul.f32 %v3023_v3, %v340_v60  ;;  %v380_v27 = vmul.f32 %v3023_v3, %v341_v61  ;;  %v381_v28 = vmul.f32 %v3023_v3, %v342_v7  ;;  %v2563_v60 = vld [vmem:[%s4528_s1 + $0x100] sm:$0xff]  ;;  %v2564_v61 = vld [vmem:[%s4528_s1 + $0x108] sm:$0xff] }
  0x27   : > { %855 = vst.msk [vmem:[#allocation2 + $0xe8] sm:$0xff] %vm787_vm0, %v615_v21  ;;  %857 = vst.msk [vmem:[#allocation2 + $0xf8] sm:$0xff] %vm787_vm0, %v681_v22  ;;  %v382_v29 = vmul.f32 %v3023_v3, %v343_v8  ;;  %v383_v30 = vmul.f32 %v3023_v3, %v344_v15  ;;  %v3265_v31 = vpack.c.bf16 %v967_v16, %v966_v62  ;;  %707 = vrot.lane.b32.xlu0 %v3187_v34, %s2955_s23  ;;  %v970_v20 = vld [vmem:[%s4528_s1 + $0x60] sm:$0xff] }
  0x28   : > { %709 = vrot.lane.b32.xlu1 %v3203_v42, %s2955_s23  ;;  %v618_v37 = vsel %vm594_vm1, %v616_v11, %v617_v23  ;;  %v682_v38 = vsel %vm594_vm1, %v617_v23, 0.0  ;;  %v3280_v39 = vmax.f32 %v417_v25, 0.0  ;;  %v418_v40 = vadd.f32 %v3079_v18, %v379_v26  ;;  %v971_v26 = vld [vmem:[%s4528_s1 + $0x68] sm:$0xff] }
  0x29   : > { %859 = vst.msk [vmem:[#allocation2 + $0x108] sm:$0xff] %vm787_vm0, %v618_v37  ;;  %861 = vst.msk [vmem:[#allocation2 + $0x118] sm:$0xff] %vm787_vm0, %v682_v38  ;;  %v419_v43 = vadd.f32 %v3079_v18, %v380_v27  ;;  %v420_v44 = vadd.f32 %v3079_v18, %v381_v28  ;;  %v421_v55 = vadd.f32 %v3079_v18, %v382_v29  ;;  %2755 = vmatpush1.bf16.msra.mxu0 %v3265_v31  ;;  %v2565_v27 = vld [vmem:[%s4528_s1 + $0x110] sm:$0xff] }
  0x2a   : > { %v422_v57 = vadd.f32 %v3079_v18, %v383_v30  ;;  %v619_v62 = vrot.slane %v3280_v39, 1  ;;  %v3303_v63 = vmax.f32 %v418_v40, 0.0  ;;  %v2715_v1 = vpack.c.bf16 %v2562_v35, %v2561_v33  ;;  %2756 = vmatprep.subr.bf16.mxu0 %v2953_v4  ;;  %v2566_v33 = vld [vmem:[%s4528_s1 + $0x118] sm:$0xff]  ;;  %v347_v35 = vld [vmem:[%s3074_s16 + $0xc0] sm:$0xff] }
  0x2b   : > { %v384_v2 = vmul.f32 %v3023_v3, %v345_v36  ;;  %v3307_v6 = vmax.f32 %v419_v43, 0.0  ;;  %v3309_v7 = vmax.f32 %v420_v44, 0.0  ;;  %v3311_v8 = vmax.f32 %v421_v55, 0.0  ;;  %711 = vrot.lane.b32.xlu0 %v3207_v45, %s2955_s23  ;;  %v348_v36 = vld [vmem:[%s3074_s16 + $0xc8] sm:$0xff]  ;;  %v972_v43 = vld [vmem:[%s4528_s1 + $0x70] sm:$0xff]  ;;  %v973_v44 = vld [vmem:[%s4528_s1 + $0x78] sm:$0xff] }
  0x2c   : > { %v3313_v9 = vmax.f32 %v422_v57, 0.0  ;;  %713 = vrot.lane.b32.xlu1 %v3209_v46, %s2955_s23  ;;  %v620_v11 = vrot.slane %v3303_v63, 1  ;;  %v3322_v16 = vpack.c.bf16 %v969_v58, %v968_v41  ;;  %v2718_v19 = vpack.c.bf16 %v2564_v61, %v2563_v60  ;;  %2716 = vmatpush1.bf16.msra.mxu1 %v2715_v1  ;;  %v349_v55 = vld [vmem:[%s3074_s16 + $0xd0] sm:$0xff]  ;;  %v2567_v1 = vld [vmem:[%s4528_s1 + $0x120] sm:$0xff] }
  0x2d   : > { %v423_v15 = vadd.f32 %v3079_v18, %v384_v2  ;;  %v622_v21 = vrot.slane %v3307_v6, 1  ;;  %v623_v22 = vrot.slane %v3309_v7, 1  ;;  %v625_v23 = vrot.slane %v3311_v8, 1  ;;  %2717 = vmatprep.subr.bf16.mxu1 %v2953_v4  ;;  %v2568_v2 = vld [vmem:[%s4528_s1 + $0x128] sm:$0xff] }
  0x2e   : > { %v626_v25 = vrot.slane %v3313_v9, 1  ;;  %v621_v28 = vsel %vm594_vm1, %v619_v62, %v620_v11  ;;  %v683_v29 = vsel %vm594_vm1, %v620_v11, 0.0  ;;  %2758 = vmatpush1.bf16.msra.mxu0 %v3322_v16  ;;  %v385_v30 = vmul.f32 %v3023_v3, %v346_v10  ;;  %v350_v11 = vld [vmem:[%s3074_s16 + $0xd8] sm:$0xff] }
  0x2f   : > { %863 = vst.msk [vmem:[#allocation2 + $0x128] sm:$0xff] %vm787_vm0, %v621_v28  ;;  %865 = vst.msk [vmem:[#allocation2 + $0x138] sm:$0xff] %vm787_vm0, %v683_v29  ;;  %v624_v37 = vsel %vm594_vm1, %v622_v21, %v623_v22  ;;  %v684_v38 = vsel %vm594_vm1, %v623_v22, 0.0  ;;  %2759 = vmatprep.subr.bf16.mxu0 %v2953_v4  ;;  %715 = vrot.lane.b32.xlu0 %v3211_v50, %s2955_s23  ;;  %v3369_v57 = vmax.f32 %v423_v15, 0.0  ;;  %v974_v21 = vld [vmem:[%s4528_s1 + $0x80] sm:$0xff]  ;;  %v975_v22 = vld [vmem:[%s4528_s1 + $0x88] sm:$0xff] }
  0x30   : > { %v627_v40 = vsel %vm594_vm1, %v625_v23, %v626_v25  ;;  %v685_v41 = vsel %vm594_vm1, %v626_v25, 0.0  ;;  %717 = vrot.lane.b32.xlu1 %v3213_v54, %s2955_s23  ;;  %867 = vst.msk [vmem:[#allocation2 + $0x148] sm:$0xff] %vm787_vm0, %v624_v37  ;;  %869 = vst.msk [vmem:[#allocation2 + $0x158] sm:$0xff] %vm787_vm0, %v684_v38  ;;  %v424_v58 = vadd.f32 %v3079_v18, %v385_v30  ;;  %2719 = vmatpush1.bf16.msra.mxu1 %v2718_v19  ;;  %v351_v25 = vld [vmem:[%s3074_s16 + $0xe0] sm:$0xff] }
  0x31   : > { %871 = vst.msk [vmem:[#allocation2 + $0x168] sm:$0xff] %vm787_vm0, %v627_v40  ;;  %873 = vst.msk [vmem:[#allocation2 + $0x178] sm:$0xff] %vm787_vm0, %v685_v41  ;;  %v3372_v60 = vpack.c.bf16 %v971_v26, %v970_v20  ;;  %v2721_v61 = vpack.c.bf16 %v2566_v33, %v2565_v27  ;;  %v386_v62 = vmul.f32 %v3023_v3, %v347_v35  ;;  %v628_v15 = vrot.slane %v3369_v57, 1 }
  0x32   : > { %v387_v10 = vmul.f32 %v3023_v3, %v348_v36  ;;  %v3384_v20 = vmax.f32 %v424_v58, 0.0  ;;  %2720 = vmatprep.subr.bf16.mxu1 %v2953_v4  ;;  %v3388_v19 = vpack.c.bf16 %v973_v44, %v972_v43  ;;  %v388_v23 = vmul.f32 %v3023_v3, %v349_v55  ;;  %v2569_v43 = vld [vmem:[%s4528_s1 + $0x130] sm:$0xff]  ;;  %v2570_v44 = vld [vmem:[%s4528_s1 + $0x138] sm:$0xff] }
  0x33   : > { %2761 = vmatpush1.bf16.msra.mxu0 %v3372_v60  ;;  %v425_v26 = vadd.f32 %v3079_v18, %v386_v62  ;;  %719 = vrot.lane.b32.xlu0 %v3216_v56, %s2955_s23  ;;  %v2724_v29 = vpack.c.bf16 %v2568_v2, %v2567_v1  ;;  %v389_v33 = vmul.f32 %v3023_v3, %v350_v11  ;;  %v976_v2 = vld [vmem:[%s4528_s1 + $0x90] sm:$0xff]  ;;  %v3443_v11 = vld [vmem:[%s4528_s1 + $0x140] sm:$0xff] }
  0x34   : > { %2762 = vmatprep.subr.bf16.mxu0 %v2953_v4  ;;  %v426_v27 = vadd.f32 %v3079_v18, %v387_v10  ;;  %721 = vrot.lane.b32.xlu1 %v3238_v12, %s2955_s23  ;;  %v629_v28 = vrot.slane %v3384_v20, 1  ;;  %v427_v30 = vadd.f32 %v3079_v18, %v388_v23  ;;  %v3412_v37 = vpack.c.bf16 %v975_v22, %v974_v21  ;;  %v977_v10 = vld [vmem:[%s4528_s1 + $0x98] sm:$0xff]  ;;  %v2572_v22 = vld [vmem:[%s4528_s1 + $0x148] sm:$0xff] }
  0x35   : > { %2722 = vmatpush1.bf16.msra.mxu1 %v2721_v61  ;;  %v3408_v35 = vmax.f32 %v425_v26, 0.0  ;;  %v390_v38 = vmul.f32 %v3023_v3, %v351_v25  ;;  %v428_v58 = vadd.f32 %v3079_v18, %v389_v33  ;;  %v352_v61 = vld [vmem:[%s3074_s16 + $0xe8] sm:$0xff]  ;;  %v353_v25 = vld [vmem:[%s3074_s16 + $0xf0] sm:$0xff] }
  0x36   : > { %v3410_v36 = vmax.f32 %v426_v27, 0.0  ;;  %v630_v40 = vsel %vm594_vm1, %v628_v15, %v629_v28  ;;  %v686_v41 = vsel %vm594_vm1, %v629_v28, 0.0  ;;  %2723 = vmatprep.subr.bf16.mxu1 %v2953_v4  ;;  %v3425_v55 = vmax.f32 %v427_v30, 0.0  ;;  %v978_v30 = vld [vmem:[%s4528_s1 + $0xa0] sm:$0xff]  ;;  %v979_v33 = vld [vmem:[%s4528_s1 + $0xa8] sm:$0xff] }
  0x37   : > { %2764 = vmatpush1.bf16.msra.mxu0 %v3388_v19  ;;  %875 = vst.msk [vmem:[#allocation2 + $0x188] sm:$0xff] %vm787_vm0, %v630_v40  ;;  %877 = vst.msk [vmem:[#allocation2 + $0x198] sm:$0xff] %vm787_vm0, %v686_v41  ;;  %v631_v62 = vrot.slane %v3408_v35, 1  ;;  %v429_v15 = vadd.f32 %v3079_v18, %v390_v38  ;;  %723 = vrot.lane.b32.xlu0 %v3280_v39, %s2955_s23  ;;  %v3454_v23 = vmax.f32 %v428_v58, 0.0  ;;  %v498_v41 = vrot.slane %v3117_v47, 7 }
  0x38   : > { %2765 = vmatprep.subr.bf16.mxu0 %v2953_v4  ;;  %v632_v1 = vrot.slane %v3410_v36, 1  ;;  %725 = vrot.lane.b32.xlu1 %v3303_v63, %s2955_s23  ;;  %v634_v21 = vrot.slane %v3425_v55, 1  ;;  %v2727_v28 = vpack.c.bf16 %v2570_v44, %v2569_v43  ;;  %v391_v38 = vmul.f32 %v3023_v3, %v352_v61  ;;  %v354_v44 = vld [vmem:[%s3074_s16 + $0xf8] sm:$0xff]  ;;  %s322_s16 = scalar_lea.vmem %s4535_s8, %s4549_s28 }
  0x39   : > { %2725 = vmatpush1.bf16.msra.mxu1 %v2724_v29  ;;  %v3470_v29 = vpack.c.bf16 %v977_v10, %v976_v2  ;;  %v635_v40 = vrot.slane %v3454_v23, 1  ;;  %v499_v43 = vrot.slane %v3119_v48, 7  ;;  %v2730_v58 = vpack.c.bf16 %v2572_v22, %v3443_v11 }
  0x3a   : > { %v633_v26 = vsel %vm594_vm1, %v631_v62, %v632_v1  ;;  %v687_v27 = vsel %vm594_vm1, %v632_v1, 0.0  ;;  %2726 = vmatprep.subr.bf16.mxu1 %v2953_v4  ;;  %v3478_v61 = vmax.f32 %v429_v15, 0.0  ;;  %v430_v62 = vadd.f32 %v3079_v18, %v391_v38  ;;  %v2573_v15 = vld [vmem:[%s4528_s1 + $0x150] sm:$0xff] }
  0x3b   : > { %879 = vst.msk [vmem:[#allocation2 + $0x1a8] sm:$0xff] %vm787_vm0, %v633_v26  ;;  %881 = vst.msk [vmem:[#allocation2 + $0x1b8] sm:$0xff] %vm787_vm0, %v687_v27  ;;  %2767 = vmatpush1.bf16.msra.mxu0 %v3412_v37  ;;  %v392_v1 = vmul.f32 %v3023_v3, %v353_v25  ;;  %727 = vrot.lane.b32.xlu0 %v3307_v6, %s2955_s23  ;;  %v636_v2 = vsel %vm594_vm1, %v634_v21, %v635_v40  ;;  %v688_v48 = vsel %vm594_vm1, %v635_v40, 0.0  ;;  %v2574_v21 = vld [vmem:[%s4528_s1 + $0x158] sm:$0xff]  ;;  %v980_v40 = vld [vmem:[%s4528_s1 + $0xb0] sm:$0xff] }
  0x3c   : > { %2768 = vmatprep.subr.bf16.mxu0 %v2953_v4  ;;  %729 = vrot.lane.b32.xlu1 %v3309_v7, %s2955_s23  ;;  %v3488_v10 = vpack.c.bf16 %v979_v33, %v978_v30  ;;  %v3493_v11 = vsel %vm497_vm2, %v498_v41, %v499_v43  ;;  %883 = vst.msk [vmem:[#allocation2 + $0x1c8] sm:$0xff] %vm787_vm0, %v636_v2  ;;  %885 = vst.msk [vmem:[#allocation2 + $0x1d8] sm:$0xff] %vm787_vm0, %v688_v48  ;;  %v637_v22 = vrot.slane %v3478_v61, 1 }
  0x3d   : > { %2728 = vmatpush1.bf16.msra.mxu1 %v2727_v28  ;;  %v3504_v25 = vmax.f32 %v430_v62, 0.0  ;;  %v431_v26 = vadd.f32 %v3079_v18, %v392_v1  ;;  %v393_v27 = vmul.f32 %v3023_v3, %v354_v44  ;;  %v4537_v28 = vrot.slane %v3121_v49, 7  ;;  %v981_v3 = vld [vmem:[%s4528_s1 + $0xb8] sm:$0xff] }
  0x3e   : > { %2729 = vmatprep.subr.bf16.mxu1 %v2953_v4  ;;  %v502_v30 = vrot.slane %v3125_v51, 7  ;;  %v4536_v33 = vrot.slane %v3127_v52, 7  ;;  %v505_v38 = vrot.slane %v3129_v53, 7  ;;  %v2733_v53 = vpack.c.bf16 %v2574_v21, %v2573_v15  ;;  %v2575_v21 = vld [vmem:[%s4528_s1 + $0x160] sm:$0xff] }
  0x3f   : > { %2770 = vmatpush1.bf16.msra.mxu0 %v3470_v29  ;;  %v638_v43 = vrot.slane %v3504_v25, 1  ;;  %v3522_v44 = vmax.f32 %v431_v26, 0.0  ;;  %v432_v51 = vadd.f32 %v3079_v18, %v393_v27  ;;  %731 = vrot.lane.b32.xlu0 %v3311_v8, %s2955_s23  ;;  %v3546_v15 = vpack.c.bf16 %v981_v3, %v980_v40  ;;  %v2643_v3 = vld [vmem:[%s4528_s1 + $0x180] sm:$0xff] }
  0x40   : > { %2771 = vmatprep.subr.bf16.mxu0 %v2953_v4  ;;  %733 = vrot.lane.b32.xlu1 %v3313_v9, %s2955_s23  ;;  %v3532_v62 = vsel %vm497_vm2, %v4537_v28, %v502_v30  ;;  %v3537_v1 = vsel %vm497_vm2, %v4536_v33, %v505_v38  ;;  %v508_v27 = vrot.slane %v3147_v0, 7  ;;  %v510_v38 = vrot.slane %v3187_v34, 7  ;;  %v2644_v0 = vld [vmem:[%s4528_s1 + $0x188] sm:$0xff] }
  0x41   : > { %2731 = vmatpush1.bf16.msra.mxu1 %v2730_v58  ;;  %v639_v18 = vsel %vm594_vm1, %v637_v22, %v638_v43  ;;  %v689_v2 = vsel %vm594_vm1, %v638_v43, 0.0  ;;  %v640_v48 = vrot.slane %v3522_v44, 1  ;;  %v3542_v26 = vmax.f32 %v432_v51, 0.0  ;;  %v2576_v58 = vld [vmem:[%s4528_s1 + $0x168] sm:$0xff] }
  0x42   : > { %2732 = vmatprep.subr.bf16.mxu1 %v2953_v4  ;;  %887 = vst.msk [vmem:[#allocation2 + $0x1e8] sm:$0xff] %vm787_vm0, %v639_v18  ;;  %889 = vst.msk [vmem:[#allocation2 + $0x1f8] sm:$0xff] %vm787_vm0, %v689_v2  ;;  %v507_v22 = vrot.slane %v3141_v59, 7  ;;  %v511_v40 = vrot.slane %v3203_v42, 7  ;;  %v513_v42 = vrot.slane %v3207_v45, 7  ;;  %v514_v51 = vrot.slane %v3209_v46, 7 }
  0x43   : > { %2773 = vmatpush1.bf16.msra.mxu0 %v3488_v10  ;;  %v641_v30 = vrot.slane %v3542_v26, 1  ;;  %735 = vrot.lane.b32.xlu0 %v3369_v57, %s2955_s23  ;;  %v2736_v18 = vpack.c.bf16 %v2576_v58, %v2575_v21  ;;  %v2578_v46 = vld [vmem:[%s4528_s1 + $0x178] sm:$0xff]  ;;  %v2778_v21 = vpack.c.bf16 %v2644_v0, %v2643_v3  ;;  %v516_v58 = vrot.slane %v3211_v50, 7 }
  0x44   : > { %2774 = vmatprep.subr.bf16.mxu0 %v2953_v4  ;;  %737 = vrot.lane.b32.xlu1 %v3384_v20, %s2955_s23  ;;  %v3575_v43 = vsel %vm497_vm2, %v507_v22, %v508_v27  ;;  %v3584_v28 = vsel %vm497_vm2, %v510_v38, %v511_v40  ;;  %v2577_v27 = vld [vmem:[%s4528_s1 + $0x170] sm:$0xff]  ;;  %v520_v40 = vrot.slane %v3238_v12, 7  ;;  %v523_v0 = vrot.slane %v3303_v63, 7 }
  0x45   : > { %2734 = vmatpush1.bf16.msra.mxu1 %v2733_v53  ;;  %v642_v2 = vsel %vm594_vm1, %v640_v48, %v641_v30  ;;  %v690_v33 = vsel %vm594_vm1, %v641_v30, 0.0  ;;  %v3599_v53 = vsel %vm497_vm2, %v513_v42, %v514_v51  ;;  %v897_v48 = vld [vmem:[#allocation2 + $0x18] sm:$0xff]  ;;  %v517_v30 = vrot.slane %v3213_v54, 7  ;;  %v2645_v12 = vld [vmem:[%s4528_s1 + $0x190] sm:$0xff] }
  0x46   : > { %2735 = vmatprep.subr.bf16.mxu1 %v2953_v4  ;;  %891 = vst.msk [vmem:[#allocation2 + $0x208] sm:$0xff] %vm787_vm0, %v642_v2  ;;  %893 = vst.msk [vmem:[#allocation2 + $0x218] sm:$0xff] %vm787_vm0, %v690_v33  ;;  %v519_v33 = vrot.slane %v3216_v56, 7  ;;  %v2739_v51 = vpack.c.bf16 %v2578_v46, %v2577_v27  ;;  %v522_v54 = vrot.slane %v3280_v39, 7  ;;  %v525_v27 = vrot.slane %v3307_v6, 7 }
  0x47   : > { %2776 = vmatpush1.bf16.msra.mxu0 %v3546_v15  ;;  %739 = vrot.lane.b32.xlu0 %v3408_v35, %s2955_s23  ;;  %v3614_v3 = vsel %vm497_vm2, %v516_v58, %v517_v30  ;;  %v526_v46 = vrot.slane %v3309_v7, 7  ;;  %v2648_v30 = vld [vmem:[%s4528_s1 + $0x1a8] sm:$0xff] }
  0x48   : > { %2777 = vmatprep.subr.bf16.mxu0 %v2953_v4  ;;  %741 = vrot.lane.b32.xlu1 %v3410_v36, %s2955_s23  ;;  %v3629_v2 = vsel %vm497_vm2, %v519_v33, %v520_v40  ;;  %v3634_v63 = vsel %vm497_vm2, %v522_v54, %v523_v0  ;;  %v2650_v40 = vld [vmem:[%s4528_s1 + $0x1b8] sm:$0xff]  ;;  %v529_v0 = vrot.slane %v3313_v9, 7  ;;  %v2653_v9 = vld [vmem:[%s4528_s1 + $0x1d0] sm:$0xff] }
  0x49   : > { %2737 = vmatpush1.bf16.msra.mxu1 %v2736_v18  ;;  %v2646_v18 = vld [vmem:[%s4528_s1 + $0x198] sm:$0xff]  ;;  %v3655_v7 = vsel %vm497_vm2, %v525_v27, %v526_v46  ;;  %v2652_v46 = vld [vmem:[%s4528_s1 + $0x1c8] sm:$0xff] }
  0x4a   : > { %1553 = vmatmul.mubr.f32.vlgmr.msra.gmra.mrb[0].mxu0 %v2954_v13  ;;  %2738 = vmatprep.subr.bf16.mxu1 %v2953_v4 }
  0x4b   : > { %2612 = vmatprep.mubr.msk.f32.mxu0 %vm787_vm0, %v897_v48  ;;  %2779 = vmatpush1.bf16.msra.mxu0 %v2778_v21  ;;  %v2781_v48 = vpack.c.bf16 %v2646_v18, %v2645_v12  ;;  %v2647_v21 = vld [vmem:[%s4528_s1 + $0x1a0] sm:$0xff] }
  0x4c   : > { %743 = vrot.lane.b32.xlu0 %v3425_v55, %s2955_s23  ;;  %745 = vrot.lane.b32.xlu1 %v3454_v23, %s2955_s23  ;;  %v2651_v18 = vld [vmem:[%s4528_s1 + $0x1c0] sm:$0xff] }
  0x4d   : > { %2740 = vmatpush1.bf16.msra.mxu1 %v2739_v51  ;;  %2780 = vmatprep.subr.bf16.mxu0 %v2953_v4  ;;  %v4538_v51 = vrot.slane %v3311_v8, 7 }
  0x4e   : > { %1558 = vmatmul.mubr.f32.gmra.mrb[2].mxu0 %v2954_v13  ;;  %2813 = vmatprep.subr.bf16.mxu1 %v2953_v4  ;;  %v2784_v13 = vpack.c.bf16 %v2648_v30, %v2647_v21  ;;  %v2790_v21 = vpack.c.bf16 %v2652_v46, %v2651_v18  ;;  %v2654_v30 = vld [vmem:[%s4528_s1 + $0x1d8] sm:$0xff] }
  0x4f   : > { %2613 = vmatprep.mubr.msk.f32.mxu0 %vm787_vm0, %v3244_v17  ;;  %2782 = vmatpush1.bf16.msra.mxu0 %v2781_v48  ;;  %v2649_v17 = vld [vmem:[%s4528_s1 + $0x1b0] sm:$0xff]  ;;  %v3685_v48 = vsel %vm497_vm2, %v4538_v51, %v529_v0  ;;  %v2655_v0 = vld [vmem:[%s4528_s1 + $0x1e0] sm:$0xff] }
  0x50   : > { %747 = vrot.lane.b32.xlu0 %v3478_v61, %s2955_s23  ;;  %749 = vrot.lane.b32.xlu1 %v3504_v25, %s2955_s23  ;;  %v2787_v12 = vpack.c.bf16 %v2650_v40, %v2649_v17  ;;  %v532_v17 = vrot.slane %v3384_v20, 7  ;;  %v2793_v40 = vpack.c.bf16 %v2654_v30, %v2653_v9  ;;  %v2657_v20 = vld [vmem:[%s4528_s1 + $0x1f0] sm:$0xff]  ;;  %v4540_v9 = vrot.slane %v3408_v35, 7 }
  0x51   : > { %2783 = vmatprep.subr.bf16.mxu0 %v2953_v4  ;;  %v535_v30 = vrot.slane %v3410_v36, 7  ;;  %v2661_v36 = vld [vmem:[%s4528_s1 + $0x210] sm:$0xff] }
  0x53   : > { %2785 = vmatpush1.bf16.msra.mxu0 %v2784_v13  ;;  %v4539_v13 = vrot.slane %v3369_v57, 7 }
  0x54   : > { %751 = vrot.lane.b32.xlu0 %v3522_v44, %s2955_s23  ;;  %753 = vrot.lane.b32.xlu1 %v3542_v26, %s2955_s23 }
  0x55   : > { %2786 = vmatprep.subr.bf16.mxu0 %v2953_v4  ;;  %v3706_v18 = vsel %vm497_vm2, %v4539_v13, %v532_v17  ;;  %v2659_v17 = vld [vmem:[%s4528_s1 + $0x200] sm:$0xff] }
  0x57   : > { %2788 = vmatpush1.bf16.msra.mxu0 %v2787_v12  ;;  %v2656_v12 = vld [vmem:[%s4528_s1 + $0x1e8] sm:$0xff] }
  0x58   : > { %2789 = vmatprep.subr.bf16.mxu0 %v2953_v4  ;;  %v2796_v46 = vpack.c.bf16 %v2656_v12, %v2655_v0  ;;  %v3727_v0 = vsel %vm497_vm2, %v4540_v9, %v535_v30  ;;  %v2664_v30 = vld [vmem:[%s4528_s1 + $0x228] sm:$0xff] }
  0x5b   : > { %2791 = vmatpush1.bf16.msra.mxu0 %v2790_v21  ;;  %v2658_v21 = vld [vmem:[%s4528_s1 + $0x1f8] sm:$0xff] }
  0x5c   : > { %2792 = vmatprep.subr.bf16.mxu0 %v2953_v4  ;;  %v2799_v51 = vpack.c.bf16 %v2658_v21, %v2657_v20  ;;  %v537_v20 = vrot.slane %v3425_v55, 7  ;;  %v538_v21 = vrot.slane %v3454_v23, 7  ;;  %v2665_v23 = vld [vmem:[%s4528_s1 + $0x230] sm:$0xff]  ;;  %v4547_v55 = vrot.slane %v3478_v61, 7 }
  0x5f   : > { %2794 = vmatpush1.bf16.msra.mxu0 %v2793_v40  ;;  %v2660_v40 = vld [vmem:[%s4528_s1 + $0x208] sm:$0xff] }
  0x60   : > { %2795 = vmatprep.subr.bf16.mxu0 %v2953_v4  ;;  %v2802_v12 = vpack.c.bf16 %v2660_v40, %v2659_v17  ;;  %v3748_v17 = vsel %vm497_vm2, %v537_v20, %v538_v21  ;;  %v543_v21 = vrot.slane %v3522_v44, 7  ;;  %v4071_v44 = vld [vmem:[#allocation2 + $0x138] sm:$0xff] }
  0x63   : > { %2797 = vmatpush1.bf16.msra.mxu0 %v2796_v46  ;;  %v2662_v46 = vld [vmem:[%s4528_s1 + $0x218] sm:$0xff] }
  0x64   : > { %2798 = vmatprep.subr.bf16.mxu0 %v2953_v4  ;;  %v2805_v13 = vpack.c.bf16 %v2662_v46, %v2661_v36  ;;  %v4541_v36 = vrot.slane %v3478_v61, 7  ;;  %v541_v46 = vrot.slane %v3504_v25, 7  ;;  %v578_v25 = vsel %vm497_vm2, 0.0, %v498_v41 }
  0x65   : > { %v593_v61 = vsel %vm497_vm2, 0.0, %v543_v21 }
  0x67   : > { %2800 = vmatpush1.bf16.msra.mxu0 %v2799_v51  ;;  %v2663_v51 = vld [vmem:[%s4528_s1 + $0x220] sm:$0xff] }
  0x68   : > { %2801 = vmatprep.subr.bf16.mxu0 %v2953_v4  ;;  %v2808_v40 = vpack.c.bf16 %v2664_v30, %v2663_v51  ;;  %v544_v51 = vrot.slane %v3542_v26, 7 }
  0x6a   : > { %v3770_v30 = vsel %vm497_vm2, %v543_v21, %v544_v51  ;;  %v4079_v21 = vld [vmem:[#allocation2 + $0x148] sm:$0xff] }
  0x6b   : > { %2803 = vmatpush1.bf16.msra.mxu0 %v2802_v12  ;;  %v2666_v12 = vld [vmem:[%s4528_s1 + $0x238] sm:$0xff] }
  0x6c   : > { %2804 = vmatprep.subr.bf16.mxu0 %v2953_v4  ;;  %v2811_v9 = vpack.c.bf16 %v2666_v12, %v2665_v23 }
  0x6f   : > { %2806 = vmatpush1.bf16.msra.mxu0 %v2805_v13  ;;  %v3763_v13 = vsel %vm497_vm2, %v4541_v36, %v541_v46 }
  0x70   : > { %2807 = vmatprep.subr.bf16.mxu0 %v2953_v4 }
  0x73   : > { %2809 = vmatpush1.bf16.msra.mxu0 %v2808_v40  ;;  %v4542_v40 = vrot.slane %v3121_v49, 7  ;;  %v3785_v49 = vld [vmem:[#allocation2 + $0x48] sm:$0xff] }
  0x74   : > { %2810 = vmatprep.subr.bf16.mxu0 %v2953_v4 }
  0x75   : > { %v579_v23 = vsel %vm497_vm2, 0.0, %v4542_v40 }
  0x77   : > { %2812 = vmatpush1.bf16.msra.mxu0 %v2811_v9  ;;  %v985_v9 = vld [vmem:[#allocation2 + $0x38] sm:$0xff] }
  0x89   : > { %v692_v12 = vpop.permute.xlu0 %691  ;;  %v696_v46 = vpop.permute.xlu1 %695 }
  0x8a   : > { %v788_v36 = vsel %vm787_vm0, %v578_v25, %v692_v12  ;;  %v3780_v26 = vsel %vm787_vm0, %v579_v23, %v696_v46  ;;  %v3801_v12 = vld [vmem:[#allocation2 + $0x58] sm:$0xff]  ;;  %v3821_v46 = vld [vmem:[#allocation2 + $0x68] sm:$0xff] }
  0x8b   : > { %1232 = vmatmul.mubr.f32.vlgmr.msra.gmra.mrb[0].mxu1 %v788_v36  ;;  %1563 = vmatmul.mubr.f32.gmra.mrb[4].mxu0 %v788_v36 }
  0x8c   : > { %2825 = vmatpush1.bf16.msra.mxu1 %v3026_v5  ;;  %2580 = vmatprep.mubr.msk.f32.mxu1 %vm787_vm0, %v985_v9  ;;  %v4543_v5 = vrot.slane %v3127_v52, 7 }
  0x8d   : > { %v694_v47 = vpop.permute.xlu0 %693  ;;  %v698_v41 = vpop.permute.xlu1 %697  ;;  %2614 = vmatprep.mubr.msk.f32.mxu0 %vm787_vm0, %v985_v9  ;;  %2814 = vmatprep.subr.bf16.mxu1 %v2953_v4 }
  0x8e   : > { %v789_v51 = vsel %vm787_vm0, %v3493_v11, %v694_v47  ;;  %v3792_v25 = vsel %vm787_vm0, %v3532_v62, %v698_v41  ;;  %v580_v36 = vsel %vm497_vm2, 0.0, %v4543_v5  ;;  %v581_v62 = vsel %vm497_vm2, 0.0, %v507_v22 }
  0x8f   : > { %1237 = vmatmul.mubr.f32.gmra.mrb[2].mxu1 %v789_v51  ;;  %1568 = vmatmul.mubr.f32.gmra.mrb[6].mxu0 %v789_v51  ;;  %v582_v22 = vsel %vm497_vm2, 0.0, %v510_v38  ;;  %v583_v38 = vsel %vm497_vm2, 0.0, %v513_v42  ;;  %v584_v42 = vsel %vm497_vm2, 0.0, %v516_v58  ;;  %v585_v58 = vsel %vm497_vm2, 0.0, %v519_v33 }
  0x90   : > { %2581 = vmatprep.mubr.msk.f32.mxu1 %vm787_vm0, %v3785_v49  ;;  %2615 = vmatprep.mubr.msk.f32.mxu0 %vm787_vm0, %v3785_v49  ;;  %v586_v33 = vsel %vm497_vm2, 0.0, %v522_v54  ;;  %v587_v54 = vsel %vm497_vm2, 0.0, %v525_v27  ;;  %v4544_v27 = vrot.slane %v3311_v8, 7 }
  0x91   : > { %v700_v40 = vpop.permute.xlu0 %699  ;;  %v702_v23 = vpop.permute.xlu1 %701  ;;  %2826 = vmatpush1.bf16.msra.mxu1 %v3058_v14 }
  0x92   : > { %v3805_v11 = vsel %vm787_vm0, %v580_v36, %v700_v40  ;;  %v3809_v52 = vsel %vm787_vm0, %v3537_v1, %v702_v23  ;;  %2815 = vmatprep.subr.bf16.mxu1 %v2953_v4 }
  0x93   : > { %1242 = vmatmul.mubr.f32.gmra.mrb[4].mxu1 %v3780_v26  ;;  %1573 = vmatmul.mubr.f32.gmra.mrb[8].mxu0 %v3780_v26 }
  0x94   : > { %2582 = vmatprep.mubr.msk.f32.mxu1 %vm787_vm0, %v3801_v12  ;;  %2616 = vmatprep.mubr.msk.f32.mxu0 %vm787_vm0, %v3801_v12 }
  0x95   : > { %v704_v14 = vpop.permute.xlu0 %703  ;;  %v706_v1 = vpop.permute.xlu1 %705  ;;  %2827 = vmatpush1.bf16.msra.mxu1 %v3091_v24  ;;  %v3841_v24 = vld [vmem:[#allocation2 + $0x78] sm:$0xff] }
  0x96   : > { %v3825_v9 = vsel %vm787_vm0, %v581_v62, %v704_v14  ;;  %v3829_v59 = vsel %vm787_vm0, %v3575_v43, %v706_v1  ;;  %2816 = vmatprep.subr.bf16.mxu1 %v2953_v4 }
  0x97   : > { %1247 = vmatmul.mubr.f32.gmra.mrb[6].mxu1 %v3792_v25  ;;  %1578 = vmatmul.mubr.f32.gmra.mrb[10].mxu0 %v3792_v25 }
  0x98   : > { %2583 = vmatprep.mubr.msk.f32.mxu1 %vm787_vm0, %v3821_v46  ;;  %2617 = vmatprep.mubr.msk.f32.mxu0 %vm787_vm0, %v3821_v46 }
  0x99   : > { %v708_v43 = vpop.permute.xlu0 %707  ;;  %2828 = vmatpush1.bf16.msra.mxu1 %v3100_v32  ;;  %v3861_v32 = vld [vmem:[#allocation2 + $0x88] sm:$0xff] }
  0x9a   : > { %v710_v47 = vpop.permute.xlu1 %709  ;;  %v3845_v41 = vsel %vm787_vm0, %v582_v22, %v708_v43  ;;  %2817 = vmatprep.subr.bf16.mxu1 %v2953_v4 }
  0x9b   : > { %v3849_v34 = vsel %vm787_vm0, %v3584_v28, %v710_v47  ;;  %1252 = vmatmul.mubr.f32.gmra.mrb[8].mxu1 %v3805_v11  ;;  %1583 = vmatmul.mubr.f32.gmra.mrb[12].mxu0 %v3805_v11  ;;  %v588_v47 = vsel %vm497_vm2, 0.0, %v4544_v27 }
  0x9c   : > { %2584 = vmatprep.mubr.msk.f32.mxu1 %vm787_vm0, %v3841_v24  ;;  %2618 = vmatprep.mubr.msk.f32.mxu0 %vm787_vm0, %v3841_v24 }
  0x9d   : > { %v712_v28 = vpop.permute.xlu0 %711  ;;  %2829 = vmatpush1.bf16.msra.mxu1 %v3265_v31  ;;  %v3881_v31 = vld [vmem:[#allocation2 + $0x98] sm:$0xff] }
  0x9e   : > { %v714_v51 = vpop.permute.xlu1 %713  ;;  %v3865_v5 = vsel %vm787_vm0, %v583_v38, %v712_v28  ;;  %2818 = vmatprep.subr.bf16.mxu1 %v2953_v4 }
  0x9f   : > { %v3869_v45 = vsel %vm787_vm0, %v3599_v53, %v714_v51  ;;  %1257 = vmatmul.mubr.f32.gmra.mrb[10].mxu1 %v3809_v52  ;;  %1588 = vmatmul.mubr.f32.gmra.mrb[14].mxu0 %v3809_v52  ;;  %v4545_v51 = vrot.slane %v3369_v57, 7 }
  0xa0   : > { %2585 = vmatprep.mubr.msk.f32.mxu1 %vm787_vm0, %v3861_v32  ;;  %2619 = vmatprep.mubr.msk.f32.mxu0 %vm787_vm0, %v3861_v32 }
  0xa1   : > { %v716_v53 = vpop.permute.xlu0 %715  ;;  %2830 = vmatpush1.bf16.msra.mxu1 %v3322_v16  ;;  %v3901_v16 = vld [vmem:[#allocation2 + $0xa8] sm:$0xff] }
  0xa2   : > { %v718_v36 = vpop.permute.xlu1 %717  ;;  %v3885_v40 = vsel %vm787_vm0, %v584_v42, %v716_v53  ;;  %2819 = vmatprep.subr.bf16.mxu1 %v2953_v4  ;;  %v589_v42 = vsel %vm497_vm2, 0.0, %v4545_v51 }
  0xa3   : > { %v3889_v50 = vsel %vm787_vm0, %v3614_v3, %v718_v36  ;;  %1262 = vmatmul.mubr.f32.gmra.mrb[12].mxu1 %v3825_v9  ;;  %1593 = vmatmul.mubr.f32.gmra.mrb[16].mxu0 %v3825_v9 }
  0xa4   : > { %2586 = vmatprep.mubr.msk.f32.mxu1 %vm787_vm0, %v3881_v31  ;;  %2620 = vmatprep.mubr.msk.f32.mxu0 %vm787_vm0, %v3881_v31 }
  0xa5   : > { %v720_v3 = vpop.permute.xlu0 %719  ;;  %2831 = vmatpush1.bf16.msra.mxu1 %v3372_v60  ;;  %v3921_v60 = vld [vmem:[#allocation2 + $0xb8] sm:$0xff] }
  0xa6   : > { %v722_v23 = vpop.permute.xlu1 %721  ;;  %v3905_v62 = vsel %vm787_vm0, %v585_v58, %v720_v3  ;;  %2820 = vmatprep.subr.bf16.mxu1 %v2953_v4  ;;  %v4546_v58 = vrot.slane %v3408_v35, 7 }
  0xa7   : > { %v3909_v56 = vsel %vm787_vm0, %v3629_v2, %v722_v23  ;;  %1267 = vmatmul.mubr.f32.gmra.mrb[14].mxu1 %v3829_v59  ;;  %1598 = vmatmul.mubr.f32.gmra.mrb[18].mxu0 %v3829_v59 }
  0xa8   : > { %2587 = vmatprep.mubr.msk.f32.mxu1 %vm787_vm0, %v3901_v16  ;;  %2621 = vmatprep.mubr.msk.f32.mxu0 %vm787_vm0, %v3901_v16  ;;  %v590_v3 = vsel %vm497_vm2, 0.0, %v4546_v58 }
  0xa9   : > { %v724_v2 = vpop.permute.xlu0 %723  ;;  %2832 = vmatpush1.bf16.msra.mxu1 %v3388_v19  ;;  %v3941_v19 = vld [vmem:[#allocation2 + $0xc8] sm:$0xff] }
  0xaa   : > { %v726_v14 = vpop.permute.xlu1 %725  ;;  %v3925_v1 = vsel %vm787_vm0, %v586_v33, %v724_v2  ;;  %2821 = vmatprep.subr.bf16.mxu1 %v2953_v4  ;;  %v591_v33 = vsel %vm497_vm2, 0.0, %v537_v20  ;;  %v592_v20 = vsel %vm497_vm2, 0.0, %v4547_v55 }
  0xab   : > { %v3929_v39 = vsel %vm787_vm0, %v3634_v63, %v726_v14  ;;  %1272 = vmatmul.mubr.f32.gmra.mrb[16].mxu1 %v3845_v41  ;;  %1603 = vmatmul.mubr.f32.gmra.mrb[20].mxu0 %v3845_v41 }
  0xac   : > { %2588 = vmatprep.mubr.msk.f32.mxu1 %vm787_vm0, %v3921_v60  ;;  %2622 = vmatprep.mubr.msk.f32.mxu0 %vm787_vm0, %v3921_v60 }
  0xad   : > { %v728_v63 = vpop.permute.xlu0 %727  ;;  %2833 = vmatpush1.bf16.msra.mxu1 %v3412_v37  ;;  %v3961_v37 = vld [vmem:[#allocation2 + $0xd8] sm:$0xff] }
  0xae   : > { %v730_v22 = vpop.permute.xlu1 %729  ;;  %v3945_v43 = vsel %vm787_vm0, %v587_v54, %v728_v63  ;;  %2822 = vmatprep.subr.bf16.mxu1 %v2953_v4  ;;  %v4038_v63 = vld [vmem:[#allocation2 + $0x118] sm:$0xff] }
  0xaf   : > { %v3949_v6 = vsel %vm787_vm0, %v3655_v7, %v730_v22  ;;  %1277 = vmatmul.mubr.f32.gmra.mrb[18].mxu1 %v3849_v34  ;;  %1608 = vmatmul.mubr.f32.gmra.mrb[22].mxu0 %v3849_v34 }
  0xb0   : > { %2589 = vmatprep.mubr.msk.f32.mxu1 %vm787_vm0, %v3941_v19  ;;  %2623 = vmatprep.mubr.msk.f32.mxu0 %vm787_vm0, %v3941_v19 }
  0xb1   : > { %v732_v7 = vpop.permute.xlu0 %731  ;;  %2834 = vmatpush1.bf16.msra.mxu1 %v3470_v29  ;;  %v3981_v29 = vld [vmem:[#allocation2 + $0xe8] sm:$0xff] }
  0xb2   : > { %v734_v38 = vpop.permute.xlu1 %733  ;;  %v3965_v28 = vsel %vm787_vm0, %v588_v47, %v732_v7  ;;  %2823 = vmatprep.subr.bf16.mxu1 %v2953_v4 }
  0xb3   : > { %v3969_v8 = vsel %vm787_vm0, %v3685_v48, %v734_v38  ;;  %1282 = vmatmul.mubr.f32.gmra.mrb[20].mxu1 %v3865_v5  ;;  %1613 = vmatmul.mubr.f32.gmra.mrb[24].mxu0 %v3865_v5 }
  0xb4   : > { %2590 = vmatprep.mubr.msk.f32.mxu1 %vm787_vm0, %v3961_v37  ;;  %2624 = vmatprep.mubr.msk.f32.mxu0 %vm787_vm0, %v3961_v37 }
  0xb5   : > { %v736_v48 = vpop.permute.xlu0 %735  ;;  %2835 = vmatpush1.bf16.msra.mxu1 %v3488_v10  ;;  %v4001_v10 = vld [vmem:[#allocation2 + $0xf8] sm:$0xff] }
  0xb6   : > { %v738_v53 = vpop.permute.xlu1 %737  ;;  %v3985_v36 = vsel %vm787_vm0, %v589_v42, %v736_v48  ;;  %2824 = vmatprep.subr.bf16.mxu1 %v2953_v4 }
  0xb7   : > { %v3989_v57 = vsel %vm787_vm0, %v3706_v18, %v738_v53  ;;  %1287 = vmatmul.mubr.f32.gmra.mrb[22].mxu1 %v3869_v45  ;;  %1618 = vmatmul.mubr.f32.gmra.mrb[26].mxu0 %v3869_v45 }
  0xb8   : > { %2591 = vmatprep.mubr.msk.f32.mxu1 %vm787_vm0, %v3981_v29  ;;  %2625 = vmatprep.mubr.msk.f32.mxu0 %vm787_vm0, %v3981_v29 }
  0xb9   : > { %v740_v18 = vpop.permute.xlu0 %739  ;;  %2836 = vmatpush1.bf16.msra.mxu1 %v3546_v15  ;;  %v4020_v15 = vld [vmem:[#allocation2 + $0x108] sm:$0xff] }
  0xba   : > { %v742_v23 = vpop.permute.xlu1 %741  ;;  %v4005_v4 = vsel %vm787_vm0, %v590_v3, %v740_v18 }
  0xbb   : > { %v4009_v35 = vsel %vm787_vm0, %v3727_v0, %v742_v23  ;;  %1292 = vmatmul.mubr.f32.gmra.mrb[24].mxu1 %v3885_v40  ;;  %1623 = vmatmul.mubr.f32.gmra.mrb[28].mxu0 %v3885_v40 }
  0xbc   : > { %2592 = vmatprep.mubr.msk.f32.mxu1 %vm787_vm0, %v4001_v10  ;;  %2626 = vmatprep.mubr.msk.f32.mxu0 %vm787_vm0, %v4001_v10 }
  0xbe   : > { %v744_v2 = vpop.permute.xlu0 %743  ;;  %v746_v14 = vpop.permute.xlu1 %745 }
  0xbf   : > { %v4023_v0 = vsel %vm787_vm0, %v591_v33, %v744_v2  ;;  %v4027_v54 = vsel %vm787_vm0, %v3748_v17, %v746_v14  ;;  %1297 = vmatmul.mubr.f32.gmra.mrb[26].mxu1 %v3889_v50  ;;  %1628 = vmatmul.mubr.f32.gmra.mrb[30].mxu0 %v3889_v50  ;;  %v4296_v14 = vld [vmem:[%s4531_s4] ss:$0 sm:$0xff] }
  0xc0   : > { %2593 = vmatprep.mubr.msk.f32.mxu1 %vm787_vm0, %v4020_v15  ;;  %2667 = vmatprep.mubr.msk.f32.mxu0 %vm787_vm0, %v3785_v49  ;;  %v4056_v49 = vld [vmem:[#allocation2 + $0x128] sm:$0xff] }
  0xc2   : > { %v748_v22 = vpop.permute.xlu0 %747  ;;  %v750_v27 = vpop.permute.xlu1 %749 }
  0xc3   : > { %v4041_v17 = vsel %vm787_vm0, %v592_v20, %v748_v22  ;;  %v4045_v47 = vsel %vm787_vm0, %v3763_v13, %v750_v27  ;;  %1302 = vmatmul.mubr.f32.gmra.mrb[28].mxu1 %v3905_v62  ;;  %1964 = vmatmul.mubr.f32.vlgmr.msra.gmra.mrb[0].mxu0 %v3780_v26  ;;  %v4301_v20 = vld [vmem:[%s4532_s5] ss:$0 sm:$0xff] }
  0xc4   : > { %2594 = vmatprep.mubr.msk.f32.mxu1 %vm787_vm0, %v4038_v63  ;;  %2668 = vmatprep.mubr.msk.f32.mxu0 %vm787_vm0, %v3801_v12  ;;  %v4103_v12 = vld [vmem:[#allocation2 + $0x178] sm:$0xff] }
  0xc6   : > { %v752_v7 = vpop.permute.xlu0 %751  ;;  %v754_v38 = vpop.permute.xlu1 %753 }
  0xc7   : > { %v4059_v13 = vsel %vm787_vm0, %v593_v61, %v752_v7  ;;  %v4063_v26 = vsel %vm787_vm0, %v3770_v30, %v754_v38  ;;  %1307 = vmatmul.mubr.f32.gmra.mrb[30].mxu1 %v3909_v56  ;;  %1969 = vmatmul.mubr.f32.gmra.mrb[2].mxu0 %v3792_v25  ;;  %v4087_v30 = vld [vmem:[#allocation2 + $0x158] sm:$0xff]  ;;  %v4095_v25 = vld [vmem:[#allocation2 + $0x168] sm:$0xff] }
  0xc8   : > { %2595 = vmatprep.mubr.msk.f32.mxu1 %vm787_vm0, %v4056_v49  ;;  %2669 = vmatprep.mubr.msk.f32.mxu0 %vm787_vm0, %v3821_v46  ;;  %v4127_v46 = vld [vmem:[#allocation2 + $0x1a8] sm:$0xff] }
  0xcb   : > { %1312 = vmatmul.mubr.f32.gmra.mrb[32].mxu1 %v3925_v1  ;;  %1974 = vmatmul.mubr.f32.gmra.mrb[4].mxu0 %v3805_v11  ;;  %v4111_v11 = vld [vmem:[#allocation2 + $0x188] sm:$0xff] }
  0xcc   : > { %2596 = vmatprep.mubr.msk.f32.mxu1 %vm787_vm0, %v4071_v44  ;;  %2670 = vmatprep.mubr.msk.f32.mxu0 %vm787_vm0, %v3841_v24  ;;  %v4151_v24 = vld [vmem:[#allocation2 + $0x1d8] sm:$0xff] }
  0xcf   : > { %1317 = vmatmul.mubr.f32.gmra.mrb[34].mxu1 %v3929_v39  ;;  %1979 = vmatmul.mubr.f32.gmra.mrb[6].mxu0 %v3809_v52  ;;  %v4119_v52 = vld [vmem:[#allocation2 + $0x198] sm:$0xff] }
  0xd0   : > { %2597 = vmatprep.mubr.msk.f32.mxu1 %vm787_vm0, %v4079_v21  ;;  %2671 = vmatprep.mubr.msk.f32.mxu0 %vm787_vm0, %v3861_v32  ;;  %v1043_v32 = vld [vmem:[#allocation2 + $0x208] sm:$0xff] }
  0xd3   : > { %1322 = vmatmul.mubr.f32.gmra.mrb[36].mxu1 %v3945_v43  ;;  %1984 = vmatmul.mubr.f32.gmra.mrb[8].mxu0 %v3825_v9  ;;  %v4135_v9 = vld [vmem:[#allocation2 + $0x1b8] sm:$0xff] }
  0xd4   : > { %2598 = vmatprep.mubr.msk.f32.mxu1 %vm787_vm0, %v4087_v30  ;;  %2672 = vmatprep.mubr.msk.f32.mxu0 %vm787_vm0, %v3881_v31  ;;  %v1777_v31 = vld [vmem:[#allocation2 + $0x238] sm:$0xff] }
  0xd7   : > { %1327 = vmatmul.mubr.f32.gmra.mrb[38].mxu1 %v3949_v6  ;;  %1989 = vmatmul.mubr.f32.gmra.mrb[10].mxu0 %v3829_v59  ;;  %v4143_v59 = vld [vmem:[#allocation2 + $0x1c8] sm:$0xff] }
  0xd8   : > { %2599 = vmatprep.mubr.msk.f32.mxu1 %vm787_vm0, %v4095_v25  ;;  %2673 = vmatprep.mubr.msk.f32.mxu0 %vm787_vm0, %v3901_v16 }
  0xdb   : > { %1332 = vmatmul.mubr.f32.gmra.mrb[40].mxu1 %v3965_v28  ;;  %1994 = vmatmul.mubr.f32.gmra.mrb[12].mxu0 %v3845_v41  ;;  %v4159_v41 = vld [vmem:[#allocation2 + $0x1e8] sm:$0xff] }
  0xdc   : > { %2600 = vmatprep.mubr.msk.f32.mxu1 %vm787_vm0, %v4103_v12  ;;  %2674 = vmatprep.mubr.msk.f32.mxu0 %vm787_vm0, %v3921_v60 }
  0xdf   : > { %1337 = vmatmul.mubr.f32.gmra.mrb[42].mxu1 %v3969_v8  ;;  %1999 = vmatmul.mubr.f32.gmra.mrb[14].mxu0 %v3849_v34  ;;  %v4167_v34 = vld [vmem:[#allocation2 + $0x1f8] sm:$0xff] }
  0xe0   : > { %2601 = vmatprep.mubr.msk.f32.mxu1 %vm787_vm0, %v4111_v11  ;;  %2675 = vmatprep.mubr.msk.f32.mxu0 %vm787_vm0, %v3941_v19 }
  0xe3   : > { %1342 = vmatmul.mubr.f32.gmra.mrb[44].mxu1 %v3985_v36  ;;  %2004 = vmatmul.mubr.f32.gmra.mrb[16].mxu0 %v3865_v5  ;;  %v1045_v5 = vld [vmem:[#allocation2 + $0x218] sm:$0xff] }
  0xe4   : > { %2602 = vmatprep.mubr.msk.f32.mxu1 %vm787_vm0, %v4119_v52  ;;  %2676 = vmatprep.mubr.msk.f32.mxu0 %vm787_vm0, %v3961_v37 }
  0xe7   : > { %1347 = vmatmul.mubr.f32.gmra.mrb[46].mxu1 %v3989_v57  ;;  %2009 = vmatmul.mubr.f32.gmra.mrb[18].mxu0 %v3869_v45  ;;  %v1775_v45 = vld [vmem:[#allocation2 + $0x228] sm:$0xff] }
  0xe8   : > { %2603 = vmatprep.mubr.msk.f32.mxu1 %vm787_vm0, %v4127_v46  ;;  %2677 = vmatprep.mubr.msk.f32.mxu0 %vm787_vm0, %v3981_v29 }
  0xeb   : > { %1352 = vmatmul.mubr.f32.gmra.mrb[48].mxu1 %v4005_v4  ;;  %2014 = vmatmul.mubr.f32.gmra.mrb[20].mxu0 %v3885_v40  ;;  %v2944_v40 = vld [vmem:[#allocation2] sm:$0xff] }
  0xec   : > { %2604 = vmatprep.mubr.msk.f32.mxu1 %vm787_vm0, %v4135_v9  ;;  %2678 = vmatprep.mubr.msk.f32.mxu0 %vm787_vm0, %v4001_v10 }
  0xef   : > { %1357 = vmatmul.mubr.f32.gmra.mrb[50].mxu1 %v4009_v35  ;;  %2019 = vmatmul.mubr.f32.gmra.mrb[22].mxu0 %v3889_v50 }
  0xf0   : > { %2605 = vmatprep.mubr.msk.f32.mxu1 %vm787_vm0, %v4143_v59  ;;  %2679 = vmatprep.mubr.msk.f32.mxu0 %vm787_vm0, %v4020_v15 }
  0xf3   : > { %1362 = vmatmul.mubr.f32.gmra.mrb[52].mxu1 %v4023_v0  ;;  %2024 = vmatmul.mubr.f32.gmra.mrb[24].mxu0 %v3905_v62 }
  0xf4   : > { %2606 = vmatprep.mubr.msk.f32.mxu1 %vm787_vm0, %v4151_v24  ;;  %2680 = vmatprep.mubr.msk.f32.mxu0 %vm787_vm0, %v4038_v63 }
  0xf7   : > { %1367 = vmatmul.mubr.f32.gmra.mrb[54].mxu1 %v4027_v54  ;;  %2029 = vmatmul.mubr.f32.gmra.mrb[26].mxu0 %v3909_v56 }
  0xf8   : > { %2607 = vmatprep.mubr.msk.f32.mxu1 %vm787_vm0, %v4159_v41  ;;  %2681 = vmatprep.mubr.msk.f32.mxu0 %vm787_vm0, %v4056_v49 }
  0xfb   : > { %1372 = vmatmul.mubr.f32.gmra.mrb[56].mxu1 %v4041_v17  ;;  %2034 = vmatmul.mubr.f32.gmra.mrb[28].mxu0 %v3925_v1 }
  0xfc   : > { %2608 = vmatprep.mubr.msk.f32.mxu1 %vm787_vm0, %v4167_v34  ;;  %2682 = vmatprep.mubr.msk.f32.mxu0 %vm787_vm0, %v4071_v44 }
  0xff   : > { %1377 = vmatmul.mubr.f32.gmra.mrb[58].mxu1 %v4045_v47  ;;  %2039 = vmatmul.mubr.f32.gmra.mrb[30].mxu0 %v3929_v39 }
 0x100   : > { %2609 = vmatprep.mubr.msk.f32.mxu1 %vm787_vm0, %v1043_v32  ;;  %2683 = vmatprep.mubr.msk.f32.mxu0 %vm787_vm0, %v4079_v21 }
 0x103   : > { %1382 = vmatmul.mubr.f32.gmra.mrb[60].mxu1 %v4059_v13  ;;  %2044 = vmatmul.mubr.f32.gmra.mrb[32].mxu0 %v3945_v43 }
 0x104   : > { %2610 = vmatprep.mubr.msk.f32.mxu1 %vm787_vm0, %v1045_v5  ;;  %2684 = vmatprep.mubr.msk.f32.mxu0 %vm787_vm0, %v4087_v30 }
 0x107   : > { %1387 = vmatmul.mubr.f32.gmra.mrb[62].mxu1 %v4063_v26  ;;  %2049 = vmatmul.mubr.f32.gmra.mrb[34].mxu0 %v3949_v6 }
 0x108   : > { %2627 = vmatprep.mubr.msk.f32.mxu1 %vm787_vm0, %v4020_v15  ;;  %2685 = vmatprep.mubr.msk.f32.mxu0 %vm787_vm0, %v4095_v25 }
 0x10b   : > { %1633 = vmatmul.mubr.f32.vlgmr.msra.gmra.mrb[32].mxu1 %v3905_v62  ;;  %2054 = vmatmul.mubr.f32.gmra.mrb[36].mxu0 %v3965_v28 }
 0x10c   : > { %2628 = vmatprep.mubr.msk.f32.mxu1 %vm787_vm0, %v4038_v63  ;;  %2686 = vmatprep.mubr.msk.f32.mxu0 %vm787_vm0, %v4103_v12 }
 0x10f   : > { %1638 = vmatmul.mubr.f32.gmra.mrb[34].mxu1 %v3909_v56  ;;  %2059 = vmatmul.mubr.f32.gmra.mrb[38].mxu0 %v3969_v8 }
 0x110   : > { %2629 = vmatprep.mubr.msk.f32.mxu1 %vm787_vm0, %v4056_v49  ;;  %2687 = vmatprep.mubr.msk.f32.mxu0 %vm787_vm0, %v4111_v11 }
 0x113   : > { %1643 = vmatmul.mubr.f32.gmra.mrb[36].mxu1 %v3925_v1  ;;  %2064 = vmatmul.mubr.f32.gmra.mrb[40].mxu0 %v3985_v36 }
 0x114   : > { %2630 = vmatprep.mubr.msk.f32.mxu1 %vm787_vm0, %v4071_v44  ;;  %2688 = vmatprep.mubr.msk.f32.mxu0 %vm787_vm0, %v4119_v52 }
 0x117   : > { %1648 = vmatmul.mubr.f32.gmra.mrb[38].mxu1 %v3929_v39  ;;  %2069 = vmatmul.mubr.f32.gmra.mrb[42].mxu0 %v3989_v57 }
 0x118   : > { %2631 = vmatprep.mubr.msk.f32.mxu1 %vm787_vm0, %v4079_v21  ;;  %2689 = vmatprep.mubr.msk.f32.mxu0 %vm787_vm0, %v4127_v46 }
 0x11b   : > { %1653 = vmatmul.mubr.f32.gmra.mrb[40].mxu1 %v3945_v43  ;;  %2074 = vmatmul.mubr.f32.gmra.mrb[44].mxu0 %v4005_v4 }
 0x11c   : > { %2632 = vmatprep.mubr.msk.f32.mxu1 %vm787_vm0, %v4087_v30  ;;  %2690 = vmatprep.mubr.msk.f32.mxu0 %vm787_vm0, %v4135_v9 }
 0x11f   : > { %1658 = vmatmul.mubr.f32.gmra.mrb[42].mxu1 %v3949_v6  ;;  %2079 = vmatmul.mubr.f32.gmra.mrb[46].mxu0 %v4009_v35 }
 0x120   : > { %2633 = vmatprep.mubr.msk.f32.mxu1 %vm787_vm0, %v4095_v25  ;;  %2691 = vmatprep.mubr.msk.f32.mxu0 %vm787_vm0, %v4143_v59 }
 0x123   : > { %1663 = vmatmul.mubr.f32.gmra.mrb[44].mxu1 %v3965_v28  ;;  %2084 = vmatmul.mubr.f32.gmra.mrb[48].mxu0 %v4023_v0 }
 0x124   : > { %2634 = vmatprep.mubr.msk.f32.mxu1 %vm787_vm0, %v4103_v12  ;;  %2692 = vmatprep.mubr.msk.f32.mxu0 %vm787_vm0, %v4151_v24 }
 0x127   : > { %1668 = vmatmul.mubr.f32.gmra.mrb[46].mxu1 %v3969_v8  ;;  %2089 = vmatmul.mubr.f32.gmra.mrb[50].mxu0 %v4027_v54 }
 0x128   : > { %2635 = vmatprep.mubr.msk.f32.mxu1 %vm787_vm0, %v4111_v11  ;;  %2693 = vmatprep.mubr.msk.f32.mxu0 %vm787_vm0, %v4159_v41 }
 0x12b   : > { %1673 = vmatmul.mubr.f32.gmra.mrb[48].mxu1 %v3985_v36  ;;  %2094 = vmatmul.mubr.f32.gmra.mrb[52].mxu0 %v4041_v17 }
 0x12c   : > { %2636 = vmatprep.mubr.msk.f32.mxu1 %vm787_vm0, %v4119_v52  ;;  %2694 = vmatprep.mubr.msk.f32.mxu0 %vm787_vm0, %v4167_v34 }
 0x12f   : > { %1678 = vmatmul.mubr.f32.gmra.mrb[50].mxu1 %v3989_v57  ;;  %2099 = vmatmul.mubr.f32.gmra.mrb[54].mxu0 %v4045_v47 }
 0x130   : > { %2637 = vmatprep.mubr.msk.f32.mxu1 %vm787_vm0, %v4127_v46  ;;  %2695 = vmatprep.mubr.msk.f32.mxu0 %vm787_vm0, %v1043_v32 }
 0x133   : > { %1683 = vmatmul.mubr.f32.gmra.mrb[52].mxu1 %v4005_v4  ;;  %2104 = vmatmul.mubr.f32.gmra.mrb[56].mxu0 %v4059_v13 }
 0x134   : > { %2638 = vmatprep.mubr.msk.f32.mxu1 %vm787_vm0, %v4135_v9  ;;  %2696 = vmatprep.mubr.msk.f32.mxu0 %vm787_vm0, %v1045_v5 }
 0x137   : > { %1688 = vmatmul.mubr.f32.gmra.mrb[54].mxu1 %v4009_v35  ;;  %2109 = vmatmul.mubr.f32.gmra.mrb[58].mxu0 %v4063_v26 }
 0x138   : > { %2639 = vmatprep.mubr.msk.f32.mxu1 %vm787_vm0, %v4143_v59  ;;  %2697 = vmatprep.mubr.msk.f32.mxu0 %vm787_vm0, %v1775_v45 }
 0x13b   : > { %1693 = vmatmul.mubr.f32.gmra.mrb[56].mxu1 %v4023_v0  ;;  %2114 = vmatmul.mubr.f32.gmra.mrb[60].mxu0 %v2944_v40 }
 0x13c   : > { %2640 = vmatprep.mubr.msk.f32.mxu1 %vm787_vm0, %v4151_v24  ;;  %2698 = vmatprep.mubr.msk.f32.mxu0 %vm787_vm0, %v1777_v31 }
 0x13f   : > { %1698 = vmatmul.mubr.f32.gmra.mrb[58].mxu1 %v4027_v54  ;;  %2119 = vmatmul.mubr.f32.gmra.mrb[62].mxu0 %v2944_v40 }
 0x140   : > { %2641 = vmatprep.mubr.msk.f32.mxu1 %vm787_vm0, %v4159_v41 }
 0x143   : > { %1703 = vmatmul.mubr.f32.gmra.mrb[60].mxu1 %v4041_v17 }
 0x144   : > { %2642 = vmatprep.mubr.msk.f32.mxu1 %vm787_vm0, %v4167_v34 }
 0x147   : > { %1708 = vmatmul.mubr.f32.gmra.mrb[62].mxu1 %v4045_v47 }
 0x15e   : > { %v1233_v50 = vpop.f32.mrb[0].mxu1 }
 0x15f   : > { %v1235_v16 = vpop.f32.mrb[1].mxu1 }
 0x162   : > { %v1238_v62 = vpop.f32.mrb[2].mxu1 }
 0x163   : > { %v1240_v56 = vpop.f32.mrb[3].mxu1 }
 0x166   : > { %v1243_v60 = vpop.f32.mrb[4].mxu1 }
 0x167   : > { %v1245_v1 = vpop.f32.mrb[5].mxu1 }
 0x16a   : > { %v1248_v39 = vpop.f32.mrb[6].mxu1 }
 0x16b   : > { %v1250_v19 = vpop.f32.mrb[7].mxu1 }
 0x16e   : > { %v4271_v43 = vpop.f32.mrb[8].mxu1 }
 0x16f   : > { %v1255_v6 = vpop.f32.mrb[9].mxu1 }
 0x172   : > { %v4273_v37 = vpop.f32.mrb[10].mxu1 }
 0x173   : > { %v1260_v28 = vpop.f32.mrb[11].mxu1 }
 0x176   : > { %v4275_v8 = vpop.f32.mrb[12].mxu1 }
 0x177   : > { %v1265_v51 = vpop.f32.mrb[13].mxu1 }
 0x17a   : > { %v4277_v42 = vpop.f32.mrb[14].mxu1 }
 0x17b   : > { %v1270_v29 = vpop.f32.mrb[15].mxu1 }
 0x17e   : > { %v4279_v48 = vpop.f32.mrb[16].mxu1 }
 0x17f   : > { %v1275_v53 = vpop.f32.mrb[17].mxu1 }
 0x182   : > { %v4281_v36 = vpop.f32.mrb[18].mxu1 }
 0x183   : > { %v1280_v57 = vpop.f32.mrb[19].mxu1 }
 0x186   : > { %v4283_v58 = vpop.f32.mrb[20].mxu1 }
 0x187   : > { %v1285_v3 = vpop.f32.mrb[21].mxu1 }
 0x18a   : > { %v4285_v10 = vpop.f32.mrb[22].mxu1 }
 0x18b   : > { %v1290_v18 = vpop.f32.mrb[23].mxu1 }
 0x18e   : > { %v4287_v23 = vpop.f32.mrb[24].mxu1 }
 0x18f   : > { %v1295_v4 = vpop.f32.mrb[25].mxu1 }
 0x192   : > { %v4289_v35 = vpop.f32.mrb[26].mxu1 }
 0x193   : > { %v1300_v33 = vpop.f32.mrb[27].mxu1 }
 0x196   : > { %v4291_v15 = vpop.f32.mrb[28].mxu1  ;;  %v1965_v2 = vpop.f32.mrb[0].mxu0 }
 0x197   : > { %v2837_v0 = vadd.f32 %v1965_v2, %v1233_v50  ;;  %v1305_v54 = vpop.f32.mrb[29].mxu1  ;;  %v1967_v55 = vpop.f32.mrb[1].mxu0 }
 0x199   : > { %v2163_v63 = vmul.f32 %v2837_v0, %v4296_v14 }
 0x19a   : > { %v4311_v22 = vpop.f32.mrb[30].mxu1  ;;  %v1970_v27 = vpop.f32.mrb[2].mxu0 }
 0x19b   : > { %v2202_v17 = vadd.f32 %v4301_v20, %v2163_v63  ;;  %v2838_v47 = vadd.f32 %v1970_v27, %v1238_v62  ;;  %v1310_v61 = vpop.f32.mrb[31].mxu1  ;;  %v1972_v49 = vpop.f32.mrb[3].mxu0 }
 0x19d   : > { %2234 = vst.msk [vmem:[%s4309_s20] sm:$0xff] %vm787_vm0, %v2202_v17  ;;  %v2164_v7 = vmul.f32 %v2838_v47, %v4296_v14  ;;  %v2337_v13 = vmul.f32 %v2202_v17, %v2202_v17  ;;  %v2266_v30 = vsel %vm787_vm0, %v2202_v17, 0.0 }
 0x19e   : > { %v1975_v38 = vpop.f32.mrb[4].mxu0 }
 0x19f   : > { %v2203_v26 = vadd.f32 %v4301_v20, %v2164_v7  ;;  %v2839_v44 = vadd.f32 %v1975_v38, %v1243_v60  ;;  %v1977_v21 = vpop.f32.mrb[5].mxu0  ;;  %v2369_v9 = vsel %vm787_vm0, %v2337_v13, 0.0 }
 0x1a1   : > { %2235 = vst.msk [vmem:[%s4309_s20 + $0x8] sm:$0xff] %vm787_vm0, %v2203_v26  ;;  %v2267_v25 = vsel %vm787_vm0, %v2203_v26, 0.0  ;;  %v2338_v12 = vmul.f32 %v2203_v26, %v2203_v26  ;;  %v2165_v11 = vmul.f32 %v2839_v44, %v4296_v14 }
 0x1a2   : > { %v2268_v52 = vadd.f32 %v2267_v25, %v2266_v30  ;;  %v1980_v46 = vpop.f32.mrb[6].mxu0 }
 0x1a3   : > { %v2370_v59 = vsel %vm787_vm0, %v2338_v12, 0.0  ;;  %v2204_v24 = vadd.f32 %v4301_v20, %v2165_v11  ;;  %v2840_v41 = vadd.f32 %v1980_v46, %v1248_v39  ;;  %v1982_v34 = vpop.f32.mrb[7].mxu0 }
 0x1a4   : > { %v2371_v32 = vadd.f32 %v2370_v59, %v2369_v9 }
 0x1a5   : > { %2236 = vst.msk [vmem:[%s4309_s20 + $0x10] sm:$0xff] %vm787_vm0, %v2204_v24  ;;  %v2269_v5 = vsel %vm787_vm0, %v2204_v24, 0.0  ;;  %v2339_v45 = vmul.f32 %v2204_v24, %v2204_v24  ;;  %v2166_v31 = vmul.f32 %v2840_v41, %v4296_v14 }
 0x1a6   : > { %v2270_v40 = vadd.f32 %v2269_v5, %v2268_v52  ;;  %v1985_v50 = vpop.f32.mrb[8].mxu0 }
 0x1a7   : > { %v2372_v16 = vsel %vm787_vm0, %v2339_v45, 0.0  ;;  %v2205_v62 = vadd.f32 %v4301_v20, %v2166_v31  ;;  %v2841_v56 = vadd.f32 %v1985_v50, %v4271_v43  ;;  %v1987_v60 = vpop.f32.mrb[9].mxu0 }
 0x1a8   : > { %v2373_v1 = vadd.f32 %v2372_v16, %v2371_v32 }
 0x1a9   : > { %2237 = vst.msk [vmem:[%s4309_s20 + $0x18] sm:$0xff] %vm787_vm0, %v2205_v62  ;;  %v2271_v39 = vsel %vm787_vm0, %v2205_v62, 0.0  ;;  %v2340_v19 = vmul.f32 %v2205_v62, %v2205_v62  ;;  %v2167_v6 = vmul.f32 %v2841_v56, %v4296_v14 }
 0x1aa   : > { %v2272_v28 = vadd.f32 %v2271_v39, %v2270_v40  ;;  %v1990_v51 = vpop.f32.mrb[10].mxu0 }
 0x1ab   : > { %v2374_v29 = vsel %vm787_vm0, %v2340_v19, 0.0  ;;  %v2206_v53 = vadd.f32 %v4301_v20, %v2167_v6  ;;  %v2842_v57 = vadd.f32 %v1990_v51, %v4273_v37  ;;  %v1992_v3 = vpop.f32.mrb[11].mxu0 }
 0x1ac   : > { %v2375_v43 = vadd.f32 %v2374_v29, %v2373_v1 }
 0x1ad   : > { %2238 = vst.msk [vmem:[%s4309_s20 + $0x20] sm:$0xff] %vm787_vm0, %v2206_v53  ;;  %v2273_v18 = vsel %vm787_vm0, %v2206_v53, 0.0  ;;  %v2341_v4 = vmul.f32 %v2206_v53, %v2206_v53  ;;  %v2168_v33 = vmul.f32 %v2842_v57, %v4296_v14 }
 0x1ae   : > { %v2274_v2 = vadd.f32 %v2273_v18, %v2272_v28  ;;  %v1995_v0 = vpop.f32.mrb[12].mxu0 }
 0x1af   : > { %v2376_v54 = vsel %vm787_vm0, %v2341_v4, 0.0  ;;  %v2207_v55 = vadd.f32 %v4301_v20, %v2168_v33  ;;  %v2843_v63 = vadd.f32 %v1995_v0, %v4275_v8  ;;  %v1997_v27 = vpop.f32.mrb[13].mxu0 }
 0x1b0   : > { %v2377_v37 = vadd.f32 %v2376_v54, %v2375_v43 }
 0x1b1   : > { %2239 = vst.msk [vmem:[%s4309_s20 + $0x28] sm:$0xff] %vm787_vm0, %v2207_v55  ;;  %v2275_v17 = vsel %vm787_vm0, %v2207_v55, 0.0  ;;  %v2342_v47 = vmul.f32 %v2207_v55, %v2207_v55  ;;  %v2169_v61 = vmul.f32 %v2843_v63, %v4296_v14 }
 0x1b2   : > { %v2276_v49 = vadd.f32 %v2275_v17, %v2274_v2  ;;  %v2000_v7 = vpop.f32.mrb[14].mxu0 }
 0x1b3   : > { %v2378_v38 = vsel %vm787_vm0, %v2342_v47, 0.0  ;;  %v2208_v13 = vadd.f32 %v4301_v20, %v2169_v61  ;;  %v2844_v26 = vadd.f32 %v2000_v7, %v4277_v42  ;;  %v2002_v44 = vpop.f32.mrb[15].mxu0 }
 0x1b4   : > { %v2379_v8 = vadd.f32 %v2378_v38, %v2377_v37 }
 0x1b5   : > { %2240 = vst.msk [vmem:[%s4309_s20 + $0x30] sm:$0xff] %vm787_vm0, %v2208_v13  ;;  %v2277_v21 = vsel %vm787_vm0, %v2208_v13, 0.0  ;;  %v2343_v30 = vmul.f32 %v2208_v13, %v2208_v13  ;;  %v2170_v25 = vmul.f32 %v2844_v26, %v4296_v14 }
 0x1b6   : > { %v2278_v12 = vadd.f32 %v2277_v21, %v2276_v49  ;;  %v2005_v11 = vpop.f32.mrb[16].mxu0 }
 0x1b7   : > { %v2380_v52 = vsel %vm787_vm0, %v2343_v30, 0.0  ;;  %v2209_v46 = vadd.f32 %v4301_v20, %v2170_v25  ;;  %v2845_v9 = vadd.f32 %v2005_v11, %v4279_v48  ;;  %v2007_v59 = vpop.f32.mrb[17].mxu0 }
 0x1b8   : > { %v2381_v42 = vadd.f32 %v2380_v52, %v2379_v8 }
 0x1b9   : > { %2241 = vst.msk [vmem:[%s4309_s20 + $0x38] sm:$0xff] %vm787_vm0, %v2209_v46  ;;  %v2279_v24 = vsel %vm787_vm0, %v2209_v46, 0.0  ;;  %v2344_v41 = vmul.f32 %v2209_v46, %v2209_v46  ;;  %v2171_v34 = vmul.f32 %v2845_v9, %v4296_v14 }
 0x1ba   : > { %v2280_v32 = vadd.f32 %v2279_v24, %v2278_v12  ;;  %v2010_v5 = vpop.f32.mrb[18].mxu0 }
 0x1bb   : > { %v2382_v45 = vsel %vm787_vm0, %v2344_v41, 0.0  ;;  %v2210_v31 = vadd.f32 %v4301_v20, %v2171_v34  ;;  %v2846_v40 = vadd.f32 %v2010_v5, %v4281_v36  ;;  %v2012_v50 = vpop.f32.mrb[19].mxu0 }
 0x1bc   : > { %v2383_v48 = vadd.f32 %v2382_v45, %v2381_v42 }
 0x1bd   : > { %2242 = vst.msk [vmem:[%s4309_s20 + $0x40] sm:$0xff] %vm787_vm0, %v2210_v31  ;;  %v2281_v16 = vsel %vm787_vm0, %v2210_v31, 0.0  ;;  %v2345_v62 = vmul.f32 %v2210_v31, %v2210_v31  ;;  %v2172_v56 = vmul.f32 %v2846_v40, %v4296_v14 }
 0x1be   : > { %v2282_v60 = vadd.f32 %v2281_v16, %v2280_v32  ;;  %v2015_v1 = vpop.f32.mrb[20].mxu0 }
 0x1bf   : > { %v2384_v39 = vsel %vm787_vm0, %v2345_v62, 0.0  ;;  %v2211_v19 = vadd.f32 %v4301_v20, %v2172_v56  ;;  %v2847_v6 = vadd.f32 %v2015_v1, %v4283_v58  ;;  %v2017_v28 = vpop.f32.mrb[21].mxu0 }
 0x1c0   : > { %v2385_v36 = vadd.f32 %v2384_v39, %v2383_v48 }
 0x1c1   : > { %2243 = vst.msk [vmem:[%s4309_s20 + $0x48] sm:$0xff] %vm787_vm0, %v2211_v19  ;;  %v2283_v51 = vsel %vm787_vm0, %v2211_v19, 0.0  ;;  %v2346_v29 = vmul.f32 %v2211_v19, %v2211_v19  ;;  %v2173_v53 = vmul.f32 %v2847_v6, %v4296_v14 }
 0x1c2   : > { %v2284_v57 = vadd.f32 %v2283_v51, %v2282_v60  ;;  %v2020_v3 = vpop.f32.mrb[22].mxu0 }
 0x1c3   : > { %v2386_v43 = vsel %vm787_vm0, %v2346_v29, 0.0  ;;  %v2212_v18 = vadd.f32 %v4301_v20, %v2173_v53  ;;  %v2848_v4 = vadd.f32 %v2020_v3, %v4285_v10  ;;  %v2022_v33 = vpop.f32.mrb[23].mxu0 }
 0x1c4   : > { %v2387_v58 = vadd.f32 %v2386_v43, %v2385_v36 }
 0x1c5   : > { %2244 = vst.msk [vmem:[%s4309_s20 + $0x50] sm:$0xff] %vm787_vm0, %v2212_v18  ;;  %v2285_v2 = vsel %vm787_vm0, %v2212_v18, 0.0  ;;  %v2347_v0 = vmul.f32 %v2212_v18, %v2212_v18  ;;  %v2174_v54 = vmul.f32 %v2848_v4, %v4296_v14 }
 0x1c6   : > { %v2286_v55 = vadd.f32 %v2285_v2, %v2284_v57  ;;  %v2025_v63 = vpop.f32.mrb[24].mxu0 }
 0x1c7   : > { %v2388_v27 = vsel %vm787_vm0, %v2347_v0, 0.0  ;;  %v2213_v37 = vadd.f32 %v4301_v20, %v2174_v54  ;;  %v2849_v17 = vadd.f32 %v2025_v63, %v4287_v23  ;;  %v2027_v47 = vpop.f32.mrb[25].mxu0 }
 0x1c8   : > { %v2389_v10 = vadd.f32 %v2388_v27, %v2387_v58 }
 0x1c9   : > { %2245 = vst.msk [vmem:[%s4309_s20 + $0x58] sm:$0xff] %vm787_vm0, %v2213_v37  ;;  %v2287_v61 = vsel %vm787_vm0, %v2213_v37, 0.0  ;;  %v2348_v49 = vmul.f32 %v2213_v37, %v2213_v37  ;;  %v2175_v7 = vmul.f32 %v2849_v17, %v4296_v14 }
 0x1ca   : > { %v2288_v38 = vadd.f32 %v2287_v61, %v2286_v55  ;;  %v2030_v13 = vpop.f32.mrb[26].mxu0 }
 0x1cb   : > { %v2390_v26 = vsel %vm787_vm0, %v2348_v49, 0.0  ;;  %v2214_v44 = vadd.f32 %v4301_v20, %v2175_v7  ;;  %v2850_v8 = vadd.f32 %v2030_v13, %v4289_v35  ;;  %v2032_v21 = vpop.f32.mrb[27].mxu0 }
 0x1cc   : > { %v2391_v23 = vadd.f32 %v2390_v26, %v2389_v10 }
 0x1cd   : > { %2246 = vst.msk [vmem:[%s4309_s20 + $0x60] sm:$0xff] %vm787_vm0, %v2214_v44  ;;  %v2289_v30 = vsel %vm787_vm0, %v2214_v44, 0.0  ;;  %v2349_v25 = vmul.f32 %v2214_v44, %v2214_v44  ;;  %v2176_v12 = vmul.f32 %v2850_v8, %v4296_v14 }
 0x1ce   : > { %v2290_v11 = vadd.f32 %v2289_v30, %v2288_v38  ;;  %v2035_v52 = vpop.f32.mrb[28].mxu0 }
 0x1cf   : > { %v2392_v46 = vsel %vm787_vm0, %v2349_v25, 0.0  ;;  %v2215_v9 = vadd.f32 %v4301_v20, %v2176_v12  ;;  %v2851_v59 = vadd.f32 %v2035_v52, %v4291_v15  ;;  %v2037_v42 = vpop.f32.mrb[29].mxu0 }
 0x1d0   : > { %v2393_v35 = vadd.f32 %v2392_v46, %v2391_v23 }
 0x1d1   : > { %2247 = vst.msk [vmem:[%s4309_s20 + $0x68] sm:$0xff] %vm787_vm0, %v2215_v9  ;;  %v2291_v24 = vsel %vm787_vm0, %v2215_v9, 0.0  ;;  %v2350_v41 = vmul.f32 %v2215_v9, %v2215_v9  ;;  %v2177_v34 = vmul.f32 %v2851_v59, %v4296_v14 }
 0x1d2   : > { %v2292_v32 = vadd.f32 %v2291_v24, %v2290_v11  ;;  %v2040_v5 = vpop.f32.mrb[30].mxu0 }
 0x1d3   : > { %v2394_v45 = vsel %vm787_vm0, %v2350_v41, 0.0  ;;  %v2216_v31 = vadd.f32 %v4301_v20, %v2177_v34  ;;  %v2852_v40 = vadd.f32 %v2040_v5, %v4311_v22  ;;  %v2042_v50 = vpop.f32.mrb[31].mxu0 }
 0x1d4   : > { %v2395_v15 = vadd.f32 %v2394_v45, %v2393_v35 }
 0x1d5   : > { %2248 = vst.msk [vmem:[%s4309_s20 + $0x70] sm:$0xff] %vm787_vm0, %v2216_v31  ;;  %v2293_v48 = vsel %vm787_vm0, %v2216_v31, 0.0  ;;  %v2351_v16 = vmul.f32 %v2216_v31, %v2216_v31  ;;  %v2178_v62 = vmul.f32 %v2852_v40, %v4296_v14 }
 0x1d6   : > { %v2294_v56 = vadd.f32 %v2293_v48, %v2292_v32  ;;  %v2045_v60 = vpop.f32.mrb[32].mxu0 }
 0x1d7   : > { %v2396_v1 = vsel %vm787_vm0, %v2351_v16, 0.0  ;;  %v2217_v39 = vadd.f32 %v4301_v20, %v2178_v62  ;;  %v2047_v19 = vpop.f32.mrb[33].mxu0 }
 0x1d8   : > { %v2397_v6 = vadd.f32 %v2396_v1, %v2395_v15 }
 0x1d9   : > { %2249 = vst.msk [vmem:[%s4309_s20 + $0x78] sm:$0xff] %vm787_vm0, %v2217_v39  ;;  %v2295_v22 = vsel %vm787_vm0, %v2217_v39, 0.0  ;;  %v2352_v28 = vmul.f32 %v2217_v39, %v2217_v39 }
 0x1da   : > { %v2296_v36 = vadd.f32 %v2295_v22, %v2294_v56  ;;  %v2050_v51 = vpop.f32.mrb[34].mxu0 }
 0x1db   : > { %v2398_v29 = vsel %vm787_vm0, %v2352_v28, 0.0  ;;  %v2052_v53 = vpop.f32.mrb[35].mxu0 }
 0x1dc   : > { %v2399_v57 = vadd.f32 %v2398_v29, %v2397_v6 }
 0x1de   : > { %v1634_v3 = vpop.f32.mrb[32].mxu1  ;;  %v2055_v43 = vpop.f32.mrb[36].mxu0 }
 0x1df   : > { %v2853_v18 = vadd.f32 %v2045_v60, %v1634_v3  ;;  %v1636_v4 = vpop.f32.mrb[33].mxu1  ;;  %v2057_v33 = vpop.f32.mrb[37].mxu0 }
 0x1e1   : > { %v2179_v58 = vmul.f32 %v2853_v18, %v4296_v14 }
 0x1e2   : > { %v1639_v2 = vpop.f32.mrb[34].mxu1  ;;  %v2060_v0 = vpop.f32.mrb[38].mxu0 }
 0x1e3   : > { %v2218_v54 = vadd.f32 %v4301_v20, %v2179_v58  ;;  %v2854_v55 = vadd.f32 %v2050_v51, %v1639_v2  ;;  %v1641_v63 = vpop.f32.mrb[35].mxu1  ;;  %v2062_v27 = vpop.f32.mrb[39].mxu0 }
 0x1e5   : > { %2250 = vst.msk [vmem:[%s4309_s20 + $0x80] sm:$0xff] %vm787_vm0, %v2218_v54  ;;  %v2297_v37 = vsel %vm787_vm0, %v2218_v54, 0.0  ;;  %v2353_v17 = vmul.f32 %v2218_v54, %v2218_v54  ;;  %v2180_v47 = vmul.f32 %v2854_v55, %v4296_v14 }
 0x1e6   : > { %v2298_v10 = vadd.f32 %v2297_v37, %v2296_v36  ;;  %v1644_v61 = vpop.f32.mrb[36].mxu1  ;;  %v2065_v49 = vpop.f32.mrb[40].mxu0 }
 0x1e7   : > { %v2400_v7 = vsel %vm787_vm0, %v2353_v17, 0.0  ;;  %v2219_v38 = vadd.f32 %v4301_v20, %v2180_v47  ;;  %v2855_v13 = vadd.f32 %v2055_v43, %v1644_v61  ;;  %v1646_v26 = vpop.f32.mrb[37].mxu1  ;;  %v2067_v44 = vpop.f32.mrb[41].mxu0 }
 0x1e8   : > { %v2401_v8 = vadd.f32 %v2400_v7, %v2399_v57 }
 0x1e9   : > { %2251 = vst.msk [vmem:[%s4309_s20 + $0x88] sm:$0xff] %vm787_vm0, %v2219_v38  ;;  %v2299_v21 = vsel %vm787_vm0, %v2219_v38, 0.0  ;;  %v2354_v23 = vmul.f32 %v2219_v38, %v2219_v38  ;;  %v2181_v30 = vmul.f32 %v2855_v13, %v4296_v14 }
 0x1ea   : > { %v2300_v25 = vadd.f32 %v2299_v21, %v2298_v10  ;;  %v1649_v12 = vpop.f32.mrb[38].mxu1  ;;  %v2070_v11 = vpop.f32.mrb[42].mxu0 }
 0x1eb   : > { %v2402_v52 = vsel %vm787_vm0, %v2354_v23, 0.0  ;;  %v2220_v46 = vadd.f32 %v4301_v20, %v2181_v30  ;;  %v2856_v9 = vadd.f32 %v2060_v0, %v1649_v12  ;;  %v1651_v59 = vpop.f32.mrb[39].mxu1  ;;  %v2072_v42 = vpop.f32.mrb[43].mxu0 }
 0x1ec   : > { %v2403_v35 = vadd.f32 %v2402_v52, %v2401_v8 }
 0x1ed   : > { %2252 = vst.msk [vmem:[%s4309_s20 + $0x90] sm:$0xff] %vm787_vm0, %v2220_v46  ;;  %v2301_v24 = vsel %vm787_vm0, %v2220_v46, 0.0  ;;  %v2355_v41 = vmul.f32 %v2220_v46, %v2220_v46  ;;  %v2182_v34 = vmul.f32 %v2856_v9, %v4296_v14 }
 0x1ee   : > { %v2302_v32 = vadd.f32 %v2301_v24, %v2300_v25  ;;  %v1654_v5 = vpop.f32.mrb[40].mxu1  ;;  %v2075_v45 = vpop.f32.mrb[44].mxu0 }
 0x1ef   : > { %v2404_v31 = vsel %vm787_vm0, %v2355_v41, 0.0  ;;  %v2221_v40 = vadd.f32 %v4301_v20, %v2182_v34  ;;  %v2857_v50 = vadd.f32 %v2065_v49, %v1654_v5  ;;  %v1656_v15 = vpop.f32.mrb[41].mxu1  ;;  %v2077_v48 = vpop.f32.mrb[45].mxu0 }
 0x1f0   : > { %v2405_v16 = vadd.f32 %v2404_v31, %v2403_v35 }
 0x1f1   : > { %2253 = vst.msk [vmem:[%s4309_s20 + $0x98] sm:$0xff] %vm787_vm0, %v2221_v40  ;;  %v2303_v62 = vsel %vm787_vm0, %v2221_v40, 0.0  ;;  %v2356_v56 = vmul.f32 %v2221_v40, %v2221_v40  ;;  %v2183_v60 = vmul.f32 %v2857_v50, %v4296_v14 }
 0x1f2   : > { %v2304_v1 = vadd.f32 %v2303_v62, %v2302_v32  ;;  %v1659_v39 = vpop.f32.mrb[42].mxu1  ;;  %v2080_v19 = vpop.f32.mrb[46].mxu0 }
 0x1f3   : > { %v2406_v6 = vsel %vm787_vm0, %v2356_v56, 0.0  ;;  %v2222_v22 = vadd.f32 %v4301_v20, %v2183_v60  ;;  %v2858_v28 = vadd.f32 %v2070_v11, %v1659_v39  ;;  %v1661_v36 = vpop.f32.mrb[43].mxu1  ;;  %v2082_v51 = vpop.f32.mrb[47].mxu0 }
 0x1f4   : > { %v2407_v29 = vadd.f32 %v2406_v6, %v2405_v16 }
 0x1f5   : > { %2254 = vst.msk [vmem:[%s4309_s20 + $0xa0] sm:$0xff] %vm787_vm0, %v2222_v22  ;;  %v2305_v53 = vsel %vm787_vm0, %v2222_v22, 0.0  ;;  %v2357_v57 = vmul.f32 %v2222_v22, %v2222_v22  ;;  %v2184_v3 = vmul.f32 %v2858_v28, %v4296_v14 }
 0x1f6   : > { %v2306_v43 = vadd.f32 %v2305_v53, %v2304_v1  ;;  %v1664_v18 = vpop.f32.mrb[44].mxu1  ;;  %v2085_v4 = vpop.f32.mrb[48].mxu0 }
 0x1f7   : > { %v2408_v33 = vsel %vm787_vm0, %v2357_v57, 0.0  ;;  %v2223_v58 = vadd.f32 %v4301_v20, %v2184_v3  ;;  %v2859_v2 = vadd.f32 %v2075_v45, %v1664_v18  ;;  %v1666_v0 = vpop.f32.mrb[45].mxu1  ;;  %v2087_v54 = vpop.f32.mrb[49].mxu0 }
 0x1f8   : > { %v2409_v55 = vadd.f32 %v2408_v33, %v2407_v29 }
 0x1f9   : > { %2255 = vst.msk [vmem:[%s4309_s20 + $0xa8] sm:$0xff] %vm787_vm0, %v2223_v58  ;;  %v2307_v63 = vsel %vm787_vm0, %v2223_v58, 0.0  ;;  %v2358_v27 = vmul.f32 %v2223_v58, %v2223_v58  ;;  %v2185_v37 = vmul.f32 %v2859_v2, %v4296_v14 }
 0x1fa   : > { %v2308_v17 = vadd.f32 %v2307_v63, %v2306_v43  ;;  %v1669_v47 = vpop.f32.mrb[46].mxu1  ;;  %v2090_v10 = vpop.f32.mrb[50].mxu0 }
 0x1fb   : > { %v2410_v61 = vsel %vm787_vm0, %v2358_v27, 0.0  ;;  %v2224_v49 = vadd.f32 %v4301_v20, %v2185_v37  ;;  %v2860_v7 = vadd.f32 %v2080_v19, %v1669_v47  ;;  %v1671_v38 = vpop.f32.mrb[47].mxu1  ;;  %v2092_v13 = vpop.f32.mrb[51].mxu0 }
 0x1fc   : > { %v2411_v26 = vadd.f32 %v2410_v61, %v2409_v55 }
 0x1fd   : > { %2256 = vst.msk [vmem:[%s4309_s20 + $0xb0] sm:$0xff] %vm787_vm0, %v2224_v49  ;;  %v2309_v44 = vsel %vm787_vm0, %v2224_v49, 0.0  ;;  %v2359_v8 = vmul.f32 %v2224_v49, %v2224_v49  ;;  %v2186_v21 = vmul.f32 %v2860_v7, %v4296_v14 }
 0x1fe   : > { %v2310_v23 = vadd.f32 %v2309_v44, %v2308_v17  ;;  %v1674_v30 = vpop.f32.mrb[48].mxu1  ;;  %v2095_v25 = vpop.f32.mrb[52].mxu0 }
 0x1ff   : > { %v2412_v12 = vsel %vm787_vm0, %v2359_v8, 0.0  ;;  %v2225_v11 = vadd.f32 %v4301_v20, %v2186_v21  ;;  %v2861_v52 = vadd.f32 %v2085_v4, %v1674_v30  ;;  %v1676_v46 = vpop.f32.mrb[49].mxu1  ;;  %v2097_v9 = vpop.f32.mrb[53].mxu0 }
 0x200   : > { %v2413_v59 = vadd.f32 %v2412_v12, %v2411_v26 }
 0x201   : > { %2257 = vst.msk [vmem:[%s4309_s20 + $0xb8] sm:$0xff] %vm787_vm0, %v2225_v11  ;;  %v2311_v42 = vsel %vm787_vm0, %v2225_v11, 0.0  ;;  %v2360_v35 = vmul.f32 %v2225_v11, %v2225_v11  ;;  %v2187_v24 = vmul.f32 %v2861_v52, %v4296_v14 }
 0x202   : > { %v2312_v41 = vadd.f32 %v2311_v42, %v2310_v23  ;;  %v1679_v34 = vpop.f32.mrb[50].mxu1  ;;  %v2100_v32 = vpop.f32.mrb[54].mxu0 }
 0x203   : > { %v2414_v5 = vsel %vm787_vm0, %v2360_v35, 0.0  ;;  %v2226_v45 = vadd.f32 %v4301_v20, %v2187_v24  ;;  %v2862_v31 = vadd.f32 %v2090_v10, %v1679_v34  ;;  %v1681_v40 = vpop.f32.mrb[51].mxu1  ;;  %v2102_v50 = vpop.f32.mrb[55].mxu0 }
 0x204   : > { %v2415_v15 = vadd.f32 %v2414_v5, %v2413_v59 }
 0x205   : > { %2258 = vst.msk [vmem:[%s4309_s20 + $0xc0] sm:$0xff] %vm787_vm0, %v2226_v45  ;;  %v2313_v48 = vsel %vm787_vm0, %v2226_v45, 0.0  ;;  %v2361_v16 = vmul.f32 %v2226_v45, %v2226_v45  ;;  %v2188_v62 = vmul.f32 %v2862_v31, %v4296_v14 }
 0x206   : > { %v2314_v56 = vadd.f32 %v2313_v48, %v2312_v41  ;;  %v1684_v60 = vpop.f32.mrb[52].mxu1  ;;  %v2105_v1 = vpop.f32.mrb[56].mxu0 }
 0x207   : > { %v2416_v39 = vsel %vm787_vm0, %v2361_v16, 0.0  ;;  %v2227_v19 = vadd.f32 %v4301_v20, %v2188_v62  ;;  %v2863_v6 = vadd.f32 %v2095_v25, %v1684_v60  ;;  %v1686_v22 = vpop.f32.mrb[53].mxu1  ;;  %v2107_v28 = vpop.f32.mrb[57].mxu0 }
 0x208   : > { %v2417_v36 = vadd.f32 %v2416_v39, %v2415_v15 }
 0x209   : > { %2259 = vst.msk [vmem:[%s4309_s20 + $0xc8] sm:$0xff] %vm787_vm0, %v2227_v19  ;;  %v2315_v51 = vsel %vm787_vm0, %v2227_v19, 0.0  ;;  %v2362_v29 = vmul.f32 %v2227_v19, %v2227_v19  ;;  %v2189_v53 = vmul.f32 %v2863_v6, %v4296_v14 }
 0x20a   : > { %v2316_v57 = vadd.f32 %v2315_v51, %v2314_v56  ;;  %v1689_v3 = vpop.f32.mrb[54].mxu1  ;;  %v2110_v43 = vpop.f32.mrb[58].mxu0 }
 0x20b   : > { %v2418_v18 = vsel %vm787_vm0, %v2362_v29, 0.0  ;;  %v2228_v4 = vadd.f32 %v4301_v20, %v2189_v53  ;;  %v2864_v33 = vadd.f32 %v2100_v32, %v1689_v3  ;;  %v1691_v58 = vpop.f32.mrb[55].mxu1  ;;  %v2112_v2 = vpop.f32.mrb[59].mxu0 }
 0x20c   : > { %v2419_v0 = vadd.f32 %v2418_v18, %v2417_v36 }
 0x20d   : > { %2260 = vst.msk [vmem:[%s4309_s20 + $0xd0] sm:$0xff] %vm787_vm0, %v2228_v4  ;;  %v2317_v54 = vsel %vm787_vm0, %v2228_v4, 0.0  ;;  %v2363_v55 = vmul.f32 %v2228_v4, %v2228_v4  ;;  %v2190_v63 = vmul.f32 %v2864_v33, %v4296_v14 }
 0x20e   : > { %v2318_v27 = vadd.f32 %v2317_v54, %v2316_v57  ;;  %v1694_v37 = vpop.f32.mrb[56].mxu1  ;;  %v2115_v17 = vpop.f32.mrb[60].mxu0 }
 0x20f   : > { %v2420_v47 = vsel %vm787_vm0, %v2363_v55, 0.0  ;;  %v2229_v10 = vadd.f32 %v4301_v20, %v2190_v63  ;;  %v2865_v61 = vadd.f32 %v2105_v1, %v1694_v37  ;;  %v1696_v49 = vpop.f32.mrb[57].mxu1  ;;  %v2117_v7 = vpop.f32.mrb[61].mxu0 }
 0x210   : > { %v2421_v38 = vadd.f32 %v2420_v47, %v2419_v0 }
 0x211   : > { %2261 = vst.msk [vmem:[%s4309_s20 + $0xd8] sm:$0xff] %vm787_vm0, %v2229_v10  ;;  %v2319_v13 = vsel %vm787_vm0, %v2229_v10, 0.0  ;;  %v2364_v26 = vmul.f32 %v2229_v10, %v2229_v10  ;;  %v2191_v44 = vmul.f32 %v2865_v61, %v4296_v14 }
 0x212   : > { %v2320_v8 = vadd.f32 %v2319_v13, %v2318_v27  ;;  %v1699_v21 = vpop.f32.mrb[58].mxu1  ;;  %v2120_v23 = vpop.f32.mrb[62].mxu0 }
 0x213   : > { %v2422_v30 = vsel %vm787_vm0, %v2364_v26, 0.0  ;;  %v2230_v25 = vadd.f32 %v4301_v20, %v2191_v44  ;;  %v2866_v12 = vadd.f32 %v2110_v43, %v1699_v21  ;;  %v1701_v11 = vpop.f32.mrb[59].mxu1  ;;  %v2122_v52 = vpop.f32.mrb[63].mxu0 }
 0x214   : > { %v2423_v46 = vadd.f32 %v2422_v30, %v2421_v38 }
 0x215   : > { %2262 = vst.msk [vmem:[%s4309_s20 + $0xe0] sm:$0xff] %vm787_vm0, %v2230_v25  ;;  %v2321_v9 = vsel %vm787_vm0, %v2230_v25, 0.0  ;;  %v2365_v59 = vmul.f32 %v2230_v25, %v2230_v25  ;;  %v2192_v42 = vmul.f32 %v2866_v12, %v4296_v14 }
 0x216   : > { %v2322_v35 = vadd.f32 %v2321_v9, %v2320_v8  ;;  %v1704_v24 = vpop.f32.mrb[60].mxu1 }
 0x217   : > { %v2424_v41 = vsel %vm787_vm0, %v2365_v59, 0.0  ;;  %v2231_v34 = vadd.f32 %v4301_v20, %v2192_v42  ;;  %v2867_v32 = vadd.f32 %v2115_v17, %v1704_v24  ;;  %v1706_v5 = vpop.f32.mrb[61].mxu1 }
 0x218   : > { %v2425_v45 = vadd.f32 %v2424_v41, %v2423_v46 }
 0x219   : > { %2263 = vst.msk [vmem:[%s4309_s20 + $0xe8] sm:$0xff] %vm787_vm0, %v2231_v34  ;;  %v2323_v31 = vsel %vm787_vm0, %v2231_v34, 0.0  ;;  %v2366_v40 = vmul.f32 %v2231_v34, %v2231_v34  ;;  %v2193_v50 = vmul.f32 %v2867_v32, %v4296_v14 }
 0x21a   : > { %v2324_v15 = vadd.f32 %v2323_v31, %v2322_v35  ;;  %v1709_v48 = vpop.f32.mrb[62].mxu1 }
 0x21b   : > { %v2426_v16 = vsel %vm787_vm0, %v2366_v40, 0.0  ;;  %v2232_v62 = vadd.f32 %v4301_v20, %v2193_v50  ;;  %v2868_v56 = vadd.f32 %v2120_v23, %v1709_v48  ;;  %v1711_v60 = vpop.f32.mrb[63].mxu1 }
 0x21c   : > { %v2427_v1 = vadd.f32 %v2426_v16, %v2425_v45 }
 0x21d   : > { %2264 = vst.msk [vmem:[%s4309_s20 + $0xf0] sm:$0xff] %vm787_vm0, %v2232_v62  ;;  %v2325_v39 = vsel %vm787_vm0, %v2232_v62, 0.0  ;;  %v2367_v19 = vmul.f32 %v2232_v62, %v2232_v62  ;;  %v2194_v6 = vmul.f32 %v2868_v56, %v4296_v14 }
 0x21e   : > { %v2326_v22 = vadd.f32 %v2325_v39, %v2324_v15 }
 0x21f   : > { %v2428_v28 = vsel %vm787_vm0, %v2367_v19, 0.0  ;;  %v2233_v36 = vadd.f32 %v4301_v20, %v2194_v6 }
 0x220   : > { %v2429_v51 = vadd.f32 %v2428_v28, %v2427_v1 }
 0x221   : > { %2265 = vst.msk [vmem:[%s4309_s20 + $0xf8] sm:$0xff] %vm787_vm0, %v2233_v36  ;;  %v2327_v29 = vsel %vm787_vm0, %v2233_v36, 0.0  ;;  %v2368_v53 = vmul.f32 %v2233_v36, %v2233_v36 }
 0x222   : > { %v2328_v57 = vadd.f32 %v2327_v29, %v2326_v22 }
 0x223   : > { %v2430_v3 = vsel %vm787_vm0, %v2368_v53, 0.0 }
 0x224   : > { %v2329_v43 = vrot.slane %v2328_v57, 4  ;;  %v2431_v18 = vadd.f32 %v2430_v3, %v2429_v51 }
 0x226   : > { %v2330_v4 = vadd.f32 %v2329_v43, %v2328_v57  ;;  %v2432_v14 = vrot.slane %v2431_v18, 4 }
 0x228   : > { %v2331_v33 = vrot.slane %v2330_v4, 2  ;;  %v2433_v58 = vadd.f32 %v2432_v14, %v2431_v18 }
 0x22a   : > { %v2332_v2 = vadd.f32 %v2331_v33, %v2330_v4  ;;  %v2434_v0 = vrot.slane %v2433_v58, 2 }
 0x22c   : > { %v2333_v20 = vrot.slane %v2332_v2, 1  ;;  %v2435_v54 = vadd.f32 %v2434_v0, %v2433_v58 }
 0x22e   : > { %v2334_v55 = vadd.f32 %v2333_v20, %v2332_v2  ;;  %v2436_v63 = vrot.slane %v2435_v54, 1 }
 0x230   : > { %2336 = vst.msk [vmem:[%s319_s22] sm:$0x1] %vm2335_vm3, %v2334_v55  ;;  %v2437_v27 = vadd.f32 %v2436_v63, %v2435_v54 }
 0x232   : > { %2438 = vst.msk [vmem:[%s322_s16] sm:$0x1] %vm2335_vm3, %v2437_v27 }
 0x233 PF: > { %s19_s27 = sadd.s32 1, %s2951_s27  }
 0x234   : > { %p16_p4 = scmp.ge.s32.totalorder %s19_s27, 4  }
 0x236   :  { %18 = sbr.rel (!%p16_p4) target bundleno = 1 (0x1), region = 103 }

// kernel: dncnn_forward.9
= control target key start
LH: loop header
LB: loop body
LE: loop exit
PB: predicated region body
PF: predicated region fallthrough
CT: control target
= control target key end

     0   :  { %14 = vsyncpa [#allocation4], 0  ;;  %s4816_s0 = inlined_call_operand.vmem [shape: f32[2,16,16,64], index: 0, kind: input, shape index: {}]   ;;  %s4817_s1 = inlined_call_operand.vmem [shape: f32[3,192,4], index: 1, kind: input, shape index: {}]   ;;  %s4818_s2 = inlined_call_operand.vmem [shape: f32[1,64], index: 2, kind: input, shape index: {}]   ;;  %s4819_s3 = inlined_call_operand.vmem [shape: f32[1,64], index: 3, kind: input, shape index: {}]   ;;  %s4820_s4 = inlined_call_operand.vmem [shape: f32[1,4], index: 4, kind: input, shape index: {}]   ;;  %s4821_s5 = inlined_call_operand.vmem [shape: f32[1,4], index: 5, kind: input, shape index: {}]   ;;  %s4822_s6 = inlined_call_operand.vmem [shape: f32[2,16,16,4], index: 6, kind: output, shape index: {0}]   ;;  %s4823_s7 = inlined_call_operand.hbm [shape: f32[2,1,4], index: 7, kind: output, shape index: {1}]   ;;  %s4824_s8 = inlined_call_operand.hbm [shape: f32[2,1,4], index: 8, kind: output, shape index: {2}]  }
   0x1   :  { %16 = vsyncpa [#allocation4 + $0x1], 0 }
   0x2   :  { %17 = vsyncpa [#allocation6], 0 }
   0x3   :  { %19 = vsyncpa [#allocation6 + $0x1], 0  ;;  %s3172_s27 = smov 0   ;;  %s3174_s28 = smov 0  }
   0x4   :  { %s3176_s29 = smov 0   ;;  %s3178_s30 = smov 0  }
   0x5 LB: > { %s3193_s9 = sadd.s32 4294967295, %s3120_s30   ;;  %s2588_s10 = sadd.s32 4294967294, %s3120_s30   ;;  %s3120_s30 = sphi %s3178_s30, %s4844_s30   ;;  %s3116_s29 = sphi %s3176_s29, %s4843_s29   ;;  %s3112_s28 = sphi %s3174_s28, %s4842_s28   ;;  %s3108_s27 = sphi %s3172_s27, %s4841_s27  }
   0x6   : > { %s3197_s11 = sadd.s32 1, %s3120_s30   ;;  %s189_s12 = sadd.s32 1, %s3116_s29 }
   0x7   : > { %s186_s13 = ssub.s32 %s3120_s30, %s3197_s11  ;;  %p199_p0 = scmp.ne.s32.totalorder %s3116_s29, %s3112_s28 }
   0x8   : > { %p187_p1 = scmp.eq.s32.totalorder %s186_s13, 0  ;;  %p200_p2 = scmp.eq.s32.totalorder %s3193_s9, 1 }
   0x9   : > { %p205_p3 = scmp.ne.s32.totalorder %s3112_s28, %s3108_s27  ;;  %p206_p4 = scmp.eq.s32.totalorder %s2588_s10, 1 }
   0xa   : > { %s3208_s14 = scalar_select %p187_p1, %s3116_s29, %s189_s12  }
   0xb   : > { %p3210_p5 = por %p200_p2, %p199_p0  ;;  %p3214_p6 = por %p206_p4, %p205_p3 }
   0xc   : > { %p2591_p7 = scmp.ge.s32.totalorder %s3120_s30, 1  ;;  %p273_p8 = scmp.lt.s32.totalorder %s3120_s30, 3 }
   0xe   : > { %p274_p9 = pnand %p2591_p7, %p273_p8 }
   0xf   : > { %p315_p10 = scmp.lt.s32.totalorder (!%p274_p9), %s3193_s9, 1  ;;  %vm789_vm0 = vcmask (!%p274_p9), 523264   ;;  %v960_v0 = vld [vmem:[%s4817_s1] sm:$0xff] (!%p274_p9)  ;;  %v961_v1 = vld [vmem:[%s4817_s1 + $0x8] sm:$0xff] (!%p274_p9)  ;;  %v962_v2 = vld [vmem:[%s4817_s1 + $0x10] sm:$0xff] (!%p274_p9)  ;;  %v3122_v4 = vmov (!%p274_p9), 0.0|0.0  }
  0x10   : > { %277 = sbr.rel (%p274_p9) target bundleno = 608 (0x260), region = 44  ;;  %v3236_v3 = vld [vmem:[%s4818_s2] ss:$0 sm:$0xff] (!%p274_p9)  ;;  %2786 = vmatprep.subr.bf16.mxu0 (!%p274_p9), %v3122_v4  ;;  %v3239_v5 = vpack.c.bf16 (!%p274_p9), %v961_v1, %v960_v0  ;;  %v963_v6 = vld [vmem:[%s4817_s1 + $0x18] sm:$0xff] (!%p274_p9)  ;;  %2750 = vmatprep.subr.bf16.mxu1 (!%p274_p9), %v3122_v4  ;;  %v2599_v8 = vld [vmem:[%s4817_s1 + $0xc8] sm:$0xff] (!%p274_p9)  ;;  %v3123_v13 = vmov (!%p274_p9), 0.0  }
  0x11   : > { %v2598_v7 = vld [vmem:[%s4817_s1 + $0xc0] sm:$0xff] (!%p274_p9)  ;;  %v965_v11 = vld [vmem:[%s4817_s1 + $0x28] sm:$0xff] (!%p274_p9)  ;;  %v2600_v12 = vld [vmem:[%s4817_s1 + $0xd0] sm:$0xff] (!%p274_p9)  ;;  %823 = vst.msk [vmem:[#allocation2 + $0x8] sm:$0xff] (!%p274_p9), %vm789_vm0, %v3123_v13  ;;  %v3271_v14 = vpack.c.bf16 (!%p274_p9), %v963_v6, %v962_v2  ;;  %vm596_vm1 = vcmask (!%p274_p9), 1046528   ;;  %s3124_s18 = smov (!%p274_p9), 64  }
  0x12   : > { %v2751_v9 = vpack.c.bf16 (!%p274_p9), %v2599_v8, %v2598_v7  ;;  %v964_v10 = vld [vmem:[%s4817_s1 + $0x20] sm:$0xff] (!%p274_p9)  ;;  %822 = vst [vmem:[#allocation2] sm:$0xff] (!%p274_p9), %v3123_v13  ;;  %825 = vst.msk [vmem:[#allocation2 + $0x18] sm:$0xff] (!%p274_p9), %vm789_vm0, %v3123_v13  ;;  %2788 = vmatpush1.bf16.msra.mxu0 (!%p274_p9), %v3239_v5  ;;  %v2601_v15 = vld [vmem:[%s4817_s1 + $0xd8] sm:$0xff] (!%p274_p9)  ;;  %vm499_vm2 = vcmask (!%p274_p9), 1040384   ;;  %vm2236_vm3 = vcmask (!%p274_p9), 31744  }
  0x13   : > { %828 = vst.msk [vmem:[#allocation2 + $0x228] sm:$0xff] (!%p274_p9), %vm789_vm0, %v3123_v13  ;;  %830 = vst.msk [vmem:[#allocation2 + $0x238] sm:$0xff] (!%p274_p9), %vm789_vm0, %v3123_v13  ;;  %v966_v16 = vld [vmem:[%s4817_s1 + $0x30] sm:$0xff] (!%p274_p9)  ;;  %v967_v17 = vld [vmem:[%s4817_s1 + $0x38] sm:$0xff] (!%p274_p9)  ;;  %2789 = vmatprep.subr.bf16.mxu0 (!%p274_p9), %v3122_v4  ;;  %v3304_v24 = vpack.c.bf16 (!%p274_p9), %v965_v11, %v964_v10  ;;  %v2754_v25 = vpack.c.bf16 (!%p274_p9), %v2601_v15, %v2600_v12  ;;  %vm2338_vm4 = vcmask (!%p274_p9), 24576   ;;  %s3125_s13 = smov (!%p274_p9), [#allocation3]  }
  0x14   : > { %v3292_v18 = vld [vmem:[%s4819_s3] ss:$0 sm:$0xff] (!%p274_p9)  ;;  %2752 = vmatpush1.bf16.msra.mxu1 (!%p274_p9), %v2751_v9  ;;  %v2603_v20 = vld [vmem:[%s4817_s1 + $0xe8] sm:$0xff] (!%p274_p9)  ;;  %v3313_v32 = vpack.c.bf16 (!%p274_p9), %v967_v17, %v966_v16  ;;  %s3030_s17 = sshll.u32 (!%p274_p9), %s3125_s13, 4  ;;  %s3031_s17 = int_to_ptr.vmem [resolvable:$false] %s3030_s17 }
  0x15   : > { %v2602_v19 = vld [vmem:[%s4817_s1 + $0xe0] sm:$0xff] (!%p274_p9)  ;;  %2753 = vmatprep.subr.bf16.mxu1 (!%p274_p9), %v3122_v4 }
  0x16   : > { %2791 = vmatpush1.bf16.msra.mxu0 (!%p274_p9), %v3271_v14  ;;  %v2757_v38 = vpack.c.bf16 (!%p274_p9), %v2603_v20, %v2602_v19 }
  0x17   : > { %s3231_s23 = scalar_select %p315_p10, %s3193_s9, 1  ;;  %2792 = vmatprep.subr.bf16.mxu0 %v3122_v4 }
  0x18   : > { %2755 = vmatpush1.bf16.msra.mxu1 %v2754_v25  ;;  %v897_v25 = vld [vmem:[#allocation2 + $0x8] sm:$0xff] }
  0x19   : > { %s2748_s26 = sshll.u32 %s3231_s23, 8  ;;  %2756 = vmatprep.subr.bf16.mxu1 %v3122_v4  ;;  %2654 = vmatprep.mubr.msk.f32.mxu0 %vm789_vm0, %v897_v25  ;;  %s4730_s23 = sand.u32 1, %s3112_s28  }
  0x1a   : > { %s3287_s22 = scalar_lea.vmem %s4816_s0, %s2748_s26  ;;  %2794 = vmatpush1.bf16.msra.mxu0 %v3304_v24  ;;  %s4522_s24 = scalar_lea.vmem %s4822_s6, %s2748_s26 }
  0x1b   : > { %v325_v21 = vld [vmem:[%s3287_s22] sm:$0xff]  ;;  %v326_v22 = vld [vmem:[%s3287_s22 + $0x8] sm:$0xff]  ;;  %v327_v23 = vld [vmem:[%s3287_s22 + $0x10] sm:$0xff]  ;;  %2795 = vmatprep.subr.bf16.mxu0 %v3122_v4  ;;  %s2744_s26 = sshll.u32 %s3193_s9, 4  ;;  %s308_s25 = scalar_lea.vmem [#allocation3], %s4730_s23 }
  0x1c   : > { %v364_v26 = vmul.f32 %v3236_v3, %v325_v21  ;;  %v365_v27 = vmul.f32 %v3236_v3, %v326_v22  ;;  %v366_v28 = vmul.f32 %v3236_v3, %v327_v23  ;;  %v328_v29 = vld [vmem:[%s3287_s22 + $0x18] sm:$0xff]  ;;  %v329_v30 = vld [vmem:[%s3287_s22 + $0x20] sm:$0xff]  ;;  %v330_v31 = vld [vmem:[%s3287_s22 + $0x28] sm:$0xff]  ;;  %2758 = vmatpush1.bf16.msra.mxu1 %v2757_v38  ;;  %s2467_s10 = sshll.u32 %s308_s25, 4  ;;  %s4831_s12 = scalar_lea.vmem [#allocation5], %s4730_s23  ;;  %s4742_s10 = int_to_ptr.vmem [resolvable:$true] %s2467_s10 }
  0x1d   : > { %v367_v33 = vmul.f32 %v3236_v3, %v328_v29  ;;  %v368_v34 = vmul.f32 %v3236_v3, %v329_v30  ;;  %v369_v35 = vmul.f32 %v3236_v3, %v330_v31  ;;  %v331_v36 = vld [vmem:[%s3287_s22 + $0x30] sm:$0xff]  ;;  %v332_v37 = vld [vmem:[%s3287_s22 + $0x38] sm:$0xff]  ;;  %v333_v55 = vld [vmem:[%s3287_s22 + $0x40] sm:$0xff]  ;;  %2759 = vmatprep.subr.bf16.mxu1 %v3122_v4  ;;  %s4740_s19 = scalar_lea.hbm %s4823_s7, %s2744_s26  ;;  %s4748_s21 = scalar_lea.hbm %s4824_s8, %s2744_s26 }
  0x1e   : > { %v403_v39 = vadd.f32 %v3292_v18, %v364_v26  ;;  %v404_v40 = vadd.f32 %v3292_v18, %v365_v27  ;;  %v405_v41 = vadd.f32 %v3292_v18, %v366_v28  ;;  %v370_v42 = vmul.f32 %v3236_v3, %v331_v36  ;;  %v334_v60 = vld [vmem:[%s3287_s22 + $0x48] sm:$0xff]  ;;  %v335_v1 = vld [vmem:[%s3287_s22 + $0x50] sm:$0xff]  ;;  %v336_v2 = vld [vmem:[%s3287_s22 + $0x58] sm:$0xff]  ;;  %2797 = vmatpush1.bf16.msra.mxu0 %v3313_v32  ;;  %p3033_p0 = scmp.lt.s32.totalorder %s4742_s10, %s3031_s17 }
  0x1f   : > { %v406_v43 = vadd.f32 %v3292_v18, %v367_v33  ;;  %v407_v44 = vadd.f32 %v3292_v18, %v368_v34  ;;  %v408_v45 = vadd.f32 %v3292_v18, %v369_v35  ;;  %v371_v46 = vmul.f32 %v3236_v3, %v332_v37  ;;  %v337_v10 = vld [vmem:[%s3287_s22 + $0x60] sm:$0xff]  ;;  %v338_v11 = vld [vmem:[%s3287_s22 + $0x68] sm:$0xff]  ;;  %v339_v12 = vld [vmem:[%s3287_s22 + $0x70] sm:$0xff]  ;;  %2798 = vmatprep.subr.bf16.mxu0 %v3122_v4 }
  0x20   : > { %v3330_v47 = vmax.f32 %v403_v39, 0.0  ;;  %v3332_v48 = vmax.f32 %v404_v40, 0.0  ;;  %v3334_v49 = vmax.f32 %v405_v41, 0.0  ;;  %v409_v50 = vadd.f32 %v3292_v18, %v370_v42  ;;  %v340_v30 = vld [vmem:[%s3287_s22 + $0x78] sm:$0xff]  ;;  %v341_v40 = vld [vmem:[%s3287_s22 + $0x80] sm:$0xff] }
  0x21   : > { %v3338_v51 = vmax.f32 %v406_v43, 0.0  ;;  %v3340_v52 = vmax.f32 %v407_v44, 0.0  ;;  %v3342_v53 = vmax.f32 %v408_v45, 0.0  ;;  %v410_v54 = vadd.f32 %v3292_v18, %v371_v46 }
  0x22   : > { %693 = vrot.lane.b32.xlu0 %v3330_v47, %s3124_s18  ;;  %v597_v56 = vrot.slane %v3330_v47, 1  ;;  %v598_v57 = vrot.slane %v3332_v48, 1  ;;  %697 = vrot.lane.b32.xlu1 %v3334_v49, %s3124_s18  ;;  %v600_v58 = vrot.slane %v3334_v49, 1  ;;  %v3354_v59 = vmax.f32 %v409_v50, 0.0 }
  0x23   : > { %v601_v61 = vrot.slane %v3338_v51, 1  ;;  %v603_v62 = vrot.slane %v3340_v52, 1  ;;  %v604_v63 = vrot.slane %v3342_v53, 1  ;;  %v3360_v0 = vmax.f32 %v410_v54, 0.0 }
  0x24   : > { %v677_v6 = vsel %vm596_vm1, %v598_v57, 0.0  ;;  %v599_v7 = vsel %vm596_vm1, %v597_v56, %v598_v57  ;;  %v606_v8 = vrot.slane %v3354_v59, 1  ;;  %v372_v9 = vmul.f32 %v3236_v3, %v333_v55 }
  0x25   : > { %835 = vst.msk [vmem:[#allocation2 + $0x38] sm:$0xff] %vm789_vm0, %v677_v6  ;;  %833 = vst.msk [vmem:[#allocation2 + $0x28] sm:$0xff] %vm789_vm0, %v599_v7  ;;  %v678_v15 = vsel %vm596_vm1, %v601_v61, 0.0  ;;  %v602_v16 = vsel %vm596_vm1, %v600_v58, %v601_v61  ;;  %v605_v17 = vsel %vm596_vm1, %v603_v62, %v604_v63  ;;  %v679_v19 = vsel %vm596_vm1, %v604_v63, 0.0  ;;  %v343_v61 = vld [vmem:[%s3287_s22 + $0x90] sm:$0xff]  ;;  %v968_v62 = vld [vmem:[%s4817_s1 + $0x40] sm:$0xff] }
  0x26   : > { %695 = vrot.lane.b32.xlu0 %v3332_v48, %s3124_s18  ;;  %839 = vst.msk [vmem:[#allocation2 + $0x58] sm:$0xff] %vm789_vm0, %v678_v15  ;;  %699 = vrot.lane.b32.xlu1 %v3338_v51, %s3124_s18  ;;  %837 = vst.msk [vmem:[#allocation2 + $0x48] sm:$0xff] %vm789_vm0, %v602_v16  ;;  %v607_v20 = vrot.slane %v3360_v0, 1  ;;  %v411_v21 = vadd.f32 %v3292_v18, %v372_v9  ;;  %v373_v22 = vmul.f32 %v3236_v3, %v334_v60  ;;  %v342_v60 = vld [vmem:[%s3287_s22 + $0x88] sm:$0xff]  ;;  %v344_v7 = vld [vmem:[%s3287_s22 + $0x98] sm:$0xff] }
  0x27   : > { %841 = vst.msk [vmem:[#allocation2 + $0x68] sm:$0xff] %vm789_vm0, %v605_v17  ;;  %843 = vst.msk [vmem:[#allocation2 + $0x78] sm:$0xff] %vm789_vm0, %v679_v19  ;;  %v374_v23 = vmul.f32 %v3236_v3, %v335_v1  ;;  %v375_v26 = vmul.f32 %v3236_v3, %v336_v2  ;;  %v376_v27 = vmul.f32 %v3236_v3, %v337_v10  ;;  %v346_v15 = vld [vmem:[%s3287_s22 + $0xa8] sm:$0xff] }
  0x28   : > { %v377_v28 = vmul.f32 %v3236_v3, %v338_v11  ;;  %v378_v29 = vmul.f32 %v3236_v3, %v339_v12  ;;  %v608_v31 = vsel %vm596_vm1, %v606_v8, %v607_v20  ;;  %v680_v33 = vsel %vm596_vm1, %v607_v20, 0.0  ;;  %v345_v8 = vld [vmem:[%s3287_s22 + $0xa0] sm:$0xff]  ;;  %v969_v16 = vld [vmem:[%s4817_s1 + $0x48] sm:$0xff] }
  0x29   : > { %v3400_v34 = vmax.f32 %v411_v21, 0.0  ;;  %v412_v35 = vadd.f32 %v3292_v18, %v373_v22  ;;  %845 = vst.msk [vmem:[#allocation2 + $0x88] sm:$0xff] %vm789_vm0, %v608_v31  ;;  %847 = vst.msk [vmem:[#allocation2 + $0x98] sm:$0xff] %vm789_vm0, %v680_v33  ;;  %v413_v36 = vadd.f32 %v3292_v18, %v374_v23  ;;  %v414_v37 = vadd.f32 %v3292_v18, %v375_v26  ;;  %v2604_v33 = vld [vmem:[%s4817_s1 + $0xf0] sm:$0xff] }
  0x2a   : > { %v415_v38 = vadd.f32 %v3292_v18, %v376_v27  ;;  %v416_v39 = vadd.f32 %v3292_v18, %v377_v28  ;;  %701 = vrot.lane.b32.xlu0 %v3340_v52, %s3124_s18  ;;  %703 = vrot.lane.b32.xlu1 %v3342_v53, %s3124_s18  ;;  %v417_v43 = vadd.f32 %v3292_v18, %v378_v29 }
  0x2b   : > { %v609_v41 = vrot.slane %v3400_v34, 1  ;;  %v3416_v42 = vmax.f32 %v412_v35, 0.0  ;;  %v379_v44 = vmul.f32 %v3236_v3, %v340_v30  ;;  %v3420_v45 = vmax.f32 %v413_v36, 0.0  ;;  %v2605_v35 = vld [vmem:[%s4817_s1 + $0xf8] sm:$0xff]  ;;  %v347_v36 = vld [vmem:[%s3287_s22 + $0xb0] sm:$0xff] }
  0x2c   : > { %v3422_v46 = vmax.f32 %v414_v37, 0.0  ;;  %v3424_v50 = vmax.f32 %v415_v38, 0.0  ;;  %v3426_v54 = vmax.f32 %v416_v39, 0.0  ;;  %v3429_v56 = vmax.f32 %v417_v43, 0.0  ;;  %v3457_v17 = vld [vmem:[#allocation2 + $0x28] sm:$0xff] }
  0x2d   : > { %v610_v55 = vrot.slane %v3416_v42, 1  ;;  %v418_v57 = vadd.f32 %v3292_v18, %v379_v44  ;;  %v380_v58 = vmul.f32 %v3236_v3, %v341_v40  ;;  %v612_v63 = vrot.slane %v3420_v45, 1  ;;  %2622 = vmatprep.mubr.msk.f32.mxu1 %vm789_vm0, %v3457_v17 }
  0x2e   : > { %v613_v1 = vrot.slane %v3422_v46, 1  ;;  %v615_v2 = vrot.slane %v3424_v50, 1  ;;  %v616_v6 = vrot.slane %v3426_v54, 1  ;;  %705 = vrot.lane.b32.xlu0 %v3354_v59, %s3124_s18  ;;  %707 = vrot.lane.b32.xlu1 %v3360_v0, %s3124_s18  ;;  %v618_v11 = vrot.slane %v3429_v56, 1 }
  0x2f   : > { %v611_v9 = vsel %vm596_vm1, %v609_v41, %v610_v55  ;;  %v681_v10 = vsel %vm596_vm1, %v610_v55, 0.0  ;;  %v3451_v12 = vmax.f32 %v418_v57, 0.0  ;;  %v419_v25 = vadd.f32 %v3292_v18, %v380_v58  ;;  %v970_v41 = vld [vmem:[%s4817_s1 + $0x50] sm:$0xff]  ;;  %v971_v58 = vld [vmem:[%s4817_s1 + $0x58] sm:$0xff] }
  0x30   : > { %849 = vst.msk [vmem:[#allocation2 + $0xa8] sm:$0xff] %vm789_vm0, %v611_v9  ;;  %851 = vst.msk [vmem:[#allocation2 + $0xb8] sm:$0xff] %vm789_vm0, %v681_v10  ;;  %v614_v19 = vsel %vm596_vm1, %v612_v63, %v613_v1  ;;  %v682_v20 = vsel %vm596_vm1, %v613_v1, 0.0  ;;  %v617_v21 = vsel %vm596_vm1, %v615_v2, %v616_v6  ;;  %v683_v22 = vsel %vm596_vm1, %v616_v6, 0.0  ;;  %v348_v10 = vld [vmem:[%s3287_s22 + $0xb8] sm:$0xff] }
  0x31   : > { %853 = vst.msk [vmem:[#allocation2 + $0xc8] sm:$0xff] %vm789_vm0, %v614_v19  ;;  %855 = vst.msk [vmem:[#allocation2 + $0xd8] sm:$0xff] %vm789_vm0, %v682_v20  ;;  %v619_v23 = vrot.slane %v3451_v12, 1  ;;  %v381_v26 = vmul.f32 %v3236_v3, %v342_v60  ;;  %v382_v27 = vmul.f32 %v3236_v3, %v343_v61  ;;  %v383_v28 = vmul.f32 %v3236_v3, %v344_v7  ;;  %v2606_v60 = vld [vmem:[%s4817_s1 + $0x100] sm:$0xff]  ;;  %v2607_v61 = vld [vmem:[%s4817_s1 + $0x108] sm:$0xff] }
  0x32   : > { %857 = vst.msk [vmem:[#allocation2 + $0xe8] sm:$0xff] %vm789_vm0, %v617_v21  ;;  %859 = vst.msk [vmem:[#allocation2 + $0xf8] sm:$0xff] %vm789_vm0, %v683_v22  ;;  %v384_v29 = vmul.f32 %v3236_v3, %v345_v8  ;;  %v385_v30 = vmul.f32 %v3236_v3, %v346_v15  ;;  %v3478_v31 = vpack.c.bf16 %v969_v16, %v968_v62  ;;  %709 = vrot.lane.b32.xlu0 %v3400_v34, %s3124_s18  ;;  %v972_v20 = vld [vmem:[%s4817_s1 + $0x60] sm:$0xff] }
  0x33   : > { %711 = vrot.lane.b32.xlu1 %v3416_v42, %s3124_s18  ;;  %v620_v37 = vsel %vm596_vm1, %v618_v11, %v619_v23  ;;  %v684_v38 = vsel %vm596_vm1, %v619_v23, 0.0  ;;  %v3493_v39 = vmax.f32 %v419_v25, 0.0  ;;  %v420_v40 = vadd.f32 %v3292_v18, %v381_v26  ;;  %v973_v26 = vld [vmem:[%s4817_s1 + $0x68] sm:$0xff] }
  0x34   : > { %861 = vst.msk [vmem:[#allocation2 + $0x108] sm:$0xff] %vm789_vm0, %v620_v37  ;;  %863 = vst.msk [vmem:[#allocation2 + $0x118] sm:$0xff] %vm789_vm0, %v684_v38  ;;  %v421_v43 = vadd.f32 %v3292_v18, %v382_v27  ;;  %v422_v44 = vadd.f32 %v3292_v18, %v383_v28  ;;  %v423_v55 = vadd.f32 %v3292_v18, %v384_v29  ;;  %2800 = vmatpush1.bf16.msra.mxu0 %v3478_v31  ;;  %v2608_v27 = vld [vmem:[%s4817_s1 + $0x110] sm:$0xff] }
  0x35   : > { %v424_v57 = vadd.f32 %v3292_v18, %v385_v30  ;;  %v621_v62 = vrot.slane %v3493_v39, 1  ;;  %v3516_v63 = vmax.f32 %v420_v40, 0.0  ;;  %v2760_v1 = vpack.c.bf16 %v2605_v35, %v2604_v33  ;;  %2801 = vmatprep.subr.bf16.mxu0 %v3122_v4  ;;  %v2609_v33 = vld [vmem:[%s4817_s1 + $0x118] sm:$0xff]  ;;  %v349_v35 = vld [vmem:[%s3287_s22 + $0xc0] sm:$0xff] }
  0x36   : > { %v386_v2 = vmul.f32 %v3236_v3, %v347_v36  ;;  %v3520_v6 = vmax.f32 %v421_v43, 0.0  ;;  %v3522_v7 = vmax.f32 %v422_v44, 0.0  ;;  %v3524_v8 = vmax.f32 %v423_v55, 0.0  ;;  %713 = vrot.lane.b32.xlu0 %v3420_v45, %s3124_s18  ;;  %v350_v36 = vld [vmem:[%s3287_s22 + $0xc8] sm:$0xff]  ;;  %v974_v43 = vld [vmem:[%s4817_s1 + $0x70] sm:$0xff]  ;;  %v975_v44 = vld [vmem:[%s4817_s1 + $0x78] sm:$0xff] }
  0x37   : > { %v3526_v9 = vmax.f32 %v424_v57, 0.0  ;;  %715 = vrot.lane.b32.xlu1 %v3422_v46, %s3124_s18  ;;  %v622_v11 = vrot.slane %v3516_v63, 1  ;;  %v3535_v16 = vpack.c.bf16 %v971_v58, %v970_v41  ;;  %v2763_v19 = vpack.c.bf16 %v2607_v61, %v2606_v60  ;;  %2761 = vmatpush1.bf16.msra.mxu1 %v2760_v1  ;;  %v351_v55 = vld [vmem:[%s3287_s22 + $0xd0] sm:$0xff]  ;;  %v2610_v1 = vld [vmem:[%s4817_s1 + $0x120] sm:$0xff] }
  0x38   : > { %v425_v15 = vadd.f32 %v3292_v18, %v386_v2  ;;  %v624_v21 = vrot.slane %v3520_v6, 1  ;;  %v625_v22 = vrot.slane %v3522_v7, 1  ;;  %v627_v23 = vrot.slane %v3524_v8, 1  ;;  %2762 = vmatprep.subr.bf16.mxu1 %v3122_v4  ;;  %v2611_v2 = vld [vmem:[%s4817_s1 + $0x128] sm:$0xff] }
  0x39   : > { %v628_v25 = vrot.slane %v3526_v9, 1  ;;  %v623_v28 = vsel %vm596_vm1, %v621_v62, %v622_v11  ;;  %v685_v29 = vsel %vm596_vm1, %v622_v11, 0.0  ;;  %2803 = vmatpush1.bf16.msra.mxu0 %v3535_v16  ;;  %v387_v30 = vmul.f32 %v3236_v3, %v348_v10  ;;  %v352_v11 = vld [vmem:[%s3287_s22 + $0xd8] sm:$0xff] }
  0x3a   : > { %865 = vst.msk [vmem:[#allocation2 + $0x128] sm:$0xff] %vm789_vm0, %v623_v28  ;;  %867 = vst.msk [vmem:[#allocation2 + $0x138] sm:$0xff] %vm789_vm0, %v685_v29  ;;  %v626_v37 = vsel %vm596_vm1, %v624_v21, %v625_v22  ;;  %v686_v38 = vsel %vm596_vm1, %v625_v22, 0.0  ;;  %2804 = vmatprep.subr.bf16.mxu0 %v3122_v4  ;;  %717 = vrot.lane.b32.xlu0 %v3424_v50, %s3124_s18  ;;  %v3582_v57 = vmax.f32 %v425_v15, 0.0  ;;  %v976_v21 = vld [vmem:[%s4817_s1 + $0x80] sm:$0xff]  ;;  %v977_v22 = vld [vmem:[%s4817_s1 + $0x88] sm:$0xff] }
  0x3b   : > { %v629_v40 = vsel %vm596_vm1, %v627_v23, %v628_v25  ;;  %v687_v41 = vsel %vm596_vm1, %v628_v25, 0.0  ;;  %719 = vrot.lane.b32.xlu1 %v3426_v54, %s3124_s18  ;;  %869 = vst.msk [vmem:[#allocation2 + $0x148] sm:$0xff] %vm789_vm0, %v626_v37  ;;  %871 = vst.msk [vmem:[#allocation2 + $0x158] sm:$0xff] %vm789_vm0, %v686_v38  ;;  %v426_v58 = vadd.f32 %v3292_v18, %v387_v30  ;;  %2764 = vmatpush1.bf16.msra.mxu1 %v2763_v19  ;;  %v353_v25 = vld [vmem:[%s3287_s22 + $0xe0] sm:$0xff] }
  0x3c   : > { %873 = vst.msk [vmem:[#allocation2 + $0x168] sm:$0xff] %vm789_vm0, %v629_v40  ;;  %875 = vst.msk [vmem:[#allocation2 + $0x178] sm:$0xff] %vm789_vm0, %v687_v41  ;;  %v3585_v60 = vpack.c.bf16 %v973_v26, %v972_v20  ;;  %v2766_v61 = vpack.c.bf16 %v2609_v33, %v2608_v27  ;;  %v388_v62 = vmul.f32 %v3236_v3, %v349_v35  ;;  %v630_v15 = vrot.slane %v3582_v57, 1 }
  0x3d   : > { %v389_v10 = vmul.f32 %v3236_v3, %v350_v36  ;;  %v3597_v20 = vmax.f32 %v426_v58, 0.0  ;;  %2765 = vmatprep.subr.bf16.mxu1 %v3122_v4  ;;  %v3601_v19 = vpack.c.bf16 %v975_v44, %v974_v43  ;;  %v390_v23 = vmul.f32 %v3236_v3, %v351_v55  ;;  %v2612_v43 = vld [vmem:[%s4817_s1 + $0x130] sm:$0xff]  ;;  %v2613_v44 = vld [vmem:[%s4817_s1 + $0x138] sm:$0xff] }
  0x3e   : > { %2806 = vmatpush1.bf16.msra.mxu0 %v3585_v60  ;;  %v427_v26 = vadd.f32 %v3292_v18, %v388_v62  ;;  %721 = vrot.lane.b32.xlu0 %v3429_v56, %s3124_s18  ;;  %v2769_v29 = vpack.c.bf16 %v2611_v2, %v2610_v1  ;;  %v391_v33 = vmul.f32 %v3236_v3, %v352_v11  ;;  %v978_v2 = vld [vmem:[%s4817_s1 + $0x90] sm:$0xff]  ;;  %v3656_v11 = vld [vmem:[%s4817_s1 + $0x140] sm:$0xff] }
  0x3f   : > { %2807 = vmatprep.subr.bf16.mxu0 %v3122_v4  ;;  %v428_v27 = vadd.f32 %v3292_v18, %v389_v10  ;;  %723 = vrot.lane.b32.xlu1 %v3451_v12, %s3124_s18  ;;  %v631_v28 = vrot.slane %v3597_v20, 1  ;;  %v429_v30 = vadd.f32 %v3292_v18, %v390_v23  ;;  %v3625_v37 = vpack.c.bf16 %v977_v22, %v976_v21  ;;  %v979_v10 = vld [vmem:[%s4817_s1 + $0x98] sm:$0xff]  ;;  %v2615_v22 = vld [vmem:[%s4817_s1 + $0x148] sm:$0xff] }
  0x40   : > { %2767 = vmatpush1.bf16.msra.mxu1 %v2766_v61  ;;  %v3621_v35 = vmax.f32 %v427_v26, 0.0  ;;  %v392_v38 = vmul.f32 %v3236_v3, %v353_v25  ;;  %v430_v58 = vadd.f32 %v3292_v18, %v391_v33  ;;  %v354_v61 = vld [vmem:[%s3287_s22 + $0xe8] sm:$0xff]  ;;  %v355_v25 = vld [vmem:[%s3287_s22 + $0xf0] sm:$0xff] }
  0x41   : > { %v3623_v36 = vmax.f32 %v428_v27, 0.0  ;;  %v632_v40 = vsel %vm596_vm1, %v630_v15, %v631_v28  ;;  %v688_v41 = vsel %vm596_vm1, %v631_v28, 0.0  ;;  %2768 = vmatprep.subr.bf16.mxu1 %v3122_v4  ;;  %v3638_v55 = vmax.f32 %v429_v30, 0.0  ;;  %v980_v30 = vld [vmem:[%s4817_s1 + $0xa0] sm:$0xff]  ;;  %v981_v33 = vld [vmem:[%s4817_s1 + $0xa8] sm:$0xff] }
  0x42   : > { %2809 = vmatpush1.bf16.msra.mxu0 %v3601_v19  ;;  %877 = vst.msk [vmem:[#allocation2 + $0x188] sm:$0xff] %vm789_vm0, %v632_v40  ;;  %879 = vst.msk [vmem:[#allocation2 + $0x198] sm:$0xff] %vm789_vm0, %v688_v41  ;;  %v633_v62 = vrot.slane %v3621_v35, 1  ;;  %v431_v15 = vadd.f32 %v3292_v18, %v392_v38  ;;  %725 = vrot.lane.b32.xlu0 %v3493_v39, %s3124_s18  ;;  %v3667_v23 = vmax.f32 %v430_v58, 0.0  ;;  %v500_v41 = vrot.slane %v3330_v47, 7 }
  0x43   : > { %2810 = vmatprep.subr.bf16.mxu0 %v3122_v4  ;;  %v634_v1 = vrot.slane %v3623_v36, 1  ;;  %727 = vrot.lane.b32.xlu1 %v3516_v63, %s3124_s18  ;;  %v636_v21 = vrot.slane %v3638_v55, 1  ;;  %v2772_v28 = vpack.c.bf16 %v2613_v44, %v2612_v43  ;;  %v393_v38 = vmul.f32 %v3236_v3, %v354_v61  ;;  %v356_v44 = vld [vmem:[%s3287_s22 + $0xf8] sm:$0xff]  ;;  %s2480_s22 = sshll.u32 %s4831_s12, 4  ;;  %s3032_s12 = scalar_lea.vmem %s3031_s17, 32  ;;  %s4750_s22 = int_to_ptr.vmem [resolvable:$true] %s2480_s22 }
  0x44   : > { %2770 = vmatpush1.bf16.msra.mxu1 %v2769_v29  ;;  %v3683_v29 = vpack.c.bf16 %v979_v10, %v978_v2  ;;  %v637_v40 = vrot.slane %v3667_v23, 1  ;;  %v501_v43 = vrot.slane %v3332_v48, 7  ;;  %v2775_v58 = vpack.c.bf16 %v2615_v22, %v3656_v11 }
  0x45   : > { %v635_v26 = vsel %vm596_vm1, %v633_v62, %v634_v1  ;;  %v689_v27 = vsel %vm596_vm1, %v634_v1, 0.0  ;;  %2771 = vmatprep.subr.bf16.mxu1 %v3122_v4  ;;  %v3691_v61 = vmax.f32 %v431_v15, 0.0  ;;  %v432_v62 = vadd.f32 %v3292_v18, %v393_v38  ;;  %v2616_v15 = vld [vmem:[%s4817_s1 + $0x150] sm:$0xff] }
  0x46   : > { %881 = vst.msk [vmem:[#allocation2 + $0x1a8] sm:$0xff] %vm789_vm0, %v635_v26  ;;  %883 = vst.msk [vmem:[#allocation2 + $0x1b8] sm:$0xff] %vm789_vm0, %v689_v27  ;;  %2812 = vmatpush1.bf16.msra.mxu0 %v3625_v37  ;;  %v394_v1 = vmul.f32 %v3236_v3, %v355_v25  ;;  %729 = vrot.lane.b32.xlu0 %v3520_v6, %s3124_s18  ;;  %v638_v2 = vsel %vm596_vm1, %v636_v21, %v637_v40  ;;  %v690_v48 = vsel %vm596_vm1, %v637_v40, 0.0  ;;  %v2617_v21 = vld [vmem:[%s4817_s1 + $0x158] sm:$0xff]  ;;  %v982_v40 = vld [vmem:[%s4817_s1 + $0xb0] sm:$0xff] }
  0x47   : > { %2813 = vmatprep.subr.bf16.mxu0 %v3122_v4  ;;  %731 = vrot.lane.b32.xlu1 %v3522_v7, %s3124_s18  ;;  %v3701_v10 = vpack.c.bf16 %v981_v33, %v980_v30  ;;  %v3706_v11 = vsel %vm499_vm2, %v500_v41, %v501_v43  ;;  %885 = vst.msk [vmem:[#allocation2 + $0x1c8] sm:$0xff] %vm789_vm0, %v638_v2  ;;  %887 = vst.msk [vmem:[#allocation2 + $0x1d8] sm:$0xff] %vm789_vm0, %v690_v48  ;;  %v639_v22 = vrot.slane %v3691_v61, 1 }
  0x48   : > { %2773 = vmatpush1.bf16.msra.mxu1 %v2772_v28  ;;  %v3717_v25 = vmax.f32 %v432_v62, 0.0  ;;  %v433_v26 = vadd.f32 %v3292_v18, %v394_v1  ;;  %v395_v27 = vmul.f32 %v3236_v3, %v356_v44  ;;  %v4826_v28 = vrot.slane %v3334_v49, 7  ;;  %v983_v3 = vld [vmem:[%s4817_s1 + $0xb8] sm:$0xff] }
  0x49   : > { %2774 = vmatprep.subr.bf16.mxu1 %v3122_v4  ;;  %v504_v30 = vrot.slane %v3338_v51, 7  ;;  %v4825_v33 = vrot.slane %v3340_v52, 7  ;;  %v507_v38 = vrot.slane %v3342_v53, 7  ;;  %v2778_v53 = vpack.c.bf16 %v2617_v21, %v2616_v15  ;;  %v2618_v21 = vld [vmem:[%s4817_s1 + $0x160] sm:$0xff] }
  0x4a   : > { %2815 = vmatpush1.bf16.msra.mxu0 %v3683_v29  ;;  %v640_v43 = vrot.slane %v3717_v25, 1  ;;  %v3735_v44 = vmax.f32 %v433_v26, 0.0  ;;  %v434_v51 = vadd.f32 %v3292_v18, %v395_v27  ;;  %733 = vrot.lane.b32.xlu0 %v3524_v8, %s3124_s18  ;;  %v3759_v15 = vpack.c.bf16 %v983_v3, %v982_v40  ;;  %v2686_v3 = vld [vmem:[%s4817_s1 + $0x180] sm:$0xff] }
  0x4b   : > { %2816 = vmatprep.subr.bf16.mxu0 %v3122_v4  ;;  %735 = vrot.lane.b32.xlu1 %v3526_v9, %s3124_s18  ;;  %v3745_v62 = vsel %vm499_vm2, %v4826_v28, %v504_v30  ;;  %v3750_v1 = vsel %vm499_vm2, %v4825_v33, %v507_v38  ;;  %v510_v27 = vrot.slane %v3360_v0, 7  ;;  %v512_v38 = vrot.slane %v3400_v34, 7  ;;  %v2687_v0 = vld [vmem:[%s4817_s1 + $0x188] sm:$0xff] }
  0x4c   : > { %2776 = vmatpush1.bf16.msra.mxu1 %v2775_v58  ;;  %v641_v18 = vsel %vm596_vm1, %v639_v22, %v640_v43  ;;  %v691_v2 = vsel %vm596_vm1, %v640_v43, 0.0  ;;  %v642_v48 = vrot.slane %v3735_v44, 1  ;;  %v3755_v26 = vmax.f32 %v434_v51, 0.0  ;;  %v2619_v58 = vld [vmem:[%s4817_s1 + $0x168] sm:$0xff] }
  0x4d   : > { %2777 = vmatprep.subr.bf16.mxu1 %v3122_v4  ;;  %889 = vst.msk [vmem:[#allocation2 + $0x1e8] sm:$0xff] %vm789_vm0, %v641_v18  ;;  %891 = vst.msk [vmem:[#allocation2 + $0x1f8] sm:$0xff] %vm789_vm0, %v691_v2  ;;  %v509_v22 = vrot.slane %v3354_v59, 7  ;;  %v513_v40 = vrot.slane %v3416_v42, 7  ;;  %v515_v42 = vrot.slane %v3420_v45, 7  ;;  %v516_v51 = vrot.slane %v3422_v46, 7 }
  0x4e   : > { %2818 = vmatpush1.bf16.msra.mxu0 %v3701_v10  ;;  %v643_v30 = vrot.slane %v3755_v26, 1  ;;  %737 = vrot.lane.b32.xlu0 %v3582_v57, %s3124_s18  ;;  %v2781_v18 = vpack.c.bf16 %v2619_v58, %v2618_v21  ;;  %v2621_v46 = vld [vmem:[%s4817_s1 + $0x178] sm:$0xff]  ;;  %v2823_v21 = vpack.c.bf16 %v2687_v0, %v2686_v3  ;;  %v518_v58 = vrot.slane %v3424_v50, 7 }
  0x4f   : > { %2819 = vmatprep.subr.bf16.mxu0 %v3122_v4  ;;  %739 = vrot.lane.b32.xlu1 %v3597_v20, %s3124_s18  ;;  %v3788_v43 = vsel %vm499_vm2, %v509_v22, %v510_v27  ;;  %v3797_v28 = vsel %vm499_vm2, %v512_v38, %v513_v40  ;;  %v2620_v27 = vld [vmem:[%s4817_s1 + $0x170] sm:$0xff]  ;;  %v522_v40 = vrot.slane %v3451_v12, 7  ;;  %v525_v0 = vrot.slane %v3516_v63, 7 }
  0x50   : > { %2779 = vmatpush1.bf16.msra.mxu1 %v2778_v53  ;;  %v644_v2 = vsel %vm596_vm1, %v642_v48, %v643_v30  ;;  %v692_v33 = vsel %vm596_vm1, %v643_v30, 0.0  ;;  %v3812_v53 = vsel %vm499_vm2, %v515_v42, %v516_v51  ;;  %v899_v48 = vld [vmem:[#allocation2 + $0x18] sm:$0xff]  ;;  %v519_v30 = vrot.slane %v3426_v54, 7  ;;  %v2688_v12 = vld [vmem:[%s4817_s1 + $0x190] sm:$0xff] }
  0x51   : > { %2780 = vmatprep.subr.bf16.mxu1 %v3122_v4  ;;  %893 = vst.msk [vmem:[#allocation2 + $0x208] sm:$0xff] %vm789_vm0, %v644_v2  ;;  %895 = vst.msk [vmem:[#allocation2 + $0x218] sm:$0xff] %vm789_vm0, %v692_v33  ;;  %v521_v33 = vrot.slane %v3429_v56, 7  ;;  %v2784_v51 = vpack.c.bf16 %v2621_v46, %v2620_v27  ;;  %v524_v54 = vrot.slane %v3493_v39, 7  ;;  %v527_v27 = vrot.slane %v3520_v6, 7 }
  0x52   : > { %2821 = vmatpush1.bf16.msra.mxu0 %v3759_v15  ;;  %741 = vrot.lane.b32.xlu0 %v3621_v35, %s3124_s18  ;;  %v3827_v3 = vsel %vm499_vm2, %v518_v58, %v519_v30  ;;  %v528_v46 = vrot.slane %v3522_v7, 7  ;;  %v2691_v30 = vld [vmem:[%s4817_s1 + $0x1a8] sm:$0xff] }
  0x53   : > { %2822 = vmatprep.subr.bf16.mxu0 %v3122_v4  ;;  %743 = vrot.lane.b32.xlu1 %v3623_v36, %s3124_s18  ;;  %v3842_v2 = vsel %vm499_vm2, %v521_v33, %v522_v40  ;;  %v3847_v63 = vsel %vm499_vm2, %v524_v54, %v525_v0  ;;  %v2693_v40 = vld [vmem:[%s4817_s1 + $0x1b8] sm:$0xff]  ;;  %v531_v0 = vrot.slane %v3526_v9, 7  ;;  %v2696_v9 = vld [vmem:[%s4817_s1 + $0x1d0] sm:$0xff] }
  0x54   : > { %2782 = vmatpush1.bf16.msra.mxu1 %v2781_v18  ;;  %v2689_v18 = vld [vmem:[%s4817_s1 + $0x198] sm:$0xff]  ;;  %v3868_v7 = vsel %vm499_vm2, %v527_v27, %v528_v46  ;;  %v2695_v46 = vld [vmem:[%s4817_s1 + $0x1c8] sm:$0xff] }
  0x55   : > { %1555 = vmatmul.mubr.f32.vlgmr.msra.gmra.mrb[0].mxu0 %v3123_v13  ;;  %2783 = vmatprep.subr.bf16.mxu1 %v3122_v4 }
  0x56   : > { %2655 = vmatprep.mubr.msk.f32.mxu0 %vm789_vm0, %v899_v48  ;;  %2824 = vmatpush1.bf16.msra.mxu0 %v2823_v21  ;;  %v2826_v48 = vpack.c.bf16 %v2689_v18, %v2688_v12  ;;  %v2690_v21 = vld [vmem:[%s4817_s1 + $0x1a0] sm:$0xff] }
  0x57   : > { %745 = vrot.lane.b32.xlu0 %v3638_v55, %s3124_s18  ;;  %747 = vrot.lane.b32.xlu1 %v3667_v23, %s3124_s18  ;;  %v2694_v18 = vld [vmem:[%s4817_s1 + $0x1c0] sm:$0xff] }
  0x58   : > { %2785 = vmatpush1.bf16.msra.mxu1 %v2784_v51  ;;  %2825 = vmatprep.subr.bf16.mxu0 %v3122_v4  ;;  %v4827_v51 = vrot.slane %v3524_v8, 7 }
  0x59   : > { %1560 = vmatmul.mubr.f32.gmra.mrb[2].mxu0 %v3123_v13  ;;  %2858 = vmatprep.subr.bf16.mxu1 %v3122_v4  ;;  %v2829_v13 = vpack.c.bf16 %v2691_v30, %v2690_v21  ;;  %v2835_v21 = vpack.c.bf16 %v2695_v46, %v2694_v18  ;;  %v2697_v30 = vld [vmem:[%s4817_s1 + $0x1d8] sm:$0xff] }
  0x5a   : > { %2656 = vmatprep.mubr.msk.f32.mxu0 %vm789_vm0, %v3457_v17  ;;  %2827 = vmatpush1.bf16.msra.mxu0 %v2826_v48  ;;  %v2692_v17 = vld [vmem:[%s4817_s1 + $0x1b0] sm:$0xff]  ;;  %v3898_v48 = vsel %vm499_vm2, %v4827_v51, %v531_v0  ;;  %v2698_v0 = vld [vmem:[%s4817_s1 + $0x1e0] sm:$0xff] }
  0x5b   : > { %749 = vrot.lane.b32.xlu0 %v3691_v61, %s3124_s18  ;;  %751 = vrot.lane.b32.xlu1 %v3717_v25, %s3124_s18  ;;  %v2832_v12 = vpack.c.bf16 %v2693_v40, %v2692_v17  ;;  %v534_v17 = vrot.slane %v3597_v20, 7  ;;  %v2838_v40 = vpack.c.bf16 %v2697_v30, %v2696_v9  ;;  %v2700_v20 = vld [vmem:[%s4817_s1 + $0x1f0] sm:$0xff]  ;;  %v4829_v9 = vrot.slane %v3621_v35, 7 }
  0x5c   : > { %2828 = vmatprep.subr.bf16.mxu0 %v3122_v4  ;;  %v537_v30 = vrot.slane %v3623_v36, 7  ;;  %v2704_v36 = vld [vmem:[%s4817_s1 + $0x210] sm:$0xff] }
  0x5e   : > { %2830 = vmatpush1.bf16.msra.mxu0 %v2829_v13  ;;  %v4828_v13 = vrot.slane %v3582_v57, 7 }
  0x5f   : > { %753 = vrot.lane.b32.xlu0 %v3735_v44, %s3124_s18  ;;  %755 = vrot.lane.b32.xlu1 %v3755_v26, %s3124_s18  ;;  %s2448_s18 = scalar_lea.sflag [#allocation4], %s4730_s23 }
  0x60   : > { %2831 = vmatprep.subr.bf16.mxu0 %v3122_v4  ;;  %v3919_v18 = vsel %vm499_vm2, %v4828_v13, %v534_v17  ;;  %v2702_v17 = vld [vmem:[%s4817_s1 + $0x200] sm:$0xff] }
  0x62   : > { %2833 = vmatpush1.bf16.msra.mxu0 %v2832_v12  ;;  %v2699_v12 = vld [vmem:[%s4817_s1 + $0x1e8] sm:$0xff] }
  0x63   : > { %2834 = vmatprep.subr.bf16.mxu0 %v3122_v4  ;;  %v2841_v46 = vpack.c.bf16 %v2699_v12, %v2698_v0  ;;  %v3940_v0 = vsel %vm499_vm2, %v4829_v9, %v537_v30  ;;  %v2707_v30 = vld [vmem:[%s4817_s1 + $0x228] sm:$0xff] }
  0x66   : > { %2836 = vmatpush1.bf16.msra.mxu0 %v2835_v21  ;;  %v2701_v21 = vld [vmem:[%s4817_s1 + $0x1f8] sm:$0xff] }
  0x67   : > { %2837 = vmatprep.subr.bf16.mxu0 %v3122_v4  ;;  %v2844_v51 = vpack.c.bf16 %v2701_v21, %v2700_v20  ;;  %v539_v20 = vrot.slane %v3638_v55, 7  ;;  %v540_v21 = vrot.slane %v3667_v23, 7  ;;  %v2708_v23 = vld [vmem:[%s4817_s1 + $0x230] sm:$0xff]  ;;  %v4839_v55 = vrot.slane %v3691_v61, 7 }
  0x6a   : > { %2839 = vmatpush1.bf16.msra.mxu0 %v2838_v40  ;;  %v2703_v40 = vld [vmem:[%s4817_s1 + $0x208] sm:$0xff] }
  0x6b   : > { %2840 = vmatprep.subr.bf16.mxu0 %v3122_v4  ;;  %v2847_v12 = vpack.c.bf16 %v2703_v40, %v2702_v17  ;;  %v3961_v17 = vsel %vm499_vm2, %v539_v20, %v540_v21  ;;  %v545_v21 = vrot.slane %v3735_v44, 7  ;;  %v4284_v44 = vld [vmem:[#allocation2 + $0x138] sm:$0xff] }
  0x6e   : > { %2842 = vmatpush1.bf16.msra.mxu0 %v2841_v46  ;;  %v2705_v46 = vld [vmem:[%s4817_s1 + $0x218] sm:$0xff] }
  0x6f   : > { %2843 = vmatprep.subr.bf16.mxu0 %v3122_v4  ;;  %v2850_v13 = vpack.c.bf16 %v2705_v46, %v2704_v36  ;;  %v4830_v36 = vrot.slane %v3691_v61, 7  ;;  %v543_v46 = vrot.slane %v3717_v25, 7  ;;  %v580_v25 = vsel %vm499_vm2, 0.0, %v500_v41 }
  0x70   : > { %v595_v61 = vsel %vm499_vm2, 0.0, %v545_v21 }
  0x72   : > { %2845 = vmatpush1.bf16.msra.mxu0 %v2844_v51  ;;  %v2706_v51 = vld [vmem:[%s4817_s1 + $0x220] sm:$0xff] }
  0x73   : > { %2846 = vmatprep.subr.bf16.mxu0 %v3122_v4  ;;  %v2853_v40 = vpack.c.bf16 %v2707_v30, %v2706_v51  ;;  %v546_v51 = vrot.slane %v3755_v26, 7 }
  0x75   : > { %v3983_v30 = vsel %vm499_vm2, %v545_v21, %v546_v51  ;;  %v4292_v21 = vld [vmem:[#allocation2 + $0x148] sm:$0xff] }
  0x76   : > { %2848 = vmatpush1.bf16.msra.mxu0 %v2847_v12  ;;  %v2709_v12 = vld [vmem:[%s4817_s1 + $0x238] sm:$0xff] }
  0x77   : > { %2849 = vmatprep.subr.bf16.mxu0 %v3122_v4  ;;  %v2856_v9 = vpack.c.bf16 %v2709_v12, %v2708_v23 }
  0x7a   : > { %2851 = vmatpush1.bf16.msra.mxu0 %v2850_v13  ;;  %v3976_v13 = vsel %vm499_vm2, %v4830_v36, %v543_v46 }
  0x7b   : > { %2852 = vmatprep.subr.bf16.mxu0 %v3122_v4 }
  0x7e   : > { %2854 = vmatpush1.bf16.msra.mxu0 %v2853_v40  ;;  %v4834_v40 = vrot.slane %v3334_v49, 7  ;;  %v3998_v49 = vld [vmem:[#allocation2 + $0x48] sm:$0xff] }
  0x7f   : > { %2855 = vmatprep.subr.bf16.mxu0 %v3122_v4 }
  0x80   : > { %v581_v23 = vsel %vm499_vm2, 0.0, %v4834_v40 }
  0x82   : > { %2857 = vmatpush1.bf16.msra.mxu0 %v2856_v9  ;;  %v987_v9 = vld [vmem:[#allocation2 + $0x38] sm:$0xff] }
  0x94   : > { %v694_v12 = vpop.permute.xlu0 %693  ;;  %v698_v46 = vpop.permute.xlu1 %697 }
  0x95   : > { %v790_v36 = vsel %vm789_vm0, %v580_v25, %v694_v12  ;;  %v3993_v26 = vsel %vm789_vm0, %v581_v23, %v698_v46  ;;  %v4014_v12 = vld [vmem:[#allocation2 + $0x58] sm:$0xff]  ;;  %v4034_v46 = vld [vmem:[#allocation2 + $0x68] sm:$0xff] }
  0x96   : > { %1234 = vmatmul.mubr.f32.vlgmr.msra.gmra.mrb[0].mxu1 %v790_v36  ;;  %1565 = vmatmul.mubr.f32.gmra.mrb[4].mxu0 %v790_v36 }
  0x97   : > { %2870 = vmatpush1.bf16.msra.mxu1 %v3239_v5  ;;  %2623 = vmatprep.mubr.msk.f32.mxu1 %vm789_vm0, %v987_v9  ;;  %v4835_v5 = vrot.slane %v3340_v52, 7 }
  0x98   : > { %v696_v47 = vpop.permute.xlu0 %695  ;;  %v700_v41 = vpop.permute.xlu1 %699  ;;  %2657 = vmatprep.mubr.msk.f32.mxu0 %vm789_vm0, %v987_v9  ;;  %2859 = vmatprep.subr.bf16.mxu1 %v3122_v4 }
  0x99   : > { %v791_v51 = vsel %vm789_vm0, %v3706_v11, %v696_v47  ;;  %v4005_v25 = vsel %vm789_vm0, %v3745_v62, %v700_v41  ;;  %v582_v36 = vsel %vm499_vm2, 0.0, %v4835_v5  ;;  %v583_v62 = vsel %vm499_vm2, 0.0, %v509_v22 }
  0x9a   : > { %1239 = vmatmul.mubr.f32.gmra.mrb[2].mxu1 %v791_v51  ;;  %1570 = vmatmul.mubr.f32.gmra.mrb[6].mxu0 %v791_v51  ;;  %v584_v22 = vsel %vm499_vm2, 0.0, %v512_v38  ;;  %v585_v38 = vsel %vm499_vm2, 0.0, %v515_v42  ;;  %v586_v42 = vsel %vm499_vm2, 0.0, %v518_v58  ;;  %v587_v58 = vsel %vm499_vm2, 0.0, %v521_v33 }
  0x9b   : > { %2624 = vmatprep.mubr.msk.f32.mxu1 %vm789_vm0, %v3998_v49  ;;  %2658 = vmatprep.mubr.msk.f32.mxu0 %vm789_vm0, %v3998_v49  ;;  %v588_v33 = vsel %vm499_vm2, 0.0, %v524_v54  ;;  %v589_v54 = vsel %vm499_vm2, 0.0, %v527_v27  ;;  %v4836_v27 = vrot.slane %v3524_v8, 7 }
  0x9c   : > { %v702_v40 = vpop.permute.xlu0 %701  ;;  %v704_v23 = vpop.permute.xlu1 %703  ;;  %2871 = vmatpush1.bf16.msra.mxu1 %v3271_v14 }
  0x9d   : > { %v4018_v11 = vsel %vm789_vm0, %v582_v36, %v702_v40  ;;  %v4022_v52 = vsel %vm789_vm0, %v3750_v1, %v704_v23  ;;  %2860 = vmatprep.subr.bf16.mxu1 %v3122_v4 }
  0x9e   : > { %1244 = vmatmul.mubr.f32.gmra.mrb[4].mxu1 %v3993_v26  ;;  %1575 = vmatmul.mubr.f32.gmra.mrb[8].mxu0 %v3993_v26 }
  0x9f   : > { %2625 = vmatprep.mubr.msk.f32.mxu1 %vm789_vm0, %v4014_v12  ;;  %2659 = vmatprep.mubr.msk.f32.mxu0 %vm789_vm0, %v4014_v12 }
  0xa0   : > { %v706_v14 = vpop.permute.xlu0 %705  ;;  %v708_v1 = vpop.permute.xlu1 %707  ;;  %2872 = vmatpush1.bf16.msra.mxu1 %v3304_v24  ;;  %v4054_v24 = vld [vmem:[#allocation2 + $0x78] sm:$0xff] }
  0xa1   : > { %v4038_v9 = vsel %vm789_vm0, %v583_v62, %v706_v14  ;;  %v4042_v59 = vsel %vm789_vm0, %v3788_v43, %v708_v1  ;;  %2861 = vmatprep.subr.bf16.mxu1 %v3122_v4 }
  0xa2   : > { %1249 = vmatmul.mubr.f32.gmra.mrb[6].mxu1 %v4005_v25  ;;  %1580 = vmatmul.mubr.f32.gmra.mrb[10].mxu0 %v4005_v25 }
  0xa3   : > { %2626 = vmatprep.mubr.msk.f32.mxu1 %vm789_vm0, %v4034_v46  ;;  %2660 = vmatprep.mubr.msk.f32.mxu0 %vm789_vm0, %v4034_v46 }
  0xa4   : > { %v710_v43 = vpop.permute.xlu0 %709  ;;  %2873 = vmatpush1.bf16.msra.mxu1 %v3313_v32  ;;  %v4074_v32 = vld [vmem:[#allocation2 + $0x88] sm:$0xff] }
  0xa5   : > { %v712_v47 = vpop.permute.xlu1 %711  ;;  %v4058_v41 = vsel %vm789_vm0, %v584_v22, %v710_v43  ;;  %2862 = vmatprep.subr.bf16.mxu1 %v3122_v4 }
  0xa6   : > { %v4062_v34 = vsel %vm789_vm0, %v3797_v28, %v712_v47  ;;  %1254 = vmatmul.mubr.f32.gmra.mrb[8].mxu1 %v4018_v11  ;;  %1585 = vmatmul.mubr.f32.gmra.mrb[12].mxu0 %v4018_v11  ;;  %v590_v47 = vsel %vm499_vm2, 0.0, %v4836_v27 }
  0xa7   : > { %2627 = vmatprep.mubr.msk.f32.mxu1 %vm789_vm0, %v4054_v24  ;;  %2661 = vmatprep.mubr.msk.f32.mxu0 %vm789_vm0, %v4054_v24 }
  0xa8   : > { %v714_v28 = vpop.permute.xlu0 %713  ;;  %2874 = vmatpush1.bf16.msra.mxu1 %v3478_v31  ;;  %v4094_v31 = vld [vmem:[#allocation2 + $0x98] sm:$0xff] }
  0xa9   : > { %v716_v51 = vpop.permute.xlu1 %715  ;;  %v4078_v5 = vsel %vm789_vm0, %v585_v38, %v714_v28  ;;  %2863 = vmatprep.subr.bf16.mxu1 %v3122_v4 }
  0xaa   : > { %v4082_v45 = vsel %vm789_vm0, %v3812_v53, %v716_v51  ;;  %1259 = vmatmul.mubr.f32.gmra.mrb[10].mxu1 %v4022_v52  ;;  %1590 = vmatmul.mubr.f32.gmra.mrb[14].mxu0 %v4022_v52  ;;  %v4837_v51 = vrot.slane %v3582_v57, 7 }
  0xab   : > { %2628 = vmatprep.mubr.msk.f32.mxu1 %vm789_vm0, %v4074_v32  ;;  %2662 = vmatprep.mubr.msk.f32.mxu0 %vm789_vm0, %v4074_v32 }
  0xac   : > { %v718_v53 = vpop.permute.xlu0 %717  ;;  %2875 = vmatpush1.bf16.msra.mxu1 %v3535_v16  ;;  %v4114_v16 = vld [vmem:[#allocation2 + $0xa8] sm:$0xff] }
  0xad   : > { %v720_v36 = vpop.permute.xlu1 %719  ;;  %v4098_v40 = vsel %vm789_vm0, %v586_v42, %v718_v53  ;;  %2864 = vmatprep.subr.bf16.mxu1 %v3122_v4  ;;  %v591_v42 = vsel %vm499_vm2, 0.0, %v4837_v51 }
  0xae   : > { %v4102_v50 = vsel %vm789_vm0, %v3827_v3, %v720_v36  ;;  %1264 = vmatmul.mubr.f32.gmra.mrb[12].mxu1 %v4038_v9  ;;  %1595 = vmatmul.mubr.f32.gmra.mrb[16].mxu0 %v4038_v9 }
  0xaf   : > { %2629 = vmatprep.mubr.msk.f32.mxu1 %vm789_vm0, %v4094_v31  ;;  %2663 = vmatprep.mubr.msk.f32.mxu0 %vm789_vm0, %v4094_v31 }
  0xb0   : > { %v722_v3 = vpop.permute.xlu0 %721  ;;  %2876 = vmatpush1.bf16.msra.mxu1 %v3585_v60  ;;  %v4134_v60 = vld [vmem:[#allocation2 + $0xb8] sm:$0xff] }
  0xb1   : > { %v724_v23 = vpop.permute.xlu1 %723  ;;  %v4118_v62 = vsel %vm789_vm0, %v587_v58, %v722_v3  ;;  %2865 = vmatprep.subr.bf16.mxu1 %v3122_v4  ;;  %v4838_v58 = vrot.slane %v3621_v35, 7 }
  0xb2   : > { %v4122_v56 = vsel %vm789_vm0, %v3842_v2, %v724_v23  ;;  %1269 = vmatmul.mubr.f32.gmra.mrb[14].mxu1 %v4042_v59  ;;  %1600 = vmatmul.mubr.f32.gmra.mrb[18].mxu0 %v4042_v59 }
  0xb3   : > { %2630 = vmatprep.mubr.msk.f32.mxu1 %vm789_vm0, %v4114_v16  ;;  %2664 = vmatprep.mubr.msk.f32.mxu0 %vm789_vm0, %v4114_v16  ;;  %v592_v3 = vsel %vm499_vm2, 0.0, %v4838_v58 }
  0xb4   : > { %v726_v2 = vpop.permute.xlu0 %725  ;;  %2877 = vmatpush1.bf16.msra.mxu1 %v3601_v19  ;;  %v4154_v19 = vld [vmem:[#allocation2 + $0xc8] sm:$0xff] }
  0xb5   : > { %v728_v14 = vpop.permute.xlu1 %727  ;;  %v4138_v1 = vsel %vm789_vm0, %v588_v33, %v726_v2  ;;  %2866 = vmatprep.subr.bf16.mxu1 %v3122_v4  ;;  %v593_v33 = vsel %vm499_vm2, 0.0, %v539_v20  ;;  %v594_v20 = vsel %vm499_vm2, 0.0, %v4839_v55 }
  0xb6   : > { %v4142_v39 = vsel %vm789_vm0, %v3847_v63, %v728_v14  ;;  %1274 = vmatmul.mubr.f32.gmra.mrb[16].mxu1 %v4058_v41  ;;  %1605 = vmatmul.mubr.f32.gmra.mrb[20].mxu0 %v4058_v41 }
  0xb7   : > { %2631 = vmatprep.mubr.msk.f32.mxu1 %vm789_vm0, %v4134_v60  ;;  %2665 = vmatprep.mubr.msk.f32.mxu0 %vm789_vm0, %v4134_v60 }
  0xb8   : > { %v730_v63 = vpop.permute.xlu0 %729  ;;  %2878 = vmatpush1.bf16.msra.mxu1 %v3625_v37  ;;  %v4174_v37 = vld [vmem:[#allocation2 + $0xd8] sm:$0xff] }
  0xb9   : > { %v732_v22 = vpop.permute.xlu1 %731  ;;  %v4158_v43 = vsel %vm789_vm0, %v589_v54, %v730_v63  ;;  %2867 = vmatprep.subr.bf16.mxu1 %v3122_v4  ;;  %v4251_v63 = vld [vmem:[#allocation2 + $0x118] sm:$0xff] }
  0xba   : > { %v4162_v6 = vsel %vm789_vm0, %v3868_v7, %v732_v22  ;;  %1279 = vmatmul.mubr.f32.gmra.mrb[18].mxu1 %v4062_v34  ;;  %1610 = vmatmul.mubr.f32.gmra.mrb[22].mxu0 %v4062_v34 }
  0xbb   : > { %2632 = vmatprep.mubr.msk.f32.mxu1 %vm789_vm0, %v4154_v19  ;;  %2666 = vmatprep.mubr.msk.f32.mxu0 %vm789_vm0, %v4154_v19 }
  0xbc   : > { %v734_v7 = vpop.permute.xlu0 %733  ;;  %2879 = vmatpush1.bf16.msra.mxu1 %v3683_v29  ;;  %v4194_v29 = vld [vmem:[#allocation2 + $0xe8] sm:$0xff] }
  0xbd   : > { %v736_v38 = vpop.permute.xlu1 %735  ;;  %v4178_v28 = vsel %vm789_vm0, %v590_v47, %v734_v7  ;;  %2868 = vmatprep.subr.bf16.mxu1 %v3122_v4 }
  0xbe   : > { %v4182_v8 = vsel %vm789_vm0, %v3898_v48, %v736_v38  ;;  %1284 = vmatmul.mubr.f32.gmra.mrb[20].mxu1 %v4078_v5  ;;  %1615 = vmatmul.mubr.f32.gmra.mrb[24].mxu0 %v4078_v5 }
  0xbf   : > { %2633 = vmatprep.mubr.msk.f32.mxu1 %vm789_vm0, %v4174_v37  ;;  %2667 = vmatprep.mubr.msk.f32.mxu0 %vm789_vm0, %v4174_v37 }
  0xc0   : > { %v738_v48 = vpop.permute.xlu0 %737  ;;  %2880 = vmatpush1.bf16.msra.mxu1 %v3701_v10  ;;  %v4214_v10 = vld [vmem:[#allocation2 + $0xf8] sm:$0xff] }
  0xc1   : > { %v740_v53 = vpop.permute.xlu1 %739  ;;  %v4198_v36 = vsel %vm789_vm0, %v591_v42, %v738_v48  ;;  %2869 = vmatprep.subr.bf16.mxu1 %v3122_v4 }
  0xc2   : > { %v4202_v57 = vsel %vm789_vm0, %v3919_v18, %v740_v53  ;;  %1289 = vmatmul.mubr.f32.gmra.mrb[22].mxu1 %v4082_v45  ;;  %1620 = vmatmul.mubr.f32.gmra.mrb[26].mxu0 %v4082_v45 }
  0xc3   : > { %2634 = vmatprep.mubr.msk.f32.mxu1 %vm789_vm0, %v4194_v29  ;;  %2668 = vmatprep.mubr.msk.f32.mxu0 %vm789_vm0, %v4194_v29 }
  0xc4   : > { %v742_v18 = vpop.permute.xlu0 %741  ;;  %2881 = vmatpush1.bf16.msra.mxu1 %v3759_v15  ;;  %v4233_v15 = vld [vmem:[#allocation2 + $0x108] sm:$0xff] }
  0xc5   : > { %v744_v23 = vpop.permute.xlu1 %743  ;;  %v4218_v4 = vsel %vm789_vm0, %v592_v3, %v742_v18 }
  0xc6   : > { %v4222_v35 = vsel %vm789_vm0, %v3940_v0, %v744_v23  ;;  %1294 = vmatmul.mubr.f32.gmra.mrb[24].mxu1 %v4098_v40  ;;  %1625 = vmatmul.mubr.f32.gmra.mrb[28].mxu0 %v4098_v40 }
  0xc7   : > { %2635 = vmatprep.mubr.msk.f32.mxu1 %vm789_vm0, %v4214_v10  ;;  %2669 = vmatprep.mubr.msk.f32.mxu0 %vm789_vm0, %v4214_v10 }
  0xc9   : > { %v746_v2 = vpop.permute.xlu0 %745  ;;  %v748_v14 = vpop.permute.xlu1 %747 }
  0xca   : > { %v4236_v0 = vsel %vm789_vm0, %v593_v33, %v746_v2  ;;  %v4240_v54 = vsel %vm789_vm0, %v3961_v17, %v748_v14  ;;  %1299 = vmatmul.mubr.f32.gmra.mrb[26].mxu1 %v4102_v50  ;;  %1630 = vmatmul.mubr.f32.gmra.mrb[30].mxu0 %v4102_v50  ;;  %v4509_v14 = vld [vmem:[%s4820_s4] ss:$0 sm:$0xff] }
  0xcb   : > { %2636 = vmatprep.mubr.msk.f32.mxu1 %vm789_vm0, %v4233_v15  ;;  %2710 = vmatprep.mubr.msk.f32.mxu0 %vm789_vm0, %v3998_v49  ;;  %v4269_v49 = vld [vmem:[#allocation2 + $0x128] sm:$0xff] }
  0xcd   : > { %v750_v22 = vpop.permute.xlu0 %749  ;;  %v752_v27 = vpop.permute.xlu1 %751 }
  0xce   : > { %v4254_v17 = vsel %vm789_vm0, %v594_v20, %v750_v22  ;;  %v4258_v47 = vsel %vm789_vm0, %v3976_v13, %v752_v27  ;;  %1304 = vmatmul.mubr.f32.gmra.mrb[28].mxu1 %v4118_v62  ;;  %1966 = vmatmul.mubr.f32.vlgmr.msra.gmra.mrb[0].mxu0 %v3993_v26  ;;  %v4514_v20 = vld [vmem:[%s4821_s5] ss:$0 sm:$0xff] }
  0xcf   : > { %2637 = vmatprep.mubr.msk.f32.mxu1 %vm789_vm0, %v4251_v63  ;;  %2711 = vmatprep.mubr.msk.f32.mxu0 %vm789_vm0, %v4014_v12  ;;  %v4316_v12 = vld [vmem:[#allocation2 + $0x178] sm:$0xff] }
  0xd1   : > { %v754_v7 = vpop.permute.xlu0 %753  ;;  %v756_v38 = vpop.permute.xlu1 %755 }
  0xd2   : > { %v4272_v13 = vsel %vm789_vm0, %v595_v61, %v754_v7  ;;  %v4276_v26 = vsel %vm789_vm0, %v3983_v30, %v756_v38  ;;  %1309 = vmatmul.mubr.f32.gmra.mrb[30].mxu1 %v4122_v56  ;;  %1971 = vmatmul.mubr.f32.gmra.mrb[2].mxu0 %v4005_v25  ;;  %v4300_v30 = vld [vmem:[#allocation2 + $0x158] sm:$0xff]  ;;  %v4308_v25 = vld [vmem:[#allocation2 + $0x168] sm:$0xff] }
  0xd3   : > { %2638 = vmatprep.mubr.msk.f32.mxu1 %vm789_vm0, %v4269_v49  ;;  %2712 = vmatprep.mubr.msk.f32.mxu0 %vm789_vm0, %v4034_v46  ;;  %v4340_v46 = vld [vmem:[#allocation2 + $0x1a8] sm:$0xff] }
  0xd6   : > { %1314 = vmatmul.mubr.f32.gmra.mrb[32].mxu1 %v4138_v1  ;;  %1976 = vmatmul.mubr.f32.gmra.mrb[4].mxu0 %v4018_v11  ;;  %v4324_v11 = vld [vmem:[#allocation2 + $0x188] sm:$0xff] }
  0xd7   : > { %2639 = vmatprep.mubr.msk.f32.mxu1 %vm789_vm0, %v4284_v44  ;;  %2713 = vmatprep.mubr.msk.f32.mxu0 %vm789_vm0, %v4054_v24  ;;  %v4364_v24 = vld [vmem:[#allocation2 + $0x1d8] sm:$0xff] }
  0xda   : > { %1319 = vmatmul.mubr.f32.gmra.mrb[34].mxu1 %v4142_v39  ;;  %1981 = vmatmul.mubr.f32.gmra.mrb[6].mxu0 %v4022_v52  ;;  %v4332_v52 = vld [vmem:[#allocation2 + $0x198] sm:$0xff] }
  0xdb   : > { %2640 = vmatprep.mubr.msk.f32.mxu1 %vm789_vm0, %v4292_v21  ;;  %2714 = vmatprep.mubr.msk.f32.mxu0 %vm789_vm0, %v4074_v32  ;;  %v1045_v32 = vld [vmem:[#allocation2 + $0x208] sm:$0xff] }
  0xde   : > { %1324 = vmatmul.mubr.f32.gmra.mrb[36].mxu1 %v4158_v43  ;;  %1986 = vmatmul.mubr.f32.gmra.mrb[8].mxu0 %v4038_v9  ;;  %v4348_v9 = vld [vmem:[#allocation2 + $0x1b8] sm:$0xff] }
  0xdf   : > { %2641 = vmatprep.mubr.msk.f32.mxu1 %vm789_vm0, %v4300_v30  ;;  %2715 = vmatprep.mubr.msk.f32.mxu0 %vm789_vm0, %v4094_v31  ;;  %v1779_v31 = vld [vmem:[#allocation2 + $0x238] sm:$0xff] }
  0xe2   : > { %1329 = vmatmul.mubr.f32.gmra.mrb[38].mxu1 %v4162_v6  ;;  %1991 = vmatmul.mubr.f32.gmra.mrb[10].mxu0 %v4042_v59  ;;  %v4356_v59 = vld [vmem:[#allocation2 + $0x1c8] sm:$0xff] }
  0xe3   : > { %2642 = vmatprep.mubr.msk.f32.mxu1 %vm789_vm0, %v4308_v25  ;;  %2716 = vmatprep.mubr.msk.f32.mxu0 %vm789_vm0, %v4114_v16 }
  0xe6   : > { %1334 = vmatmul.mubr.f32.gmra.mrb[40].mxu1 %v4178_v28  ;;  %1996 = vmatmul.mubr.f32.gmra.mrb[12].mxu0 %v4058_v41  ;;  %v4372_v41 = vld [vmem:[#allocation2 + $0x1e8] sm:$0xff] }
  0xe7   : > { %2643 = vmatprep.mubr.msk.f32.mxu1 %vm789_vm0, %v4316_v12  ;;  %2717 = vmatprep.mubr.msk.f32.mxu0 %vm789_vm0, %v4134_v60 }
  0xea   : > { %1339 = vmatmul.mubr.f32.gmra.mrb[42].mxu1 %v4182_v8  ;;  %2001 = vmatmul.mubr.f32.gmra.mrb[14].mxu0 %v4062_v34  ;;  %v4380_v34 = vld [vmem:[#allocation2 + $0x1f8] sm:$0xff] }
  0xeb   : > { %2644 = vmatprep.mubr.msk.f32.mxu1 %vm789_vm0, %v4324_v11  ;;  %2718 = vmatprep.mubr.msk.f32.mxu0 %vm789_vm0, %v4154_v19 }
  0xee   : > { %1344 = vmatmul.mubr.f32.gmra.mrb[44].mxu1 %v4198_v36  ;;  %2006 = vmatmul.mubr.f32.gmra.mrb[16].mxu0 %v4078_v5  ;;  %v1047_v5 = vld [vmem:[#allocation2 + $0x218] sm:$0xff] }
  0xef   : > { %2645 = vmatprep.mubr.msk.f32.mxu1 %vm789_vm0, %v4332_v52  ;;  %2719 = vmatprep.mubr.msk.f32.mxu0 %vm789_vm0, %v4174_v37 }
  0xf2   : > { %1349 = vmatmul.mubr.f32.gmra.mrb[46].mxu1 %v4202_v57  ;;  %2011 = vmatmul.mubr.f32.gmra.mrb[18].mxu0 %v4082_v45  ;;  %v1777_v45 = vld [vmem:[#allocation2 + $0x228] sm:$0xff] }
  0xf3   : > { %2646 = vmatprep.mubr.msk.f32.mxu1 %vm789_vm0, %v4340_v46  ;;  %2720 = vmatprep.mubr.msk.f32.mxu0 %vm789_vm0, %v4194_v29 }
  0xf6   : > { %1354 = vmatmul.mubr.f32.gmra.mrb[48].mxu1 %v4218_v4  ;;  %2016 = vmatmul.mubr.f32.gmra.mrb[20].mxu0 %v4098_v40  ;;  %v3025_v40 = vld [vmem:[#allocation2] sm:$0xff] }
  0xf7   : > { %2647 = vmatprep.mubr.msk.f32.mxu1 %vm789_vm0, %v4348_v9  ;;  %2721 = vmatprep.mubr.msk.f32.mxu0 %vm789_vm0, %v4214_v10 }
  0xfa   : > { %1359 = vmatmul.mubr.f32.gmra.mrb[50].mxu1 %v4222_v35  ;;  %2021 = vmatmul.mubr.f32.gmra.mrb[22].mxu0 %v4102_v50 }
  0xfb   : > { %2648 = vmatprep.mubr.msk.f32.mxu1 %vm789_vm0, %v4356_v59  ;;  %2722 = vmatprep.mubr.msk.f32.mxu0 %vm789_vm0, %v4233_v15 }
  0xfe   : > { %1364 = vmatmul.mubr.f32.gmra.mrb[52].mxu1 %v4236_v0  ;;  %2026 = vmatmul.mubr.f32.gmra.mrb[24].mxu0 %v4118_v62 }
  0xff   : > { %2649 = vmatprep.mubr.msk.f32.mxu1 %vm789_vm0, %v4364_v24  ;;  %2723 = vmatprep.mubr.msk.f32.mxu0 %vm789_vm0, %v4251_v63 }
 0x102   : > { %1369 = vmatmul.mubr.f32.gmra.mrb[54].mxu1 %v4240_v54  ;;  %2031 = vmatmul.mubr.f32.gmra.mrb[26].mxu0 %v4122_v56 }
 0x103   : > { %2650 = vmatprep.mubr.msk.f32.mxu1 %vm789_vm0, %v4372_v41  ;;  %2724 = vmatprep.mubr.msk.f32.mxu0 %vm789_vm0, %v4269_v49 }
 0x106   : > { %1374 = vmatmul.mubr.f32.gmra.mrb[56].mxu1 %v4254_v17  ;;  %2036 = vmatmul.mubr.f32.gmra.mrb[28].mxu0 %v4138_v1 }
 0x107   : > { %2651 = vmatprep.mubr.msk.f32.mxu1 %vm789_vm0, %v4380_v34  ;;  %2725 = vmatprep.mubr.msk.f32.mxu0 %vm789_vm0, %v4284_v44 }
 0x10a   : > { %1379 = vmatmul.mubr.f32.gmra.mrb[58].mxu1 %v4258_v47  ;;  %2041 = vmatmul.mubr.f32.gmra.mrb[30].mxu0 %v4142_v39 }
 0x10b   : > { %2652 = vmatprep.mubr.msk.f32.mxu1 %vm789_vm0, %v1045_v32  ;;  %2726 = vmatprep.mubr.msk.f32.mxu0 %vm789_vm0, %v4292_v21 }
 0x10e   : > { %1384 = vmatmul.mubr.f32.gmra.mrb[60].mxu1 %v4272_v13  ;;  %2046 = vmatmul.mubr.f32.gmra.mrb[32].mxu0 %v4158_v43 }
 0x10f   : > { %2653 = vmatprep.mubr.msk.f32.mxu1 %vm789_vm0, %v1047_v5  ;;  %2727 = vmatprep.mubr.msk.f32.mxu0 %vm789_vm0, %v4300_v30 }
 0x112   : > { %1389 = vmatmul.mubr.f32.gmra.mrb[62].mxu1 %v4276_v26  ;;  %2051 = vmatmul.mubr.f32.gmra.mrb[34].mxu0 %v4162_v6 }
 0x113   : > { %2670 = vmatprep.mubr.msk.f32.mxu1 %vm789_vm0, %v4233_v15  ;;  %2728 = vmatprep.mubr.msk.f32.mxu0 %vm789_vm0, %v4308_v25 }
 0x116   : > { %1635 = vmatmul.mubr.f32.vlgmr.msra.gmra.mrb[32].mxu1 %v4118_v62  ;;  %2056 = vmatmul.mubr.f32.gmra.mrb[36].mxu0 %v4178_v28 }
 0x117   : > { %2671 = vmatprep.mubr.msk.f32.mxu1 %vm789_vm0, %v4251_v63  ;;  %2729 = vmatprep.mubr.msk.f32.mxu0 %vm789_vm0, %v4316_v12 }
 0x11a   : > { %1640 = vmatmul.mubr.f32.gmra.mrb[34].mxu1 %v4122_v56  ;;  %2061 = vmatmul.mubr.f32.gmra.mrb[38].mxu0 %v4182_v8 }
 0x11b   : > { %2672 = vmatprep.mubr.msk.f32.mxu1 %vm789_vm0, %v4269_v49  ;;  %2730 = vmatprep.mubr.msk.f32.mxu0 %vm789_vm0, %v4324_v11 }
 0x11e   : > { %1645 = vmatmul.mubr.f32.gmra.mrb[36].mxu1 %v4138_v1  ;;  %2066 = vmatmul.mubr.f32.gmra.mrb[40].mxu0 %v4198_v36 }
 0x11f   : > { %2673 = vmatprep.mubr.msk.f32.mxu1 %vm789_vm0, %v4284_v44  ;;  %2731 = vmatprep.mubr.msk.f32.mxu0 %vm789_vm0, %v4332_v52 }
 0x122   : > { %1650 = vmatmul.mubr.f32.gmra.mrb[38].mxu1 %v4142_v39  ;;  %2071 = vmatmul.mubr.f32.gmra.mrb[42].mxu0 %v4202_v57 }
 0x123   : > { %2674 = vmatprep.mubr.msk.f32.mxu1 %vm789_vm0, %v4292_v21  ;;  %2732 = vmatprep.mubr.msk.f32.mxu0 %vm789_vm0, %v4340_v46 }
 0x126   : > { %1655 = vmatmul.mubr.f32.gmra.mrb[40].mxu1 %v4158_v43  ;;  %2076 = vmatmul.mubr.f32.gmra.mrb[44].mxu0 %v4218_v4 }
 0x127   : > { %2675 = vmatprep.mubr.msk.f32.mxu1 %vm789_vm0, %v4300_v30  ;;  %2733 = vmatprep.mubr.msk.f32.mxu0 %vm789_vm0, %v4348_v9 }
 0x12a   : > { %1660 = vmatmul.mubr.f32.gmra.mrb[42].mxu1 %v4162_v6  ;;  %2081 = vmatmul.mubr.f32.gmra.mrb[46].mxu0 %v4222_v35 }
 0x12b   : > { %2676 = vmatprep.mubr.msk.f32.mxu1 %vm789_vm0, %v4308_v25  ;;  %2734 = vmatprep.mubr.msk.f32.mxu0 %vm789_vm0, %v4356_v59 }
 0x12e   : > { %1665 = vmatmul.mubr.f32.gmra.mrb[44].mxu1 %v4178_v28  ;;  %2086 = vmatmul.mubr.f32.gmra.mrb[48].mxu0 %v4236_v0 }
 0x12f   : > { %2677 = vmatprep.mubr.msk.f32.mxu1 %vm789_vm0, %v4316_v12  ;;  %2735 = vmatprep.mubr.msk.f32.mxu0 %vm789_vm0, %v4364_v24 }
 0x132   : > { %1670 = vmatmul.mubr.f32.gmra.mrb[46].mxu1 %v4182_v8  ;;  %2091 = vmatmul.mubr.f32.gmra.mrb[50].mxu0 %v4240_v54 }
 0x133   : > { %2678 = vmatprep.mubr.msk.f32.mxu1 %vm789_vm0, %v4324_v11  ;;  %2736 = vmatprep.mubr.msk.f32.mxu0 %vm789_vm0, %v4372_v41 }
 0x136   : > { %1675 = vmatmul.mubr.f32.gmra.mrb[48].mxu1 %v4198_v36  ;;  %2096 = vmatmul.mubr.f32.gmra.mrb[52].mxu0 %v4254_v17 }
 0x137   : > { %2679 = vmatprep.mubr.msk.f32.mxu1 %vm789_vm0, %v4332_v52  ;;  %2737 = vmatprep.mubr.msk.f32.mxu0 %vm789_vm0, %v4380_v34 }
 0x13a   : > { %1680 = vmatmul.mubr.f32.gmra.mrb[50].mxu1 %v4202_v57  ;;  %2101 = vmatmul.mubr.f32.gmra.mrb[54].mxu0 %v4258_v47 }
 0x13b   : > { %2680 = vmatprep.mubr.msk.f32.mxu1 %vm789_vm0, %v4340_v46  ;;  %2738 = vmatprep.mubr.msk.f32.mxu0 %vm789_vm0, %v1045_v32 }
 0x13e   : > { %1685 = vmatmul.mubr.f32.gmra.mrb[52].mxu1 %v4218_v4  ;;  %2106 = vmatmul.mubr.f32.gmra.mrb[56].mxu0 %v4272_v13 }
 0x13f   : > { %2681 = vmatprep.mubr.msk.f32.mxu1 %vm789_vm0, %v4348_v9  ;;  %2739 = vmatprep.mubr.msk.f32.mxu0 %vm789_vm0, %v1047_v5 }
 0x142   : > { %1690 = vmatmul.mubr.f32.gmra.mrb[54].mxu1 %v4222_v35  ;;  %2111 = vmatmul.mubr.f32.gmra.mrb[58].mxu0 %v4276_v26 }
 0x143   : > { %2682 = vmatprep.mubr.msk.f32.mxu1 %vm789_vm0, %v4356_v59  ;;  %2740 = vmatprep.mubr.msk.f32.mxu0 %vm789_vm0, %v1777_v45 }
 0x146   : > { %1695 = vmatmul.mubr.f32.gmra.mrb[56].mxu1 %v4236_v0  ;;  %2116 = vmatmul.mubr.f32.gmra.mrb[60].mxu0 %v3025_v40 }
 0x147   : > { %2683 = vmatprep.mubr.msk.f32.mxu1 %vm789_vm0, %v4364_v24  ;;  %2741 = vmatprep.mubr.msk.f32.mxu0 %vm789_vm0, %v1779_v31 }
 0x14a   : > { %1700 = vmatmul.mubr.f32.gmra.mrb[58].mxu1 %v4240_v54  ;;  %2121 = vmatmul.mubr.f32.gmra.mrb[62].mxu0 %v3025_v40 }
 0x14b   : > { %2684 = vmatprep.mubr.msk.f32.mxu1 %vm789_vm0, %v4372_v41 }
 0x14e   : > { %1705 = vmatmul.mubr.f32.gmra.mrb[60].mxu1 %v4254_v17 }
 0x14f   : > { %2685 = vmatprep.mubr.msk.f32.mxu1 %vm789_vm0, %v4380_v34 }
 0x152   : > { %1710 = vmatmul.mubr.f32.gmra.mrb[62].mxu1 %v4258_v47 }
 0x169   : > { %v1235_v50 = vpop.f32.mrb[0].mxu1 }
 0x16a   : > { %v1237_v16 = vpop.f32.mrb[1].mxu1 }
 0x16d   : > { %v1240_v62 = vpop.f32.mrb[2].mxu1 }
 0x16e   : > { %v1242_v56 = vpop.f32.mrb[3].mxu1 }
 0x171   : > { %v1245_v60 = vpop.f32.mrb[4].mxu1 }
 0x172   : > { %v1247_v1 = vpop.f32.mrb[5].mxu1 }
 0x175   : > { %v1250_v39 = vpop.f32.mrb[6].mxu1 }
 0x176   : > { %v1252_v19 = vpop.f32.mrb[7].mxu1 }
 0x179   : > { %v4484_v43 = vpop.f32.mrb[8].mxu1 }
 0x17a   : > { %v1257_v6 = vpop.f32.mrb[9].mxu1 }
 0x17d   : > { %v4486_v37 = vpop.f32.mrb[10].mxu1 }
 0x17e   : > { %v1262_v28 = vpop.f32.mrb[11].mxu1 }
 0x181   : > { %v4488_v8 = vpop.f32.mrb[12].mxu1 }
 0x182   : > { %v1267_v51 = vpop.f32.mrb[13].mxu1 }
 0x185   : > { %v4490_v42 = vpop.f32.mrb[14].mxu1 }
 0x186   : > { %v1272_v29 = vpop.f32.mrb[15].mxu1 }
 0x189   : > { %v4492_v48 = vpop.f32.mrb[16].mxu1 }
 0x18a   : > { %v1277_v53 = vpop.f32.mrb[17].mxu1 }
 0x18d   : > { %v4494_v36 = vpop.f32.mrb[18].mxu1 }
 0x18e   : > { %v1282_v57 = vpop.f32.mrb[19].mxu1 }
 0x191   : > { %v4496_v58 = vpop.f32.mrb[20].mxu1 }
 0x192   : > { %v1287_v3 = vpop.f32.mrb[21].mxu1 }
 0x195   : > { %v4498_v10 = vpop.f32.mrb[22].mxu1 }
 0x196   : > { %v1292_v18 = vpop.f32.mrb[23].mxu1 }
 0x199   : > { %v4500_v23 = vpop.f32.mrb[24].mxu1 }
 0x19a   : > { %v1297_v4 = vpop.f32.mrb[25].mxu1 }
 0x19d   : > { %v4502_v35 = vpop.f32.mrb[26].mxu1 }
 0x19e   : > { %v1302_v33 = vpop.f32.mrb[27].mxu1 }
 0x1a1   : > { %v4504_v15 = vpop.f32.mrb[28].mxu1  ;;  %v1967_v2 = vpop.f32.mrb[0].mxu0 }
 0x1a2   : > { %v2882_v0 = vadd.f32 %v1967_v2, %v1235_v50  ;;  %v1307_v54 = vpop.f32.mrb[29].mxu1  ;;  %v1969_v55 = vpop.f32.mrb[1].mxu0 }
 0x1a4   : > { %v2165_v63 = vmul.f32 %v2882_v0, %v4509_v14 }
 0x1a5   : > { %v4524_v22 = vpop.f32.mrb[30].mxu1  ;;  %v1972_v27 = vpop.f32.mrb[2].mxu0 }
 0x1a6   : > { %v2204_v17 = vadd.f32 %v4514_v20, %v2165_v63  ;;  %v2883_v47 = vadd.f32 %v1972_v27, %v1240_v62  ;;  %v1312_v61 = vpop.f32.mrb[31].mxu1  ;;  %v1974_v49 = vpop.f32.mrb[3].mxu0 }
 0x1a8   : > { %2237 = vst.msk [vmem:[%s4522_s24] sm:$0xff] %vm2236_vm3, %v2204_v17  ;;  %v2166_v7 = vmul.f32 %v2883_v47, %v4509_v14  ;;  %v2340_v13 = vmul.f32 %v2204_v17, %v2204_v17  ;;  %v2269_v30 = vsel %vm2236_vm3, %v2204_v17, 0.0 }
 0x1a9   : > { %v1977_v38 = vpop.f32.mrb[4].mxu0 }
 0x1aa   : > { %v2205_v26 = vadd.f32 %v4514_v20, %v2166_v7  ;;  %v2884_v44 = vadd.f32 %v1977_v38, %v1245_v60  ;;  %v1979_v21 = vpop.f32.mrb[5].mxu0  ;;  %v2372_v9 = vsel %vm2236_vm3, %v2340_v13, 0.0 }
 0x1ac   : > { %2238 = vst.msk [vmem:[%s4522_s24 + $0x8] sm:$0xff] %vm2236_vm3, %v2205_v26  ;;  %v2270_v25 = vsel %vm2236_vm3, %v2205_v26, 0.0  ;;  %v2341_v12 = vmul.f32 %v2205_v26, %v2205_v26  ;;  %v2167_v11 = vmul.f32 %v2884_v44, %v4509_v14 }
 0x1ad   : > { %v2271_v52 = vadd.f32 %v2270_v25, %v2269_v30  ;;  %v1982_v46 = vpop.f32.mrb[6].mxu0 }
 0x1ae   : > { %v2373_v59 = vsel %vm2236_vm3, %v2341_v12, 0.0  ;;  %v2206_v24 = vadd.f32 %v4514_v20, %v2167_v11  ;;  %v2885_v41 = vadd.f32 %v1982_v46, %v1250_v39  ;;  %v1984_v34 = vpop.f32.mrb[7].mxu0 }
 0x1af   : > { %v2374_v32 = vadd.f32 %v2373_v59, %v2372_v9 }
 0x1b0   : > { %2239 = vst.msk [vmem:[%s4522_s24 + $0x10] sm:$0xff] %vm2236_vm3, %v2206_v24  ;;  %v2272_v5 = vsel %vm2236_vm3, %v2206_v24, 0.0  ;;  %v2342_v45 = vmul.f32 %v2206_v24, %v2206_v24  ;;  %v2168_v31 = vmul.f32 %v2885_v41, %v4509_v14 }
 0x1b1   : > { %v2273_v40 = vadd.f32 %v2272_v5, %v2271_v52  ;;  %v1987_v50 = vpop.f32.mrb[8].mxu0 }
 0x1b2   : > { %v2375_v16 = vsel %vm2236_vm3, %v2342_v45, 0.0  ;;  %v2207_v62 = vadd.f32 %v4514_v20, %v2168_v31  ;;  %v2886_v56 = vadd.f32 %v1987_v50, %v4484_v43  ;;  %v1989_v60 = vpop.f32.mrb[9].mxu0 }
 0x1b3   : > { %v2376_v1 = vadd.f32 %v2375_v16, %v2374_v32 }
 0x1b4   : > { %2240 = vst.msk [vmem:[%s4522_s24 + $0x18] sm:$0xff] %vm2236_vm3, %v2207_v62  ;;  %v2274_v39 = vsel %vm2236_vm3, %v2207_v62, 0.0  ;;  %v2343_v19 = vmul.f32 %v2207_v62, %v2207_v62  ;;  %v2169_v6 = vmul.f32 %v2886_v56, %v4509_v14 }
 0x1b5   : > { %v2275_v28 = vadd.f32 %v2274_v39, %v2273_v40  ;;  %v1992_v51 = vpop.f32.mrb[10].mxu0 }
 0x1b6   : > { %v2377_v29 = vsel %vm2236_vm3, %v2343_v19, 0.0  ;;  %v2208_v53 = vadd.f32 %v4514_v20, %v2169_v6  ;;  %v2887_v57 = vadd.f32 %v1992_v51, %v4486_v37  ;;  %v1994_v3 = vpop.f32.mrb[11].mxu0 }
 0x1b7   : > { %v2378_v43 = vadd.f32 %v2377_v29, %v2376_v1 }
 0x1b8   : > { %2241 = vst.msk [vmem:[%s4522_s24 + $0x20] sm:$0xff] %vm2236_vm3, %v2208_v53  ;;  %v2276_v18 = vsel %vm2236_vm3, %v2208_v53, 0.0  ;;  %v2344_v4 = vmul.f32 %v2208_v53, %v2208_v53  ;;  %v2170_v33 = vmul.f32 %v2887_v57, %v4509_v14 }
 0x1b9   : > { %v2277_v2 = vadd.f32 %v2276_v18, %v2275_v28  ;;  %v1997_v0 = vpop.f32.mrb[12].mxu0 }
 0x1ba   : > { %v2379_v54 = vsel %vm2236_vm3, %v2344_v4, 0.0  ;;  %v2209_v55 = vadd.f32 %v4514_v20, %v2170_v33  ;;  %v2888_v63 = vadd.f32 %v1997_v0, %v4488_v8  ;;  %v1999_v27 = vpop.f32.mrb[13].mxu0 }
 0x1bb   : > { %v2380_v37 = vadd.f32 %v2379_v54, %v2378_v43 }
 0x1bc   : > { %2242 = vst.msk [vmem:[%s4522_s24 + $0x28] sm:$0xff] %vm2236_vm3, %v2209_v55  ;;  %v2278_v17 = vsel %vm2236_vm3, %v2209_v55, 0.0  ;;  %v2345_v47 = vmul.f32 %v2209_v55, %v2209_v55  ;;  %v2171_v61 = vmul.f32 %v2888_v63, %v4509_v14 }
 0x1bd   : > { %v2279_v49 = vadd.f32 %v2278_v17, %v2277_v2  ;;  %v2002_v7 = vpop.f32.mrb[14].mxu0 }
 0x1be   : > { %v2381_v38 = vsel %vm2236_vm3, %v2345_v47, 0.0  ;;  %v2210_v13 = vadd.f32 %v4514_v20, %v2171_v61  ;;  %v2889_v26 = vadd.f32 %v2002_v7, %v4490_v42  ;;  %v2004_v44 = vpop.f32.mrb[15].mxu0 }
 0x1bf   : > { %v2382_v8 = vadd.f32 %v2381_v38, %v2380_v37 }
 0x1c0   : > { %2243 = vst.msk [vmem:[%s4522_s24 + $0x30] sm:$0xff] %vm2236_vm3, %v2210_v13  ;;  %v2280_v21 = vsel %vm2236_vm3, %v2210_v13, 0.0  ;;  %v2346_v30 = vmul.f32 %v2210_v13, %v2210_v13  ;;  %v2172_v25 = vmul.f32 %v2889_v26, %v4509_v14 }
 0x1c1   : > { %v2281_v12 = vadd.f32 %v2280_v21, %v2279_v49  ;;  %v2007_v11 = vpop.f32.mrb[16].mxu0 }
 0x1c2   : > { %v2383_v52 = vsel %vm2236_vm3, %v2346_v30, 0.0  ;;  %v2211_v46 = vadd.f32 %v4514_v20, %v2172_v25  ;;  %v2890_v9 = vadd.f32 %v2007_v11, %v4492_v48  ;;  %v2009_v59 = vpop.f32.mrb[17].mxu0 }
 0x1c3   : > { %v2384_v42 = vadd.f32 %v2383_v52, %v2382_v8 }
 0x1c4   : > { %2244 = vst.msk [vmem:[%s4522_s24 + $0x38] sm:$0xff] %vm2236_vm3, %v2211_v46  ;;  %v2282_v24 = vsel %vm2236_vm3, %v2211_v46, 0.0  ;;  %v2347_v41 = vmul.f32 %v2211_v46, %v2211_v46  ;;  %v2173_v34 = vmul.f32 %v2890_v9, %v4509_v14 }
 0x1c5   : > { %v2283_v32 = vadd.f32 %v2282_v24, %v2281_v12  ;;  %v2012_v5 = vpop.f32.mrb[18].mxu0 }
 0x1c6   : > { %v2385_v45 = vsel %vm2236_vm3, %v2347_v41, 0.0  ;;  %v2212_v31 = vadd.f32 %v4514_v20, %v2173_v34  ;;  %v2891_v40 = vadd.f32 %v2012_v5, %v4494_v36  ;;  %v2014_v50 = vpop.f32.mrb[19].mxu0 }
 0x1c7   : > { %v2386_v48 = vadd.f32 %v2385_v45, %v2384_v42 }
 0x1c8   : > { %2245 = vst.msk [vmem:[%s4522_s24 + $0x40] sm:$0xff] %vm2236_vm3, %v2212_v31  ;;  %v2284_v16 = vsel %vm2236_vm3, %v2212_v31, 0.0  ;;  %v2348_v62 = vmul.f32 %v2212_v31, %v2212_v31  ;;  %v2174_v56 = vmul.f32 %v2891_v40, %v4509_v14 }
 0x1c9   : > { %v2285_v60 = vadd.f32 %v2284_v16, %v2283_v32  ;;  %v2017_v1 = vpop.f32.mrb[20].mxu0 }
 0x1ca   : > { %v2387_v39 = vsel %vm2236_vm3, %v2348_v62, 0.0  ;;  %v2213_v19 = vadd.f32 %v4514_v20, %v2174_v56  ;;  %v2892_v6 = vadd.f32 %v2017_v1, %v4496_v58  ;;  %v2019_v28 = vpop.f32.mrb[21].mxu0 }
 0x1cb   : > { %v2388_v36 = vadd.f32 %v2387_v39, %v2386_v48 }
 0x1cc   : > { %2246 = vst.msk [vmem:[%s4522_s24 + $0x48] sm:$0xff] %vm2236_vm3, %v2213_v19  ;;  %v2286_v51 = vsel %vm2236_vm3, %v2213_v19, 0.0  ;;  %v2349_v29 = vmul.f32 %v2213_v19, %v2213_v19  ;;  %v2175_v53 = vmul.f32 %v2892_v6, %v4509_v14 }
 0x1cd   : > { %v2287_v57 = vadd.f32 %v2286_v51, %v2285_v60  ;;  %v2022_v3 = vpop.f32.mrb[22].mxu0 }
 0x1ce   : > { %v2389_v43 = vsel %vm2236_vm3, %v2349_v29, 0.0  ;;  %v2214_v18 = vadd.f32 %v4514_v20, %v2175_v53  ;;  %v2893_v4 = vadd.f32 %v2022_v3, %v4498_v10  ;;  %v2024_v33 = vpop.f32.mrb[23].mxu0 }
 0x1cf   : > { %v2390_v58 = vadd.f32 %v2389_v43, %v2388_v36 }
 0x1d0   : > { %2247 = vst.msk [vmem:[%s4522_s24 + $0x50] sm:$0xff] %vm2236_vm3, %v2214_v18  ;;  %v2288_v2 = vsel %vm2236_vm3, %v2214_v18, 0.0  ;;  %v2350_v0 = vmul.f32 %v2214_v18, %v2214_v18  ;;  %v2176_v54 = vmul.f32 %v2893_v4, %v4509_v14 }
 0x1d1   : > { %v2289_v55 = vadd.f32 %v2288_v2, %v2287_v57  ;;  %v2027_v63 = vpop.f32.mrb[24].mxu0 }
 0x1d2   : > { %v2391_v27 = vsel %vm2236_vm3, %v2350_v0, 0.0  ;;  %v2215_v37 = vadd.f32 %v4514_v20, %v2176_v54  ;;  %v2894_v17 = vadd.f32 %v2027_v63, %v4500_v23  ;;  %v2029_v47 = vpop.f32.mrb[25].mxu0 }
 0x1d3   : > { %v2392_v10 = vadd.f32 %v2391_v27, %v2390_v58 }
 0x1d4   : > { %2248 = vst.msk [vmem:[%s4522_s24 + $0x58] sm:$0xff] %vm2236_vm3, %v2215_v37  ;;  %v2290_v61 = vsel %vm2236_vm3, %v2215_v37, 0.0  ;;  %v2351_v49 = vmul.f32 %v2215_v37, %v2215_v37  ;;  %v2177_v7 = vmul.f32 %v2894_v17, %v4509_v14 }
 0x1d5   : > { %v2291_v38 = vadd.f32 %v2290_v61, %v2289_v55  ;;  %v2032_v13 = vpop.f32.mrb[26].mxu0 }
 0x1d6   : > { %v2393_v26 = vsel %vm2236_vm3, %v2351_v49, 0.0  ;;  %v2216_v44 = vadd.f32 %v4514_v20, %v2177_v7  ;;  %v2895_v8 = vadd.f32 %v2032_v13, %v4502_v35  ;;  %v2034_v21 = vpop.f32.mrb[27].mxu0 }
 0x1d7   : > { %v2394_v23 = vadd.f32 %v2393_v26, %v2392_v10 }
 0x1d8   : > { %2249 = vst.msk [vmem:[%s4522_s24 + $0x60] sm:$0xff] %vm2236_vm3, %v2216_v44  ;;  %v2292_v30 = vsel %vm2236_vm3, %v2216_v44, 0.0  ;;  %v2352_v25 = vmul.f32 %v2216_v44, %v2216_v44  ;;  %v2178_v12 = vmul.f32 %v2895_v8, %v4509_v14 }
 0x1d9   : > { %v2293_v11 = vadd.f32 %v2292_v30, %v2291_v38  ;;  %v2037_v52 = vpop.f32.mrb[28].mxu0 }
 0x1da   : > { %v2395_v46 = vsel %vm2236_vm3, %v2352_v25, 0.0  ;;  %v2217_v9 = vadd.f32 %v4514_v20, %v2178_v12  ;;  %v2896_v59 = vadd.f32 %v2037_v52, %v4504_v15  ;;  %v2039_v42 = vpop.f32.mrb[29].mxu0 }
 0x1db   : > { %v2396_v35 = vadd.f32 %v2395_v46, %v2394_v23 }
 0x1dc   : > { %2250 = vst.msk [vmem:[%s4522_s24 + $0x68] sm:$0xff] %vm2236_vm3, %v2217_v9  ;;  %v2294_v24 = vsel %vm2236_vm3, %v2217_v9, 0.0  ;;  %v2353_v41 = vmul.f32 %v2217_v9, %v2217_v9  ;;  %v2179_v34 = vmul.f32 %v2896_v59, %v4509_v14 }
 0x1dd   : > { %v2295_v32 = vadd.f32 %v2294_v24, %v2293_v11  ;;  %v2042_v5 = vpop.f32.mrb[30].mxu0 }
 0x1de   : > { %v2397_v45 = vsel %vm2236_vm3, %v2353_v41, 0.0  ;;  %v2218_v31 = vadd.f32 %v4514_v20, %v2179_v34  ;;  %v2897_v40 = vadd.f32 %v2042_v5, %v4524_v22  ;;  %v2044_v50 = vpop.f32.mrb[31].mxu0 }
 0x1df   : > { %v2398_v15 = vadd.f32 %v2397_v45, %v2396_v35 }
 0x1e0   : > { %2251 = vst.msk [vmem:[%s4522_s24 + $0x70] sm:$0xff] %vm2236_vm3, %v2218_v31  ;;  %v2296_v48 = vsel %vm2236_vm3, %v2218_v31, 0.0  ;;  %v2354_v16 = vmul.f32 %v2218_v31, %v2218_v31  ;;  %v2180_v62 = vmul.f32 %v2897_v40, %v4509_v14 }
 0x1e1   : > { %v2297_v56 = vadd.f32 %v2296_v48, %v2295_v32  ;;  %v2047_v60 = vpop.f32.mrb[32].mxu0 }
 0x1e2   : > { %v2399_v1 = vsel %vm2236_vm3, %v2354_v16, 0.0  ;;  %v2219_v39 = vadd.f32 %v4514_v20, %v2180_v62  ;;  %v2049_v19 = vpop.f32.mrb[33].mxu0 }
 0x1e3   : > { %v2400_v6 = vadd.f32 %v2399_v1, %v2398_v15 }
 0x1e4   : > { %2252 = vst.msk [vmem:[%s4522_s24 + $0x78] sm:$0xff] %vm2236_vm3, %v2219_v39  ;;  %v2298_v22 = vsel %vm2236_vm3, %v2219_v39, 0.0  ;;  %v2355_v28 = vmul.f32 %v2219_v39, %v2219_v39 }
 0x1e5   : > { %v2299_v36 = vadd.f32 %v2298_v22, %v2297_v56  ;;  %v2052_v51 = vpop.f32.mrb[34].mxu0 }
 0x1e6   : > { %v2401_v29 = vsel %vm2236_vm3, %v2355_v28, 0.0  ;;  %v2054_v53 = vpop.f32.mrb[35].mxu0 }
 0x1e7   : > { %v2402_v57 = vadd.f32 %v2401_v29, %v2400_v6 }
 0x1e9   : > { %v1636_v3 = vpop.f32.mrb[32].mxu1  ;;  %v2057_v43 = vpop.f32.mrb[36].mxu0 }
 0x1ea   : > { %v2898_v18 = vadd.f32 %v2047_v60, %v1636_v3  ;;  %v1638_v4 = vpop.f32.mrb[33].mxu1  ;;  %v2059_v33 = vpop.f32.mrb[37].mxu0 }
 0x1ec   : > { %v2181_v58 = vmul.f32 %v2898_v18, %v4509_v14 }
 0x1ed   : > { %v1641_v2 = vpop.f32.mrb[34].mxu1  ;;  %v2062_v0 = vpop.f32.mrb[38].mxu0 }
 0x1ee   : > { %v2220_v54 = vadd.f32 %v4514_v20, %v2181_v58  ;;  %v2899_v55 = vadd.f32 %v2052_v51, %v1641_v2  ;;  %v1643_v63 = vpop.f32.mrb[35].mxu1  ;;  %v2064_v27 = vpop.f32.mrb[39].mxu0 }
 0x1f0   : > { %2253 = vst.msk [vmem:[%s4522_s24 + $0x80] sm:$0xff] %vm2236_vm3, %v2220_v54  ;;  %v2300_v37 = vsel %vm2236_vm3, %v2220_v54, 0.0  ;;  %v2356_v17 = vmul.f32 %v2220_v54, %v2220_v54  ;;  %v2182_v47 = vmul.f32 %v2899_v55, %v4509_v14 }
 0x1f1   : > { %v2301_v10 = vadd.f32 %v2300_v37, %v2299_v36  ;;  %v1646_v61 = vpop.f32.mrb[36].mxu1  ;;  %v2067_v49 = vpop.f32.mrb[40].mxu0 }
 0x1f2   : > { %v2403_v7 = vsel %vm2236_vm3, %v2356_v17, 0.0  ;;  %v2221_v38 = vadd.f32 %v4514_v20, %v2182_v47  ;;  %v2900_v13 = vadd.f32 %v2057_v43, %v1646_v61  ;;  %v1648_v26 = vpop.f32.mrb[37].mxu1  ;;  %v2069_v44 = vpop.f32.mrb[41].mxu0 }
 0x1f3   : > { %v2404_v8 = vadd.f32 %v2403_v7, %v2402_v57 }
 0x1f4   : > { %2254 = vst.msk [vmem:[%s4522_s24 + $0x88] sm:$0xff] %vm2236_vm3, %v2221_v38  ;;  %v2302_v21 = vsel %vm2236_vm3, %v2221_v38, 0.0  ;;  %v2357_v23 = vmul.f32 %v2221_v38, %v2221_v38  ;;  %v2183_v30 = vmul.f32 %v2900_v13, %v4509_v14 }
 0x1f5   : > { %v2303_v25 = vadd.f32 %v2302_v21, %v2301_v10  ;;  %v1651_v12 = vpop.f32.mrb[38].mxu1  ;;  %v2072_v11 = vpop.f32.mrb[42].mxu0 }
 0x1f6   : > { %v2405_v52 = vsel %vm2236_vm3, %v2357_v23, 0.0  ;;  %v2222_v46 = vadd.f32 %v4514_v20, %v2183_v30  ;;  %v2901_v9 = vadd.f32 %v2062_v0, %v1651_v12  ;;  %v1653_v59 = vpop.f32.mrb[39].mxu1  ;;  %v2074_v42 = vpop.f32.mrb[43].mxu0 }
 0x1f7   : > { %v2406_v35 = vadd.f32 %v2405_v52, %v2404_v8 }
 0x1f8   : > { %2255 = vst.msk [vmem:[%s4522_s24 + $0x90] sm:$0xff] %vm2236_vm3, %v2222_v46  ;;  %v2304_v24 = vsel %vm2236_vm3, %v2222_v46, 0.0  ;;  %v2358_v41 = vmul.f32 %v2222_v46, %v2222_v46  ;;  %v2184_v34 = vmul.f32 %v2901_v9, %v4509_v14 }
 0x1f9   : > { %v2305_v32 = vadd.f32 %v2304_v24, %v2303_v25  ;;  %v1656_v5 = vpop.f32.mrb[40].mxu1  ;;  %v2077_v45 = vpop.f32.mrb[44].mxu0 }
 0x1fa   : > { %v2407_v31 = vsel %vm2236_vm3, %v2358_v41, 0.0  ;;  %v2223_v40 = vadd.f32 %v4514_v20, %v2184_v34  ;;  %v2902_v50 = vadd.f32 %v2067_v49, %v1656_v5  ;;  %v1658_v15 = vpop.f32.mrb[41].mxu1  ;;  %v2079_v48 = vpop.f32.mrb[45].mxu0 }
 0x1fb   : > { %v2408_v16 = vadd.f32 %v2407_v31, %v2406_v35 }
 0x1fc   : > { %2256 = vst.msk [vmem:[%s4522_s24 + $0x98] sm:$0xff] %vm2236_vm3, %v2223_v40  ;;  %v2306_v62 = vsel %vm2236_vm3, %v2223_v40, 0.0  ;;  %v2359_v56 = vmul.f32 %v2223_v40, %v2223_v40  ;;  %v2185_v60 = vmul.f32 %v2902_v50, %v4509_v14 }
 0x1fd   : > { %v2307_v1 = vadd.f32 %v2306_v62, %v2305_v32  ;;  %v1661_v39 = vpop.f32.mrb[42].mxu1  ;;  %v2082_v19 = vpop.f32.mrb[46].mxu0 }
 0x1fe   : > { %v2409_v6 = vsel %vm2236_vm3, %v2359_v56, 0.0  ;;  %v2224_v22 = vadd.f32 %v4514_v20, %v2185_v60  ;;  %v2903_v28 = vadd.f32 %v2072_v11, %v1661_v39  ;;  %v1663_v36 = vpop.f32.mrb[43].mxu1  ;;  %v2084_v51 = vpop.f32.mrb[47].mxu0 }
 0x1ff   : > { %v2410_v29 = vadd.f32 %v2409_v6, %v2408_v16 }
 0x200   : > { %2257 = vst.msk [vmem:[%s4522_s24 + $0xa0] sm:$0xff] %vm2236_vm3, %v2224_v22  ;;  %v2308_v53 = vsel %vm2236_vm3, %v2224_v22, 0.0  ;;  %v2360_v57 = vmul.f32 %v2224_v22, %v2224_v22  ;;  %v2186_v3 = vmul.f32 %v2903_v28, %v4509_v14 }
 0x201   : > { %v2309_v43 = vadd.f32 %v2308_v53, %v2307_v1  ;;  %v1666_v18 = vpop.f32.mrb[44].mxu1  ;;  %v2087_v4 = vpop.f32.mrb[48].mxu0 }
 0x202   : > { %v2411_v33 = vsel %vm2236_vm3, %v2360_v57, 0.0  ;;  %v2225_v58 = vadd.f32 %v4514_v20, %v2186_v3  ;;  %v2904_v2 = vadd.f32 %v2077_v45, %v1666_v18  ;;  %v1668_v0 = vpop.f32.mrb[45].mxu1  ;;  %v2089_v54 = vpop.f32.mrb[49].mxu0 }
 0x203   : > { %v2412_v55 = vadd.f32 %v2411_v33, %v2410_v29 }
 0x204   : > { %2258 = vst.msk [vmem:[%s4522_s24 + $0xa8] sm:$0xff] %vm2236_vm3, %v2225_v58  ;;  %v2310_v63 = vsel %vm2236_vm3, %v2225_v58, 0.0  ;;  %v2361_v27 = vmul.f32 %v2225_v58, %v2225_v58  ;;  %v2187_v37 = vmul.f32 %v2904_v2, %v4509_v14 }
 0x205   : > { %v2311_v17 = vadd.f32 %v2310_v63, %v2309_v43  ;;  %v1671_v47 = vpop.f32.mrb[46].mxu1  ;;  %v2092_v10 = vpop.f32.mrb[50].mxu0 }
 0x206   : > { %v2413_v61 = vsel %vm2236_vm3, %v2361_v27, 0.0  ;;  %v2226_v49 = vadd.f32 %v4514_v20, %v2187_v37  ;;  %v2905_v7 = vadd.f32 %v2082_v19, %v1671_v47  ;;  %v1673_v38 = vpop.f32.mrb[47].mxu1  ;;  %v2094_v13 = vpop.f32.mrb[51].mxu0 }
 0x207   : > { %v2414_v26 = vadd.f32 %v2413_v61, %v2412_v55 }
 0x208   : > { %2259 = vst.msk [vmem:[%s4522_s24 + $0xb0] sm:$0xff] %vm2236_vm3, %v2226_v49  ;;  %v2312_v44 = vsel %vm2236_vm3, %v2226_v49, 0.0  ;;  %v2362_v8 = vmul.f32 %v2226_v49, %v2226_v49  ;;  %v2188_v21 = vmul.f32 %v2905_v7, %v4509_v14 }
 0x209   : > { %v2313_v23 = vadd.f32 %v2312_v44, %v2311_v17  ;;  %v1676_v30 = vpop.f32.mrb[48].mxu1  ;;  %v2097_v25 = vpop.f32.mrb[52].mxu0 }
 0x20a   : > { %v2415_v12 = vsel %vm2236_vm3, %v2362_v8, 0.0  ;;  %v2227_v11 = vadd.f32 %v4514_v20, %v2188_v21  ;;  %v2906_v52 = vadd.f32 %v2087_v4, %v1676_v30  ;;  %v1678_v46 = vpop.f32.mrb[49].mxu1  ;;  %v2099_v9 = vpop.f32.mrb[53].mxu0 }
 0x20b   : > { %v2416_v59 = vadd.f32 %v2415_v12, %v2414_v26 }
 0x20c   : > { %2260 = vst.msk [vmem:[%s4522_s24 + $0xb8] sm:$0xff] %vm2236_vm3, %v2227_v11  ;;  %v2314_v42 = vsel %vm2236_vm3, %v2227_v11, 0.0  ;;  %v2363_v35 = vmul.f32 %v2227_v11, %v2227_v11  ;;  %v2189_v24 = vmul.f32 %v2906_v52, %v4509_v14 }
 0x20d   : > { %v2315_v41 = vadd.f32 %v2314_v42, %v2313_v23  ;;  %v1681_v34 = vpop.f32.mrb[50].mxu1  ;;  %v2102_v32 = vpop.f32.mrb[54].mxu0 }
 0x20e   : > { %v2417_v5 = vsel %vm2236_vm3, %v2363_v35, 0.0  ;;  %v2228_v45 = vadd.f32 %v4514_v20, %v2189_v24  ;;  %v2907_v31 = vadd.f32 %v2092_v10, %v1681_v34  ;;  %v1683_v40 = vpop.f32.mrb[51].mxu1  ;;  %v2104_v50 = vpop.f32.mrb[55].mxu0 }
 0x20f   : > { %v2418_v15 = vadd.f32 %v2417_v5, %v2416_v59 }
 0x210   : > { %2261 = vst.msk [vmem:[%s4522_s24 + $0xc0] sm:$0xff] %vm2236_vm3, %v2228_v45  ;;  %v2316_v48 = vsel %vm2236_vm3, %v2228_v45, 0.0  ;;  %v2364_v16 = vmul.f32 %v2228_v45, %v2228_v45  ;;  %v2190_v62 = vmul.f32 %v2907_v31, %v4509_v14 }
 0x211   : > { %v2317_v56 = vadd.f32 %v2316_v48, %v2315_v41  ;;  %v1686_v60 = vpop.f32.mrb[52].mxu1  ;;  %v2107_v1 = vpop.f32.mrb[56].mxu0 }
 0x212   : > { %v2419_v39 = vsel %vm2236_vm3, %v2364_v16, 0.0  ;;  %v2229_v19 = vadd.f32 %v4514_v20, %v2190_v62  ;;  %v2908_v6 = vadd.f32 %v2097_v25, %v1686_v60  ;;  %v1688_v22 = vpop.f32.mrb[53].mxu1  ;;  %v2109_v28 = vpop.f32.mrb[57].mxu0 }
 0x213   : > { %v2420_v36 = vadd.f32 %v2419_v39, %v2418_v15 }
 0x214   : > { %2262 = vst.msk [vmem:[%s4522_s24 + $0xc8] sm:$0xff] %vm2236_vm3, %v2229_v19  ;;  %v2318_v51 = vsel %vm2236_vm3, %v2229_v19, 0.0  ;;  %v2365_v29 = vmul.f32 %v2229_v19, %v2229_v19  ;;  %v2191_v53 = vmul.f32 %v2908_v6, %v4509_v14 }
 0x215   : > { %v2319_v57 = vadd.f32 %v2318_v51, %v2317_v56  ;;  %v1691_v3 = vpop.f32.mrb[54].mxu1  ;;  %v2112_v43 = vpop.f32.mrb[58].mxu0 }
 0x216   : > { %v2421_v18 = vsel %vm2236_vm3, %v2365_v29, 0.0  ;;  %v2230_v4 = vadd.f32 %v4514_v20, %v2191_v53  ;;  %v2909_v33 = vadd.f32 %v2102_v32, %v1691_v3  ;;  %v1693_v58 = vpop.f32.mrb[55].mxu1  ;;  %v2114_v2 = vpop.f32.mrb[59].mxu0 }
 0x217   : > { %v2422_v0 = vadd.f32 %v2421_v18, %v2420_v36 }
 0x218   : > { %2263 = vst.msk [vmem:[%s4522_s24 + $0xd0] sm:$0xff] %vm2236_vm3, %v2230_v4  ;;  %v2320_v54 = vsel %vm2236_vm3, %v2230_v4, 0.0  ;;  %v2366_v55 = vmul.f32 %v2230_v4, %v2230_v4  ;;  %v2192_v63 = vmul.f32 %v2909_v33, %v4509_v14 }
 0x219   : > { %v2321_v27 = vadd.f32 %v2320_v54, %v2319_v57  ;;  %v1696_v37 = vpop.f32.mrb[56].mxu1  ;;  %v2117_v17 = vpop.f32.mrb[60].mxu0 }
 0x21a   : > { %v2423_v47 = vsel %vm2236_vm3, %v2366_v55, 0.0  ;;  %v2231_v10 = vadd.f32 %v4514_v20, %v2192_v63  ;;  %v2910_v61 = vadd.f32 %v2107_v1, %v1696_v37  ;;  %v1698_v49 = vpop.f32.mrb[57].mxu1  ;;  %v2119_v7 = vpop.f32.mrb[61].mxu0 }
 0x21b   : > { %v2424_v38 = vadd.f32 %v2423_v47, %v2422_v0 }
 0x21c   : > { %2264 = vst.msk [vmem:[%s4522_s24 + $0xd8] sm:$0xff] %vm2236_vm3, %v2231_v10  ;;  %v2322_v13 = vsel %vm2236_vm3, %v2231_v10, 0.0  ;;  %v2367_v26 = vmul.f32 %v2231_v10, %v2231_v10  ;;  %v2193_v44 = vmul.f32 %v2910_v61, %v4509_v14 }
 0x21d   : > { %v2323_v8 = vadd.f32 %v2322_v13, %v2321_v27  ;;  %v1701_v21 = vpop.f32.mrb[58].mxu1  ;;  %v2122_v23 = vpop.f32.mrb[62].mxu0 }
 0x21e   : > { %v2425_v30 = vsel %vm2236_vm3, %v2367_v26, 0.0  ;;  %v2232_v25 = vadd.f32 %v4514_v20, %v2193_v44  ;;  %v2911_v12 = vadd.f32 %v2112_v43, %v1701_v21  ;;  %v1703_v11 = vpop.f32.mrb[59].mxu1  ;;  %v2124_v52 = vpop.f32.mrb[63].mxu0 }
 0x21f   : > { %v2426_v46 = vadd.f32 %v2425_v30, %v2424_v38 }
 0x220   : > { %2265 = vst.msk [vmem:[%s4522_s24 + $0xe0] sm:$0xff] %vm2236_vm3, %v2232_v25  ;;  %v2324_v9 = vsel %vm2236_vm3, %v2232_v25, 0.0  ;;  %v2368_v59 = vmul.f32 %v2232_v25, %v2232_v25  ;;  %v2194_v42 = vmul.f32 %v2911_v12, %v4509_v14 }
 0x221   : > { %v2325_v35 = vadd.f32 %v2324_v9, %v2323_v8  ;;  %v1706_v24 = vpop.f32.mrb[60].mxu1 }
 0x222   : > { %v2427_v41 = vsel %vm2236_vm3, %v2368_v59, 0.0  ;;  %v2233_v34 = vadd.f32 %v4514_v20, %v2194_v42  ;;  %v2912_v32 = vadd.f32 %v2117_v17, %v1706_v24  ;;  %v1708_v5 = vpop.f32.mrb[61].mxu1 }
 0x223   : > { %v2428_v45 = vadd.f32 %v2427_v41, %v2426_v46 }
 0x224   : > { %2266 = vst.msk [vmem:[%s4522_s24 + $0xe8] sm:$0xff] %vm2236_vm3, %v2233_v34  ;;  %v2326_v31 = vsel %vm2236_vm3, %v2233_v34, 0.0  ;;  %v2369_v40 = vmul.f32 %v2233_v34, %v2233_v34  ;;  %v2195_v50 = vmul.f32 %v2912_v32, %v4509_v14 }
 0x225   : > { %v2327_v15 = vadd.f32 %v2326_v31, %v2325_v35  ;;  %v1711_v48 = vpop.f32.mrb[62].mxu1 }
 0x226   : > { %v2429_v16 = vsel %vm2236_vm3, %v2369_v40, 0.0  ;;  %v2234_v62 = vadd.f32 %v4514_v20, %v2195_v50  ;;  %v2913_v56 = vadd.f32 %v2122_v23, %v1711_v48  ;;  %v1713_v60 = vpop.f32.mrb[63].mxu1 }
 0x227   : > { %v2430_v1 = vadd.f32 %v2429_v16, %v2428_v45 }
 0x228   : > { %2267 = vst.msk [vmem:[%s4522_s24 + $0xf0] sm:$0xff] %vm2236_vm3, %v2234_v62  ;;  %v2328_v39 = vsel %vm2236_vm3, %v2234_v62, 0.0  ;;  %v2370_v19 = vmul.f32 %v2234_v62, %v2234_v62  ;;  %v2196_v6 = vmul.f32 %v2913_v56, %v4509_v14 }
 0x229   : > { %v2329_v22 = vadd.f32 %v2328_v39, %v2327_v15 }
 0x22a   : > { %v2431_v28 = vsel %vm2236_vm3, %v2370_v19, 0.0  ;;  %v2235_v36 = vadd.f32 %v4514_v20, %v2196_v6 }
 0x22b   : > { %v2432_v51 = vadd.f32 %v2431_v28, %v2430_v1 }
 0x22c   : > { %2268 = vst.msk [vmem:[%s4522_s24 + $0xf8] sm:$0xff] %vm2236_vm3, %v2235_v36  ;;  %v2330_v29 = vsel %vm2236_vm3, %v2235_v36, 0.0  ;;  %v2371_v53 = vmul.f32 %v2235_v36, %v2235_v36  ;;  %s3026_s24 = scalar_lea.vmem %s4742_s10, 16 }
 0x22d   : > { %v2331_v57 = vadd.f32 %v2330_v29, %v2329_v22  ;;  %p3027_p11 = scmp.ne.s32.totalorder %s4742_s10, %s3026_s24  ;;  %p3034_p1 = scmp.lt.s32.totalorder %s3032_s12, %s3026_s24 }
 0x22e   : > { %v2433_v3 = vsel %vm2236_vm3, %v2371_v53, 0.0 }
 0x22f   : > { %v2332_v43 = vrot.slane %v2331_v57, 4  ;;  %v2434_v18 = vadd.f32 %v2433_v3, %v2432_v51  ;;  %p3028_p12 = pnand %p3027_p11, %p3210_p5  ;;  %p3035_p2 = por %p3034_p1, %p3033_p0 }
 0x231   : > { %v2333_v14 = vadd.f32 %v2332_v43, %v2331_v57  ;;  %v2435_v4 = vrot.slane %v2434_v18, 4  ;;  %p3029_p13 = pneg %p3028_p12 }
 0x233   : > { %v2334_v20 = vrot.slane %v2333_v14, 2  ;;  %v2436_v33 = vadd.f32 %v2435_v4, %v2434_v18  ;;  %p3036_p3 = pnand %p3035_p2, %p3029_p13 }
 0x235   : > { %v2335_v58 = vadd.f32 %v2334_v20, %v2333_v14  ;;  %v2437_v2 = vrot.slane %v2436_v33, 2 }
 0x237   : > { %v2336_v0 = vrot.slane %v2335_v58, 1  ;;  %v2438_v54 = vadd.f32 %v2437_v2, %v2436_v33 }
 0x239   : > { %v2337_v55 = vadd.f32 %v2336_v0, %v2335_v58  ;;  %v2439_v63 = vrot.slane %v2438_v54, 1 }
 0x23b   : > { %2339 = vst.msk [vmem:[%s308_s25] sm:$0x1] %vm2338_vm4, %v2337_v55  ;;  %v2440_v27 = vadd.f32 %v2439_v63, %v2438_v54 }
 0x23c   : > { %3039 = shalt.err (!%p3036_p3)
}
 0x23d   : > { %s3040_s26 = scalar_lea.hbm %s4740_s19, 16  ;;  %s3044_s20 = scalar_lea.hbm %s4823_s7, 32 }
 0x23e   : > { %p3041_p4 = scmp.ne.s32.totalorder %s4740_s19, %s3040_s26  ;;  %p3045_p9 = scmp.lt.u32.totalorder %s4740_s19, %s4823_s7 }
 0x23f   : > { %p3046_p10 = scmp.lt.u32.totalorder %s3044_s20, %s3040_s26  ;;  %p3048_p12 = scmp.lt.u32.totalorder %s3040_s26, %s4740_s19 }
 0x240   : > { %p3042_p7 = pnand %p3041_p4, %p3210_p5 }
 0x241   : > { %p3047_p11 = por %p3046_p10, %p3045_p9 }
 0x242   : > { %p3043_p8 = pneg %p3042_p7 }
 0x243   : > { %p3049_p13 = por %p3048_p12, %p3047_p11 }
 0x245   : > { %p3050_p0 = pnand %p3049_p13, %p3043_p8 }
 0x247   : > { %3053 = shalt.err (!%p3050_p0)
}
 0x248   : > { %2978 = dma.vmem_to_hbm [thread:$0]  (%p3210_p5), %s4742_s10, 16, %s4740_s19, %s2448_s18  }
 0x249   : > { %s4840_s12 = scalar_lea.vmem [#allocation5], %s4730_s23  ;;  %s2452_s24 = scalar_lea.sflag [#allocation6], %s4730_s23 }
 0x24a   : > { %2441 = vst.msk [vmem:[%s4840_s12] sm:$0x1] %vm2338_vm4, %v2440_v27  ;;  %s3054_s25 = scalar_lea.vmem %s4750_s22, 16  ;;  %s3126_s26 = smov [#allocation5]  }
 0x24b   : > { %p3055_p1 = scmp.ne.s32.totalorder %s4750_s22, %s3054_s25  ;;  %s3058_s9 = sshll.u32 %s3126_s26, 4  ;;  %s3059_s9 = int_to_ptr.vmem [resolvable:$false] %s3058_s9 }
 0x24c   : > { %s3060_s20 = scalar_lea.vmem %s3059_s9, 32  ;;  %p3061_p4 = scmp.lt.s32.totalorder %s4750_s22, %s3059_s9 }
 0x24d   : > { %p3056_p2 = pnand %p3055_p1, %p3210_p5  ;;  %p3062_p7 = scmp.lt.s32.totalorder %s3060_s20, %s3054_s25 }
 0x24f   : > { %p3057_p3 = pneg %p3056_p2  ;;  %p3063_p8 = por %p3062_p7, %p3061_p4 }
 0x251   : > { %p3064_p9 = pnand %p3063_p8, %p3057_p3 }
 0x253   : > { %3067 = shalt.err (!%p3064_p9)
}
 0x254   : > { %s3068_s23 = scalar_lea.hbm %s4748_s21, 16  ;;  %s3072_s18 = scalar_lea.hbm %s4824_s8, 32 }
 0x255   : > { %p3069_p10 = scmp.ne.s32.totalorder %s4748_s21, %s3068_s23  ;;  %p3073_p13 = scmp.lt.u32.totalorder %s4748_s21, %s4824_s8 }
 0x256   : > { %p3074_p0 = scmp.lt.u32.totalorder %s3072_s18, %s3068_s23  ;;  %p3076_p2 = scmp.lt.u32.totalorder %s3068_s23, %s4748_s21 }
 0x257   : > { %p3070_p11 = pnand %p3069_p10, %p3210_p5 }
 0x258   : > { %p3075_p1 = por %p3074_p0, %p3073_p13 }
 0x259   : > { %p3071_p12 = pneg %p3070_p11 }
 0x25a   : > { %p3077_p3 = por %p3076_p2, %p3075_p1 }
 0x25c   : > { %p3078_p4 = pnand %p3077_p3, %p3071_p12 }
 0x25e   : > { %3081 = shalt.err (!%p3078_p4)
}
 0x25f   : > { %2979 = dma.vmem_to_hbm [thread:$0]  (%p3210_p5), %s4750_s22, 16, %s4748_s21, %s2452_s24  }
 0x260 PF: > { %p2989_p7 = scmp.ge.s32.totalorder %s3120_s30, 2  ;;  %s2500_s12 = sand.u32 1, %s3108_s27  }
 0x261   : > { %s2501_s25 = scalar_lea.sflag [#allocation4], %s2500_s12 }
 0x262   : > { %p2983_p8 = pnand %p2989_p7, %p3214_p6 }
 0x264   : > { %3099 = dma.done.wait (!%p2983_p8), %s2501_s25, 16  }
 0x265   : > { %3101 = vsyncadd (!%p2983_p8), %s2501_s25, 4294967280  ;;  %s2509_s26 = scalar_lea.sflag [#allocation6], %s2500_s12 }
 0x266   : > { %3103 = dma.done.wait (!%p2983_p8), %s2509_s26, 16  }
 0x267   : > { %3105 = vsyncadd (!%p2983_p8), %s2509_s26, 4294967280  ;;  %p22_p5 = scmp.ge.s32.totalorder %s3197_s11, 4   ;;  %s4841_s27 = smov %s3112_s28 }
 0x268   : > { %s4842_s28 = smov %s3116_s29  ;;  %s4843_s29 = smov %s3208_s14 }
 0x269   : > { %s4844_s30 = smov %s3197_s11  ;;  %24 = sbr.rel (!%p22_p5) target bundleno = 5 (0x5), region = 113 }
 0x270   :  { %2513 = vsyncpa [#allocation4], 1 }
 0x271   :  { %2515 = vsyncpa [#allocation4 + $0x1], 1 }
 0x272   :  { %2516 = vsyncpa [#allocation6], 1 }
 0x273   :  { %2518 = vsyncpa [#allocation6 + $0x1], 1 }

</bundles_post_ra>
